<compile_context>
chip_gen: v5e
topology: v5e:2x2
jax: 0.10.0
libtpu: 0.0.40
codegen_flags: <defaults>
</compile_context>

<pallas_src>
import functools

import jax
import jax.numpy as jnp
import numpy as np
from jax.experimental import pallas as pl
from jax.experimental.pallas import tpu as pltpu

EPS = 1e-5
_VMEM_LIMIT = 60 * 1024 * 1024  # explicit scoped-VMEM budget (<= v7x physical)


# --------------------------------------------------------------------------
# Static align_corners=True bilinear sampling metadata (numpy, trace time)
# --------------------------------------------------------------------------

def _axis_lerp(out_size, in_size):
    """Per-output-row source rows (lo, hi) and the H scale factor."""
    if out_size == 1:
        src = np.zeros((1,), np.float64)
        scale = 0.0
    else:
        scale = (in_size - 1) / (out_size - 1)
        src = np.arange(out_size, dtype=np.float64) * scale
    lo = np.clip(np.floor(src), 0, in_size - 1).astype(np.int32)
    hi = np.minimum(lo + 1, in_size - 1).astype(np.int32)
    return lo, hi, float(scale)


def _bilinear_matrix(out_size, in_size):
    """(out, in) interpolation matrix for the W axis (align_corners=True)."""
    lo, hi, scale = _axis_lerp(out_size, in_size)
    frac = (np.arange(out_size, dtype=np.float64) * scale - lo).astype(np.float32)
    m = np.zeros((out_size, in_size), np.float32)
    m[np.arange(out_size), lo] += 1.0 - frac
    m[np.arange(out_size), hi] += frac
    return m


# --------------------------------------------------------------------------
# Kernel 1: FeatureFused = bilinear resize + 1x1 convs + BN + ReLU + concat
# --------------------------------------------------------------------------

def _fuse_kernel(lo2_r, hi2_r, lo3_r, hi3_r,              # scalar prefetch (SMEM)
                 c2lo_r, c2hi_r, c3lo_r, c3hi_r, c4_r,    # per-step row blocks
                 rw2_r, rw3_r, w2p_r, w3p_r, emb_r, bias_r,
                 o_ref, *, scale2, scale3):
    i = pl.program_id(1)
    fi = i.astype(jnp.float32)
    # H-direction lerp fractions, reconstructed from the static scale + lo row.
    f2 = fi * scale2 - lo2_r[i].astype(jnp.float32)
    f3 = fi * scale3 - lo3_r[i].astype(jnp.float32)

    # W-resize on the MXU for both source rows, then the H-lerp on the small
    # (wo, C) results.  (Rw @ ((1-f) lo + f hi) == (1-f) Rw@lo + f Rw@hi.)
    a2 = jnp.dot(rw2_r[...], c2lo_r[0, 0], preferred_element_type=jnp.float32)
    b2 = jnp.dot(rw2_r[...], c2hi_r[0, 0], preferred_element_type=jnp.float32)
    r2 = (a2 * (1.0 - f2) + b2 * f2).astype(jnp.bfloat16)        # (wo, 512)

    a3 = jnp.dot(rw3_r[...], c3lo_r[0, 0], preferred_element_type=jnp.float32)
    b3 = jnp.dot(rw3_r[...], c3hi_r[0, 0], preferred_element_type=jnp.float32)
    r3 = (a3 * (1.0 - f3) + b3 * f3).astype(jnp.bfloat16)        # (wo, 1024)

    # 1x1 convs (BN scale folded into the weights) into the packed lane-dense
    # layout [c4 | conv3(c3) | conv2(c2)], then bias + ReLU.
    y = jnp.dot(r2, w2p_r[...], preferred_element_type=jnp.float32)
    y = y + jnp.dot(r3, w3p_r[...], preferred_element_type=jnp.float32)
    y = jnp.maximum(y + bias_r[...], 0.0)
    # c4 passthrough into cols [0:C4]; correct ONLY because those columns of
    # w2p / w3p / bias are exactly zero (see init_params).
    y = y + jnp.dot(c4_r[0, 0], emb_r[...], preferred_element_type=jnp.float32)

    wo = c4_r.shape[2]
    cf = o_ref.shape[3]
    o_ref[0, 0, pl.ds(0, wo), :] = y.astype(o_ref.dtype)
    # Two trailing zero columns per row: these become the left/right SAME
    # padding columns when the block kernel stages this buffer flat.
    o_ref[0, 0, pl.ds(wo, 2), :] = jnp.zeros((2, cf), o_ref.dtype)


def feature_fused(c2, c3, c4, rw2, rw3, w2p, w3p, emb, bias):
    n, h2, w2c, cc2 = c2.shape
    _, h3, w3c, cc3 = c3.shape
    _, ho, wo, c4c = c4.shape
    cf = w2p.shape[1]

    lo2, hi2, scale2 = _axis_lerp(ho, h2)
    lo3, hi3, scale3 = _axis_lerp(ho, h3)

    kernel = functools.partial(_fuse_kernel, scale2=scale2, scale3=scale3)

    grid_spec = pltpu.PrefetchScalarGridSpec(
        num_scalar_prefetch=4,
        grid=(n, ho),
        in_specs=[
            # two source rows of c2 / c3 per output row (data-dependent rows
            # via scalar prefetch); c4's matching row; small constants.
            pl.BlockSpec((1, 1, w2c, cc2),
                         lambda b, i, s2lo, s2hi, s3lo, s3hi: (b, s2lo[i], 0, 0)),
            pl.BlockSpec((1, 1, w2c, cc2),
                         lambda b, i, s2lo, s2hi, s3lo, s3hi: (b, s2hi[i], 0, 0)),
            pl.BlockSpec((1, 1, w3c, cc3),
                         lambda b, i, s2lo, s2hi, s3lo, s3hi: (b, s3lo[i], 0, 0)),
            pl.BlockSpec((1, 1, w3c, cc3),
                         lambda b, i, s2lo, s2hi, s3lo, s3hi: (b, s3hi[i], 0, 0)),
            pl.BlockSpec((1, 1, wo, c4c), lambda b, i, *_: (b, i, 0, 0)),
            pl.BlockSpec((wo, w2c), lambda *_: (0, 0)),
            pl.BlockSpec((wo, w3c), lambda *_: (0, 0)),
            pl.BlockSpec(w2p.shape, lambda *_: (0, 0)),
            pl.BlockSpec(w3p.shape, lambda *_: (0, 0)),
            pl.BlockSpec(emb.shape, lambda *_: (0, 0)),
            pl.BlockSpec(bias.shape, lambda *_: (0, 0)),
        ],
        out_specs=pl.BlockSpec((1, 1, wo + 2, cf), lambda b, i, *_: (b, i, 0, 0)),
    )
    return pl.pallas_call(
        kernel,
        out_shape=jax.ShapeDtypeStruct((n, ho, wo + 2, cf), jnp.bfloat16),
        grid_spec=grid_spec,
        compiler_params=pltpu.CompilerParams(
            dimension_semantics=("parallel", "parallel"),
            vmem_limit_bytes=_VMEM_LIMIT),
    )(jnp.asarray(lo2), jnp.asarray(hi2), jnp.asarray(lo3), jnp.asarray(hi3),
      c2, c2, c3, c3, c4, rw2, rw3, w2p, w3p, emb, bias)


# --------------------------------------------------------------------------
# Kernel 2: block = (conv3x3 + BN + ReLU) x 2 on a flat padded layout
# --------------------------------------------------------------------------

def _block_kernel(x_ref, w1_ref, b1_ref, w2_ref, b2_ref, o_ref,
                  xp1, win1, xp2, win2, *, hh, ww):
    w2p = ww + 2                  # padded row stride: [left pad | W data | right pad]
    n_rows = hh * w2p             # flat conv rows (incl. 2 wrap columns per row)
    edge = w2p + 1                # head/tail slabs of xp* that must stay zero

    def stage(dst, vals):
        # `vals` already carries zeros in its 2 wrap columns per row, so one
        # shifted contiguous store lands the data in the interior AND zeros on
        # the left/right SAME-padding positions; only the small head/tail slabs
        # (top/bottom padding rows) are zeroed explicitly.
        cz = dst.shape[1]
        dst[pl.ds(0, edge), :] = jnp.zeros((edge, cz), dst.dtype)
        dst[pl.ds(edge, n_rows), :] = vals
        dst[pl.ds(edge + n_rows, edge), :] = jnp.zeros((edge, cz), dst.dtype)

    def conv(xp, win, w_ref, b_ref):
        # dh-merged window: win[q, dh*C + c] = xp[q + dh*w2p, c]  ->  K = 3*C.
        c = xp.shape[1]
        win[:, 0:c] = xp[pl.ds(0, n_rows + 2), :]
        win[:, c:2 * c] = xp[pl.ds(w2p, n_rows + 2), :]
        win[:, 2 * c:3 * c] = xp[pl.ds(2 * w2p, n_rows + 2), :]
        # dw taps = shifted reads of the window feeding the MXU (K = 3*C).
        acc = jnp.dot(win[pl.ds(0, n_rows), :], w_ref[0],
                      preferred_element_type=jnp.float32)
        acc = acc + jnp.dot(win[pl.ds(1, n_rows), :], w_ref[1],
                            preferred_element_type=jnp.float32)
        acc = acc + jnp.dot(win[pl.ds(2, n_rows), :], w_ref[2],
                            preferred_element_type=jnp.float32)
        return jnp.maximum(acc + b_ref[...], 0.0)        # (n_rows, Cout) f32

    # conv1 + BN + ReLU  (input's wrap columns are already zero from kernel 1)
    stage(xp1, x_ref[0])
    y1 = conv(xp1, win1, w1_ref, b1_ref)

    # zero the wrap columns before staging as conv2's padded input
    col = jax.lax.broadcasted_iota(jnp.int32, (n_rows, 1), 0) % w2p
    y1 = jnp.where(col < ww, y1, 0.0)

    # conv2 + BN + ReLU  (256-channel intermediate never leaves VMEM)
    stage(xp2, y1.astype(xp2.dtype))
    y2 = conv(xp2, win2, w2_ref, b2_ref)

    o_ref[0] = y2.astype(o_ref.dtype)


def dense_block(x_flat, w1, b1, w2, b2, h, w):
    n, n_rows, cin = x_flat.shape
    assert n_rows == h * (w + 2)
    cmid = w1.shape[2]
    cout = w2.shape[2]
    rows_p = (h + 2) * (w + 2) + 2

    kernel = functools.partial(_block_kernel, hh=h, ww=w)
    return pl.pallas_call(
        kernel,
        out_shape=jax.ShapeDtypeStruct((n, n_rows, cout), jnp.float32),
        grid=(n,),
        in_specs=[
            pl.BlockSpec((1, n_rows, cin), lambda i: (i, 0, 0)),
            pl.BlockSpec(w1.shape, lambda i: (0, 0, 0)),
            pl.BlockSpec(b1.shape, lambda i: (0, 0)),
            pl.BlockSpec(w2.shape, lambda i: (0, 0, 0)),
            pl.BlockSpec(b2.shape, lambda i: (0, 0)),
        ],
        out_specs=pl.BlockSpec((1, n_rows, cout), lambda i: (i, 0, 0)),
        scratch_shapes=[
            pltpu.VMEM((rows_p, cin), jnp.bfloat16),          # padded input
            pltpu.VMEM((n_rows + 2, 3 * cin), jnp.bfloat16),  # conv1 window
            pltpu.VMEM((rows_p, cmid), jnp.bfloat16),         # padded intermediate
            pltpu.VMEM((n_rows + 2, 3 * cmid), jnp.bfloat16), # conv2 window
        ],
        compiler_params=pltpu.CompilerParams(
            dimension_semantics=("parallel",),
            vmem_limit_bytes=_VMEM_LIMIT),
    )(x_flat, w1, b1, w2, b2)


# --------------------------------------------------------------------------
# Parameters (synthetic, BN folded)
# --------------------------------------------------------------------------

def _fold_bn(gamma, beta, mean, var):
    s = gamma / jnp.sqrt(var + EPS)
    return s, beta - mean * s


def init_params(key, c4_channels=32, inter_channels=48):
    in_channels = c4_channels + 2 * inter_channels
    ks = jax.random.split(key, 8)

    def conv_w(k, shape, fan_in):
        return jax.random.normal(k, shape, jnp.float32) * (2.0 / fan_in) ** 0.5

    def bn(k, c):
        kg, kb, km, kv = jax.random.split(k, 4)
        gamma = 1.0 + 0.1 * jax.random.normal(kg, (c,), jnp.float32)
        beta = 0.1 * jax.random.normal(kb, (c,), jnp.float32)
        mean = 0.1 * jax.random.normal(km, (c,), jnp.float32)
        var = 0.5 + jax.nn.softplus(jax.random.normal(kv, (c,), jnp.float32))
        return _fold_bn(gamma, beta, mean, var)

    s2, b2 = bn(ks[1], inter_channels)
    s3, b3 = bn(ks[3], inter_channels)
    sb1, bb1 = bn(ks[5], 256)
    sb2, bb2 = bn(ks[7], 256)

    # Fold BN scale into the (bias-free) conv weights.
    w2 = conv_w(ks[0], (512, inter_channels), 512) * s2
    w3 = conv_w(ks[2], (1024, inter_channels), 1024) * s3
    wb1 = conv_w(ks[4], (3, 3, in_channels, 256), 9 * in_channels) * sb1   # (dh,dw,ci,co)
    wb2 = conv_w(ks[6], (3, 3, 256, 256), 9 * 256) * sb2

    cf = in_channels
    c4c, ic = c4_channels, inter_channels
    # Packed lane-dense layout [c4 | conv3(c3) | conv2(c2)].
    # INVARIANT: columns [0:c4c] of w2p / w3p / bias_fused stay exactly zero;
    # the fuse kernel applies ReLU *before* adding the c4 passthrough and is
    # only correct under that invariant.
    w2p = jnp.zeros((512, cf), jnp.float32).at[:, c4c + ic:].set(w2)
    w3p = jnp.zeros((1024, cf), jnp.float32).at[:, c4c:c4c + ic].set(w3)
    bias_f = (jnp.zeros((1, cf), jnp.float32)
              .at[0, c4c:c4c + ic].set(b3)
              .at[0, c4c + ic:].set(b2))

    # 3x3 weights packed for the flat-padded kernel: leading axis = dw, the
    # contraction axis is dh-major (dh*Cin + cin), i.e. (dw, 3*Cin, Cout).
    wb1p = jnp.transpose(wb1, (1, 0, 2, 3)).reshape(3, 3 * in_channels, 256)
    wb2p = jnp.transpose(wb2, (1, 0, 2, 3)).reshape(3, 3 * 256, 256)

    return {
        'w2p': w2p.astype(jnp.bfloat16),
        'w3p': w3p.astype(jnp.bfloat16),
        'bias_fused': bias_f,
        'emb': jnp.eye(c4c, cf, dtype=jnp.bfloat16),   # identity embed for c4 cols
        'wb1': wb1p.astype(jnp.bfloat16),
        'bb1': bb1.reshape(1, 256),
        'wb2': wb2p.astype(jnp.bfloat16),
        'bb2': bb2.reshape(1, 256),
    }


# --------------------------------------------------------------------------
# _DUHead forward
# --------------------------------------------------------------------------

def du_head_forward(params, c2_nchw, c3_nchw, c4_nchw):
    n = c4_nchw.shape[0]
    ho, wo = c4_nchw.shape[2], c4_nchw.shape[3]
    w2c = c2_nchw.shape[3]
    w3c = c3_nchw.shape[3]

    # NCHW -> NHWC + bf16 cast (one fused XLA pass per source tensor).
    c2 = jnp.transpose(c2_nchw, (0, 2, 3, 1)).astype(jnp.bfloat16)
    c3 = jnp.transpose(c3_nchw, (0, 2, 3, 1)).astype(jnp.bfloat16)
    c4 = jnp.transpose(c4_nchw, (0, 2, 3, 1)).astype(jnp.bfloat16)

    # W-direction interpolation matrices (tiny constants, live in VMEM).
    rw2 = jnp.asarray(_bilinear_matrix(wo, w2c), jnp.bfloat16)
    rw3 = jnp.asarray(_bilinear_matrix(wo, w3c), jnp.bfloat16)

    # FeatureFused: resize + 1x1 convs + BN + ReLU + concat, one kernel.
    fused_p = feature_fused(c2, c3, c4, rw2, rw3,
                            params['w2p'], params['w3p'],
                            params['emb'], params['bias_fused'])
    cf = fused_p.shape[-1]

    # block: (conv3x3 + BN + ReLU) x 2 on the flat padded layout.
    x_flat = fused_p.reshape(n, ho * (wo + 2), cf)          # free reshape
    out_flat = dense_block(x_flat, params['wb1'], params['bb1'],
                           params['wb2'], params['bb2'], ho, wo)

    # Drop the 2 wrap columns per row and return NCHW (PyTorch convention).
    out = out_flat.reshape(n, ho, wo + 2, 256)[:, :, :wo, :]
    return jnp.transpose(out, (0, 3, 1, 2))


if __name__ == "__main__":
    key = jax.random.PRNGKey(0)
    k_in, k_par = jax.random.split(key)
    k2, k3, k4 = jax.random.split(k_in, 3)

    N = 2
    c2 = jax.random.normal(k2, (N, 512, 16, 16), jnp.float32)
    c3 = jax.random.normal(k3, (N, 1024, 8, 8), jnp.float32)
    c4 = jax.random.normal(k4, (N, 32, 8, 8), jnp.float32)   # in_ch = 32+48+48

    params = init_params(k_par, c4_channels=32, inter_channels=48)

    out = jax.jit(du_head_forward)(params, c2, c3, c4)
    out = jax.block_until_ready(out)
    assert out.shape == (N, 256, 8, 8), out.shape
    assert bool(jnp.all(jnp.isfinite(out)))
    print("KERNEL_OK")
</pallas_src>

<mosaic_0001>
module attributes {stable_mosaic.version = 11 : i64} {
  func.func @_fuse_kernel(%arg0: i32, %arg1: i32, %arg2: memref<8xi32, #tpu.memory_space<smem>>, %arg3: memref<8xi32, #tpu.memory_space<smem>>, %arg4: memref<8xi32, #tpu.memory_space<smem>>, %arg5: memref<8xi32, #tpu.memory_space<smem>>, %arg6: memref<1x1x16x512xbf16, #tpu.memory_space<vmem>>, %arg7: memref<1x1x16x512xbf16, #tpu.memory_space<vmem>>, %arg8: memref<1x1x8x1024xbf16, #tpu.memory_space<vmem>>, %arg9: memref<1x1x8x1024xbf16, #tpu.memory_space<vmem>>, %arg10: memref<1x1x8x32xbf16, #tpu.memory_space<vmem>>, %arg11: memref<8x16xbf16, #tpu.memory_space<vmem>>, %arg12: memref<8x8xbf16, #tpu.memory_space<vmem>>, %arg13: memref<512x128xbf16, #tpu.memory_space<vmem>>, %arg14: memref<1024x128xbf16, #tpu.memory_space<vmem>>, %arg15: memref<32x128xbf16, #tpu.memory_space<vmem>>, %arg16: memref<1x128xf32, #tpu.memory_space<vmem>>, %arg17: memref<1x1x10x128xbf16, #tpu.memory_space<vmem>>) attributes {dimension_semantics = [#tpu.dimension_semantics<parallel>, #tpu.dimension_semantics<parallel>], iteration_bounds = array<i64: 2, 8>, scalar_prefetch = 4 : i64, scratch_operands = 0 : i64, tpu.core_type = #tpu.core_type<tc>, window_params = [{transform_indices = @transform_0, window_bounds = array<i64: 1, 1, 16, 512>}, {transform_indices = @transform_1, window_bounds = array<i64: 1, 1, 16, 512>}, {transform_indices = @transform_2, window_bounds = array<i64: 1, 1, 8, 1024>}, {transform_indices = @transform_3, window_bounds = array<i64: 1, 1, 8, 1024>}, {transform_indices = @transform_4, window_bounds = array<i64: 1, 1, 8, 32>}, {pipeline_mode = #tpu.pipeline_mode<synchronous>, transform_indices = @transform_5, window_bounds = array<i64: 8, 16>}, {pipeline_mode = #tpu.pipeline_mode<synchronous>, transform_indices = @transform_6, window_bounds = array<i64: 8, 8>}, {pipeline_mode = #tpu.pipeline_mode<synchronous>, transform_indices = @transform_7, window_bounds = array<i64: 512, 128>}, {pipeline_mode = #tpu.pipeline_mode<synchronous>, transform_indices = @transform_8, window_bounds = array<i64: 1024, 128>}, {pipeline_mode = #tpu.pipeline_mode<synchronous>, transform_indices = @transform_9, window_bounds = array<i64: 32, 128>}, {pipeline_mode = #tpu.pipeline_mode<synchronous>, transform_indices = @transform_10, window_bounds = array<i64: 1, 128>}, {transform_indices = @transform_11, window_bounds = array<i64: 1, 1, 10, 128>}]} {
    %0 = arith.sitofp %arg1 : i32 to f32
    %cst = arith.constant 2.14285707 : f32
    %1 = arith.mulf %0, %cst : f32
    %2 = arith.index_cast %arg1 : i32 to index
    %3 = memref.load %arg2[%2] : memref<8xi32, #tpu.memory_space<smem>>
    %4 = arith.sitofp %3 : i32 to f32
    %5 = arith.subf %1, %4 : f32
    %cst_0 = arith.constant 1.000000e+00 : f32
    %6 = arith.mulf %0, %cst_0 : f32
    %7 = arith.index_cast %arg1 : i32 to index
    %8 = memref.load %arg4[%7] : memref<8xi32, #tpu.memory_space<smem>>
    %9 = arith.sitofp %8 : i32 to f32
    %10 = arith.subf %6, %9 : f32
    %c0 = arith.constant 0 : index
    %c0_1 = arith.constant 0 : index
    %11 = vector.load %arg11[%c0, %c0_1] : memref<8x16xbf16, #tpu.memory_space<vmem>>, vector<8x16xbf16>
    %c0_2 = arith.constant 0 : index
    %c0_3 = arith.constant 0 : index
    %c0_4 = arith.constant 0 : index
    %c0_5 = arith.constant 0 : index
    %12 = vector.load %arg6[%c0_2, %c0_3, %c0_4, %c0_5] : memref<1x1x16x512xbf16, #tpu.memory_space<vmem>>, vector<1x1x16x512xbf16>
    %13 = vector.shape_cast %12 : vector<1x1x16x512xbf16> to vector<16x512xbf16>
    %cst_6 = arith.constant dense<0.000000e+00> : vector<8x512xf32>
    %14 = tpu.matmul %11, %13, %cst_6 {dimension_numbers = #tpu.dot_dimension_numbers<[1], [0], [0], [1], [0, 0, 1, 1], [], []>} : vector<8x16xbf16>, vector<16x512xbf16>, vector<8x512xf32> -> vector<8x512xf32>
    %c0_7 = arith.constant 0 : index
    %c0_8 = arith.constant 0 : index
    %15 = vector.load %arg11[%c0_7, %c0_8] : memref<8x16xbf16, #tpu.memory_space<vmem>>, vector<8x16xbf16>
    %c0_9 = arith.constant 0 : index
    %c0_10 = arith.constant 0 : index
    %c0_11 = arith.constant 0 : index
    %c0_12 = arith.constant 0 : index
    %16 = vector.load %arg7[%c0_9, %c0_10, %c0_11, %c0_12] : memref<1x1x16x512xbf16, #tpu.memory_space<vmem>>, vector<1x1x16x512xbf16>
    %17 = vector.shape_cast %16 : vector<1x1x16x512xbf16> to vector<16x512xbf16>
    %cst_13 = arith.constant dense<0.000000e+00> : vector<8x512xf32>
    %18 = tpu.matmul %15, %17, %cst_13 {dimension_numbers = #tpu.dot_dimension_numbers<[1], [0], [0], [1], [0, 0, 1, 1], [], []>} : vector<8x16xbf16>, vector<16x512xbf16>, vector<8x512xf32> -> vector<8x512xf32>
    %cst_14 = arith.constant 1.000000e+00 : f32
    %19 = arith.subf %cst_14, %5 : f32
    %20 = vector.broadcast %19 : f32 to vector<8x512xf32>
    %21 = arith.mulf %14, %20 : vector<8x512xf32>
    %22 = vector.broadcast %5 : f32 to vector<8x512xf32>
    %23 = arith.mulf %18, %22 : vector<8x512xf32>
    %24 = arith.addf %21, %23 : vector<8x512xf32>
    %25 = arith.truncf %24 : vector<8x512xf32> to vector<8x512xbf16>
    %c0_15 = arith.constant 0 : index
    %c0_16 = arith.constant 0 : index
    %26 = vector.load %arg12[%c0_15, %c0_16] : memref<8x8xbf16, #tpu.memory_space<vmem>>, vector<8x8xbf16>
    %c0_17 = arith.constant 0 : index
    %c0_18 = arith.constant 0 : index
    %c0_19 = arith.constant 0 : index
    %c0_20 = arith.constant 0 : index
    %27 = vector.load %arg8[%c0_17, %c0_18, %c0_19, %c0_20] : memref<1x1x8x1024xbf16, #tpu.memory_space<vmem>>, vector<1x1x8x1024xbf16>
    %28 = vector.shape_cast %27 : vector<1x1x8x1024xbf16> to vector<8x1024xbf16>
    %cst_21 = arith.constant dense<0.000000e+00> : vector<8x1024xf32>
    %29 = tpu.matmul %26, %28, %cst_21 {dimension_numbers = #tpu.dot_dimension_numbers<[1], [0], [0], [1], [0, 0, 1, 1], [], []>} : vector<8x8xbf16>, vector<8x1024xbf16>, vector<8x1024xf32> -> vector<8x1024xf32>
    %c0_22 = arith.constant 0 : index
    %c0_23 = arith.constant 0 : index
    %30 = vector.load %arg12[%c0_22, %c0_23] : memref<8x8xbf16, #tpu.memory_space<vmem>>, vector<8x8xbf16>
    %c0_24 = arith.constant 0 : index
    %c0_25 = arith.constant 0 : index
    %c0_26 = arith.constant 0 : index
    %c0_27 = arith.constant 0 : index
    %31 = vector.load %arg9[%c0_24, %c0_25, %c0_26, %c0_27] : memref<1x1x8x1024xbf16, #tpu.memory_space<vmem>>, vector<1x1x8x1024xbf16>
    %32 = vector.shape_cast %31 : vector<1x1x8x1024xbf16> to vector<8x1024xbf16>
    %cst_28 = arith.constant dense<0.000000e+00> : vector<8x1024xf32>
    %33 = tpu.matmul %30, %32, %cst_28 {dimension_numbers = #tpu.dot_dimension_numbers<[1], [0], [0], [1], [0, 0, 1, 1], [], []>} : vector<8x8xbf16>, vector<8x1024xbf16>, vector<8x1024xf32> -> vector<8x1024xf32>
    %cst_29 = arith.constant 1.000000e+00 : f32
    %34 = arith.subf %cst_29, %10 : f32
    %35 = vector.broadcast %34 : f32 to vector<8x1024xf32>
    %36 = arith.mulf %29, %35 : vector<8x1024xf32>
    %37 = vector.broadcast %10 : f32 to vector<8x1024xf32>
    %38 = arith.mulf %33, %37 : vector<8x1024xf32>
    %39 = arith.addf %36, %38 : vector<8x1024xf32>
    %40 = arith.truncf %39 : vector<8x1024xf32> to vector<8x1024xbf16>
    %c0_30 = arith.constant 0 : index
    %c0_31 = arith.constant 0 : index
    %41 = vector.load %arg13[%c0_30, %c0_31] : memref<512x128xbf16, #tpu.memory_space<vmem>>, vector<512x128xbf16>
    %cst_32 = arith.constant dense<0.000000e+00> : vector<8x128xf32>
    %42 = tpu.matmul %25, %41, %cst_32 {dimension_numbers = #tpu.dot_dimension_numbers<[1], [0], [0], [1], [0, 0, 1, 1], [], []>} : vector<8x512xbf16>, vector<512x128xbf16>, vector<8x128xf32> -> vector<8x128xf32>
    %c0_33 = arith.constant 0 : index
    %c0_34 = arith.constant 0 : index
    %43 = vector.load %arg14[%c0_33, %c0_34] : memref<1024x128xbf16, #tpu.memory_space<vmem>>, vector<1024x128xbf16>
    %cst_35 = arith.constant dense<0.000000e+00> : vector<8x128xf32>
    %44 = tpu.matmul %40, %43, %cst_35 {dimension_numbers = #tpu.dot_dimension_numbers<[1], [0], [0], [1], [0, 0, 1, 1], [], []>} : vector<8x1024xbf16>, vector<1024x128xbf16>, vector<8x128xf32> -> vector<8x128xf32>
    %45 = arith.addf %42, %44 : vector<8x128xf32>
    %c0_36 = arith.constant 0 : index
    %c0_37 = arith.constant 0 : index
    %46 = vector.load %arg16[%c0_36, %c0_37] : memref<1x128xf32, #tpu.memory_space<vmem>>, vector<1x128xf32>
    %47 = vector.broadcast %46 : vector<1x128xf32> to vector<8x128xf32>
    %48 = arith.addf %45, %47 : vector<8x128xf32>
    %cst_38 = arith.constant 0.000000e+00 : f32
    %49 = vector.broadcast %cst_38 : f32 to vector<8x128xf32>
    %50 = arith.maximumf %48, %49 : vector<8x128xf32>
    %c0_39 = arith.constant 0 : index
    %c0_40 = arith.constant 0 : index
    %c0_41 = arith.constant 0 : index
    %c0_42 = arith.constant 0 : index
    %51 = vector.load %arg10[%c0_39, %c0_40, %c0_41, %c0_42] : memref<1x1x8x32xbf16, #tpu.memory_space<vmem>>, vector<1x1x8x32xbf16>
    %52 = vector.shape_cast %51 : vector<1x1x8x32xbf16> to vector<8x32xbf16>
    %c0_43 = arith.constant 0 : index
    %c0_44 = arith.constant 0 : index
    %53 = vector.load %arg15[%c0_43, %c0_44] : memref<32x128xbf16, #tpu.memory_space<vmem>>, vector<32x128xbf16>
    %cst_45 = arith.constant dense<0.000000e+00> : vector<8x128xf32>
    %54 = tpu.matmul %52, %53, %cst_45 {dimension_numbers = #tpu.dot_dimension_numbers<[1], [0], [0], [1], [0, 0, 1, 1], [], []>} : vector<8x32xbf16>, vector<32x128xbf16>, vector<8x128xf32> -> vector<8x128xf32>
    %55 = arith.addf %50, %54 : vector<8x128xf32>
    %56 = arith.truncf %55 : vector<8x128xf32> to vector<8x128xbf16>
    %c0_46 = arith.constant 0 : index
    %c0_47 = arith.constant 0 : index
    %c0_48 = arith.constant 0 : index
    %c0_49 = arith.constant 0 : index
    %57 = vector.load %arg17[%c0_46, %c0_47, %c0_48, %c0_49] : memref<1x1x10x128xbf16, #tpu.memory_space<vmem>>, vector<1x1x8x128xbf16>
    %58 = vector.shape_cast %57 : vector<1x1x8x128xbf16> to vector<8x128xbf16>
    %59 = vector.shape_cast %56 : vector<8x128xbf16> to vector<1x1x8x128xbf16>
    tpu.vector_store %arg17[%c0_46, %c0_47, %c0_48, %c0_49], %59 {strides = array<i32>} : memref<1x1x10x128xbf16, #tpu.memory_space<vmem>>, vector<1x1x8x128xbf16>,
    %cst_50 = arith.constant 0.000000e+00 : bf16
    %60 = vector.broadcast %cst_50 : bf16 to vector<2x128xbf16>
    %c0_51 = arith.constant 0 : index
    %c0_52 = arith.constant 0 : index
    %c8 = arith.constant 8 : index
    %c0_53 = arith.constant 0 : index
    %61 = vector.load %arg17[%c0_51, %c0_52, %c8, %c0_53] : memref<1x1x10x128xbf16, #tpu.memory_space<vmem>>, vector<1x1x2x128xbf16>
    %62 = vector.shape_cast %61 : vector<1x1x2x128xbf16> to vector<2x128xbf16>
    %63 = vector.shape_cast %60 : vector<2x128xbf16> to vector<1x1x2x128xbf16>
    tpu.vector_store %arg17[%c0_51, %c0_52, %c8, %c0_53], %63 {strides = array<i32>} : memref<1x1x10x128xbf16, #tpu.memory_space<vmem>>, vector<1x1x2x128xbf16>,
    return
  }
  func.func @transform_0(%arg0: i32, %arg1: i32, %arg2: memref<8xi32, #tpu.memory_space<smem>>, %arg3: memref<8xi32, #tpu.memory_space<smem>>, %arg4: memref<8xi32, #tpu.memory_space<smem>>, %arg5: memref<8xi32, #tpu.memory_space<smem>>) -> (i32, i32, i32, i32) {
    %0 = arith.index_cast %arg1 : i32 to index
    %1 = memref.load %arg2[%0] : memref<8xi32, #tpu.memory_space<smem>>
    %c0_i32 = arith.constant 0 : i32
    %c0_i32_0 = arith.constant 0 : i32
    %c0_i32_1 = arith.constant 0 : i32
    return %arg0, %1, %c0_i32, %c0_i32_0 : i32, i32, i32, i32
  }
  func.func @transform_1(%arg0: i32, %arg1: i32, %arg2: memref<8xi32, #tpu.memory_space<smem>>, %arg3: memref<8xi32, #tpu.memory_space<smem>>, %arg4: memref<8xi32, #tpu.memory_space<smem>>, %arg5: memref<8xi32, #tpu.memory_space<smem>>) -> (i32, i32, i32, i32) {
    %0 = arith.index_cast %arg1 : i32 to index
    %1 = memref.load %arg3[%0] : memref<8xi32, #tpu.memory_space<smem>>
    %c0_i32 = arith.constant 0 : i32
    %c0_i32_0 = arith.constant 0 : i32
    %c0_i32_1 = arith.constant 0 : i32
    return %arg0, %1, %c0_i32, %c0_i32_0 : i32, i32, i32, i32
  }
  func.func @transform_2(%arg0: i32, %arg1: i32, %arg2: memref<8xi32, #tpu.memory_space<smem>>, %arg3: memref<8xi32, #tpu.memory_space<smem>>, %arg4: memref<8xi32, #tpu.memory_space<smem>>, %arg5: memref<8xi32, #tpu.memory_space<smem>>) -> (i32, i32, i32, i32) {
    %0 = arith.index_cast %arg1 : i32 to index
    %1 = memref.load %arg4[%0] : memref<8xi32, #tpu.memory_space<smem>>
    %c0_i32 = arith.constant 0 : i32
    %c0_i32_0 = arith.constant 0 : i32
    %c0_i32_1 = arith.constant 0 : i32
    return %arg0, %1, %c0_i32, %c0_i32_0 : i32, i32, i32, i32
  }
  func.func @transform_3(%arg0: i32, %arg1: i32, %arg2: memref<8xi32, #tpu.memory_space<smem>>, %arg3: memref<8xi32, #tpu.memory_space<smem>>, %arg4: memref<8xi32, #tpu.memory_space<smem>>, %arg5: memref<8xi32, #tpu.memory_space<smem>>) -> (i32, i32, i32, i32) {
    %0 = arith.index_cast %arg1 : i32 to index
    %1 = memref.load %arg5[%0] : memref<8xi32, #tpu.memory_space<smem>>
    %c0_i32 = arith.constant 0 : i32
    %c0_i32_0 = arith.constant 0 : i32
    %c0_i32_1 = arith.constant 0 : i32
    return %arg0, %1, %c0_i32, %c0_i32_0 : i32, i32, i32, i32
  }
  func.func @transform_4(%arg0: i32, %arg1: i32, %arg2: memref<8xi32, #tpu.memory_space<smem>>, %arg3: memref<8xi32, #tpu.memory_space<smem>>, %arg4: memref<8xi32, #tpu.memory_space<smem>>, %arg5: memref<8xi32, #tpu.memory_space<smem>>) -> (i32, i32, i32, i32) {
    %c0_i32 = arith.constant 0 : i32
    %c0_i32_0 = arith.constant 0 : i32
    %c0_i32_1 = arith.constant 0 : i32
    return %arg0, %arg1, %c0_i32, %c0_i32_0 : i32, i32, i32, i32
  }
  func.func @transform_5(%arg0: i32, %arg1: i32, %arg2: memref<8xi32, #tpu.memory_space<smem>>, %arg3: memref<8xi32, #tpu.memory_space<smem>>, %arg4: memref<8xi32, #tpu.memory_space<smem>>, %arg5: memref<8xi32, #tpu.memory_space<smem>>) -> (i32, i32) {
    %c0_i32 = arith.constant 0 : i32
    %c0_i32_0 = arith.constant 0 : i32
    %c0_i32_1 = arith.constant 0 : i32
    return %c0_i32, %c0_i32_0 : i32, i32
  }
  func.func @transform_6(%arg0: i32, %arg1: i32, %arg2: memref<8xi32, #tpu.memory_space<smem>>, %arg3: memref<8xi32, #tpu.memory_space<smem>>, %arg4: memref<8xi32, #tpu.memory_space<smem>>, %arg5: memref<8xi32, #tpu.memory_space<smem>>) -> (i32, i32) {
    %c0_i32 = arith.constant 0 : i32
    %c0_i32_0 = arith.constant 0 : i32
    %c0_i32_1 = arith.constant 0 : i32
    return %c0_i32, %c0_i32_0 : i32, i32
  }
  func.func @transform_7(%arg0: i32, %arg1: i32, %arg2: memref<8xi32, #tpu.memory_space<smem>>, %arg3: memref<8xi32, #tpu.memory_space<smem>>, %arg4: memref<8xi32, #tpu.memory_space<smem>>, %arg5: memref<8xi32, #tpu.memory_space<smem>>) -> (i32, i32) {
    %c0_i32 = arith.constant 0 : i32
    %c0_i32_0 = arith.constant 0 : i32
    %c0_i32_1 = arith.constant 0 : i32
    return %c0_i32, %c0_i32_0 : i32, i32
  }
  func.func @transform_8(%arg0: i32, %arg1: i32, %arg2: memref<8xi32, #tpu.memory_space<smem>>, %arg3: memref<8xi32, #tpu.memory_space<smem>>, %arg4: memref<8xi32, #tpu.memory_space<smem>>, %arg5: memref<8xi32, #tpu.memory_space<smem>>) -> (i32, i32) {
    %c0_i32 = arith.constant 0 : i32
    %c0_i32_0 = arith.constant 0 : i32
    %c0_i32_1 = arith.constant 0 : i32
    return %c0_i32, %c0_i32_0 : i32, i32
  }
  func.func @transform_9(%arg0: i32, %arg1: i32, %arg2: memref<8xi32, #tpu.memory_space<smem>>, %arg3: memref<8xi32, #tpu.memory_space<smem>>, %arg4: memref<8xi32, #tpu.memory_space<smem>>, %arg5: memref<8xi32, #tpu.memory_space<smem>>) -> (i32, i32) {
    %c0_i32 = arith.constant 0 : i32
    %c0_i32_0 = arith.constant 0 : i32
    %c0_i32_1 = arith.constant 0 : i32
    return %c0_i32, %c0_i32_0 : i32, i32
  }
  func.func @transform_10(%arg0: i32, %arg1: i32, %arg2: memref<8xi32, #tpu.memory_space<smem>>, %arg3: memref<8xi32, #tpu.memory_space<smem>>, %arg4: memref<8xi32, #tpu.memory_space<smem>>, %arg5: memref<8xi32, #tpu.memory_space<smem>>) -> (i32, i32) {
    %c0_i32 = arith.constant 0 : i32
    %c0_i32_0 = arith.constant 0 : i32
    %c0_i32_1 = arith.constant 0 : i32
    return %c0_i32, %c0_i32_0 : i32, i32
  }
  func.func @transform_11(%arg0: i32, %arg1: i32, %arg2: memref<8xi32, #tpu.memory_space<smem>>, %arg3: memref<8xi32, #tpu.memory_space<smem>>, %arg4: memref<8xi32, #tpu.memory_space<smem>>, %arg5: memref<8xi32, #tpu.memory_space<smem>>) -> (i32, i32, i32, i32) {
    %c0_i32 = arith.constant 0 : i32
    %c0_i32_0 = arith.constant 0 : i32
    %c0_i32_1 = arith.constant 0 : i32
    return %arg0, %arg1, %c0_i32, %c0_i32_0 : i32, i32, i32, i32
  }
}

module attributes {stable_mosaic.version = 11 : i64} {
  func.func @_block_kernel(%arg0: i32, %arg1: memref<1x80x128xbf16, #tpu.memory_space<vmem>>, %arg2: memref<3x384x256xbf16, #tpu.memory_space<vmem>>, %arg3: memref<1x256xf32, #tpu.memory_space<vmem>>, %arg4: memref<3x768x256xbf16, #tpu.memory_space<vmem>>, %arg5: memref<1x256xf32, #tpu.memory_space<vmem>>, %arg6: memref<1x80x256xf32, #tpu.memory_space<vmem>>, %arg7: memref<102x128xbf16, #tpu.memory_space<vmem>>, %arg8: memref<82x384xbf16, #tpu.memory_space<vmem>>, %arg9: memref<102x256xbf16, #tpu.memory_space<vmem>>, %arg10: memref<82x768xbf16, #tpu.memory_space<vmem>>) attributes {dimension_semantics = [#tpu.dimension_semantics<parallel>], iteration_bounds = array<i64: 2>, scalar_prefetch = 0 : i64, scratch_operands = 4 : i64, tpu.core_type = #tpu.core_type<tc>, window_params = [{transform_indices = @transform_0, window_bounds = array<i64: 1, 80, 128>}, {pipeline_mode = #tpu.pipeline_mode<synchronous>, transform_indices = @transform_1, window_bounds = array<i64: 3, 384, 256>}, {pipeline_mode = #tpu.pipeline_mode<synchronous>, transform_indices = @transform_2, window_bounds = array<i64: 1, 256>}, {pipeline_mode = #tpu.pipeline_mode<synchronous>, transform_indices = @transform_3, window_bounds = array<i64: 3, 768, 256>}, {pipeline_mode = #tpu.pipeline_mode<synchronous>, transform_indices = @transform_4, window_bounds = array<i64: 1, 256>}, {transform_indices = @transform_5, window_bounds = array<i64: 1, 80, 256>}]} {
    %c0 = arith.constant 0 : index
    %c0_0 = arith.constant 0 : index
    %c0_1 = arith.constant 0 : index
    %0 = vector.load %arg1[%c0, %c0_0, %c0_1] : memref<1x80x128xbf16, #tpu.memory_space<vmem>>, vector<1x80x128xbf16>
    %1 = vector.shape_cast %0 : vector<1x80x128xbf16> to vector<80x128xbf16>
    %cst = arith.constant 0.000000e+00 : bf16
    %2 = vector.broadcast %cst : bf16 to vector<11x128xbf16>
    %c0_2 = arith.constant 0 : index
    %c0_3 = arith.constant 0 : index
    %3 = vector.load %arg7[%c0_2, %c0_3] : memref<102x128xbf16, #tpu.memory_space<vmem>>, vector<11x128xbf16>
    tpu.vector_store %arg7[%c0_2, %c0_3], %2 {strides = array<i32>} : memref<102x128xbf16, #tpu.memory_space<vmem>>, vector<11x128xbf16>,
    %c11 = arith.constant 11 : index
    %c0_4 = arith.constant 0 : index
    %4 = vector.load %arg7[%c11, %c0_4] : memref<102x128xbf16, #tpu.memory_space<vmem>>, vector<80x128xbf16>
    tpu.vector_store %arg7[%c11, %c0_4], %1 {strides = array<i32>} : memref<102x128xbf16, #tpu.memory_space<vmem>>, vector<80x128xbf16>,
    %cst_5 = arith.constant 0.000000e+00 : bf16
    %5 = vector.broadcast %cst_5 : bf16 to vector<11x128xbf16>
    %c91 = arith.constant 91 : index
    %c0_6 = arith.constant 0 : index
    %6 = vector.load %arg7[%c91, %c0_6] : memref<102x128xbf16, #tpu.memory_space<vmem>>, vector<11x128xbf16>
    tpu.vector_store %arg7[%c91, %c0_6], %5 {strides = array<i32>} : memref<102x128xbf16, #tpu.memory_space<vmem>>, vector<11x128xbf16>,
    %c0_7 = arith.constant 0 : index
    %c0_8 = arith.constant 0 : index
    %7 = vector.load %arg7[%c0_7, %c0_8] : memref<102x128xbf16, #tpu.memory_space<vmem>>, vector<82x128xbf16>
    %c0_9 = arith.constant 0 : index
    %c0_10 = arith.constant 0 : index
    %8 = vector.load %arg8[%c0_9, %c0_10] : memref<82x384xbf16, #tpu.memory_space<vmem>>, vector<82x128xbf16>
    tpu.vector_store %arg8[%c0_9, %c0_10], %7 {strides = array<i32>} : memref<82x384xbf16, #tpu.memory_space<vmem>>, vector<82x128xbf16>,
    %c10 = arith.constant 10 : index
    %c0_11 = arith.constant 0 : index
    %9 = vector.load %arg7[%c10, %c0_11] : memref<102x128xbf16, #tpu.memory_space<vmem>>, vector<82x128xbf16>
    %c0_12 = arith.constant 0 : index
    %c128 = arith.constant 128 : index
    %10 = vector.load %arg8[%c0_12, %c128] : memref<82x384xbf16, #tpu.memory_space<vmem>>, vector<82x128xbf16>
    tpu.vector_store %arg8[%c0_12, %c128], %9 {strides = array<i32>} : memref<82x384xbf16, #tpu.memory_space<vmem>>, vector<82x128xbf16>,
    %c20 = arith.constant 20 : index
    %c0_13 = arith.constant 0 : index
    %11 = vector.load %arg7[%c20, %c0_13] : memref<102x128xbf16, #tpu.memory_space<vmem>>, vector<82x128xbf16>
    %c0_14 = arith.constant 0 : index
    %c256 = arith.constant 256 : index
    %12 = vector.load %arg8[%c0_14, %c256] : memref<82x384xbf16, #tpu.memory_space<vmem>>, vector<82x128xbf16>
    tpu.vector_store %arg8[%c0_14, %c256], %11 {strides = array<i32>} : memref<82x384xbf16, #tpu.memory_space<vmem>>, vector<82x128xbf16>,
    %c0_15 = arith.constant 0 : index
    %c0_16 = arith.constant 0 : index
    %13 = vector.load %arg8[%c0_15, %c0_16] : memref<82x384xbf16, #tpu.memory_space<vmem>>, vector<80x384xbf16>
    %c0_17 = arith.constant 0 : index
    %c0_18 = arith.constant 0 : index
    %c0_19 = arith.constant 0 : index
    %14 = vector.load %arg2[%c0_17, %c0_18, %c0_19] : memref<3x384x256xbf16, #tpu.memory_space<vmem>>, vector<1x384x256xbf16>
    %15 = vector.shape_cast %14 : vector<1x384x256xbf16> to vector<384x256xbf16>
    %cst_20 = arith.constant dense<0.000000e+00> : vector<80x256xf32>
    %16 = tpu.matmul %13, %15, %cst_20 {dimension_numbers = #tpu.dot_dimension_numbers<[1], [0], [0], [1], [0, 0, 1, 1], [], []>} : vector<80x384xbf16>, vector<384x256xbf16>, vector<80x256xf32> -> vector<80x256xf32>
    %c1 = arith.constant 1 : index
    %c0_21 = arith.constant 0 : index
    %17 = vector.load %arg8[%c1, %c0_21] : memref<82x384xbf16, #tpu.memory_space<vmem>>, vector<80x384xbf16>
    %c1_22 = arith.constant 1 : index
    %c0_23 = arith.constant 0 : index
    %c0_24 = arith.constant 0 : index
    %18 = vector.load %arg2[%c1_22, %c0_23, %c0_24] : memref<3x384x256xbf16, #tpu.memory_space<vmem>>, vector<1x384x256xbf16>
    %19 = vector.shape_cast %18 : vector<1x384x256xbf16> to vector<384x256xbf16>
    %cst_25 = arith.constant dense<0.000000e+00> : vector<80x256xf32>
    %20 = tpu.matmul %17, %19, %cst_25 {dimension_numbers = #tpu.dot_dimension_numbers<[1], [0], [0], [1], [0, 0, 1, 1], [], []>} : vector<80x384xbf16>, vector<384x256xbf16>, vector<80x256xf32> -> vector<80x256xf32>
    %21 = arith.addf %16, %20 : vector<80x256xf32>
    %c2 = arith.constant 2 : index
    %c0_26 = arith.constant 0 : index
    %22 = vector.load %arg8[%c2, %c0_26] : memref<82x384xbf16, #tpu.memory_space<vmem>>, vector<80x384xbf16>
    %c2_27 = arith.constant 2 : index
    %c0_28 = arith.constant 0 : index
    %c0_29 = arith.constant 0 : index
    %23 = vector.load %arg2[%c2_27, %c0_28, %c0_29] : memref<3x384x256xbf16, #tpu.memory_space<vmem>>, vector<1x384x256xbf16>
    %24 = vector.shape_cast %23 : vector<1x384x256xbf16> to vector<384x256xbf16>
    %cst_30 = arith.constant dense<0.000000e+00> : vector<80x256xf32>
    %25 = tpu.matmul %22, %24, %cst_30 {dimension_numbers = #tpu.dot_dimension_numbers<[1], [0], [0], [1], [0, 0, 1, 1], [], []>} : vector<80x384xbf16>, vector<384x256xbf16>, vector<80x256xf32> -> vector<80x256xf32>
    %26 = arith.addf %21, %25 : vector<80x256xf32>
    %c0_31 = arith.constant 0 : index
    %c0_32 = arith.constant 0 : index
    %27 = vector.load %arg3[%c0_31, %c0_32] : memref<1x256xf32, #tpu.memory_space<vmem>>, vector<1x256xf32>
    %28 = vector.broadcast %27 : vector<1x256xf32> to vector<80x256xf32>
    %29 = arith.addf %26, %28 : vector<80x256xf32>
    %cst_33 = arith.constant 0.000000e+00 : f32
    %30 = vector.broadcast %cst_33 : f32 to vector<80x256xf32>
    %31 = arith.maximumf %29, %30 : vector<80x256xf32>
    %32 = tpu.iota {dimensions = array<i32: 0>} : vector<80x1xi32>
    %c10_i32 = arith.constant 10 : i32
    %c0_i32 = arith.constant 0 : i32
    %33 = arith.cmpi eq, %c10_i32, %c0_i32 : i32
    %c1_i32 = arith.constant 1 : i32
    %34 = arith.select %33, %c1_i32, %c10_i32 : i32
    %35 = vector.broadcast %34 : i32 to vector<80x1xi32>
    %36 = arith.remsi %32, %35 : vector<80x1xi32>
    %c0_i32_34 = arith.constant 0 : i32
    %37 = vector.broadcast %c0_i32_34 : i32 to vector<80x1xi32>
    %38 = arith.cmpi ne, %36, %37 : vector<80x1xi32>
    %c0_i32_35 = arith.constant 0 : i32
    %39 = vector.broadcast %c0_i32_35 : i32 to vector<80x1xi32>
    %40 = arith.cmpi slt, %36, %39 : vector<80x1xi32>
    %c0_i32_36 = arith.constant 0 : i32
    %41 = arith.cmpi slt, %34, %c0_i32_36 : i32
    %42 = vector.broadcast %41 : i1 to vector<80x1xi1>
    %43 = vector.broadcast %42 : vector<80x1xi1> to vector<80x1xi1>
    %44 = arith.xori %40, %43 : vector<80x1xi1>
    %45 = arith.andi %44, %38 : vector<80x1xi1>
    %46 = vector.broadcast %34 : i32 to vector<80x1xi32>
    %47 = arith.addi %36, %46 : vector<80x1xi32>
    %48 = arith.select %45, %47, %36 : vector<80x1xi1>, vector<80x1xi32>
    %c8_i32 = arith.constant 8 : i32
    %49 = vector.broadcast %c8_i32 : i32 to vector<80x1xi32>
    %50 = arith.cmpi slt, %48, %49 : vector<80x1xi32>
    %cst_37 = arith.constant 0.000000e+00 : f32
    %51 = vector.shape_cast %50 : vector<80x1xi1> to vector<80x1xi1>
    %52 = vector.broadcast %51 : vector<80x1xi1> to vector<80x256xi1>
    %53 = vector.broadcast %cst_37 : f32 to vector<80x256xf32>
    %54 = arith.select %52, %31, %53 : vector<80x256xi1>, vector<80x256xf32>
    %55 = arith.truncf %54 : vector<80x256xf32> to vector<80x256xbf16>
    %cst_38 = arith.constant 0.000000e+00 : bf16
    %56 = vector.broadcast %cst_38 : bf16 to vector<11x256xbf16>
    %c0_39 = arith.constant 0 : index
    %c0_40 = arith.constant 0 : index
    %57 = vector.load %arg9[%c0_39, %c0_40] : memref<102x256xbf16, #tpu.memory_space<vmem>>, vector<11x256xbf16>
    tpu.vector_store %arg9[%c0_39, %c0_40], %56 {strides = array<i32>} : memref<102x256xbf16, #tpu.memory_space<vmem>>, vector<11x256xbf16>,
    %c11_41 = arith.constant 11 : index
    %c0_42 = arith.constant 0 : index
    %58 = vector.load %arg9[%c11_41, %c0_42] : memref<102x256xbf16, #tpu.memory_space<vmem>>, vector<80x256xbf16>
    tpu.vector_store %arg9[%c11_41, %c0_42], %55 {strides = array<i32>} : memref<102x256xbf16, #tpu.memory_space<vmem>>, vector<80x256xbf16>,
    %cst_43 = arith.constant 0.000000e+00 : bf16
    %59 = vector.broadcast %cst_43 : bf16 to vector<11x256xbf16>
    %c91_44 = arith.constant 91 : index
    %c0_45 = arith.constant 0 : index
    %60 = vector.load %arg9[%c91_44, %c0_45] : memref<102x256xbf16, #tpu.memory_space<vmem>>, vector<11x256xbf16>
    tpu.vector_store %arg9[%c91_44, %c0_45], %59 {strides = array<i32>} : memref<102x256xbf16, #tpu.memory_space<vmem>>, vector<11x256xbf16>,
    %c0_46 = arith.constant 0 : index
    %c0_47 = arith.constant 0 : index
    %61 = vector.load %arg9[%c0_46, %c0_47] : memref<102x256xbf16, #tpu.memory_space<vmem>>, vector<82x256xbf16>
    %c0_48 = arith.constant 0 : index
    %c0_49 = arith.constant 0 : index
    %62 = vector.load %arg10[%c0_48, %c0_49] : memref<82x768xbf16, #tpu.memory_space<vmem>>, vector<82x256xbf16>
    tpu.vector_store %arg10[%c0_48, %c0_49], %61 {strides = array<i32>} : memref<82x768xbf16, #tpu.memory_space<vmem>>, vector<82x256xbf16>,
    %c10_50 = arith.constant 10 : index
    %c0_51 = arith.constant 0 : index
    %63 = vector.load %arg9[%c10_50, %c0_51] : memref<102x256xbf16, #tpu.memory_space<vmem>>, vector<82x256xbf16>
    %c0_52 = arith.constant 0 : index
    %c256_53 = arith.constant 256 : index
    %64 = vector.load %arg10[%c0_52, %c256_53] : memref<82x768xbf16, #tpu.memory_space<vmem>>, vector<82x256xbf16>
    tpu.vector_store %arg10[%c0_52, %c256_53], %63 {strides = array<i32>} : memref<82x768xbf16, #tpu.memory_space<vmem>>, vector<82x256xbf16>,
    %c20_54 = arith.constant 20 : index
    %c0_55 = arith.constant 0 : index
    %65 = vector.load %arg9[%c20_54, %c0_55] : memref<102x256xbf16, #tpu.memory_space<vmem>>, vector<82x256xbf16>
    %c0_56 = arith.constant 0 : index
    %c512 = arith.constant 512 : index
    %66 = vector.load %arg10[%c0_56, %c512] : memref<82x768xbf16, #tpu.memory_space<vmem>>, vector<82x256xbf16>
    tpu.vector_store %arg10[%c0_56, %c512], %65 {strides = array<i32>} : memref<82x768xbf16, #tpu.memory_space<vmem>>, vector<82x256xbf16>,
    %c0_57 = arith.constant 0 : index
    %c0_58 = arith.constant 0 : index
    %67 = vector.load %arg10[%c0_57, %c0_58] : memref<82x768xbf16, #tpu.memory_space<vmem>>, vector<80x768xbf16>
    %c0_59 = arith.constant 0 : index
    %c0_60 = arith.constant 0 : index
    %c0_61 = arith.constant 0 : index
    %68 = vector.load %arg4[%c0_59, %c0_60, %c0_61] : memref<3x768x256xbf16, #tpu.memory_space<vmem>>, vector<1x768x256xbf16>
    %69 = vector.shape_cast %68 : vector<1x768x256xbf16> to vector<768x256xbf16>
    %cst_62 = arith.constant dense<0.000000e+00> : vector<80x256xf32>
    %70 = tpu.matmul %67, %69, %cst_62 {dimension_numbers = #tpu.dot_dimension_numbers<[1], [0], [0], [1], [0, 0, 1, 1], [], []>} : vector<80x768xbf16>, vector<768x256xbf16>, vector<80x256xf32> -> vector<80x256xf32>
    %c1_63 = arith.constant 1 : index
    %c0_64 = arith.constant 0 : index
    %71 = vector.load %arg10[%c1_63, %c0_64] : memref<82x768xbf16, #tpu.memory_space<vmem>>, vector<80x768xbf16>
    %c1_65 = arith.constant 1 : index
    %c0_66 = arith.constant 0 : index
    %c0_67 = arith.constant 0 : index
    %72 = vector.load %arg4[%c1_65, %c0_66, %c0_67] : memref<3x768x256xbf16, #tpu.memory_space<vmem>>, vector<1x768x256xbf16>
    %73 = vector.shape_cast %72 : vector<1x768x256xbf16> to vector<768x256xbf16>
    %cst_68 = arith.constant dense<0.000000e+00> : vector<80x256xf32>
    %74 = tpu.matmul %71, %73, %cst_68 {dimension_numbers = #tpu.dot_dimension_numbers<[1], [0], [0], [1], [0, 0, 1, 1], [], []>} : vector<80x768xbf16>, vector<768x256xbf16>, vector<80x256xf32> -> vector<80x256xf32>
    %75 = arith.addf %70, %74 : vector<80x256xf32>
    %c2_69 = arith.constant 2 : index
    %c0_70 = arith.constant 0 : index
    %76 = vector.load %arg10[%c2_69, %c0_70] : memref<82x768xbf16, #tpu.memory_space<vmem>>, vector<80x768xbf16>
    %c2_71 = arith.constant 2 : index
    %c0_72 = arith.constant 0 : index
    %c0_73 = arith.constant 0 : index
    %77 = vector.load %arg4[%c2_71, %c0_72, %c0_73] : memref<3x768x256xbf16, #tpu.memory_space<vmem>>, vector<1x768x256xbf16>
    %78 = vector.shape_cast %77 : vector<1x768x256xbf16> to vector<768x256xbf16>
    %cst_74 = arith.constant dense<0.000000e+00> : vector<80x256xf32>
    %79 = tpu.matmul %76, %78, %cst_74 {dimension_numbers = #tpu.dot_dimension_numbers<[1], [0], [0], [1], [0, 0, 1, 1], [], []>} : vector<80x768xbf16>, vector<768x256xbf16>, vector<80x256xf32> -> vector<80x256xf32>
    %80 = arith.addf %75, %79 : vector<80x256xf32>
    %c0_75 = arith.constant 0 : index
    %c0_76 = arith.constant 0 : index
    %81 = vector.load %arg5[%c0_75, %c0_76] : memref<1x256xf32, #tpu.memory_space<vmem>>, vector<1x256xf32>
    %82 = vector.broadcast %81 : vector<1x256xf32> to vector<80x256xf32>
    %83 = arith.addf %80, %82 : vector<80x256xf32>
    %cst_77 = arith.constant 0.000000e+00 : f32
    %84 = vector.broadcast %cst_77 : f32 to vector<80x256xf32>
    %85 = arith.maximumf %83, %84 : vector<80x256xf32>
    %c0_78 = arith.constant 0 : index
    %c0_79 = arith.constant 0 : index
    %c0_80 = arith.constant 0 : index
    %86 = vector.load %arg6[%c0_78, %c0_79, %c0_80] : memref<1x80x256xf32, #tpu.memory_space<vmem>>, vector<1x80x256xf32>
    %87 = vector.shape_cast %86 : vector<1x80x256xf32> to vector<80x256xf32>
    %88 = vector.shape_cast %85 : vector<80x256xf32> to vector<1x80x256xf32>
    tpu.vector_store %arg6[%c0_78, %c0_79, %c0_80], %88 {strides = array<i32>} : memref<1x80x256xf32, #tpu.memory_space<vmem>>, vector<1x80x256xf32>,
    return
  }
  func.func @transform_0(%arg0: i32) -> (i32, i32, i32) {
    %c0_i32 = arith.constant 0 : i32
    %c0_i32_0 = arith.constant 0 : i32
    %c0_i32_1 = arith.constant 0 : i32
    return %arg0, %c0_i32, %c0_i32_0 : i32, i32, i32
  }
  func.func @transform_1(%arg0: i32) -> (i32, i32, i32) {
    %c0_i32 = arith.constant 0 : i32
    %c0_i32_0 = arith.constant 0 : i32
    %c0_i32_1 = arith.constant 0 : i32
    %c0_i32_2 = arith.constant 0 : i32
    return %c0_i32, %c0_i32_0, %c0_i32_1 : i32, i32, i32
  }
  func.func @transform_2(%arg0: i32) -> (i32, i32) {
    %c0_i32 = arith.constant 0 : i32
    %c0_i32_0 = arith.constant 0 : i32
    %c0_i32_1 = arith.constant 0 : i32
    return %c0_i32, %c0_i32_0 : i32, i32
  }
  func.func @transform_3(%arg0: i32) -> (i32, i32, i32) {
    %c0_i32 = arith.constant 0 : i32
    %c0_i32_0 = arith.constant 0 : i32
    %c0_i32_1 = arith.constant 0 : i32
    %c0_i32_2 = arith.constant 0 : i32
    return %c0_i32, %c0_i32_0, %c0_i32_1 : i32, i32, i32
  }
  func.func @transform_4(%arg0: i32) -> (i32, i32) {
    %c0_i32 = arith.constant 0 : i32
    %c0_i32_0 = arith.constant 0 : i32
    %c0_i32_1 = arith.constant 0 : i32
    return %c0_i32, %c0_i32_0 : i32, i32
  }
  func.func @transform_5(%arg0: i32) -> (i32, i32, i32) {
    %c0_i32 = arith.constant 0 : i32
    %c0_i32_0 = arith.constant 0 : i32
    %c0_i32_1 = arith.constant 0 : i32
    return %arg0, %c0_i32, %c0_i32_0 : i32, i32, i32
  }
}

</mosaic_0001>

<bundles_post_ra>
// kernel: du_head_forward.2
= control target key start
LH: loop header
LB: loop body
LE: loop exit
PB: predicated region body
PF: predicated region fallthrough
CT: control target
= control target key end

     0   :  { %s3000_s24 = smov [#allocation3]   ;;  %s3001_s25 = smov [#allocation4]   ;;  %s3610_s0 = inlined_call_operand.vmem [shape: s32[8], index: 0, kind: input, shape index: {}]   ;;  %s3611_s4 = inlined_call_operand.vmem [shape: bf16[2,16,16,512], index: 4, kind: input, shape index: {}, may-alias: {4,5}]   ;;  %s3612_s5 = inlined_call_operand.vmem [shape: bf16[2,16,16,512], index: 5, kind: input, shape index: {}, may-alias: {4,5}]   ;;  %s3613_s6 = inlined_call_operand.vmem [shape: bf16[2,8,8,1024], index: 6, kind: input, shape index: {}, may-alias: {6,7}]   ;;  %s3614_s7 = inlined_call_operand.vmem [shape: bf16[2,8,8,1024], index: 7, kind: input, shape index: {}, may-alias: {6,7}]   ;;  %s3615_s8 = inlined_call_operand.vmem [shape: bf16[2,8,8,32], index: 8, kind: input, shape index: {}]   ;;  %s3616_s9 = inlined_call_operand.vmem [shape: bf16[8,16], index: 9, kind: input, shape index: {}]   ;;  %s3617_s10 = inlined_call_operand.vmem [shape: bf16[8,8], index: 10, kind: input, shape index: {}]   ;;  %s3618_s11 = inlined_call_operand.vmem [shape: bf16[512,128], index: 11, kind: input, shape index: {}]   ;;  %s3619_s12 = inlined_call_operand.vmem [shape: bf16[1024,128], index: 12, kind: input, shape index: {}]   ;;  %s3620_s13 = inlined_call_operand.vmem [shape: bf16[32,128], index: 13, kind: input, shape index: {}]   ;;  %s3621_s14 = inlined_call_operand.vmem [shape: f32[1,128], index: 14, kind: input, shape index: {}]   ;;  %s3622_s15 = inlined_call_operand.vmem [shape: bf16[2,8,10,128], index: 15, kind: output, shape index: {}]   ;;  %s3623_s1 = inlined_call_operand.vmem [shape: s32[8], index: 1, kind: input, shape index: {}]   ;;  %s3624_s2 = inlined_call_operand.vmem [shape: s32[8], index: 2, kind: input, shape index: {}]   ;;  %s3625_s3 = inlined_call_operand.vmem [shape: s32[8], index: 3, kind: input, shape index: {}]  }
   0x1   :  { %s21_s20 = sshll.u32 %s3610_s0, 4  ;;  %s26_s23 = sshll.u32 %s3623_s1, 4  ;;  %s22_s20 = int_to_ptr.vmem [resolvable:$true] %s21_s20  ;;  %s27_s23 = int_to_ptr.vmem [resolvable:$true] %s26_s23 }
   0x2   :  { %24 = dma.vmem_to_smem %s22_s20, 16, %s3000_s24, [#allocation2] }
   0x3   :  { %29 = dma.vmem_to_smem %s27_s23, 16, %s3001_s25, [#allocation2] }
   0x4   :  { %s31_s28 = sshll.u32 %s3624_s2, 4  ;;  %s36_s16 = sshll.u32 %s3625_s3, 4  ;;  %s32_s28 = int_to_ptr.vmem [resolvable:$true] %s31_s28  ;;  %s37_s16 = int_to_ptr.vmem [resolvable:$true] %s36_s16 }
   0x5   :  { %s3002_s0 = smov [#allocation5]   ;;  %s3003_s17 = smov [#allocation6]  }
   0x6   :  { %34 = dma.vmem_to_smem %s32_s28, 16, %s3002_s0, [#allocation2] }
   0x7   :  { %39 = dma.vmem_to_smem %s37_s16, 16, %s3003_s17, [#allocation2] }
   0x8   :  { %2978 = dma.done.wait [#allocation2], 64 }
   0x9   :  { %2979 = vsyncadd [#allocation2], 4294967232 }
   0xa   :  { %42 = sfence }
   0xb   :  { %s3097_s1 = smov 0   ;;  %s3099_s18 = smov 0  }
   0xc   :  { %s3101_s19 = smov 0   ;;  %s3103_s2 = smov 0  }
   0xd   :  { %s3105_s20 = smov 0  }
   0xe LB: > { %3629 = sst [smem:[#allocation8_spill]] %s2990_s19  ;;  %s57_s3 = sadd.s32 1, %s2990_s19  ;;  %s2998_s20 = sphi %s3105_s20, %s48_s20   ;;  %s2994_s2 = sphi %s3103_s2, %s3640_s2   ;;  %s2990_s19 = sphi %s3101_s19, %s3639_s19   ;;  %s2986_s18 = sphi %s3099_s18, %s3638_s18   ;;  %s2982_s1 = sphi %s3097_s1, %s3637_s1  }
   0xf   : > { %3630 = sst [smem:[#allocation9_spill]] %s2994_s2  ;;  %s60_s21 = sadd.s32 1, %s2994_s2 }
  0x10   : > { %3631 = sst [smem:[#allocation10_spill]] %s2998_s20  ;;  %p58_p0 = scmp.ge.s32.totalorder %s57_s3, 8 }
  0x11   : > { %p2289_p1 = scmp.ge.s32.totalorder %s2998_s20, 1  ;;  %p463_p2 = scmp.lt.s32.totalorder %s2998_s20, 17 }
  0x12   : > { %s3642_s3 = smov (%p58_p0, %s57_s3), 0  ;;  %s3644_s21 = smov (!%p58_p0, %s60_s21), %s2994_s2 }
  0x13   : > { %3632 = sst [smem:[#allocation11_spill]] %s3642_s3  ;;  %p464_p3 = pnand %p2289_p1, %p463_p2 }
  0x14   : > { %p62_p4 = scmp.ge.s32.totalorder %s3644_s21, 2  ;;  %s550_s22 = sld [smem:[#allocation3 + %s2982_s1]] (!%p464_p3) }
  0x15   : > { %467 = sbr.rel (%p464_p3) target bundleno = 420 (0x1a4), region = 64  ;;  %p551_p5 = scmp.lt.s32.totalorder (!%p464_p3), %s2986_s18, 1 }
  0x16   : > { %s3646_s21 = smov (%p62_p4, %s3644_s21), 0  ;;  %s561_s23 = sld [smem:[#allocation4 + %s2982_s1]] (!%p464_p3) }
  0x17   : > { %3633 = sst [smem:[#allocation12_spill]] %s3646_s21  ;;  %p596_p10 = scmp.lt.s32.totalorder (!%p464_p3), %s2982_s1, 7 }
  0x18   : > { %s3134_s24 = sld [smem:[#allocation5 + %s2982_s1]] (!%p464_p3) }
  0x19   : > { %s3139_s27 = sld [smem:[#allocation6 + %s2982_s1]] (!%p464_p3) }
  0x1a   : > { %s3648_s18 = smov (!%p551_p5, %s2986_s18), 1  ;;  %p553_p6 = scmp.lt.s32.totalorder %s550_s22, 15  ;;  %vm645_vm0 = vcmask 130048   ;;  %v3151_v7 = vld [vmem:[%s3616_s9] sm:$0xf]  ;;  %vm825_vm1 = vcmask 1043456  }
  0x1b   : > { %s2291_s25 = sshll.u32 %s3648_s18, 7  ;;  %v796_v62 = vld [vmem:[%s3617_s10] sm:$0xf]  ;;  %vm821_vm2 = vcmask 64512   ;;  %vm2088_vm3 = vcmask 261120  }
  0x1c   : > { %p564_p7 = scmp.lt.s32.totalorder %s561_s23, 15  ;;  %s3650_s22 = smov (!%p553_p6, %s550_s22), 15 }
  0x1d   : > { %s2290_s28 = sshll.u32 %s3650_s22, 3  ;;  %s2305_s22 = sshll.u32 %s3648_s18, 4 }
  0x1e   : > { %s3652_s23 = smov (!%p564_p7, %s561_s23), 15  ;;  %p575_p8 = scmp.lt.s32.totalorder %s3134_s24, 7 }
  0x1f   : > { %s557_s29 = sadd.s32 %s2291_s25, %s2290_s28  ;;  %s2293_s30 = sshll.u32 %s3652_s23, 3 }
  0x20   : > { %s2292_s16 = sshll.u32 %s557_s29, 2  ;;  %s568_s0 = sadd.s32 %s2293_s30, %s2291_s25 }
  0x21   : > { %s559_s3 = scalar_lea.vmem %s3611_s4, %s2292_s16  ;;  %s2295_s2 = sshll.u32 %s568_s0, 2 }
  0x22   : > { %v2309_v0 = vld [vmem:[%s559_s3] sm:$0xf]  ;;  %v2760_v1 = vld [vmem:[%s559_s3 + $0xc] sm:$0xf0]  ;;  %v2758_v2 = vld [vmem:[%s559_s3 + $0x4] sm:$0xf]  ;;  %s570_s20 = scalar_lea.vmem %s3612_s5, %s2295_s2  ;;  %s612_s30 = scvt.s32.f32 %s2982_s1 }
  0x23   : > { %v2310_v3 = vor.u32 %v2760_v1, %v2309_v0  ;;  %v2311_v4 = vld [vmem:[%s559_s3 + $0x10] sm:$0xf0]  ;;  %v2317_v5 = vld [vmem:[%s559_s3 + $0x8] sm:$0xf]  ;;  %v2761_v6 = vld [vmem:[%s559_s3 + $0x14] sm:$0xf0] }
  0x24   : > { %v2314_v8 = vor.u32 %v2758_v2, %v2311_v4  ;;  %v2318_v9 = vor.u32 %v2761_v6, %v2317_v5  ;;  %v2759_v10 = vld [vmem:[%s559_s3 + $0xc] sm:$0xf]  ;;  %v2319_v11 = vld [vmem:[%s559_s3 + $0x18] sm:$0xf0]  ;;  %v2337_v12 = vld [vmem:[%s570_s20 + $0x8] sm:$0xf] }
  0x25   : > { %656 = vmatpush.bf16.msra.mxu0 %v2310_v3  ;;  %v2322_v13 = vor.u32 %v2759_v10, %v2319_v11  ;;  %v2765_v14 = vld [vmem:[%s570_s20 + $0x14] sm:$0xf0]  ;;  %v2329_v15 = vld [vmem:[%s570_s20] sm:$0xf]  ;;  %v2764_v16 = vld [vmem:[%s570_s20 + $0xc] sm:$0xf0] }
  0x26   : > { %669 = vmatpush.bf16.msra.mxu1 %v2314_v8  ;;  %682 = vmatpush.bf16.msra.mxu2 %v2318_v9  ;;  %v2338_v17 = vor.u32 %v2765_v14, %v2337_v12  ;;  %v2330_v18 = vor.u32 %v2764_v16, %v2329_v15  ;;  %v2763_v19 = vld [vmem:[%s570_s20 + $0xc] sm:$0xf]  ;;  %v2339_v20 = vld [vmem:[%s570_s20 + $0x18] sm:$0xf0]  ;;  %v2762_v21 = vld [vmem:[%s570_s20 + $0x4] sm:$0xf] }
  0x27   : > { %695 = vmatpush.bf16.msra.mxu3 %v2322_v13  ;;  %v2342_v22 = vor.u32 %v2763_v19, %v2339_v20  ;;  %v2331_v23 = vld [vmem:[%s570_s20 + $0x10] sm:$0xf0]  ;;  %s3654_s24 = smov (!%p575_p8, %s3134_s24), 7  ;;  %p586_p9 = scmp.lt.s32.totalorder %s3139_s27, 7  ;;  %v2813_v19 = vld [vmem:[%s3619_s12 + $0x78] sm:$0xff] }
  0x28   : > { %2323 = vmatmul.msk.bf16.vlgmr.msra.gmra.mxu0 %vm645_vm0, %v3151_v7  ;;  %v2334_v24 = vor.u32 %v2762_v21, %v2331_v23  ;;  %s2296_s19 = sshll.u32 %s3654_s24, 3  ;;  %s3634_s2 = sshll.u32 %s3648_s18, 6  ;;  %v2804_v20 = vld [vmem:[%s3619_s12 + $0x30] sm:$0xff]  ;;  %v2829_v23 = vld [vmem:[%s3619_s12 + $0xf8] sm:$0xff] }
  0x29   : > { %2324 = vmatmul.msk.bf16.vlgmr.msra.gmra.mxu1 %vm645_vm0, %v3151_v7  ;;  %2325 = vmatmul.msk.bf16.vlgmr.msra.gmra.mxu2 %vm645_vm0, %v3151_v7  ;;  %s579_s20 = sadd.s32 %s3634_s2, %s2296_s19  ;;  %s3656_s27 = smov (!%p586_p9, %s3139_s27), 7  ;;  %v2812_v21 = vld [vmem:[%s3619_s12 + $0x70] sm:$0xff] }
  0x2a   : > { %758 = vmatpush.bf16.msrb.mxu2 %v2338_v17  ;;  %2326 = vmatmul.msk.bf16.vlgmr.msra.gmra.mxu3 %vm645_vm0, %v3151_v7  ;;  %s2298_s3 = sshll.u32 %s579_s20, 2  ;;  %s2299_s24 = sshll.u32 %s3656_s27, 3 }
  0x2b   : > { %732 = vmatpush.bf16.msrb.mxu0 %v2330_v18  ;;  %771 = vmatpush.bf16.msrb.mxu3 %v2342_v22  ;;  %s581_s26 = scalar_lea.vmem %s3613_s6, %s2298_s3  ;;  %s3635_s28 = smov %s3634_s2  ;;  %v2805_v18 = vld [vmem:[%s3619_s12 + $0x38] sm:$0xff] }
  0x2c   : > { %745 = vmatpush.bf16.msrb.mxu1 %v2334_v24  ;;  %v798_v25 = vld [vmem:[%s581_s26 + $0x8] sm:$0xff]  ;;  %v797_v26 = vld [vmem:[%s581_s26] sm:$0xff]  ;;  %v800_v27 = vld [vmem:[%s581_s26 + $0x18] sm:$0xff]  ;;  %s590_s29 = sadd.s32 %s2299_s24, %s3635_s28  ;;  %s3256_s20 = sld [smem:[#allocation3 + %s2982_s1]] }
  0x2d   : > { %v807_v28 = vunpack.c.l.b16 %v798_v25  ;;  %v805_v29 = vunpack.c.l.b16 %v797_v26  ;;  %v808_v30 = vunpack.c.h.b16 %v798_v25  ;;  %v806_v31 = vunpack.c.h.b16 %v797_v26  ;;  %v799_v32 = vld [vmem:[%s581_s26 + $0x10] sm:$0xff]  ;;  %s2301_s27 = sshll.u32 %s590_s29, 2  ;;  %v2821_v22 = vld [vmem:[%s3619_s12 + $0xb8] sm:$0xff]  ;;  %v2803_v24 = vld [vmem:[%s3619_s12 + $0x28] sm:$0xff]  ;;  %s613_s21 = smul.f32 2.142857, %s612_s30 }
  0x2e   : > { %v811_v33 = vunpack.c.l.b16 %v800_v27  ;;  %v809_v34 = vunpack.c.l.b16 %v799_v32  ;;  %v812_v35 = vunpack.c.h.b16 %v800_v27  ;;  %v810_v40 = vunpack.c.h.b16 %v799_v32  ;;  %s3190_s0 = scalar_lea.vmem %s3614_s7, %s2301_s27  ;;  %v2811_v25 = vld [vmem:[%s3619_s12 + $0x68] sm:$0xff]  ;;  %v2820_v26 = vld [vmem:[%s3619_s12 + $0xb0] sm:$0xff]  ;;  %v2801_v32 = vld [vmem:[%s3619_s12 + $0x18] sm:$0xff]  ;;  %s617_s19 = sld [smem:[#allocation5 + %s2982_s1]] }
  0x2f   : > { %v815_v36 = vpack.c.b16 %v807_v28, %v807_v28  ;;  %v813_v37 = vpack.c.b16 %v805_v29, %v805_v29  ;;  %v816_v38 = vpack.c.b16 %v808_v30, %v808_v30  ;;  %v814_v39 = vpack.c.b16 %v806_v31, %v806_v31  ;;  %v955_v53 = vld [vmem:[%s3190_s0 + $0x8] sm:$0xff]  ;;  %v954_v54 = vld [vmem:[%s3190_s0] sm:$0xff]  ;;  %v957_v4 = vld [vmem:[%s3190_s0 + $0x18] sm:$0xff]  ;;  %s3658_s1 = smov (!%p596_p10, %s2982_s1), 7 }
  0x30   : > { %v819_v45 = vpack.c.b16 %v811_v33, %v811_v33  ;;  %v817_v46 = vpack.c.b16 %v809_v34, %v809_v34  ;;  %v820_v47 = vpack.c.b16 %v812_v35, %v812_v35  ;;  %v818_v48 = vpack.c.b16 %v810_v40, %v810_v40  ;;  %v956_v5 = vld [vmem:[%s3190_s0 + $0x10] sm:$0xff]  ;;  %v2802_v28 = vld [vmem:[%s3619_s12 + $0x20] sm:$0xff]  ;;  %v2819_v30 = vld [vmem:[%s3619_s12 + $0xa8] sm:$0xff] }
  0x31   : > { %v833_v41 = vsel %vm825_vm1, %v815_v36, 0  ;;  %v827_v42 = vsel %vm825_vm1, %v813_v37, 0  ;;  %v836_v43 = vsel %vm825_vm1, %v816_v38, 0  ;;  %v830_v44 = vsel %vm825_vm1, %v814_v39, 0  ;;  %v2828_v27 = vld [vmem:[%s3619_s12 + $0xf0] sm:$0xff]  ;;  %v2810_v29 = vld [vmem:[%s3619_s12 + $0x60] sm:$0xff] }
  0x32   : > { %883 = vmatpush.bf16.msra.mxu2 %v833_v41  ;;  %857 = vmatpush.bf16.msra.mxu0 %v827_v42  ;;  %v845_v49 = vsel %vm825_vm1, %v819_v45, 0  ;;  %v839_v50 = vsel %vm825_vm1, %v817_v46, 0  ;;  %v848_v51 = vsel %vm825_vm1, %v820_v47, 0  ;;  %v842_v52 = vsel %vm825_vm1, %v818_v48, 0  ;;  %v2827_v31 = vld [vmem:[%s3619_s12 + $0xe8] sm:$0xff]  ;;  %v2809_v33 = vld [vmem:[%s3619_s12 + $0x58] sm:$0xff]  ;;  %s615_s25 = scvt.s32.f32 %s3256_s20 }
  0x33   : > { %896 = vmatpush.bf16.msra.mxu3 %v836_v43  ;;  %870 = vmatpush.bf16.msra.mxu1 %v830_v44  ;;  %v964_v55 = vunpack.c.l.b16 %v955_v53  ;;  %v962_v56 = vunpack.c.l.b16 %v954_v54  ;;  %v965_v57 = vunpack.c.h.b16 %v955_v53  ;;  %v963_v58 = vunpack.c.h.b16 %v954_v54  ;;  %v2818_v35 = vld [vmem:[%s3619_s12 + $0xa0] sm:$0xff]  ;;  %v2800_v38 = vld [vmem:[%s3619_s12 + $0x10] sm:$0xff]  ;;  %v2817_v40 = vld [vmem:[%s3619_s12 + $0x98] sm:$0xff] }
  0x34   : > { %v968_v6 = vunpack.c.l.b16 %v957_v4  ;;  %v969_v8 = vunpack.c.h.b16 %v957_v4  ;;  %v967_v9 = vunpack.c.h.b16 %v956_v5  ;;  %v2826_v36 = vld [vmem:[%s3619_s12 + $0xe0] sm:$0xff]  ;;  %v2808_v39 = vld [vmem:[%s3619_s12 + $0x50] sm:$0xff]  ;;  %v2825_v41 = vld [vmem:[%s3619_s12 + $0xd8] sm:$0xff]  ;;  %s616_s20 = ssub.f32 %s613_s21, %s615_s25  ;;  %s618_s25 = scvt.s32.f32 %s617_s19 }
  0x35   : > { %v972_v59 = vpack.c.b16 %v964_v55, %v964_v55  ;;  %v970_v60 = vpack.c.b16 %v962_v56, %v962_v56  ;;  %v973_v61 = vpack.c.b16 %v965_v57, %v965_v57  ;;  %v971_v63 = vpack.c.b16 %v963_v58, %v963_v58  ;;  %v2799_v42 = vld [vmem:[%s3619_s12 + $0x8] sm:$0xff]  ;;  %v2816_v47 = vld [vmem:[%s3619_s12 + $0x90] sm:$0xff]  ;;  %v2845_v53 = vld [vmem:[%s3619_s12 + $0x178] sm:$0xff] }
  0x36   : > { %v976_v10 = vpack.c.b16 %v968_v6, %v968_v6  ;;  %v977_v12 = vpack.c.b16 %v969_v8, %v969_v8  ;;  %v975_v13 = vpack.c.b16 %v967_v9, %v967_v9  ;;  %v2807_v43 = vld [vmem:[%s3619_s12 + $0x48] sm:$0xff]  ;;  %v2824_v48 = vld [vmem:[%s3619_s12 + $0xd0] sm:$0xff]  ;;  %s777_s17 = ssub.f32 1.0, %s616_s20  ;;  %v783_v57 = vstv %s616_s20  ;;  %v2853_v4 = vld [vmem:[%s3619_s12 + $0x1b8] sm:$0xff] }
  0x37   : > { %v985_v0 = vsel %vm825_vm1, %v972_v59, 0  ;;  %v979_v1 = vsel %vm825_vm1, %v970_v60, 0  ;;  %v988_v2 = vsel %vm825_vm1, %v973_v61, 0  ;;  %v982_v3 = vsel %vm825_vm1, %v971_v63, 0  ;;  %v2815_v54 = vld [vmem:[%s3619_s12 + $0x88] sm:$0xff]  ;;  %v2836_v59 = vld [vmem:[%s3619_s12 + $0x130] sm:$0xff]  ;;  %s619_s24 = ssub.f32 %s612_s30, %s618_s25 }
  0x38   : > { %2343 = vmatmul.msk.bf16.vlgmr.msrb.gmra.mxu0 %vm645_vm0, %v3151_v7  ;;  %v997_v14 = vsel %vm825_vm1, %v976_v10, 0  ;;  %v1000_v16 = vsel %vm825_vm1, %v977_v12, 0  ;;  %v994_v17 = vsel %vm825_vm1, %v975_v13, 0  ;;  %v2823_v55 = vld [vmem:[%s3619_s12 + $0xc8] sm:$0xff]  ;;  %v778_v56 = vstv %s777_s17  ;;  %v2844_v60 = vld [vmem:[%s3619_s12 + $0x170] sm:$0xff]  ;;  %v2814_v63 = vld [vmem:[%s3619_s12 + $0x80] sm:$0xff] }
  0x39   : > { %2344 = vmatmul.msk.bf16.vlgmr.msrb.gmra.mxu1 %vm645_vm0, %v3151_v7  ;;  %2345 = vmatmul.msk.bf16.vlgmr.msrb.gmra.mxu2 %vm645_vm0, %v3151_v7  ;;  %v2835_v8 = vld [vmem:[%s3619_s12 + $0x128] sm:$0xff]  ;;  %v2860_v12 = vld [vmem:[%s3619_s12 + $0x1f0] sm:$0xff]  ;;  %s1106_s28 = ssub.f32 1.0, %s619_s24  ;;  %s2302_s30 = sshll.u32 %s3648_s18, 3 }
  0x3a   : > { %2346 = vmatmul.msk.bf16.vlgmr.msrb.gmra.mxu3 %vm645_vm0, %v3151_v7  ;;  %935 = vmatpush.bf16.msrb.mxu2 %v845_v49  ;;  %v966_v7 = vunpack.c.l.b16 %v956_v5  ;;  %v2861_v5 = vld [vmem:[%s3619_s12 + $0x1f8] sm:$0xff]  ;;  %v2843_v9 = vld [vmem:[%s3619_s12 + $0x168] sm:$0xff]  ;;  %s599_s29 = sadd.s32 %s2302_s30, %s3658_s1  ;;  %s2304_s17 = sshll.u32 %s3658_s1, 1 }
  0x3b   : > { %909 = vmatpush.bf16.msrb.mxu0 %v839_v50  ;;  %948 = vmatpush.bf16.msrb.mxu3 %v848_v51  ;;  %v2798_v50 = vld [vmem:[%s3619_s12] sm:$0xff]  ;;  %s2303_s27 = sshll.u32 %s599_s29, 2  ;;  %s608_s23 = sadd.s32 %s2305_s22, %s2304_s17 }
  0x3c   : > { %922 = vmatpush.bf16.msrb.mxu1 %v842_v52  ;;  %v974_v11 = vpack.c.b16 %v966_v7, %v966_v7  ;;  %v2806_v51 = vld [vmem:[%s3619_s12 + $0x40] sm:$0xff]  ;;  %v2837_v52 = vld [vmem:[%s3619_s12 + $0x138] sm:$0xff]  ;;  %s601_s20 = scalar_lea.vmem %s3615_s8, %s2303_s27  ;;  %s2306_s19 = sshll.u32 %s608_s23, 2 }
  0x3d   : > { %s3588_s26 = scalar_lea.vmem %s3622_s15, %s2306_s19 }
  0x3e   : > { %v991_v15 = vsel %vm825_vm1, %v974_v11, 0  ;;  %v2852_v11 = vld [vmem:[%s3619_s12 + $0x1b0] sm:$0xff] }
  0x48   : > { %2347 = vmatmul.msk.bf16.vlgmr.msra.gmra.mxu0 %vm821_vm2, %v796_v62 }
  0x49   : > { %2348 = vmatmul.msk.bf16.vlgmr.msra.gmra.mxu1 %vm821_vm2, %v796_v62  ;;  %2349 = vmatmul.msk.bf16.vlgmr.msra.gmra.mxu2 %vm821_vm2, %v796_v62 }
  0x4a   : > { %2350 = vmatmul.msk.bf16.vlgmr.msra.gmra.mxu3 %vm821_vm2, %v796_v62  ;;  %1035 = vmatpush.bf16.msra.mxu2 %v985_v0  ;;  %v2822_v0 = vld [vmem:[%s3619_s12 + $0xc0] sm:$0xff] }
  0x4b   : > { %1009 = vmatpush.bf16.msra.mxu0 %v979_v1  ;;  %1048 = vmatpush.bf16.msra.mxu3 %v988_v2 }
  0x4c   : > { %1022 = vmatpush.bf16.msra.mxu1 %v982_v3 }
  0x58   : > { %2351 = vmatmul.msk.bf16.vlgmr.msrb.gmra.mxu0 %vm821_vm2, %v796_v62 }
  0x59   : > { %2352 = vmatmul.msk.bf16.vlgmr.msrb.gmra.mxu1 %vm821_vm2, %v796_v62  ;;  %2353 = vmatmul.msk.bf16.vlgmr.msrb.gmra.mxu2 %vm821_vm2, %v796_v62 }
  0x5a   : > { %2354 = vmatmul.msk.bf16.vlgmr.msrb.gmra.mxu3 %vm821_vm2, %v796_v62  ;;  %1087 = vmatpush.bf16.msrb.mxu2 %v997_v14 }
  0x5b   : > { %1061 = vmatpush.bf16.msrb.mxu0 %v991_v15  ;;  %1100 = vmatpush.bf16.msrb.mxu3 %v1000_v16  ;;  %v2834_v15 = vld [vmem:[%s3619_s12 + $0x120] sm:$0xff] }
  0x5c   : > { %1074 = vmatpush.bf16.msrb.mxu1 %v994_v17  ;;  %v2842_v16 = vld [vmem:[%s3619_s12 + $0x160] sm:$0xff] }
  0x68   : > { %2355 = vmatmul.msk.bf16.vlgmr.msra.gmra.mxu0 %vm821_vm2, %v796_v62 }
  0x69   : > { %2356 = vmatmul.msk.bf16.vlgmr.msra.gmra.mxu1 %vm821_vm2, %v796_v62  ;;  %2357 = vmatmul.msk.bf16.vlgmr.msra.gmra.mxu2 %vm821_vm2, %v796_v62 }
  0x6a   : > { %2358 = vmatmul.msk.bf16.vlgmr.msra.gmra.mxu3 %vm821_vm2, %v796_v62  ;;  %1717 = vmatpush.bf16.msra.mxu0 %v2805_v18 }
  0x6b   : > { %1730 = vmatpush.bf16.msra.mxu1 %v2813_v19  ;;  %1743 = vmatpush.bf16.msra.mxu2 %v2821_v22 }
  0x6c   : > { %1756 = vmatpush.bf16.msra.mxu3 %v2829_v23 }
  0x6e   : > { %1718 = vmatpush.bf16.msra.mxu0 %v2804_v20 }
  0x6f   : > { %1731 = vmatpush.bf16.msra.mxu1 %v2812_v21  ;;  %1744 = vmatpush.bf16.msra.mxu2 %v2820_v26  ;;  %v2833_v26 = vld [vmem:[%s3619_s12 + $0x118] sm:$0xff] }
  0x70   : > { %1757 = vmatpush.bf16.msra.mxu3 %v2828_v27 }
  0x72   : > { %1719 = vmatpush.bf16.msra.mxu0 %v2803_v24  ;;  %v2851_v24 = vld [vmem:[%s3619_s12 + $0x1a8] sm:$0xff] }
  0x73   : > { %1732 = vmatpush.bf16.msra.mxu1 %v2811_v25  ;;  %1745 = vmatpush.bf16.msra.mxu2 %v2819_v30  ;;  %v2859_v25 = vld [vmem:[%s3619_s12 + $0x1e8] sm:$0xff]  ;;  %v2850_v30 = vld [vmem:[%s3619_s12 + $0x1a0] sm:$0xff] }
  0x74   : > { %1758 = vmatpush.bf16.msra.mxu3 %v2827_v31  ;;  %v2858_v31 = vld [vmem:[%s3619_s12 + $0x1e0] sm:$0xff] }
  0x76   : > { %1720 = vmatpush.bf16.msra.mxu0 %v2802_v28  ;;  %v2841_v28 = vld [vmem:[%s3619_s12 + $0x158] sm:$0xff] }
  0x77   : > { %1733 = vmatpush.bf16.msra.mxu1 %v2810_v29  ;;  %1746 = vmatpush.bf16.msra.mxu2 %v2818_v35 }
  0x78   : > { %2359 = vmatmul.msk.bf16.vlgmr.msrb.gmra.mxu0 %vm821_vm2, %v796_v62  ;;  %1759 = vmatpush.bf16.msra.mxu3 %v2826_v36 }
  0x79   : > { %2360 = vmatmul.msk.bf16.vlgmr.msrb.gmra.mxu1 %vm821_vm2, %v796_v62  ;;  %2361 = vmatmul.msk.bf16.vlgmr.msrb.gmra.mxu2 %vm821_vm2, %v796_v62 }
  0x7a   : > { %2362 = vmatmul.msk.bf16.vlgmr.msrb.gmra.mxu3 %vm821_vm2, %v796_v62  ;;  %1721 = vmatpush.bf16.msra.mxu0 %v2801_v32 }
  0x7b   : > { %1734 = vmatpush.bf16.msra.mxu1 %v2809_v33  ;;  %1747 = vmatpush.bf16.msra.mxu2 %v2817_v40  ;;  %v2832_v33 = vld [vmem:[%s3619_s12 + $0x110] sm:$0xff]  ;;  %v2831_v40 = vld [vmem:[%s3619_s12 + $0x108] sm:$0xff] }
  0x7c   : > { %1760 = vmatpush.bf16.msra.mxu3 %v2825_v41  ;;  %v2839_v41 = vld [vmem:[%s3619_s12 + $0x148] sm:$0xff] }
  0x7e   : > { %1722 = vmatpush.bf16.msra.mxu0 %v2800_v38  ;;  %v2849_v38 = vld [vmem:[%s3619_s12 + $0x198] sm:$0xff] }
  0x7f   : > { %1735 = vmatpush.bf16.msra.mxu1 %v2808_v39  ;;  %1748 = vmatpush.bf16.msra.mxu2 %v2816_v47  ;;  %v2857_v39 = vld [vmem:[%s3619_s12 + $0x1d8] sm:$0xff] }
  0x80   : > { %1761 = vmatpush.bf16.msra.mxu3 %v2824_v48 }
  0x82   : > { %1723 = vmatpush.bf16.msra.mxu0 %v2799_v42  ;;  %v2848_v42 = vld [vmem:[%s3619_s12 + $0x190] sm:$0xff] }
  0x83   : > { %1736 = vmatpush.bf16.msra.mxu1 %v2807_v43  ;;  %1749 = vmatpush.bf16.msra.mxu2 %v2815_v54  ;;  %v2856_v43 = vld [vmem:[%s3619_s12 + $0x1d0] sm:$0xff] }
  0x84   : > { %1762 = vmatpush.bf16.msra.mxu3 %v2823_v55 }
  0x86   : > { %1724 = vmatpush.bf16.msra.mxu0 %v2798_v50  ;;  %v2847_v50 = vld [vmem:[%s3619_s12 + $0x188] sm:$0xff] }
  0x87   : > { %1737 = vmatpush.bf16.msra.mxu1 %v2806_v51  ;;  %1750 = vmatpush.bf16.msra.mxu2 %v2814_v63  ;;  %v2855_v51 = vld [vmem:[%s3619_s12 + $0x1c8] sm:$0xff]  ;;  %v3443_v63 = vstv %s619_s24 }
  0x88   : > { %1763 = vmatpush.bf16.msra.mxu3 %v2822_v0 }
  0x8a   : > { %1769 = vmatpush.bf16.msrb.mxu0 %v2837_v52  ;;  %v2846_v52 = vld [vmem:[%s3619_s12 + $0x180] sm:$0xff] }
  0x8b   : > { %1782 = vmatpush.bf16.msrb.mxu1 %v2845_v53  ;;  %1795 = vmatpush.bf16.msrb.mxu2 %v2853_v4  ;;  %v2854_v53 = vld [vmem:[%s3619_s12 + $0x1c0] sm:$0xff] }
  0x8c   : > { %1808 = vmatpush.bf16.msrb.mxu3 %v2861_v5 }
  0x8e   : > { %1770 = vmatpush.bf16.msrb.mxu0 %v2836_v59 }
  0x8f   : > { %1783 = vmatpush.bf16.msrb.mxu1 %v2844_v60  ;;  %1796 = vmatpush.bf16.msrb.mxu2 %v2852_v11  ;;  %v2773_v11 = vld [vmem:[%s3618_s11 + $0x38] sm:$0xff] }
  0x90   : > { %1809 = vmatpush.bf16.msrb.mxu3 %v2860_v12 }
  0x92   : > { %1771 = vmatpush.bf16.msrb.mxu0 %v2835_v8 }
  0x93   : > { %1784 = vmatpush.bf16.msrb.mxu1 %v2843_v9  ;;  %1797 = vmatpush.bf16.msrb.mxu2 %v2851_v24 }
  0x94   : > { %1810 = vmatpush.bf16.msrb.mxu3 %v2859_v25  ;;  %v2780_v25 = vld [vmem:[%s3618_s11 + $0x70] sm:$0xff] }
  0x96   : > { %1772 = vmatpush.bf16.msrb.mxu0 %v2834_v15 }
  0x97   : > { %1785 = vmatpush.bf16.msrb.mxu1 %v2842_v16  ;;  %1798 = vmatpush.bf16.msrb.mxu2 %v2850_v30  ;;  %v2789_v30 = vld [vmem:[%s3618_s11 + $0xb8] sm:$0xff] }
  0x98   : > { %1811 = vmatpush.bf16.msrb.mxu3 %v2858_v31 }
  0x9a   : > { %1773 = vmatpush.bf16.msrb.mxu0 %v2833_v26 }
  0x9b   : > { %1786 = vmatpush.bf16.msrb.mxu1 %v2841_v28  ;;  %1799 = vmatpush.bf16.msrb.mxu2 %v2849_v38 }
  0x9c   : > { %1812 = vmatpush.bf16.msrb.mxu3 %v2857_v39 }
  0x9e   : > { %1774 = vmatpush.bf16.msrb.mxu0 %v2832_v33  ;;  %v2771_v33 = vld [vmem:[%s3618_s11 + $0x28] sm:$0xff] }
  0x9f   : > { %1800 = vmatpush.bf16.msrb.mxu2 %v2848_v42 }
  0xa0   : > { %1813 = vmatpush.bf16.msrb.mxu3 %v2856_v43 }
  0xa2   : > { %1775 = vmatpush.bf16.msrb.mxu0 %v2831_v40  ;;  %v2796_v40 = vld [vmem:[%s3618_s11 + $0xf0] sm:$0xff] }
  0xa3   : > { %1801 = vmatpush.bf16.msrb.mxu2 %v2847_v50 }
  0xa4   : > { %1814 = vmatpush.bf16.msrb.mxu3 %v2855_v51  ;;  %v2795_v51 = vld [vmem:[%s3618_s11 + $0xe8] sm:$0xff] }
  0xa5   : > { %v658_v34 = vpop.f32.mrf.mxu0 }
  0xa6   : > { %v671_v37 = vpop.f32.mrf.mxu1  ;;  %v779_v1 = vmul.f32 %v778_v56, %v658_v34  ;;  %v2840_v34 = vld [vmem:[%s3619_s12 + $0x150] sm:$0xff] }
  0xa7   : > { %v780_v6 = vmul.f32 %v778_v56, %v671_v37  ;;  %1787 = vmatpush.bf16.msrb.mxu1 %v2840_v34  ;;  %1802 = vmatpush.bf16.msrb.mxu2 %v2846_v52 }
  0xa8   : > { %1815 = vmatpush.bf16.msrb.mxu3 %v2854_v53  ;;  %v2769_v53 = vld [vmem:[%s3618_s11 + $0x18] sm:$0xff] }
  0xab   : > { %1788 = vmatpush.bf16.msrb.mxu1 %v2839_v41  ;;  %v2770_v41 = vld [vmem:[%s3618_s11 + $0x20] sm:$0xff] }
  0xac   : > { %v684_v44 = vpop.f32.mrf.mxu2 }
  0xad   : > { %v697_v45 = vpop.f32.mrf.mxu3  ;;  %v660_v46 = vpop.f32.mrf.mxu0  ;;  %v781_v17 = vmul.f32 %v778_v56, %v684_v44 }
  0xae   : > { %v673_v49 = vpop.f32.mrf.mxu1  ;;  %v782_v21 = vmul.f32 %v778_v56, %v697_v45  ;;  %v2830_v45 = vld [vmem:[%s3619_s12 + $0x100] sm:$0xff] }
  0xaf   : > { %v2838_v46 = vld [vmem:[%s3619_s12 + $0x140] sm:$0xff]  ;;  %1776 = vmatpush.bf16.msrb.mxu0 %v2830_v45 }
  0xb0   : > { %1789 = vmatpush.bf16.msrb.mxu1 %v2838_v46  ;;  %v2778_v45 = vld [vmem:[%s3618_s11 + $0x60] sm:$0xff] }
  0xb4   : > { %v686_v58 = vpop.f32.mrf.mxu2 }
  0xb5   : > { %v699_v61 = vpop.f32.mrf.mxu3  ;;  %v734_v62 = vpop.f32.mrf.mxu0 }
  0xb6   : > { %v784_v2 = vmul.f32 %v783_v57, %v734_v62  ;;  %v747_v3 = vpop.f32.mrf.mxu1  ;;  %v3441_v62 = vstv %s1106_s28 }
  0xb7   : > { %v785_v7 = vmul.f32 %v783_v57, %v747_v3 }
  0xb8   : > { %v3352_v10 = vadd.f32 %v784_v2, %v779_v1 }
  0xb9   : > { %v3360_v13 = vadd.f32 %v785_v7, %v780_v6 }
  0xbc   : > { %v760_v14 = vpop.f32.mrf.mxu2 }
  0xbd   : > { %v786_v18 = vmul.f32 %v783_v57, %v760_v14  ;;  %v773_v19 = vpop.f32.mrf.mxu3  ;;  %v736_v20 = vpop.f32.mrf.mxu0  ;;  %v2781_v14 = vld [vmem:[%s3618_s11 + $0x78] sm:$0xff] }
  0xbe   : > { %v787_v22 = vmul.f32 %v783_v57, %v773_v19  ;;  %v749_v23 = vpop.f32.mrf.mxu1 }
  0xbf   : > { %v3377_v27 = vadd.f32 %v786_v18, %v781_v17 }
  0xc0   : > { %v3382_v29 = vadd.f32 %v787_v22, %v782_v21  ;;  %v2772_v21 = vld [vmem:[%s3618_s11 + $0x30] sm:$0xff] }
  0xc4   : > { %v762_v32 = vpop.f32.mrf.mxu2 }
  0xc5   : > { %v775_v35 = vpop.f32.mrf.mxu3  ;;  %v859_v36 = vpop.f32.mrf.mxu0  ;;  %v2797_v32 = vld [vmem:[%s3618_s11 + $0xf8] sm:$0xff] }
  0xc6   : > { %v872_v37 = vpop.f32.mrf.mxu1  ;;  %v1108_v3 = vmul.f32 %v3441_v62, %v859_v36  ;;  %v2779_v35 = vld [vmem:[%s3618_s11 + $0x68] sm:$0xff] }
  0xc7   : > { %v1109_v6 = vmul.f32 %v3441_v62, %v872_v37  ;;  %v2788_v37 = vld [vmem:[%s3618_s11 + $0xb0] sm:$0xff] }
  0xcc   : > { %v885_v44 = vpop.f32.mrf.mxu2 }
  0xcd   : > { %v898_v47 = vpop.f32.mrf.mxu3  ;;  %v861_v48 = vpop.f32.mrf.mxu0  ;;  %v1110_v17 = vmul.f32 %v3441_v62, %v885_v44 }
  0xce   : > { %v874_v49 = vpop.f32.mrf.mxu1  ;;  %v1111_v22 = vmul.f32 %v3441_v62, %v898_v47 }
  0xcf   : > { %v2787_v49 = vld [vmem:[%s3618_s11 + $0xa8] sm:$0xff] }
  0xd4   : > { %v887_v54 = vpop.f32.mrf.mxu2 }
  0xd5   : > { %v900_v55 = vpop.f32.mrf.mxu3  ;;  %v911_v56 = vpop.f32.mrf.mxu0  ;;  %v2777_v54 = vld [vmem:[%s3618_s11 + $0x58] sm:$0xff] }
  0xd6   : > { %v3433_v57 = vpop.f32.mrf.mxu1  ;;  %v1112_v42 = vmul.f32 %v3441_v62, %v911_v56 }
  0xd7   : > { %v1113_v46 = vmul.f32 %v3441_v62, %v3433_v57  ;;  %v2786_v57 = vld [vmem:[%s3618_s11 + $0xa0] sm:$0xff] }
  0xdc   : > { %v3437_v58 = vpop.f32.mrf.mxu2 }
  0xdd   : > { %v3439_v59 = vpop.f32.mrf.mxu3  ;;  %v913_v60 = vpop.f32.mrf.mxu0 }
  0xde   : > { %v926_v61 = vpop.f32.mrf.mxu1  ;;  %v1114_v60 = vmul.f32 %v3441_v62, %v3437_v58  ;;  %v2768_v58 = vld [vmem:[%s3618_s11 + $0x10] sm:$0xff] }
  0xe4   : > { %v939_v0 = vpop.f32.mrf.mxu2 }
  0xe5   : > { %v952_v1 = vpop.f32.mrf.mxu3  ;;  %v1011_v2 = vpop.f32.mrf.mxu0 }
  0xe6   : > { %v1117_v4 = vmul.f32 %v3443_v63, %v1011_v2  ;;  %v1024_v5 = vpop.f32.mrf.mxu1  ;;  %v2794_v2 = vld [vmem:[%s3618_s11 + $0xe0] sm:$0xff] }
  0xe7   : > { %v1118_v7 = vmul.f32 %v3443_v63, %v1024_v5 }
  0xe8   : > { %v1125_v8 = vadd.f32 %v1117_v4, %v1108_v3  ;;  %v1115_v3 = vmul.f32 %v3441_v62, %v3439_v59  ;;  %v2785_v59 = vld [vmem:[%s3618_s11 + $0x98] sm:$0xff] }
  0xe9   : > { %v1126_v9 = vadd.f32 %v1118_v7, %v1109_v6  ;;  %v2776_v6 = vld [vmem:[%s3618_s11 + $0x50] sm:$0xff] }
  0xea   : > { %v1133_v12 = vpack.c.bf16 %v1125_v8, %v1125_v8 }
  0xeb   : > { %v1134_v15 = vpack.c.bf16 %v1126_v9, %v1126_v9 }
  0xec   : > { %v1037_v16 = vpop.f32.mrf.mxu2  ;;  %1725 = vmatmul.bf16.vlgmr.msra.gmra.mxu0 %v1133_v12  ;;  %v2775_v12 = vld [vmem:[%s3618_s11 + $0x48] sm:$0xff] }
  0xed   : > { %v1119_v18 = vmul.f32 %v3443_v63, %v1037_v16  ;;  %v1050_v19 = vpop.f32.mrf.mxu3  ;;  %1738 = vmatmul.bf16.vlgmr.msra.gmra.mxu1 %v1134_v15  ;;  %v1013_v20 = vpop.f32.mrf.mxu0  ;;  %2013 = vmatpush.bf16.msra.mxu0 %v2773_v11  ;;  %v2767_v11 = vld [vmem:[%s3618_s11 + $0x8] sm:$0xff]  ;;  %v2784_v15 = vld [vmem:[%s3618_s11 + $0x90] sm:$0xff] }
  0xee   : > { %v1120_v23 = vmul.f32 %v3443_v63, %v1050_v19  ;;  %v1026_v24 = vpop.f32.mrf.mxu1  ;;  %2026 = vmatpush.bf16.msra.mxu1 %v2781_v14  ;;  %v2774_v19 = vld [vmem:[%s3618_s11 + $0x40] sm:$0xff]  ;;  %v2863_v20 = vld [vmem:[%s3620_s13 + $0x8] sm:$0xff] }
  0xef   : > { %v1127_v26 = vadd.f32 %v1119_v18, %v1110_v17  ;;  %v2792_v17 = vld [vmem:[%s3618_s11 + $0xd0] sm:$0xff]  ;;  %v2766_v18 = vld [vmem:[%s3618_s11] sm:$0xff] }
  0xf0   : > { %v1128_v28 = vadd.f32 %v1120_v23, %v1111_v22  ;;  %v2791_v22 = vld [vmem:[%s3618_s11 + $0xc8] sm:$0xff]  ;;  %v792_v23 = vpack.c.bf16 %v3352_v10, %v3352_v10  ;;  %v2862_v24 = vld [vmem:[%s3620_s13] sm:$0xff]  ;;  %v794_v10 = vpack.c.bf16 %v3377_v27, %v3377_v27 }
  0xf1   : > { %v1135_v31 = vpack.c.bf16 %v1127_v26, %v1127_v26  ;;  %2014 = vmatpush.bf16.msra.mxu0 %v2772_v21  ;;  %v2783_v21 = vld [vmem:[%s3618_s11 + $0x88] sm:$0xff]  ;;  %v2782_v26 = vld [vmem:[%s3618_s11 + $0x80] sm:$0xff] }
  0xf2   : > { %v1136_v34 = vpack.c.bf16 %v1128_v28, %v1128_v28  ;;  %2027 = vmatpush.bf16.msra.mxu1 %v2780_v25  ;;  %v793_v25 = vpack.c.bf16 %v3360_v13, %v3360_v13  ;;  %v2790_v28 = vld [vmem:[%s3618_s11 + $0xc0] sm:$0xff]  ;;  %v795_v13 = vpack.c.bf16 %v3382_v29, %v3382_v29 }
  0xf3   : > { %1751 = vmatmul.bf16.vlgmr.msra.gmra.mxu2 %v1135_v31 }
  0xf4   : > { %1764 = vmatmul.bf16.vlgmr.msra.gmra.mxu3 %v1136_v34  ;;  %v1039_v36 = vpop.f32.mrf.mxu2  ;;  %2039 = vmatpush.bf16.msra.mxu2 %v2789_v30  ;;  %v2071_v30 = vld [vmem:[%s601_s20] sm:$0xf] }
  0xf5   : > { %v1052_v38 = vpop.f32.mrf.mxu3  ;;  %2052 = vmatpush.bf16.msra.mxu3 %v2797_v32  ;;  %v1063_v39 = vpop.f32.mrf.mxu0  ;;  %2015 = vmatpush.bf16.msra.mxu0 %v2771_v33 }
  0xf6   : > { %v1121_v43 = vmul.f32 %v3443_v63, %v1063_v39  ;;  %v1076_v44 = vpop.f32.mrf.mxu1  ;;  %2028 = vmatpush.bf16.msra.mxu1 %v2779_v35 }
  0xf7   : > { %v1122_v47 = vmul.f32 %v3443_v63, %v1076_v44 }
  0xf8   : > { %v1129_v48 = vadd.f32 %v1121_v43, %v1112_v42  ;;  %2040 = vmatpush.bf16.msra.mxu2 %v2788_v37 }
  0xf9   : > { %v1130_v50 = vadd.f32 %v1122_v47, %v1113_v46  ;;  %2053 = vmatpush.bf16.msra.mxu3 %v2796_v40  ;;  %2016 = vmatpush.bf16.msra.mxu0 %v2770_v41 }
  0xfa   : > { %v1137_v52 = vpack.c.bf16 %v1129_v48, %v1129_v48  ;;  %2029 = vmatpush.bf16.msra.mxu1 %v2778_v45  ;;  %v3004_v45 = vmov 0  }
  0xfb   : > { %v1138_v55 = vpack.c.bf16 %v1130_v50, %v1130_v50  ;;  %2108 = vst [vmem:[%s3588_s26 + $0x4] sm:$0x1] %v3004_v45 }
  0xfc   : > { %v1089_v56 = vpop.f32.mrf.mxu2  ;;  %2041 = vmatpush.bf16.msra.mxu2 %v2787_v49  ;;  %1777 = vmatmul.bf16.vlgmr.msrb.gmra.mxu0 %v1137_v52 }
  0xfd   : > { %v1123_v61 = vmul.f32 %v3443_v63, %v1089_v56  ;;  %v1102_v0 = vpop.f32.mrf.mxu3  ;;  %2054 = vmatpush.bf16.msra.mxu3 %v2795_v51  ;;  %1790 = vmatmul.bf16.vlgmr.msrb.gmra.mxu1 %v1138_v55  ;;  %v1065_v1 = vpop.f32.mrf.mxu0 }
  0xfe   : > { %v1124_v4 = vmul.f32 %v3443_v63, %v1102_v0  ;;  %2017 = vmatpush.bf16.msra.mxu0 %v2769_v53  ;;  %2030 = vmatpush.bf16.msra.mxu1 %v2777_v54  ;;  %v1078_v5 = vpop.f32.mrf.mxu1  ;;  %v2793_v63 = vld [vmem:[%s3618_s11 + $0xd8] sm:$0xff] }
  0xff   : > { %v1131_v7 = vadd.f32 %v1123_v61, %v1114_v60 }
 0x100   : > { %v1132_v8 = vadd.f32 %v1124_v4, %v1115_v3  ;;  %2042 = vmatpush.bf16.msra.mxu2 %v2786_v57 }
 0x101   : > { %v1139_v62 = vpack.c.bf16 %v1131_v7, %v1131_v7  ;;  %2055 = vmatpush.bf16.msra.mxu3 %v2794_v2  ;;  %v2909_v2 = vld [vmem:[%s3621_s14] ss:$0 sm:$0xff] }
 0x102   : > { %v1140_v9 = vpack.c.bf16 %v1132_v8, %v1132_v8  ;;  %2018 = vmatpush.bf16.msra.mxu0 %v2768_v58  ;;  %2031 = vmatpush.bf16.msra.mxu1 %v2776_v6 }
 0x103   : > { %1803 = vmatmul.bf16.vlgmr.msrb.gmra.mxu2 %v1139_v62 }
 0x104   : > { %1816 = vmatmul.bf16.vlgmr.msrb.gmra.mxu3 %v1140_v9  ;;  %v1091_v14 = vpop.f32.mrf.mxu2  ;;  %2043 = vmatpush.bf16.msra.mxu2 %v2785_v59 }
 0x105   : > { %v1104_v16 = vpop.f32.mrf.mxu3  ;;  %2056 = vmatpush.bf16.msra.mxu3 %v2793_v63 }
 0x106   : > { %2019 = vmatpush.bf16.msra.mxu0 %v2767_v11  ;;  %2032 = vmatpush.bf16.msra.mxu1 %v2775_v12 }
 0x108   : > { %2044 = vmatpush.bf16.msra.mxu2 %v2784_v15 }
 0x109   : > { %2057 = vmatpush.bf16.msra.mxu3 %v2792_v17 }
 0x10a   : > { %2020 = vmatpush.bf16.msra.mxu0 %v2766_v18  ;;  %2033 = vmatpush.bf16.msra.mxu1 %v2774_v19 }
 0x10c   : > { %2045 = vmatpush.bf16.msra.mxu2 %v2783_v21 }
 0x10d   : > { %2058 = vmatpush.bf16.msra.mxu3 %v2791_v22  ;;  %2021 = vmatmul.bf16.vlgmr.msra.gmra.mxu0 %v792_v23 }
 0x10e   : > { %2098 = vmatpush.bf16.msrb.mxu0 %v2863_v20  ;;  %2034 = vmatmul.bf16.vlgmr.msra.gmra.mxu1 %v793_v25 }
 0x110   : > { %2046 = vmatpush.bf16.msra.mxu2 %v2782_v26 }
 0x111   : > { %2059 = vmatpush.bf16.msra.mxu3 %v2790_v28 }
 0x112   : > { %2099 = vmatpush.bf16.msrb.mxu0 %v2862_v24 }
 0x113   : > { %2047 = vmatmul.bf16.vlgmr.msra.gmra.mxu2 %v794_v10 }
 0x114   : > { %2060 = vmatmul.bf16.vlgmr.msra.gmra.mxu3 %v795_v13 }
 0x11d   : > { %2755 = vmatmul.msk.bf16.vlgmr.msrb.gmra.mxu0 %vm2088_vm3, %v2071_v30 }
 0x169   : > { %v1726_v31 = vpop.f32.mrf.mxu0 }
 0x16a   : > { %v1739_v32 = vpop.f32.mrf.mxu1 }
 0x16b   : > { %v1740_v36 = vadd.f32 %v1739_v32, %v1726_v31 }
 0x171   : > { %v1728_v27 = vpop.f32.mrf.mxu0 }
 0x172   : > { %v1741_v33 = vpop.f32.mrf.mxu1 }
 0x176   : > { %v1752_v34 = vpop.f32.mrf.mxu2 }
 0x177   : > { %v1765_v35 = vpop.f32.mrf.mxu3  ;;  %v1753_v38 = vadd.f32 %v1752_v34, %v1740_v36 }
 0x179   : > { %v1778_v29 = vpop.f32.mrf.mxu0  ;;  %v1766_v40 = vadd.f32 %v1765_v35, %v1753_v38 }
 0x17a   : > { %v1791_v37 = vpop.f32.mrf.mxu1 }
 0x17b   : > { %v1779_v44 = vadd.f32 %v1778_v29, %v1766_v40 }
 0x17d   : > { %v1792_v47 = vadd.f32 %v1791_v37, %v1779_v44 }
 0x17e   : > { %v1754_v39 = vpop.f32.mrf.mxu2 }
 0x17f   : > { %v1767_v41 = vpop.f32.mrf.mxu3 }
 0x181   : > { %v1780_v42 = vpop.f32.mrf.mxu0 }
 0x182   : > { %v1793_v43 = vpop.f32.mrf.mxu1 }
 0x186   : > { %v1804_v46 = vpop.f32.mrf.mxu2 }
 0x187   : > { %v1817_v48 = vpop.f32.mrf.mxu3  ;;  %v1805_v49 = vadd.f32 %v1804_v46, %v1792_v47 }
 0x189   : > { %v1818_v52 = vadd.f32 %v1817_v48, %v1805_v49 }
 0x18a   : > { %v2022_v50 = vpop.f32.mrf.mxu0 }
 0x18b   : > { %v2035_v51 = vpop.f32.mrf.mxu1  ;;  %v2023_v55 = vadd.f32 %v2022_v50, %v1818_v52 }
 0x18d   : > { %v2036_v60 = vadd.f32 %v2035_v51, %v2023_v55 }
 0x18e   : > { %v1806_v53 = vpop.f32.mrf.mxu2 }
 0x18f   : > { %v1819_v54 = vpop.f32.mrf.mxu3 }
 0x192   : > { %v2024_v56 = vpop.f32.mrf.mxu0 }
 0x193   : > { %v2037_v57 = vpop.f32.mrf.mxu1 }
 0x196   : > { %v2048_v61 = vpop.f32.mrf.mxu2 }
 0x197   : > { %v2049_v0 = vadd.f32 %v2048_v61, %v2036_v60  ;;  %v2061_v1 = vpop.f32.mrf.mxu3 }
 0x199   : > { %v2062_v3 = vadd.f32 %v2061_v1, %v2049_v0 }
 0x19a   : > { %v2101_v4 = vpop.f32.mrf.mxu0 }
 0x19b   : > { %v2069_v5 = vadd.f32 %v2909_v2, %v2062_v3 }
 0x19d   : > { %v2070_v58 = vmax.f32 %v2069_v5, 0.0 }
 0x19e   : > { %v2050_v6 = vpop.f32.mrf.mxu2 }
 0x19f   : > { %v2105_v7 = vadd.f32 %v2101_v4, %v2070_v58  ;;  %v2063_v8 = vpop.f32.mrf.mxu3 }
 0x1a1   : > { %v2106_v59 = vpack.c.bf16 %v2105_v7, %v2105_v7 }
 0x1a2   : > { %v2103_v62 = vpop.f32.mrf.mxu0 }
 0x1a3   : > { %2107 = vst [vmem:[%s3588_s26] sm:$0xf] %v2106_v59 }
 0x1a4 PF: > { %s3636_s21 = sld [smem:[#allocation10_spill]] }
 0x1a5   : > { %s3637_s1 = sld [smem:[#allocation8_spill]] }
 0x1a6   : > { %s3638_s18 = sld [smem:[#allocation9_spill]] }
 0x1a7   : > { %s3639_s19 = sld [smem:[#allocation11_spill]] }
 0x1a8   : > { %s3640_s2 = sld [smem:[#allocation12_spill]] }
 0x1aa   : > { %s48_s20 = sadd.s32 1, %s3636_s21  }
 0x1ab   : > { %p45_p11 = scmp.ge.s32.totalorder %s48_s20, 18  }
 0x1ad   :  { %47 = sbr.rel (!%p45_p11) target bundleno = 14 (0xe), region = 106 }

// kernel: du_head_forward.3
= control target key start
LH: loop header
LB: loop body
LE: loop exit
PB: predicated region body
PF: predicated region fallthrough
CT: control target
= control target key end

     0   :  { %s9552_s18 = smov 0   ;;  %s14783_s0 = inlined_call_operand.vmem [shape: bf16[2,80,128], index: 0, kind: input, shape index: {}]   ;;  %s14784_s1 = inlined_call_operand.vmem [shape: bf16[3,384,256], index: 1, kind: input, shape index: {}]   ;;  %s14785_s2 = inlined_call_operand.vmem [shape: f32[1,256], index: 2, kind: input, shape index: {}]   ;;  %s14786_s3 = inlined_call_operand.vmem [shape: bf16[3,768,256], index: 3, kind: input, shape index: {}]   ;;  %s14787_s4 = inlined_call_operand.vmem [shape: f32[1,256], index: 4, kind: input, shape index: {}]   ;;  %s14788_s5 = inlined_call_operand.vmem [shape: f32[2,80,256], index: 5, kind: output, shape index: {}]  }
   0x1 LB: > { %s6843_s19 = sadd.s32 4294967295, %s9519_s18   ;;  %p6847_p0 = scmp.ge.s32.totalorder %s9519_s18, 1  ;;  %s9519_s18 = sphi %s9552_s18, %s15_s18  }
   0x2   : > { %p187_p1 = scmp.lt.s32.totalorder %s9519_s18, 3 }
   0x4   : > { %p188_p2 = pnand %p6847_p0, %p187_p1 }
   0x6   : > { %191 = sbr.rel (%p188_p2) target bundleno = 1473 (0x5c1), region = 40 }
   0xb   : > { %v7006_v0 = vld [vmem:[%s14784_s1 + $0x1f0] sm:$0xf]  ;;  %v9091_v1 = vld [vmem:[%s14784_s1 + $0x1f4] sm:$0xf0]  ;;  %v6998_v2 = vld [vmem:[%s14784_s1 + $0x1e0] sm:$0xf] }
   0xc   : > { %v7007_v3 = vor.u32 %v9091_v1, %v7006_v0  ;;  %v9089_v4 = vld [vmem:[%s14784_s1 + $0x1e4] sm:$0xf0]  ;;  %v7070_v5 = vld [vmem:[%s14784_s1 + $0x270] sm:$0xf]  ;;  %v9107_v6 = vld [vmem:[%s14784_s1 + $0x274] sm:$0xf0] }
   0xd   : > { %v7071_v7 = vor.u32 %v9107_v6, %v7070_v5  ;;  %v7062_v8 = vld [vmem:[%s14784_s1 + $0x260] sm:$0xf]  ;;  %v6999_v9 = vor.u32 %v9089_v4, %v6998_v2  ;;  %v9105_v10 = vld [vmem:[%s14784_s1 + $0x264] sm:$0xf0]  ;;  %v6990_v11 = vld [vmem:[%s14784_s1 + $0x1d0] sm:$0xf] }
   0xe   : > { %9484 = vmatpush.bf16.msra.mxu2 %v7007_v3  ;;  %1136 = vmatpush.bf16.msra.mxu0 %v7007_v3  ;;  %v9087_v12 = vld [vmem:[%s14784_s1 + $0x1d4] sm:$0xf0]  ;;  %v7063_v13 = vor.u32 %v9105_v10, %v7062_v8  ;;  %v7054_v14 = vld [vmem:[%s14784_s1 + $0x250] sm:$0xf]  ;;  %v6982_v17 = vld [vmem:[%s14784_s1 + $0x1c0] sm:$0xf] }
   0xf   : > { %9492 = vmatpush.bf16.msra.mxu3 %v7071_v7  ;;  %1170 = vmatpush.bf16.msra.mxu1 %v7071_v7  ;;  %v9103_v15 = vld [vmem:[%s14784_s1 + $0x254] sm:$0xf0]  ;;  %v6991_v16 = vor.u32 %v9087_v12, %v6990_v11  ;;  %v9085_v18 = vld [vmem:[%s14784_s1 + $0x1c4] sm:$0xf0]  ;;  %v7046_v20 = vld [vmem:[%s14784_s1 + $0x240] sm:$0xf] }
  0x10   : > { %v7055_v19 = vor.u32 %v9103_v15, %v7054_v14  ;;  %v9101_v21 = vld [vmem:[%s14784_s1 + $0x244] sm:$0xf0]  ;;  %v6974_v22 = vld [vmem:[%s14784_s1 + $0x1b0] sm:$0xf]  ;;  %v9083_v23 = vld [vmem:[%s14784_s1 + $0x1b4] sm:$0xf0]  ;;  %v6983_v24 = vor.u32 %v9085_v18, %v6982_v17 }
  0x11   : > { %p9616_p3 = scmp.lt.s32.totalorder %s6843_s19, 1  ;;  %vm238_vm0 = vsmask.f32 1280  ;;  %v7038_v25 = vld [vmem:[%s14784_s1 + $0x230] sm:$0xf]  ;;  %vm237_vm1 = vcmask 1041408   ;;  %v7047_v28 = vor.u32 %v9101_v21, %v7046_v20  ;;  %v6975_v40 = vor.u32 %v9083_v23, %v6974_v22 }
  0x12   : > { %9485 = vmatpush.bf16.msra.mxu2 %v6999_v9  ;;  %1137 = vmatpush.bf16.msra.mxu0 %v6999_v9  ;;  %v9099_v26 = vld [vmem:[%s14784_s1 + $0x234] sm:$0xf0]  ;;  %v240_v27 = vld [vmem:[#allocation2 + $0x4] sm:$0x3]  ;;  %v6966_v29 = vld [vmem:[%s14784_s1 + $0x1a0] sm:$0xf] }
  0x13   : > { %9493 = vmatpush.bf16.msra.mxu3 %v7063_v13  ;;  %1171 = vmatpush.bf16.msra.mxu1 %v7063_v13  ;;  %v9081_v30 = vld [vmem:[%s14784_s1 + $0x1a4] sm:$0xf0]  ;;  %v6958_v31 = vld [vmem:[%s14784_s1 + $0x190] sm:$0xf]  ;;  %v9079_v32 = vld [vmem:[%s14784_s1 + $0x194] sm:$0xf0]  ;;  %v7039_v43 = vor.u32 %v9099_v26, %v7038_v25 }
  0x14   : > { %v7030_v33 = vld [vmem:[%s14784_s1 + $0x220] sm:$0xf]  ;;  %v9097_v34 = vld [vmem:[%s14784_s1 + $0x224] sm:$0xf0]  ;;  %s15089_s19 = smov (!%p9616_p3, %s6843_s19), 1  ;;  %v9521_v35 = vmov 0   ;;  %vm9652_vm2 = vmand %vm237_vm1, %vm238_vm0  ;;  %v6967_v44 = vor.u32 %v9081_v30, %v6966_v29  ;;  %v9676_v45 = vor.u32 %v9079_v32, %v6958_v31 }
  0x15   : > { %236 = vst [vmem:[#allocation2] sm:$0xf] %v9521_v35  ;;  %v6950_v37 = vld [vmem:[%s14784_s1 + $0x180] sm:$0xf]  ;;  %v241_v38 = vsel %vm9652_vm2, 0, %v240_v27  ;;  %s9500_s6 = smul.u32 40, %s15089_s19  ;;  %v7031_v46 = vor.u32 %v9097_v34, %v7030_v33 }
  0x16   : > { %9486 = vmatpush.bf16.msra.mxu2 %v6991_v16  ;;  %1138 = vmatpush.bf16.msra.mxu0 %v6991_v16  ;;  %376 = vst [vmem:[#allocation2 + $0x30] sm:$0x7] %v9521_v35  ;;  %v9077_v39 = vld [vmem:[%s14784_s1 + $0x184] sm:$0xf0]  ;;  %v7022_v41 = vld [vmem:[%s14784_s1 + $0x210] sm:$0xf] }
  0x17   : > { %9494 = vmatpush.bf16.msra.mxu3 %v7055_v19  ;;  %1172 = vmatpush.bf16.msra.mxu1 %v7055_v19  ;;  %242 = vst [vmem:[#allocation2 + $0x4] sm:$0x3] %v241_v38  ;;  %v9095_v42 = vld [vmem:[%s14784_s1 + $0x214] sm:$0xf0]  ;;  %s9674_s13 = scalar_lea.vmem %s14783_s0, %s9500_s6  ;;  %v9678_v47 = vor.u32 %v9077_v39, %v6950_v37  ;;  %vm243_vm3 = vsmask.f32 5392 }
  0x18   : > { %2828 = vst [vmem:[#allocation4 + $0x30] sm:$0xff] %v9521_v35  ;;  %v228_v48 = vld [vmem:[%s9674_s13 + $0x8] sm:$0xf]  ;;  %v229_v49 = vld [vmem:[%s9674_s13 + $0xc] sm:$0xf]  ;;  %v9683_v51 = vor.u32 %v9095_v42, %v7022_v41  ;;  %vm9698_vm4 = vmor %vm238_vm0, %vm243_vm3  ;;  %v14862_v11 = vmov 0 }
  0x19   : > { %2967 = vst [vmem:[#allocation4 + $0x40] sm:$0x77] %v9521_v35  ;;  %v230_v50 = vld [vmem:[%s9674_s13 + $0x10] sm:$0xf]  ;;  %v231_v52 = vld [vmem:[%s9674_s13 + $0x14] sm:$0xf] }
  0x1a   : > { %9487 = vmatpush.bf16.msra.mxu2 %v6983_v24  ;;  %1139 = vmatpush.bf16.msra.mxu0 %v6983_v24  ;;  %v265_v53 = vshrl.u32 %v228_v48, 16  ;;  %v268_v54 = vshll.u32 %v228_v48, 16  ;;  %v232_v55 = vld [vmem:[%s9674_s13 + $0x18] sm:$0xf]  ;;  %v275_v56 = vshrl.u32 %v229_v49, 16  ;;  %v278_v57 = vshll.u32 %v229_v49, 16 }
  0x1b   : > { %9495 = vmatpush.bf16.msra.mxu3 %v7047_v28  ;;  %1173 = vmatpush.bf16.msra.mxu1 %v7047_v28  ;;  %v285_v58 = vshrl.u32 %v230_v50, 16  ;;  %v288_v59 = vshll.u32 %v230_v50, 16  ;;  %v295_v62 = vshrl.u32 %v231_v52, 16  ;;  %v298_v63 = vshll.u32 %v231_v52, 16  ;;  %v233_v0 = vld [vmem:[%s9674_s13 + $0x1c] sm:$0xf] }
  0x1c   : > { %v267_v60 = vrot.slane %v265_v53, 6  ;;  %v270_v61 = vrot.slane %v268_v54, 7  ;;  %v277_v1 = vrot.slane %v275_v56, 6  ;;  %v280_v2 = vrot.slane %v278_v57, 7  ;;  %v7014_v5 = vld [vmem:[%s14784_s1 + $0x200] sm:$0xf] }
  0x1d   : > { %v287_v3 = vrot.slane %v285_v58, 6  ;;  %v290_v4 = vrot.slane %v288_v59, 7  ;;  %v297_v7 = vrot.slane %v295_v62, 6  ;;  %v300_v8 = vrot.slane %v298_v63, 7  ;;  %v9093_v10 = vld [vmem:[%s14784_s1 + $0x204] sm:$0xf0] }
  0x1e   : > { %9488 = vmatpush.bf16.msra.mxu2 %v6975_v40  ;;  %1140 = vmatpush.bf16.msra.mxu0 %v6975_v40  ;;  %v9691_v6 = vor.u32 %v270_v61, %v267_v60  ;;  %v305_v9 = vshrl.u32 %v232_v55, 16  ;;  %2979 = vst [vmem:[#allocation5] sm:$0xff] %v9521_v35  ;;  %v14863_v11 = vsel %vm9698_vm4, 4294967295, %v14862_v11  ;;  %v281_v12 = vor.u32 %v280_v2, %v277_v1  ;;  %v234_v16 = vld [vmem:[%s9674_s13 + $0x20] sm:$0xf]  ;;  %s9501_s7 = smul.u32 160, %s15089_s19 }
  0x1f   : > { %9496 = vmatpush.bf16.msra.mxu3 %v7039_v43  ;;  %1174 = vmatpush.bf16.msra.mxu1 %v7039_v43  ;;  %14864 = vst [vmem:[#allocation6_spill] sm:$0xff] %v14863_v11  ;;  %v291_v13 = vor.u32 %v290_v4, %v287_v3  ;;  %v308_v14 = vshll.u32 %v232_v55, 16  ;;  %v7015_v15 = vor.u32 %v9093_v10, %v7014_v5  ;;  %vm355_vm5 = vcmask 1043457   ;;  %v226_v21 = vld [vmem:[%s9674_s13] sm:$0xf] }
  0x20   : > { %vm356_vm6 = vsmask.f32 7942  ;;  %v273_v17 = vrot.slane %v9691_v6, 4  ;;  %v301_v18 = vor.u32 %v300_v8, %v297_v7  ;;  %v307_v19 = vrot.slane %v305_v9, 6  ;;  %v227_v26 = vld [vmem:[%s9674_s13 + $0x4] sm:$0xf]  ;;  %s14653_s10 = scalar_lea.vmem %s14788_s5, %s9501_s7 }
  0x21   : > { %v315_v20 = vshrl.u32 %v233_v0, 16  ;;  %v283_v22 = vrot.slane %v281_v12, 4  ;;  %v293_v23 = vrot.slane %v291_v13, 4  ;;  %v310_v24 = vrot.slane %v308_v14, 7  ;;  %v9709_v31 = vld [vmem:[%s9674_s13 + $0x24] sm:$0xf]  ;;  %vm9737_vm9 = vmand %vm355_vm5, %vm356_vm6 }
  0x22   : > { %9489 = vmatpush.bf16.msra.mxu2 %v6967_v44  ;;  %1141 = vmatpush.bf16.msra.mxu0 %v6967_v44  ;;  %v318_v25 = vshll.u32 %v233_v0, 16  ;;  %v282_v27 = vsel %vm9698_vm4, %v273_v17, %v281_v12  ;;  %v303_v28 = vrot.slane %v301_v18, 4  ;;  %v325_v30 = vshrl.u32 %v234_v16, 16  ;;  %v377_v37 = vld [vmem:[#allocation2] sm:$0xf] }
  0x23   : > { %9497 = vmatpush.bf16.msra.mxu3 %v7031_v46  ;;  %1175 = vmatpush.bf16.msra.mxu1 %v7031_v46  ;;  %v317_v29 = vrot.slane %v315_v20, 6  ;;  %v292_v32 = vsel %vm9698_vm4, %v283_v22, %v291_v13  ;;  %v302_v33 = vsel %vm9698_vm4, %v293_v23, %v301_v18  ;;  %v311_v34 = vor.u32 %v310_v24, %v307_v19  ;;  %v358_v58 = vld [vmem:[#allocation2 + $0x4] sm:$0xe]  ;;  %v9090_v59 = vld [vmem:[%s14784_s1 + $0x1f4] sm:$0xf] }
  0x24   : > { %363 = vst [vmem:[#allocation2 + $0x10] sm:$0xf] %v282_v27  ;;  %v320_v35 = vrot.slane %v318_v25, 7  ;;  %v327_v38 = vrot.slane %v325_v30, 6  ;;  %v328_v39 = vshll.u32 %v234_v16, 16  ;;  %v246_v40 = vshrl.u32 %v226_v21, 16 }
  0x25   : > { %364 = vst [vmem:[#allocation2 + $0x14] sm:$0xf] %v292_v32  ;;  %v249_v41 = vshll.u32 %v226_v21, 16  ;;  %v312_v42 = vsel %vm9698_vm4, %v303_v28, %v311_v34  ;;  %v313_v43 = vrot.slane %v311_v34, 4  ;;  %v255_v46 = vshrl.u32 %v227_v26, 16 }
  0x26   : > { %9490 = vmatpush.bf16.msra.mxu2 %v9676_v45  ;;  %365 = vst [vmem:[#allocation2 + $0x18] sm:$0xf] %v302_v33  ;;  %v321_v44 = vor.u32 %v320_v35, %v317_v29  ;;  %1142 = vmatpush.bf16.msra.mxu0 %v9676_v45  ;;  %v330_v48 = vrot.slane %v328_v39, 7  ;;  %v248_v49 = vrot.slane %v246_v40, 6  ;;  %v258_v52 = vshll.u32 %v227_v26, 16 }
  0x27   : > { %9498 = vmatpush.bf16.msra.mxu3 %v9683_v51  ;;  %1176 = vmatpush.bf16.msra.mxu1 %v9683_v51  ;;  %366 = vst [vmem:[#allocation2 + $0x1c] sm:$0xf] %v312_v42  ;;  %v251_v50 = vrot.slane %v249_v41, 7  ;;  %vm421_vm7 = vcmask 1042432   ;;  %v257_v53 = vrot.slane %v255_v46, 6  ;;  %v335_v54 = vshrl.u32 %v9709_v31, 16 }
  0x28   : > { %v322_v51 = vsel %vm9698_vm4, %v313_v43, %v321_v44  ;;  %388 = vst [vmem:[#allocation3] sm:$0xf] %v377_v37  ;;  %v323_v55 = vrot.slane %v321_v44, 4  ;;  %v9725_v56 = vor.u32 %v330_v48, %v327_v38  ;;  %v260_v57 = vrot.slane %v258_v52, 7  ;;  %v7008_v60 = vld [vmem:[%s14784_s1 + $0x1f8] sm:$0xf0] }
  0x29   : > { %367 = vst [vmem:[#allocation2 + $0x20] sm:$0xf] %v322_v51  ;;  %v252_v45 = vor.u32 %v251_v50, %v248_v49  ;;  %vm422_vm8 = vcmask 1046532   ;;  %v338_v61 = vshll.u32 %v9709_v31, 16  ;;  %v7011_v63 = vor.u32 %v9090_v59, %v7008_v60  ;;  %v370_v29 = vld [vmem:[#allocation2 + $0x2c] sm:$0x3] }
  0x2a   : > { %9491 = vmatpush.bf16.msra.mxu2 %v9678_v47  ;;  %1143 = vmatpush.bf16.msra.mxu0 %v9678_v47  ;;  %v261_v1 = vor.u32 %v260_v57, %v257_v53  ;;  %v337_v2 = vrot.slane %v335_v54, 6  ;;  %v14865_v3 = vmov 0  ;;  %v332_v47 = vsel %vm9698_vm4, %v323_v55, %v9725_v56  ;;  %vm9752_vm10 = vmor %vm421_vm7, %vm422_vm8  ;;  %v9123_v41 = vld [vmem:[%s14784_s1 + $0x2f4] sm:$0xf0]  ;;  %v9122_v55 = vld [vmem:[%s14784_s1 + $0x2f4] sm:$0xf] }
  0x2b   : > { %9499 = vmatpush.bf16.msra.mxu3 %v7015_v15  ;;  %1177 = vmatpush.bf16.msra.mxu1 %v7015_v15  ;;  %v381_v62 = vld [vmem:[#allocation2 + $0x10] sm:$0xf]  ;;  %v253_v0 = vrot.slane %v252_v45, 4  ;;  %v14866_v3 = vsel %vm9737_vm9, 4294967295, %v14865_v3  ;;  %v359_v14 = vsel %vm9737_vm9, %v252_v45, %v358_v58  ;;  %368 = vst [vmem:[#allocation2 + $0x24] sm:$0xf] %v332_v47 }
  0x2c   : > { %14867 = vst [vmem:[#allocation7_spill] sm:$0xff] %v14866_v3  ;;  %v9741_v4 = vld [vmem:[#allocation2 + $0x10] sm:$0xf]  ;;  %v382_v5 = vld [vmem:[#allocation2 + $0x14] sm:$0xf]  ;;  %v263_v18 = vrot.slane %v261_v1, 4 }
  0x2d   : > { %392 = vst [vmem:[#allocation3 + $0x30] sm:$0xf] %v381_v62  ;;  %v403_v7 = vld [vmem:[#allocation2 + $0x14] sm:$0xf]  ;;  %v383_v8 = vld [vmem:[#allocation2 + $0x18] sm:$0xf]  ;;  %v262_v13 = vsel %vm9698_vm4, %v253_v0, %v261_v1 }
  0x2e   : > { %393 = vst [vmem:[#allocation3 + $0x3c] sm:$0xf] %v382_v5  ;;  %v404_v9 = vld [vmem:[#allocation2 + $0x18] sm:$0xf]  ;;  %v384_v10 = vld [vmem:[#allocation2 + $0x1c] sm:$0xf]  ;;  %v272_v27 = vsel %vm9698_vm4, %v263_v18, %v9691_v6 }
  0x2f   : > { %1238 = vmatpush.bf16.msrb.mxu3 %v7011_v63  ;;  %394 = vst [vmem:[#allocation3 + $0x48] sm:$0xf] %v383_v8  ;;  %v405_v12 = vld [vmem:[#allocation2 + $0x1c] sm:$0xf]  ;;  %v435_v15 = vrot.slane %v403_v7, 5  ;;  %v438_v16 = vrot.slane %v404_v9, 5 }
  0x30   : > { %395 = vst [vmem:[#allocation3 + $0x54] sm:$0xf] %v384_v10  ;;  %v441_v17 = vrot.slane %v405_v12, 5  ;;  %v406_v19 = vld [vmem:[#allocation2 + $0x20] sm:$0xf]  ;;  %v14868_v20 = vmov 0 }
  0x31   : > { %v14869_v20 = vsel %vm9752_vm10, 4294967295, %v14868_v20  ;;  %v340_v21 = vrot.slane %v338_v61, 7  ;;  %v432_v22 = vrot.slane %v9741_v4, 5  ;;  %v437_v23 = vrot.slane %v435_v15, 4  ;;  %360 = vst [vmem:[#allocation2 + $0x4] sm:$0xe] %v359_v14 }
  0x32   : > { %14870 = vst [vmem:[#allocation8_spill] sm:$0xff] %v14869_v20  ;;  %v440_v24 = vrot.slane %v438_v16, 4  ;;  %v443_v25 = vrot.slane %v441_v17, 4  ;;  %v444_v26 = vrot.slane %v406_v19, 5  ;;  %vm14799_vm11 = vsmask.f32 7424 }
  0x33   : > { %v9760_v28 = vor.u32 %v340_v21, %v337_v2  ;;  %361 = vst [vmem:[#allocation2 + $0x8] sm:$0xf] %v262_v13  ;;  %v434_v30 = vrot.slane %v432_v22, 4  ;;  %v439_v32 = vsel %vm9752_vm10, %v437_v23, %v438_v16  ;;  %v7134_v6 = vld [vmem:[%s14784_s1 + $0x2f0] sm:$0xf]  ;;  %vm500_vm12 = vcmask 1045508  }
  0x34   : > { %v6914_v31 = vld [vmem:[#allocation3 + $0x30] sm:$0xf]  ;;  %v442_v33 = vsel %vm9752_vm10, %v440_v24, %v441_v17  ;;  %v445_v34 = vsel %vm9752_vm10, %v443_v25, %v444_v26  ;;  %362 = vst [vmem:[#allocation2 + $0xc] sm:$0xf] %v272_v27  ;;  %v446_v43 = vrot.slane %v444_v26, 4  ;;  %v7135_v44 = vor.u32 %v9123_v41, %v7134_v6  ;;  %vm10006_vm13 = vmor %vm237_vm1, %vm500_vm12 }
  0x35   : > { %v9020_v35 = vld [vmem:[#allocation3 + $0x38] sm:$0xf0]  ;;  %471 = vst [vmem:[#allocation3 + $0x34] sm:$0xf] %v439_v32  ;;  %v343_v37 = vrot.slane %v9760_v28, 4  ;;  %v436_v38 = vsel %vm9752_vm10, %v434_v30, %v435_v15  ;;  %v333_v30 = vrot.slane %v9725_v56, 4 }
  0x36   : > { %v6926_v39 = vld [vmem:[#allocation3 + $0x48] sm:$0xf]  ;;  %v9776_v40 = vor.u32 %v9020_v35, %v6914_v31  ;;  %472 = vst [vmem:[#allocation3 + $0x40] sm:$0xf] %v442_v33  ;;  %v9785_v50 = vld [vmem:[#allocation2 + $0x24] sm:$0xf]  ;;  %1204 = vmatpush.bf16.msrb.mxu2 %v7135_v44 }
  0x37   : > { %v9023_v42 = vld [vmem:[#allocation3 + $0x50] sm:$0xf0]  ;;  %473 = vst [vmem:[#allocation3 + $0x4c] sm:$0xf] %v445_v34  ;;  %v371_v52 = vsel %vm9652_vm2, %v343_v37, %v370_v29  ;;  %v447_v51 = vrot.slane %v9785_v50, 5  ;;  %vm14797_vm14 = vcmask 1046528  }
  0x38   : > { %v9781_v46 = vor.u32 %v9023_v42, %v6926_v39  ;;  %v789_v48 = vshll.u32 %v9776_v40, 16  ;;  %v809_v49 = vshrl.u32 %v9776_v40, 16  ;;  %470 = vst [vmem:[#allocation3 + $0x28] sm:$0xf] %v436_v38  ;;  %v378_v53 = vld [vmem:[#allocation2 + $0x4] sm:$0xf] }
  0x39   : > { %v399_v54 = vld [vmem:[#allocation2 + $0x4] sm:$0xe]  ;;  %389 = vst [vmem:[#allocation3 + $0xc] sm:$0xf] %v378_v53  ;;  %v448_v59 = vsel %vm9752_vm10, %v446_v43, %v447_v51  ;;  %v7136_v47 = vld [vmem:[%s14784_s1 + $0x2f8] sm:$0xf0] }
  0x3a   : > { %v9793_v45 = vrot.slane %v789_v48, 1  ;;  %v813_v57 = vshll.u32 %v9781_v46, 16  ;;  %v400_v58 = vld [vmem:[#allocation2 + $0x8] sm:$0xf]  ;;  %v6850_v61 = vrot.slane %v399_v54, 9  ;;  %v7139_v13 = vor.u32 %v9122_v55, %v7136_v47 }
  0x3b   : > { %v401_v60 = vld [vmem:[#allocation2 + $0xc] sm:$0xf]  ;;  %v426_v62 = vrot.slane %v400_v58, 5  ;;  %372 = vst [vmem:[#allocation2 + $0x2c] sm:$0x3] %v371_v52 }
  0x3c   : > { %v811_v63 = vor.u32 %v809_v49, %v9793_v45  ;;  %v9801_v0 = vrot.slane %v813_v57, 1  ;;  %474 = vst [vmem:[#allocation3 + $0x58] sm:$0xf] %v448_v59  ;;  %v9019_v1 = vld [vmem:[#allocation3 + $0x34] sm:$0xf]  ;;  %v429_v2 = vrot.slane %v401_v60, 5  ;;  %1306 = vmatpush.bf16.msrb.mxu1 %v7139_v13  ;;  %v342_v57 = vsel %vm9698_vm4, %v333_v30, %v9760_v28 }
  0x3d   : > { %v6916_v5 = vld [vmem:[#allocation3 + $0x3c] sm:$0xf0]  ;;  %v427_v7 = vsel %vm9752_vm10, %v6850_v61, %v426_v62  ;;  %v428_v8 = vrot.slane %v426_v62, 4  ;;  %v9088_v16 = vld [vmem:[%s14784_s1 + $0x1e4] sm:$0xf]  ;;  %v833_v61 = vshrl.u32 %v9781_v46, 16 }
  0x3e   : > { %v9810_v9 = vsel %vm14799_vm11, %v811_v63, %v9801_v0  ;;  %v9812_v10 = vor.u32 %v9019_v1, %v6916_v5  ;;  %v431_v12 = vrot.slane %v429_v2, 4  ;;  %467 = vst [vmem:[#allocation3 + $0x4] sm:$0xf] %v427_v7  ;;  %v9022_v14 = vld [vmem:[#allocation3 + $0x4c] sm:$0xf] }
  0x3f   : > { %1154 = vmatmul.bf16.vlgmr.msra.gmra.mxu2 %v9810_v9  ;;  %v430_v15 = vsel %vm9752_vm10, %v428_v8, %v429_v2  ;;  %v7000_v17 = vld [vmem:[%s14784_s1 + $0x1e8] sm:$0xf0]  ;;  %v9120_v24 = vld [vmem:[%s14784_s1 + $0x2e4] sm:$0xf]  ;;  %v7126_v26 = vld [vmem:[%s14784_s1 + $0x2e0] sm:$0xf] }
  0x40   : > { %v797_v18 = vshll.u32 %v9812_v10, 16  ;;  %v817_v19 = vshrl.u32 %v9812_v10, 16  ;;  %v433_v21 = vsel %vm9752_vm10, %v431_v12, %v432_v22  ;;  %468 = vst [vmem:[#allocation3 + $0x10] sm:$0xf] %v430_v15  ;;  %v7003_v23 = vor.u32 %v9088_v16, %v7000_v17  ;;  %v7128_v25 = vld [vmem:[%s14784_s1 + $0x2e8] sm:$0xf0] }
  0x41   : > { %469 = vst [vmem:[#allocation3 + $0x1c] sm:$0xf] %v433_v21  ;;  %v7131_v22 = vor.u32 %v9120_v24, %v7128_v25  ;;  %v9121_v27 = vld [vmem:[%s14784_s1 + $0x2e4] sm:$0xf0]  ;;  %v385_v29 = vld [vmem:[#allocation2 + $0x20] sm:$0xf] }
  0x42   : > { %v9838_v4 = vrot.slane %v797_v18, 1  ;;  %1239 = vmatpush.bf16.msrb.mxu3 %v7003_v23  ;;  %v7127_v32 = vor.u32 %v9121_v27, %v7126_v26  ;;  %v386_v33 = vld [vmem:[#allocation2 + $0x24] sm:$0xf]  ;;  %396 = vst [vmem:[#allocation3 + $0x60] sm:$0xf] %v385_v29 }
  0x43   : > { %v6928_v31 = vld [vmem:[#allocation3 + $0x54] sm:$0xf0]  ;;  %v6904_v6 = vld [vmem:[#allocation3 + $0x24] sm:$0xf0]  ;;  %1307 = vmatpush.bf16.msrb.mxu1 %v7131_v22  ;;  %397 = vst [vmem:[#allocation3 + $0x6c] sm:$0xf] %v386_v33 }
  0x44   : > { %v9844_v34 = vor.u32 %v9022_v14, %v6928_v31  ;;  %v9118_v35 = vld [vmem:[%s14784_s1 + $0x2d4] sm:$0xf]  ;;  %v7120_v37 = vld [vmem:[%s14784_s1 + $0x2d8] sm:$0xf0]  ;;  %v819_v38 = vor.u32 %v817_v19, %v9838_v4  ;;  %1205 = vmatpush.bf16.msrb.mxu2 %v7127_v32  ;;  %v379_v49 = vld [vmem:[#allocation2 + $0x8] sm:$0xf]  ;;  %v835_v31 = vor.u32 %v833_v61, %v9801_v0 }
  0x45   : > { %v556_v56 = vld [vmem:[#allocation3] sm:$0xff]  ;;  %v7123_v39 = vor.u32 %v9118_v35, %v7120_v37  ;;  %v6992_v42 = vld [vmem:[%s14784_s1 + $0x1d8] sm:$0xf0]  ;;  %v380_v52 = vld [vmem:[#allocation2 + $0xc] sm:$0xf]  ;;  %v449_v37 = vrot.slane %v447_v51, 4 }
  0x46   : > { %v9086_v41 = vld [vmem:[%s14784_s1 + $0x1d4] sm:$0xf]  ;;  %v821_v43 = vshll.u32 %v9844_v34, 16  ;;  %v698_v44 = vunpack.c.h.b16 %v556_v56  ;;  %v697_v53 = vunpack.c.l.b16 %v556_v56  ;;  %390 = vst [vmem:[#allocation3 + $0x18] sm:$0xf] %v379_v49 }
  0x47   : > { %v6995_v48 = vor.u32 %v9086_v41, %v6992_v42  ;;  %v9860_v54 = vld [vmem:[#allocation3 + $0xc] sm:$0xff]  ;;  %v7118_v55 = vld [vmem:[%s14784_s1 + $0x2d0] sm:$0xf]  ;;  %1308 = vmatpush.bf16.msrb.mxu1 %v7123_v39  ;;  %391 = vst [vmem:[#allocation3 + $0x24] sm:$0xf] %v380_v52 }
  0x48   : > { %v9868_v58 = vrot.slane %v821_v43, 1  ;;  %v9016_v59 = vld [vmem:[#allocation3 + $0x1c] sm:$0xf]  ;;  %v701_v60 = vunpack.c.h.b16 %v9860_v54  ;;  %v700_v62 = vunpack.c.l.b16 %v9860_v54  ;;  %v9119_v1 = vld [vmem:[%s14784_s1 + $0x2d4] sm:$0xf0] }
  0x49   : > { %1240 = vmatpush.bf16.msrb.mxu3 %v6995_v48  ;;  %v9873_v63 = vor.u32 %v9016_v59, %v6904_v6  ;;  %v9106_v28 = vld [vmem:[%s14784_s1 + $0x274] sm:$0xf]  ;;  %v7072_v2 = vld [vmem:[%s14784_s1 + $0x278] sm:$0xf0]  ;;  %v7119_v12 = vor.u32 %v9119_v1, %v7118_v55  ;;  %v9116_v13 = vld [vmem:[%s14784_s1 + $0x2c4] sm:$0xf] }
  0x4a   : > { %v9886_v5 = vsel %vm14799_vm11, %v819_v38, %v9868_v58  ;;  %v9890_v7 = vpack.c.b16 %v701_v60, %v698_v44  ;;  %v6938_v8 = vld [vmem:[#allocation3 + $0x60] sm:$0xf]  ;;  %v9894_v47 = vpack.c.b16 %v700_v62, %v697_v53  ;;  %v7112_v14 = vld [vmem:[%s14784_s1 + $0x2c8] sm:$0xf0]  ;;  %v9026_v16 = vld [vmem:[#allocation3 + $0x68] sm:$0xf0]  ;;  %v7075_v17 = vor.u32 %v9106_v28, %v7072_v2 }
  0x4b   : > { %1188 = vmatmul.bf16.vlgmr.msra.gmra.mxu3 %v9886_v5  ;;  %v769_v15 = vshll.u32 %v9873_v63, 16  ;;  %v7115_v18 = vor.u32 %v9116_v13, %v7112_v14  ;;  %369 = vst [vmem:[#allocation2 + $0x28] sm:$0xf] %v342_v57  ;;  %v9906_v23 = vor.u32 %v9026_v16, %v6938_v8  ;;  %1206 = vmatpush.bf16.msrb.mxu2 %v7119_v12  ;;  %v373_v24 = vld [vmem:[#allocation2 + $0x2c] sm:$0xe] }
  0x4c   : > { %v762_v19 = vshrl.u32 %v9890_v7, 16  ;;  %v764_v21 = vshll.u32 %v9890_v7, 16  ;;  %v750_v26 = vshrl.u32 %v9894_v47, 16  ;;  %v752_v22 = vshll.u32 %v9894_v47, 16  ;;  %1272 = vmatpush.bf16.msrb.mxu0 %v7075_v17  ;;  %v9084_v29 = vld [vmem:[%s14784_s1 + $0x1c4] sm:$0xf] }
  0x4d   : > { %v9908_v25 = vrot.slane %v769_v15, 1  ;;  %1309 = vmatpush.bf16.msrb.mxu1 %v7115_v18  ;;  %v374_v27 = vsel %vm9737_vm9, 0, %v373_v24  ;;  %v837_v32 = vshll.u32 %v9906_v23, 16  ;;  %v6902_v33 = vld [vmem:[#allocation3 + $0x18] sm:$0xf] }
  0x4e   : > { %v766_v30 = vrot.slane %v764_v21, 1  ;;  %375 = vst [vmem:[#allocation2 + $0x2c] sm:$0xe] %v374_v27  ;;  %v9017_v6 = vld [vmem:[#allocation3 + $0x20] sm:$0xf0]  ;;  %v754_v35 = vrot.slane %v752_v22, 1 }
  0x4f   : > { %v6984_v38 = vld [vmem:[%s14784_s1 + $0x1c8] sm:$0xf0]  ;;  %v9924_v39 = vrot.slane %v837_v32, 1  ;;  %v9926_v41 = vor.u32 %v9017_v6, %v6902_v33  ;;  %v9104_v0 = vld [vmem:[%s14784_s1 + $0x264] sm:$0xf]  ;;  %v793_v27 = vshrl.u32 %v9873_v63, 16 }
  0x50   : > { %v767_v56 = vor.u32 %v766_v30, %v762_v19  ;;  %v6987_v42 = vor.u32 %v9084_v29, %v6984_v38  ;;  %v7064_v43 = vld [vmem:[%s14784_s1 + $0x268] sm:$0xf0]  ;;  %v755_v50 = vor.u32 %v754_v35, %v750_v26  ;;  %v9114_v44 = vld [vmem:[%s14784_s1 + $0x2b4] sm:$0xf]  ;;  %v7104_v48 = vld [vmem:[%s14784_s1 + $0x2b8] sm:$0xf0] }
  0x51   : > { %v7067_v51 = vor.u32 %v9104_v0, %v7064_v43  ;;  %v7110_v49 = vld [vmem:[%s14784_s1 + $0x2c0] sm:$0xf]  ;;  %v9949_v53 = vsel %vm14799_vm11, %v835_v31, %v9924_v39  ;;  %v757_v55 = vshll.u32 %v9926_v41, 16  ;;  %v7107_v59 = vor.u32 %v9114_v44, %v7104_v48  ;;  %v9117_v61 = vld [vmem:[%s14784_s1 + $0x2c4] sm:$0xf0] }
  0x52   : > { %v9945_v52 = vsel %vm14799_vm11, %v767_v56, %v9908_v25  ;;  %v408_v57 = vld [vmem:[#allocation2 + $0x28] sm:$0xf]  ;;  %1241 = vmatpush.bf16.msrb.mxu3 %v6987_v42  ;;  %1159 = vmatmul.bf16.gmra.mxu2 %v9949_v53  ;;  %v7111_v28 = vor.u32 %v9117_v61, %v7110_v49  ;;  %v9102_v2 = vld [vmem:[%s14784_s1 + $0x254] sm:$0xf]  ;;  %v7056_v8 = vld [vmem:[%s14784_s1 + $0x258] sm:$0xf0] }
  0x53   : > { %1178 = vmatmul.bf16.vlgmr.msra.gmra.mxu1 %v9945_v52  ;;  %v450_v1 = vrot.slane %v408_v57, 5  ;;  %v9963_v12 = vrot.slane %v757_v55, 1  ;;  %1273 = vmatpush.bf16.msrb.mxu0 %v7067_v51  ;;  %v7059_v13 = vor.u32 %v9102_v2, %v7056_v8  ;;  %v9112_v14 = vld [vmem:[%s14784_s1 + $0x2a4] sm:$0xf]  ;;  %v7096_v15 = vld [vmem:[%s14784_s1 + $0x2a8] sm:$0xf0] }
  0x54   : > { %1310 = vmatpush.bf16.msrb.mxu1 %v7107_v59  ;;  %v841_v19 = vshrl.u32 %v9844_v34, 16  ;;  %1207 = vmatpush.bf16.msrb.mxu2 %v7111_v28  ;;  %v7099_v21 = vor.u32 %v9112_v14, %v7096_v15  ;;  %v9082_v24 = vld [vmem:[%s14784_s1 + $0x1b4] sm:$0xf]  ;;  %v6976_v29 = vld [vmem:[%s14784_s1 + $0x1b8] sm:$0xf0]  ;;  %v785_v56 = vshrl.u32 %v9926_v41, 16  ;;  %v795_v59 = vor.u32 %v793_v27, %v9908_v25 }
  0x55   : > { %v409_v16 = vld [vmem:[#allocation2 + $0x2c] sm:$0x3]  ;;  %v451_v17 = vsel %vm9752_vm10, %v449_v37, %v450_v1  ;;  %v452_v18 = vrot.slane %v450_v1, 4  ;;  %v9979_v26 = vsel %vm14799_vm11, %v755_v50, %v9963_v12  ;;  %v6979_v30 = vor.u32 %v9082_v24, %v6976_v29  ;;  %v7102_v31 = vld [vmem:[%s14784_s1 + $0x2b0] sm:$0xf] }
  0x56   : > { %v453_v22 = vrot.slane %v409_v16, 5  ;;  %475 = vst [vmem:[#allocation3 + $0x64] sm:$0xf] %v451_v17  ;;  %1144 = vmatmul.bf16.vlgmr.msra.gmra.mxu0 %v9979_v26  ;;  %v9115_v32 = vld [vmem:[%s14784_s1 + $0x2b4] sm:$0xf0]  ;;  %v14871_v43 = vmov 0 }
  0x57   : > { %v387_v33 = vld [vmem:[#allocation2 + $0x28] sm:$0x1]  ;;  %1274 = vmatpush.bf16.msrb.mxu0 %v7059_v13  ;;  %v7103_v35 = vor.u32 %v9115_v32, %v7102_v31  ;;  %v9100_v38 = vld [vmem:[%s14784_s1 + $0x244] sm:$0xf]  ;;  %1242 = vmatpush.bf16.msrb.mxu3 %v6979_v30  ;;  %v7048_v42 = vld [vmem:[%s14784_s1 + $0x248] sm:$0xf0]  ;;  %v10042_v32 = vsel %vm14799_vm11, %v795_v59, %v9838_v4 }
  0x58   : > { %v454_v6 = vsel %vm9752_vm10, %v452_v18, %v453_v22  ;;  %1311 = vmatpush.bf16.msrb.mxu1 %v7099_v21  ;;  %398 = vst [vmem:[#allocation3 + $0x78] sm:$0x1] %v387_v33  ;;  %v455_v37 = vrot.slane %v453_v22, 4  ;;  %v9110_v0 = vld [vmem:[%s14784_s1 + $0x294] sm:$0xf]  ;;  %v14872_v43 = vsel %vm10006_vm13, 4294967295, %v14871_v43  ;;  %v7051_v50 = vor.u32 %v9100_v38, %v7048_v42 }
  0x59   : > { %476 = vst [vmem:[#allocation3 + $0x70] sm:$0xf] %v454_v6  ;;  %1208 = vmatpush.bf16.msrb.mxu2 %v7103_v35  ;;  %v7088_v51 = vld [vmem:[%s14784_s1 + $0x298] sm:$0xf0]  ;;  %v9080_v44 = vld [vmem:[%s14784_s1 + $0x1a4] sm:$0xf]  ;;  %v787_v33 = vor.u32 %v785_v56, %v9963_v12 }
  0x5a   : > { %14873 = vst [vmem:[#allocation9_spill] sm:$0xff] %v14872_v43  ;;  %v7091_v48 = vor.u32 %v9110_v0, %v7088_v51  ;;  %v6968_v49 = vld [vmem:[%s14784_s1 + $0x1a8] sm:$0xf0]  ;;  %v9098_v55 = vld [vmem:[%s14784_s1 + $0x234] sm:$0xf] }
  0x5b   : > { %477 = vst [vmem:[#allocation3 + $0x7c] sm:$0x1] %v455_v37  ;;  %v7040_v57 = vld [vmem:[%s14784_s1 + $0x238] sm:$0xf0]  ;;  %1275 = vmatpush.bf16.msrb.mxu0 %v7051_v50  ;;  %v6971_v61 = vor.u32 %v9080_v44, %v6968_v49  ;;  %v9108_v28 = vld [vmem:[%s14784_s1 + $0x284] sm:$0xf]  ;;  %v843_v49 = vor.u32 %v841_v19, %v9868_v58  ;;  %v10079_v58 = vsel %vm14799_vm11, %v787_v33, %v9793_v45 }
  0x5c   : > { %v7043_v1 = vor.u32 %v9098_v55, %v7040_v57  ;;  %v7080_v2 = vld [vmem:[%s14784_s1 + $0x288] sm:$0xf0]  ;;  %v7094_v8 = vld [vmem:[%s14784_s1 + $0x2a0] sm:$0xf]  ;;  %1312 = vmatpush.bf16.msrb.mxu1 %v7091_v48  ;;  %v9113_v25 = vld [vmem:[%s14784_s1 + $0x2a4] sm:$0xf0] }
  0x5d   : > { %v9025_v13 = vld [vmem:[#allocation3 + $0x64] sm:$0xf]  ;;  %v7083_v14 = vor.u32 %v9108_v28, %v7080_v2  ;;  %v478_v15 = vld [vmem:[#allocation2 + $0x8] sm:$0xc]  ;;  %1243 = vmatpush.bf16.msrb.mxu3 %v6971_v61  ;;  %v7095_v16 = vor.u32 %v9113_v25, %v7094_v8  ;;  %v479_v17 = vld [vmem:[#allocation2 + $0xc] sm:$0xf] }
  0x5e   : > { %v480_v18 = vld [vmem:[#allocation2 + $0x10] sm:$0xf]  ;;  %v481_v21 = vld [vmem:[#allocation2 + $0x14] sm:$0xf]  ;;  %v10038_v24 = vld [vmem:[#allocation2 + $0x18] sm:$0xf] }
  0x5f   : > { %v6851_v22 = vrot.slane %v478_v15, 10  ;;  %v504_v27 = vrot.slane %v479_v17, 6  ;;  %v507_v29 = vrot.slane %v480_v18, 6  ;;  %v510_v30 = vrot.slane %v481_v21, 6  ;;  %1276 = vmatpush.bf16.msrb.mxu0 %v7043_v1  ;;  %1209 = vmatpush.bf16.msrb.mxu2 %v7095_v16  ;;  %v9096_v35 = vld [vmem:[%s14784_s1 + $0x224] sm:$0xf] }
  0x60   : > { %v6940_v31 = vld [vmem:[#allocation3 + $0x6c] sm:$0xf0]  ;;  %v513_v6 = vrot.slane %v10038_v24, 6  ;;  %1313 = vmatpush.bf16.msrb.mxu1 %v7083_v14  ;;  %v7032_v12 = vld [vmem:[%s14784_s1 + $0x228] sm:$0xf0]  ;;  %v857_v50 = vshrl.u32 %v9906_v23, 16 }
  0x61   : > { %v10049_v37 = vor.u32 %v9025_v13, %v6940_v31  ;;  %v505_v42 = vsel %vm10006_vm13, %v6851_v22, %v504_v27  ;;  %v506_v0 = vrot.slane %v504_v27, 4  ;;  %v509_v4 = vrot.slane %v507_v29, 4  ;;  %v7086_v48 = vld [vmem:[%s14784_s1 + $0x290] sm:$0xf]  ;;  %v9111_v61 = vld [vmem:[%s14784_s1 + $0x294] sm:$0xf0] }
  0x62   : > { %v624_v38 = vld [vmem:[#allocation3 + $0x78] sm:$0x11]  ;;  %v512_v51 = vrot.slane %v510_v30, 4  ;;  %545 = vst [vmem:[#allocation3 + $0x8] sm:$0xf] %v505_v42  ;;  %v7035_v44 = vor.u32 %v9096_v35, %v7032_v12  ;;  %v7087_v25 = vor.u32 %v9111_v61, %v7086_v48  ;;  %v859_v16 = vor.u32 %v857_v50, %v9924_v39 }
  0x63   : > { %v727_v56 = vunpack.c.l.b16 %v624_v38  ;;  %v845_v55 = vshll.u32 %v10049_v37, 16  ;;  %1183 = vmatmul.bf16.gmra.mxu1 %v10042_v32  ;;  %v508_v57 = vsel %vm10006_vm13, %v506_v0, %v507_v29  ;;  %v511_v59 = vsel %vm10006_vm13, %v509_v4, %v510_v30  ;;  %v9078_v1 = vld [vmem:[%s14784_s1 + $0x194] sm:$0xf]  ;;  %v6960_v2 = vld [vmem:[%s14784_s1 + $0x198] sm:$0xf0] }
  0x64   : > { %v514_v19 = vsel %vm10006_vm13, %v512_v51, %v513_v6  ;;  %546 = vst [vmem:[#allocation3 + $0x14] sm:$0xf] %v508_v57  ;;  %1277 = vmatpush.bf16.msrb.mxu0 %v7035_v44  ;;  %v9094_v8 = vld [vmem:[%s14784_s1 + $0x214] sm:$0xf]  ;;  %v728_v14 = vunpack.c.h.b16 %v624_v38  ;;  %v6963_v45 = vor.u32 %v9078_v1, %v6960_v2  ;;  %v7024_v15 = vld [vmem:[%s14784_s1 + $0x218] sm:$0xf0]  ;;  %1210 = vmatpush.bf16.msrb.mxu2 %v7087_v25 }
  0x65   : > { %v10075_v28 = vpack.c.b16 %v727_v56, %v727_v56  ;;  %v10089_v13 = vrot.slane %v845_v55, 1  ;;  %547 = vst [vmem:[#allocation3 + $0x20] sm:$0xf] %v511_v59  ;;  %v865_v18 = vshrl.u32 %v10049_v37, 16  ;;  %v7027_v21 = vor.u32 %v9094_v8, %v7024_v15  ;;  %v7078_v24 = vld [vmem:[%s14784_s1 + $0x280] sm:$0xf] }
  0x66   : > { %548 = vst [vmem:[#allocation3 + $0x2c] sm:$0xf] %v514_v19  ;;  %1149 = vmatmul.bf16.gmra.mxu0 %v10079_v58  ;;  %v9109_v39 = vld [vmem:[%s14784_s1 + $0x284] sm:$0xf0]  ;;  %v9076_v27 = vld [vmem:[%s14784_s1 + $0x184] sm:$0xf]  ;;  %v10121_v42 = vpack.c.b16 %v728_v14, %v728_v14  ;;  %1244 = vmatpush.bf16.msrb.mxu3 %v6963_v45 }
  0x67   : > { %v861_v17 = vshll.u32 %v10075_v28, 16  ;;  %v10102_v22 = vsel %vm14799_vm11, %v843_v49, %v10089_v13  ;;  %v6952_v29 = vld [vmem:[%s14784_s1 + $0x188] sm:$0xf0]  ;;  %v7079_v31 = vor.u32 %v9109_v39, %v7078_v24  ;;  %v9092_v33 = vld [vmem:[%s14784_s1 + $0x204] sm:$0xf]  ;;  %v515_v38 = vrot.slane %v513_v6, 4 }
  0x68   : > { %1193 = vmatmul.bf16.gmra.mxu3 %v10102_v22  ;;  %1278 = vmatpush.bf16.msrb.mxu0 %v7027_v21  ;;  %v7016_v35 = vld [vmem:[%s14784_s1 + $0x208] sm:$0xf0]  ;;  %v6955_v4 = vor.u32 %v9076_v27, %v6952_v29  ;;  %v7262_v56 = vld [vmem:[%s14784_s1 + $0xf0] sm:$0xf]  ;;  %v9059_v50 = vld [vmem:[%s14784_s1 + $0xf4] sm:$0xf0] }
  0x69   : > { %v863_v30 = vrot.slane %v861_v17, 1  ;;  %v557_v0 = vld [vmem:[#allocation3 + $0x8] sm:$0xf]  ;;  %v7019_v12 = vor.u32 %v9092_v33, %v7016_v35  ;;  %v7263_v48 = vor.u32 %v9059_v50, %v7262_v56  ;;  %v484_v49 = vld [vmem:[#allocation2 + $0x20] sm:$0xf]  ;;  %1211 = vmatpush.bf16.msrb.mxu2 %v7079_v31  ;;  %v869_v45 = vshll.u32 %v10121_v42, 16 }
  0x6a   : > { %v699_v44 = vunpack.c.l.b16 %v557_v0  ;;  %v483_v6 = vld [vmem:[#allocation2 + $0x1c] sm:$0xf]  ;;  %v7198_v55 = vld [vmem:[%s14784_s1 + $0x70] sm:$0xf]  ;;  %v519_v61 = vrot.slane %v484_v49, 6  ;;  %1245 = vmatpush.bf16.msrb.mxu3 %v6955_v4 }
  0x6b   : > { %v10130_v51 = vsel %vm14799_vm11, %v859_v16, %v863_v30  ;;  %v10136_v57 = vld [vmem:[#allocation3 + $0x14] sm:$0xf]  ;;  %v516_v59 = vrot.slane %v483_v6, 6  ;;  %v9043_v1 = vld [vmem:[%s14784_s1 + $0x74] sm:$0xf0] }
  0x6c   : > { %1164 = vmatmul.bf16.gmra.mxu2 %v10130_v51  ;;  %v6910_v19 = vld [vmem:[#allocation3 + $0x20] sm:$0xf]  ;;  %v702_v2 = vunpack.c.l.b16 %v10136_v57  ;;  %1279 = vmatpush.bf16.msrb.mxu0 %v7019_v12  ;;  %v7199_v8 = vor.u32 %v9043_v1, %v7198_v55  ;;  %v7326_v14 = vld [vmem:[%s14784_s1 + $0x170] sm:$0xf]  ;;  %v9075_v25 = vld [vmem:[%s14784_s1 + $0x174] sm:$0xf0] }
  0x6d   : > { %v9018_v15 = vld [vmem:[#allocation3 + $0x28] sm:$0xf0]  ;;  %v517_v16 = vsel %vm10006_vm13, %v515_v38, %v516_v59  ;;  %v518_v17 = vrot.slane %v516_v59, 4  ;;  %v7327_v21 = vor.u32 %v9075_v25, %v7326_v14  ;;  %v9042_v24 = vld [vmem:[%s14784_s1 + $0x74] sm:$0xf]  ;;  %v521_v50 = vrot.slane %v519_v61, 4 }
  0x6e   : > { %v10156_v39 = vpack.c.b16 %v702_v2, %v699_v44  ;;  %v10158_v27 = vor.u32 %v9018_v15, %v6910_v19  ;;  %1629 = vmatpush.bf16.msra.mxu3 %v7263_v48  ;;  %549 = vst [vmem:[#allocation3 + $0x38] sm:$0xf] %v517_v16  ;;  %1595 = vmatpush.bf16.msra.mxu2 %v7199_v8  ;;  %v7200_v29 = vld [vmem:[%s14784_s1 + $0x78] sm:$0xf0]  ;;  %v7254_v30 = vld [vmem:[%s14784_s1 + $0xe0] sm:$0xf] }
  0x6f   : > { %v520_v31 = vsel %vm10006_vm13, %v518_v17, %v519_v61  ;;  %v7203_v33 = vor.u32 %v9042_v24, %v7200_v29  ;;  %v9057_v35 = vld [vmem:[%s14784_s1 + $0xe4] sm:$0xf0]  ;;  %v7190_v38 = vld [vmem:[%s14784_s1 + $0x60] sm:$0xf]  ;;  %v867_v44 = vor.u32 %v865_v18, %v10089_v13  ;;  %v871_v48 = vrot.slane %v869_v45, 1 }
  0x70   : > { %1663 = vmatpush.bf16.msra.mxu0 %v7327_v21  ;;  %v9041_v0 = vld [vmem:[%s14784_s1 + $0x64] sm:$0xf0]  ;;  %v774_v4 = vshrl.u32 %v10156_v39, 16  ;;  %v776_v12 = vshll.u32 %v10156_v39, 16  ;;  %v781_v56 = vshll.u32 %v10158_v27, 16  ;;  %v7255_v6 = vor.u32 %v9057_v35, %v7254_v30 }
  0x71   : > { %550 = vst [vmem:[#allocation3 + $0x44] sm:$0xf] %v520_v31  ;;  %1697 = vmatpush.bf16.msra.mxu1 %v7203_v33  ;;  %v7191_v49 = vor.u32 %v9041_v0, %v7190_v38  ;;  %v485_v55 = vld [vmem:[#allocation2 + $0x24] sm:$0xf]  ;;  %v486_v59 = vld [vmem:[#allocation2 + $0x28] sm:$0xf]  ;;  %v10186_v16 = vsel %vm14799_vm11, %v867_v44, %v871_v48 }
  0x72   : > { %v778_v1 = vrot.slane %v776_v12, 1  ;;  %v783_v19 = vrot.slane %v781_v56, 1  ;;  %v522_v8 = vrot.slane %v485_v55, 6  ;;  %v525_v14 = vrot.slane %v486_v59, 6  ;;  %1630 = vmatpush.bf16.msra.mxu3 %v7255_v6  ;;  %v487_v18 = vld [vmem:[#allocation2 + $0x2c] sm:$0xf] }
  0x73   : > { %1596 = vmatpush.bf16.msra.mxu2 %v7191_v49  ;;  %v528_v24 = vrot.slane %v487_v18, 6  ;;  %v7318_v30 = vld [vmem:[%s14784_s1 + $0x160] sm:$0xf]  ;;  %v9073_v31 = vld [vmem:[%s14784_s1 + $0x164] sm:$0xf0]  ;;  %v801_v59 = vshrl.u32 %v10158_v27, 16 }
  0x74   : > { %v779_v25 = vor.u32 %v778_v1, %v774_v4  ;;  %v523_v61 = vsel %vm10006_vm13, %v521_v50, %v522_v8  ;;  %v524_v15 = vrot.slane %v522_v8, 4  ;;  %v9040_v33 = vld [vmem:[%s14784_s1 + $0x64] sm:$0xf]  ;;  %v7192_v35 = vld [vmem:[%s14784_s1 + $0x68] sm:$0xf0] }
  0x75   : > { %v6922_v13 = vld [vmem:[#allocation3 + $0x38] sm:$0xf]  ;;  %551 = vst [vmem:[#allocation3 + $0x50] sm:$0xf] %v523_v61  ;;  %v7246_v38 = vld [vmem:[%s14784_s1 + $0xd0] sm:$0xf]  ;;  %v7195_v4 = vor.u32 %v9040_v33, %v7192_v35 }
  0x76   : > { %v784_v45 = vsel %vm14799_vm11, %v779_v25, %v783_v19  ;;  %v526_v17 = vsel %vm10006_vm13, %v524_v15, %v525_v14  ;;  %1280 = vmatmul.bf16.vlgmr.msrb.gmra.mxu0 %v9945_v52  ;;  %v7319_v52 = vor.u32 %v9073_v31, %v7318_v30  ;;  %v9055_v0 = vld [vmem:[%s14784_s1 + $0xd4] sm:$0xf0]  ;;  %v7182_v56 = vld [vmem:[%s14784_s1 + $0x50] sm:$0xf]  ;;  %v9038_v55 = vld [vmem:[%s14784_s1 + $0x54] sm:$0xf]  ;;  %v803_v31 = vor.u32 %v801_v59, %v783_v19 }
  0x77   : > { %1314 = vmatmul.bf16.vlgmr.msrb.gmra.mxu1 %v784_v45  ;;  %552 = vst [vmem:[#allocation3 + $0x5c] sm:$0xf] %v526_v17  ;;  %v7247_v12 = vor.u32 %v9055_v0, %v7246_v38  ;;  %v9039_v50 = vld [vmem:[%s14784_s1 + $0x54] sm:$0xf0]  ;;  %v488_v44 = vld [vmem:[#allocation2 + $0x30] sm:$0x7] }
  0x78   : > { %v9021_v21 = vld [vmem:[#allocation3 + $0x40] sm:$0xf0]  ;;  %1198 = vmatmul.bf16.gmra.mxu3 %v10186_v16  ;;  %1664 = vmatpush.bf16.msra.mxu0 %v7319_v52  ;;  %v7183_v48 = vor.u32 %v9039_v50, %v7182_v56  ;;  %v7310_v6 = vld [vmem:[%s14784_s1 + $0x150] sm:$0xf]  ;;  %v7184_v25 = vld [vmem:[%s14784_s1 + $0x58] sm:$0xf0] }
  0x79   : > { %v10193_v29 = vor.u32 %v9021_v21, %v6922_v13  ;;  %v9071_v49 = vld [vmem:[%s14784_s1 + $0x154] sm:$0xf0]  ;;  %1698 = vmatpush.bf16.msra.mxu1 %v7195_v4  ;;  %1631 = vmatpush.bf16.msra.mxu3 %v7247_v12  ;;  %v527_v61 = vrot.slane %v525_v14, 4  ;;  %v7187_v15 = vor.u32 %v9038_v55, %v7184_v25  ;;  %v7238_v13 = vld [vmem:[%s14784_s1 + $0xc0] sm:$0xf]  ;;  %v531_v17 = vrot.slane %v488_v44, 6 }
  0x7a   : > { %v7311_v8 = vor.u32 %v9071_v49, %v7310_v6  ;;  %1597 = vmatpush.bf16.msra.mxu2 %v7183_v48  ;;  %v9053_v18 = vld [vmem:[%s14784_s1 + $0xc4] sm:$0xf0]  ;;  %v7174_v19 = vld [vmem:[%s14784_s1 + $0x40] sm:$0xf]  ;;  %v7176_v50 = vld [vmem:[%s14784_s1 + $0x48] sm:$0xf0] }
  0x7b   : > { %v805_v1 = vshll.u32 %v10193_v29, 16  ;;  %v7239_v21 = vor.u32 %v9053_v18, %v7238_v13  ;;  %v529_v30 = vsel %vm10006_vm13, %v527_v61, %v528_v24  ;;  %v533_v0 = vrot.slane %v531_v17, 4  ;;  %v9037_v4 = vld [vmem:[%s14784_s1 + $0x44] sm:$0xf0]  ;;  %v7302_v12 = vld [vmem:[%s14784_s1 + $0x140] sm:$0xf] }
  0x7c   : > { %1212 = vmatmul.bf16.vlgmr.msrb.gmra.mxu2 %v784_v45  ;;  %v530_v45 = vrot.slane %v528_v24, 4  ;;  %1665 = vmatpush.bf16.msra.mxu0 %v7311_v8  ;;  %553 = vst [vmem:[#allocation3 + $0x68] sm:$0xf] %v529_v30  ;;  %v6934_v35 = vld [vmem:[#allocation3 + $0x50] sm:$0xf]  ;;  %v7175_v56 = vor.u32 %v9037_v4, %v7174_v19  ;;  %v825_v25 = vshrl.u32 %v10193_v29, 16 }
  0x7d   : > { %v807_v33 = vrot.slane %v805_v1, 1  ;;  %1699 = vmatpush.bf16.msra.mxu1 %v7187_v15  ;;  %1632 = vmatpush.bf16.msra.mxu3 %v7239_v21  ;;  %v7230_v6 = vld [vmem:[%s14784_s1 + $0xb0] sm:$0xf]  ;;  %v9051_v49 = vld [vmem:[%s14784_s1 + $0xb4] sm:$0xf0] }
  0x7e   : > { %v532_v14 = vsel %vm10006_vm13, %v530_v45, %v531_v17  ;;  %v9024_v38 = vld [vmem:[#allocation3 + $0x58] sm:$0xf0]  ;;  %v7231_v55 = vor.u32 %v9051_v49, %v7230_v6  ;;  %v9035_v1 = vld [vmem:[%s14784_s1 + $0x34] sm:$0xf0]  ;;  %1598 = vmatpush.bf16.msra.mxu2 %v7175_v56  ;;  %555 = vst [vmem:[#allocation3 + $0x80] sm:$0x1] %v533_v0 }
  0x7f   : > { %554 = vst [vmem:[#allocation3 + $0x74] sm:$0xf] %v532_v14  ;;  %v808_v52 = vsel %vm14799_vm11, %v803_v31, %v807_v33  ;;  %v10246_v24 = vor.u32 %v9024_v38, %v6934_v35  ;;  %v7166_v59 = vld [vmem:[%s14784_s1 + $0x30] sm:$0xf]  ;;  %v9067_v13 = vld [vmem:[%s14784_s1 + $0x134] sm:$0xf0]  ;;  %v827_v45 = vor.u32 %v825_v25, %v807_v33 }
  0x80   : > { %v7294_v8 = vld [vmem:[%s14784_s1 + $0x130] sm:$0xf]  ;;  %v7167_v15 = vor.u32 %v9035_v1, %v7166_v59  ;;  %v7168_v33 = vld [vmem:[%s14784_s1 + $0x38] sm:$0xf0]  ;;  %v7222_v38 = vld [vmem:[%s14784_s1 + $0xa0] sm:$0xf] }
  0x81   : > { %v829_v61 = vshll.u32 %v10246_v24, 16  ;;  %1633 = vmatpush.bf16.msra.mxu3 %v7231_v55  ;;  %v7295_v18 = vor.u32 %v9067_v13, %v7294_v8  ;;  %v9049_v0 = vld [vmem:[%s14784_s1 + $0xa4] sm:$0xf0]  ;;  %v9032_v56 = vld [vmem:[%s14784_s1 + $0x24] sm:$0xf] }
  0x82   : > { %1599 = vmatpush.bf16.msra.mxu2 %v7167_v15  ;;  %v7223_v4 = vor.u32 %v9049_v0, %v7222_v38  ;;  %v9030_v49 = vld [vmem:[%s14784_s1 + $0x14] sm:$0xf]  ;;  %v7152_v55 = vld [vmem:[%s14784_s1 + $0x18] sm:$0xf0]  ;;  %v7214_v59 = vld [vmem:[%s14784_s1 + $0x90] sm:$0xf] }
  0x83   : > { %v831_v17 = vrot.slane %v829_v61, 1  ;;  %v6946_v21 = vld [vmem:[#allocation3 + $0x68] sm:$0xf]  ;;  %v9047_v1 = vld [vmem:[%s14784_s1 + $0x94] sm:$0xf0]  ;;  %v7155_v13 = vor.u32 %v9030_v49, %v7152_v55 }
  0x84   : > { %v7150_v8 = vld [vmem:[%s14784_s1 + $0x10] sm:$0xf]  ;;  %v9031_v25 = vld [vmem:[%s14784_s1 + $0x14] sm:$0xf0]  ;;  %v7215_v61 = vor.u32 %v9047_v1, %v7214_v59  ;;  %v9074_v55 = vld [vmem:[%s14784_s1 + $0x174] sm:$0xf] }
  0x85   : > { %v832_v14 = vsel %vm14799_vm11, %v827_v45, %v831_v17  ;;  %1634 = vmatpush.bf16.msra.mxu3 %v7223_v4  ;;  %v7151_v15 = vor.u32 %v9031_v25, %v7150_v8  ;;  %v7278_v38 = vld [vmem:[%s14784_s1 + $0x110] sm:$0xf]  ;;  %v9063_v0 = vld [vmem:[%s14784_s1 + $0x114] sm:$0xf0]  ;;  %v7328_v59 = vld [vmem:[%s14784_s1 + $0x178] sm:$0xf0] }
  0x86   : > { %1285 = vmatmul.bf16.gmra.mxu0 %v10042_v32  ;;  %v9069_v32 = vld [vmem:[%s14784_s1 + $0x144] sm:$0xf0]  ;;  %v9058_v1 = vld [vmem:[%s14784_s1 + $0xf4] sm:$0xf]  ;;  %v7331_v8 = vor.u32 %v9074_v55, %v7328_v59  ;;  %v7264_v25 = vld [vmem:[%s14784_s1 + $0xf8] sm:$0xf0] }
  0x87   : > { %1319 = vmatmul.bf16.gmra.mxu1 %v808_v52  ;;  %v7303_v44 = vor.u32 %v9069_v32, %v7302_v12  ;;  %v9027_v30 = vld [vmem:[#allocation3 + $0x70] sm:$0xf0]  ;;  %v9136_v54 = vld [vmem:[%s14784_s1 + $0x364] sm:$0xf]  ;;  %vm2829_vm7 = vsmask.f32 5376 }
  0x88   : > { %1246 = vmatmul.bf16.vlgmr.msrb.gmra.mxu3 %v9979_v26  ;;  %v9036_v26 = vld [vmem:[%s14784_s1 + $0x44] sm:$0xf]  ;;  %v10287_v31 = vor.u32 %v9027_v30, %v6946_v21  ;;  %v9033_v12 = vld [vmem:[%s14784_s1 + $0x24] sm:$0xf0]  ;;  %v625_v21 = vld [vmem:[#allocation3 + $0x80] sm:$0x1] }
  0x89   : > { %v7179_v48 = vor.u32 %v9036_v26, %v7176_v50  ;;  %1666 = vmatpush.bf16.msra.mxu0 %v7303_v44  ;;  %v7160_v26 = vld [vmem:[%s14784_s1 + $0x28] sm:$0xf0]  ;;  %v7286_v50 = vld [vmem:[%s14784_s1 + $0x120] sm:$0xf]  ;;  %v9065_v44 = vld [vmem:[%s14784_s1 + $0x124] sm:$0xf0]  ;;  %1635 = vmatpush.bf16.msra.mxu3 %v7215_v61  ;;  %v7267_v61 = vor.u32 %v9058_v1, %v7264_v25 }
  0x8a   : > { %v853_v19 = vshll.u32 %v10287_v31, 16  ;;  %v7287_v6 = vor.u32 %v9065_v44, %v7286_v50  ;;  %v9028_v30 = vld [vmem:[%s14784_s1 + $0x4] sm:$0xf]  ;;  %v7486_v1 = vld [vmem:[%s14784_s1 + $0x3d0] sm:$0xf]  ;;  %vm11196_vm8 = vmand %vm500_vm12, %vm2829_vm7 }
  0x8b   : > { %1700 = vmatpush.bf16.msra.mxu1 %v7179_v48  ;;  %v7163_v48 = vor.u32 %v9032_v56, %v7160_v26  ;;  %v7270_v56 = vld [vmem:[%s14784_s1 + $0x100] sm:$0xf]  ;;  %v873_v26 = vshrl.u32 %v10287_v31, 16  ;;  %v9068_v25 = vld [vmem:[%s14784_s1 + $0x144] sm:$0xf] }
  0x8c   : > { %1217 = vmatmul.bf16.gmra.mxu2 %v808_v52  ;;  %v9034_v52 = vld [vmem:[%s14784_s1 + $0x34] sm:$0xf]  ;;  %v855_v45 = vrot.slane %v853_v19, 1  ;;  %v9029_v19 = vld [vmem:[%s14784_s1 + $0x4] sm:$0xf0] }
  0x8d   : > { %1667 = vmatpush.bf16.msra.mxu0 %v7295_v18  ;;  %v7171_v35 = vor.u32 %v9034_v52, %v7168_v33  ;;  %v729_v33 = vunpack.c.l.b16 %v625_v21 }
  0x8f   : > { %1701 = vmatpush.bf16.msra.mxu1 %v7171_v35 }
  0x91   : > { %1668 = vmatpush.bf16.msra.mxu0 %v7287_v6 }
  0x93   : > { %1702 = vmatpush.bf16.msra.mxu1 %v7163_v48  ;;  %v875_v48 = vor.u32 %v873_v26, %v855_v45  ;;  %v9135_v26 = vld [vmem:[%s14784_s1 + $0x354] sm:$0xf0] }
  0x96   : > { %1290 = vmatmul.bf16.gmra.mxu0 %v9886_v5  ;;  %v7158_v5 = vld [vmem:[%s14784_s1 + $0x20] sm:$0xf] }
  0x97   : > { %1324 = vmatmul.bf16.gmra.mxu1 %v832_v14  ;;  %v7159_v32 = vor.u32 %v9033_v12, %v7158_v5  ;;  %v7206_v5 = vld [vmem:[%s14784_s1 + $0x80] sm:$0xf] }
  0x98   : > { %1251 = vmatmul.bf16.gmra.mxu3 %v10079_v58  ;;  %v849_v58 = vshrl.u32 %v10246_v24, 16  ;;  %1703 = vmatpush.bf16.msra.mxu1 %v7155_v13  ;;  %v7502_v13 = vld [vmem:[%s14784_s1 + $0x3f0] sm:$0xf] }
  0x99   : > { %1600 = vmatpush.bf16.msra.mxu2 %v7159_v32  ;;  %v9061_v32 = vld [vmem:[%s14784_s1 + $0x104] sm:$0xf0] }
  0x9a   : > { %v851_v18 = vor.u32 %v849_v58, %v831_v17  ;;  %v10350_v17 = vpack.c.b16 %v729_v33, %v729_v33  ;;  %v7279_v58 = vor.u32 %v9063_v0, %v7278_v38  ;;  %v7271_v44 = vor.u32 %v9061_v32, %v7270_v56  ;;  %v7430_v0 = vld [vmem:[%s14784_s1 + $0x360] sm:$0xf]  ;;  %v7248_v32 = vld [vmem:[%s14784_s1 + $0xd8] sm:$0xf0] }
  0x9c   : > { %1222 = vmatmul.bf16.gmra.mxu2 %v832_v14  ;;  %v7144_v14 = vld [vmem:[%s14784_s1 + $0x8] sm:$0xf0]  ;;  %v856_v52 = vsel %vm14799_vm11, %v851_v18, %v855_v45  ;;  %1669 = vmatpush.bf16.msra.mxu0 %v7279_v58  ;;  %v877_v50 = vshll.u32 %v10350_v17, 16  ;;  %v9155_v18 = vld [vmem:[%s14784_s1 + $0x3f4] sm:$0xf0] }
  0x9d   : > { %1601 = vmatpush.bf16.msra.mxu2 %v7151_v15  ;;  %v7147_v35 = vor.u32 %v9028_v30, %v7144_v14  ;;  %v9072_v45 = vld [vmem:[%s14784_s1 + $0x164] sm:$0xf]  ;;  %v7503_v21 = vor.u32 %v9155_v18, %v7502_v13  ;;  %v7320_v30 = vld [vmem:[%s14784_s1 + $0x168] sm:$0xf0]  ;;  %v7494_v58 = vld [vmem:[%s14784_s1 + $0x3e0] sm:$0xf] }
  0x9e   : > { %v879_v6 = vrot.slane %v877_v50, 1  ;;  %v9056_v14 = vld [vmem:[%s14784_s1 + $0xe4] sm:$0xf]  ;;  %v7323_v33 = vor.u32 %v9072_v45, %v7320_v30  ;;  %v7240_v45 = vld [vmem:[%s14784_s1 + $0xc8] sm:$0xf0] }
  0x9f   : > { %1704 = vmatpush.bf16.msra.mxu1 %v7147_v35  ;;  %v9052_v18 = vld [vmem:[%s14784_s1 + $0xc4] sm:$0xf] }
  0xa0   : > { %1670 = vmatpush.bf16.msra.mxu0 %v7271_v44  ;;  %v880_v49 = vsel %vm14799_vm11, %v875_v48, %v879_v6 }
  0xa3   : > { %2181 = vmatpush.bf16.msrb.mxu1 %v7503_v21  ;;  %v7243_v21 = vor.u32 %v9052_v18, %v7240_v45 }
  0xa6   : > { %1295 = vmatmul.bf16.gmra.mxu0 %v10102_v22  ;;  %v7142_v22 = vld [vmem:[%s14784_s1] sm:$0xf] }
  0xa7   : > { %1329 = vmatmul.bf16.gmra.mxu1 %v856_v52  ;;  %v7143_v12 = vor.u32 %v9029_v19, %v7142_v22  ;;  %v9153_v22 = vld [vmem:[%s14784_s1 + $0x3e4] sm:$0xf0] }
  0xa8   : > { %1256 = vmatmul.bf16.gmra.mxu3 %v9810_v9  ;;  %v9045_v9 = vld [vmem:[%s14784_s1 + $0x84] sm:$0xf0]  ;;  %v7495_v19 = vor.u32 %v9153_v22, %v7494_v58  ;;  %v9066_v58 = vld [vmem:[%s14784_s1 + $0x134] sm:$0xf] }
  0xa9   : > { %v7207_v4 = vor.u32 %v9045_v9, %v7206_v5  ;;  %1602 = vmatpush.bf16.msra.mxu2 %v7143_v12  ;;  %v9137_v5 = vld [vmem:[%s14784_s1 + $0x364] sm:$0xf0]  ;;  %v9054_v12 = vld [vmem:[%s14784_s1 + $0xd4] sm:$0xf] }
  0xaa   : > { %v7431_v9 = vor.u32 %v9137_v5, %v7430_v0  ;;  %2182 = vmatpush.bf16.msrb.mxu1 %v7495_v19  ;;  %v7251_v44 = vor.u32 %v9054_v12, %v7248_v32  ;;  %v9149_v5 = vld [vmem:[%s14784_s1 + $0x3c4] sm:$0xf0] }
  0xab   : > { %1636 = vmatpush.bf16.msra.mxu3 %v7207_v4  ;;  %v7312_v4 = vld [vmem:[%s14784_s1 + $0x158] sm:$0xf0] }
  0xac   : > { %1227 = vmatmul.bf16.gmra.mxu2 %v856_v52  ;;  %v7256_v52 = vld [vmem:[%s14784_s1 + $0xe8] sm:$0xf0] }
  0xad   : > { %1731 = vmatpush.bf16.msrb.mxu2 %v7267_v61  ;;  %v7259_v35 = vor.u32 %v9056_v14, %v7256_v52  ;;  %v7304_v61 = vld [vmem:[%s14784_s1 + $0x148] sm:$0xf0]  ;;  %v7414_v52 = vld [vmem:[%s14784_s1 + $0x340] sm:$0xf] }
  0xaf   : > { %1765 = vmatpush.bf16.msrb.mxu3 %v7331_v8  ;;  %v9151_v8 = vld [vmem:[%s14784_s1 + $0x3d4] sm:$0xf0] }
  0xb1   : > { %1732 = vmatpush.bf16.msrb.mxu2 %v7259_v35  ;;  %v7478_v35 = vld [vmem:[%s14784_s1 + $0x3c0] sm:$0xf] }
  0xb2   : > { %v7479_v22 = vor.u32 %v9149_v5, %v7478_v35  ;;  %v9145_v5 = vld [vmem:[%s14784_s1 + $0x3a4] sm:$0xf0] }
  0xb3   : > { %1766 = vmatpush.bf16.msrb.mxu3 %v7323_v33  ;;  %v9133_v33 = vld [vmem:[%s14784_s1 + $0x344] sm:$0xf0] }
  0xb4   : > { %v7415_v0 = vor.u32 %v9133_v33, %v7414_v52  ;;  %v7398_v52 = vld [vmem:[%s14784_s1 + $0x320] sm:$0xf] }
  0xb5   : > { %1733 = vmatpush.bf16.msrb.mxu2 %v7251_v44  ;;  %v9131_v44 = vld [vmem:[%s14784_s1 + $0x334] sm:$0xf0] }
  0xb6   : > { %1300 = vmatmul.bf16.gmra.mxu0 %v10186_v16  ;;  %v9139_v16 = vld [vmem:[%s14784_s1 + $0x374] sm:$0xf0] }
  0xb7   : > { %1334 = vmatmul.bf16.gmra.mxu1 %v880_v49 }
  0xb8   : > { %1261 = vmatmul.bf16.gmra.mxu3 %v9949_v53  ;;  %v7438_v53 = vld [vmem:[%s14784_s1 + $0x370] sm:$0xf] }
  0xb9   : > { %v7439_v15 = vor.u32 %v9139_v16, %v7438_v53  ;;  %v7487_v16 = vor.u32 %v9151_v8, %v7486_v1  ;;  %1734 = vmatpush.bf16.msrb.mxu2 %v7243_v21  ;;  %v9147_v1 = vld [vmem:[%s14784_s1 + $0x3b4] sm:$0xf0]  ;;  %v9064_v8 = vld [vmem:[%s14784_s1 + $0x124] sm:$0xf] }
  0xba   : > { %v9048_v21 = vld [vmem:[%s14784_s1 + $0xa4] sm:$0xf] }
  0xbb   : > { %2147 = vmatpush.bf16.msrb.mxu0 %v7439_v15  ;;  %v7307_v15 = vor.u32 %v9068_v25, %v7304_v61  ;;  %2183 = vmatpush.bf16.msrb.mxu1 %v7487_v16  ;;  %v7288_v16 = vld [vmem:[%s14784_s1 + $0x128] sm:$0xf0] }
  0xbc   : > { %1232 = vmatmul.bf16.gmra.mxu2 %v880_v49 }
  0xbf   : > { %2148 = vmatpush.bf16.msrb.mxu0 %v7431_v9  ;;  %v7296_v9 = vld [vmem:[%s14784_s1 + $0x138] sm:$0xf0]  ;;  %2184 = vmatpush.bf16.msrb.mxu1 %v7479_v22 }
  0xc0   : > { %v7299_v19 = vor.u32 %v9066_v58, %v7296_v9 }
  0xc2   : > { %v1155_v38 = vpop.f32.mrf.mxu2 }
  0xc6   : > { %1671 = vmatmul.bf16.vlgmr.msra.gmra.mxu0 %v10156_v39 }
  0xc7   : > { %1705 = vmatmul.bf16.vlgmr.msra.gmra.mxu1 %v9894_v47 }
  0xc8   : > { %1266 = vmatmul.bf16.gmra.mxu3 %v10130_v51  ;;  %v9070_v51 = vld [vmem:[%s14784_s1 + $0x154] sm:$0xf] }
  0xc9   : > { %v7315_v56 = vor.u32 %v9070_v51, %v7312_v4  ;;  %v9050_v51 = vld [vmem:[%s14784_s1 + $0xb4] sm:$0xf]  ;;  %v7232_v4 = vld [vmem:[%s14784_s1 + $0xb8] sm:$0xf0] }
  0xca   : > { %v10453_v55 = vpop.f32.mrf.mxu2  ;;  %v7235_v12 = vor.u32 %v9050_v51, %v7232_v4 }
  0xcb   : > { %1767 = vmatpush.bf16.msrb.mxu3 %v7315_v56 }
  0xcc   : > { %1603 = vmatmul.bf16.vlgmr.msra.gmra.mxu2 %v9894_v47  ;;  %v7422_v47 = vld [vmem:[%s14784_s1 + $0x350] sm:$0xf] }
  0xcd   : > { %v7423_v48 = vor.u32 %v9135_v26, %v7422_v47  ;;  %1735 = vmatpush.bf16.msrb.mxu2 %v7235_v12 }
  0xce   : > { %v1189_v50 = vpop.f32.mrf.mxu3 }
  0xcf   : > { %v10451_v6 = vadd.f32 %v1189_v50, %v1155_v38  ;;  %2149 = vmatpush.bf16.msrb.mxu0 %v7423_v48  ;;  %1768 = vmatpush.bf16.msrb.mxu3 %v7307_v15  ;;  %v7406_v50 = vld [vmem:[%s14784_s1 + $0x330] sm:$0xf]  ;;  %v7291_v15 = vor.u32 %v9064_v8, %v7288_v16  ;;  %v9127_v8 = vld [vmem:[%s14784_s1 + $0x314] sm:$0xf0] }
  0xd0   : > { %v1179_v49 = vpop.f32.mrf.mxu1 }
  0xd3   : > { %v1145_v59 = vpop.f32.mrf.mxu0  ;;  %2150 = vmatpush.bf16.msrb.mxu0 %v7415_v0  ;;  %1769 = vmatpush.bf16.msrb.mxu3 %v7299_v19  ;;  %v7462_v0 = vld [vmem:[%s14784_s1 + $0x3a0] sm:$0xf] }
  0xd4   : > { %v10464_v53 = vadd.f32 %v1179_v49, %v1145_v59  ;;  %v7407_v49 = vor.u32 %v9131_v44, %v7406_v50  ;;  %v7470_v59 = vld [vmem:[%s14784_s1 + $0x3b0] sm:$0xf]  ;;  %v7463_v22 = vor.u32 %v9145_v5, %v7462_v0  ;;  %v9046_v50 = vld [vmem:[%s14784_s1 + $0x94] sm:$0xf]  ;;  %v7208_v0 = vld [vmem:[%s14784_s1 + $0x88] sm:$0xf0] }
  0xd5   : > { %v1160_v30 = vpop.f32.mrf.mxu2  ;;  %v7471_v25 = vor.u32 %v9147_v1, %v7470_v59  ;;  %v7390_v1 = vld [vmem:[%s14784_s1 + $0x310] sm:$0xf] }
  0xd6   : > { %1676 = vmatmul.bf16.gmra.mxu0 %v10158_v27  ;;  %v10505_v32 = vpop.f32.mrf.mxu3 }
  0xd7   : > { %1710 = vmatmul.bf16.gmra.mxu1 %v9926_v41  ;;  %2151 = vmatpush.bf16.msrb.mxu0 %v7407_v49 }
  0xd8   : > { %1637 = vmatmul.bf16.vlgmr.msra.gmra.mxu3 %v9890_v7  ;;  %v1181_v13 = vpop.f32.mrf.mxu1  ;;  %2185 = vmatpush.bf16.msrb.mxu1 %v7471_v25  ;;  %v7391_v25 = vor.u32 %v9127_v8, %v7390_v1 }
  0xd9   : > { %1770 = vmatpush.bf16.msrb.mxu3 %v7291_v15 }
  0xdb   : > { %v1147_v14 = vpop.f32.mrf.mxu0 }
  0xdc   : > { %1608 = vmatmul.bf16.gmra.mxu2 %v9926_v41  ;;  %v10488_v38 = vadd.f32 %v1181_v13, %v1147_v14  ;;  %v7224_v14 = vld [vmem:[%s14784_s1 + $0xa8] sm:$0xf0]  ;;  %2186 = vmatpush.bf16.msrb.mxu1 %v7463_v22 }
  0xdd   : > { %v1162_v47 = vpop.f32.mrf.mxu2  ;;  %v7227_v35 = vor.u32 %v9048_v21, %v7224_v14  ;;  %v9143_v21 = vld [vmem:[%s14784_s1 + $0x394] sm:$0xf0]  ;;  %v9060_v14 = vld [vmem:[%s14784_s1 + $0x104] sm:$0xf] }
  0xdf   : > { %1736 = vmatpush.bf16.msrb.mxu2 %v7227_v35  ;;  %v7272_v35 = vld [vmem:[%s14784_s1 + $0x108] sm:$0xf0] }
  0xe0   : > { %v1184_v56 = vpop.f32.mrf.mxu1 }
  0xe3   : > { %v1150_v26 = vpop.f32.mrf.mxu0 }
  0xe4   : > { %v10513_v48 = vadd.f32 %v1184_v56, %v1150_v26  ;;  %v9062_v56 = vld [vmem:[%s14784_s1 + $0x114] sm:$0xf]  ;;  %v7280_v26 = vld [vmem:[%s14784_s1 + $0x118] sm:$0xf0] }
  0xe5   : > { %v7283_v44 = vor.u32 %v9062_v56, %v7280_v26  ;;  %v9125_v56 = vld [vmem:[%s14784_s1 + $0x304] sm:$0xf0]  ;;  %v7446_v26 = vld [vmem:[%s14784_s1 + $0x380] sm:$0xf] }
  0xe6   : > { %1681 = vmatmul.bf16.gmra.mxu0 %v10193_v29 }
  0xe7   : > { %1715 = vmatmul.bf16.gmra.mxu1 %v9776_v40  ;;  %1771 = vmatpush.bf16.msrb.mxu3 %v7283_v44 }
  0xe8   : > { %1642 = vmatmul.bf16.gmra.mxu3 %v9873_v63  ;;  %v1186_v61 = vpop.f32.mrf.mxu1 }
  0xeb   : > { %v1194_v13 = vpop.f32.mrf.mxu3  ;;  %v1152_v45 = vpop.f32.mrf.mxu0 }
  0xec   : > { %1613 = vmatmul.bf16.gmra.mxu2 %v9776_v40  ;;  %v10531_v18 = vadd.f32 %v1194_v13, %v1160_v30  ;;  %v10542_v33 = vadd.f32 %v1186_v61, %v1152_v45  ;;  %v9129_v30 = vld [vmem:[%s14784_s1 + $0x324] sm:$0xf0]  ;;  %v7454_v45 = vld [vmem:[%s14784_s1 + $0x390] sm:$0xf] }
  0xed   : > { %v7399_v9 = vor.u32 %v9129_v30, %v7398_v52  ;;  %v7455_v52 = vor.u32 %v9143_v21, %v7454_v45  ;;  %v9044_v30 = vld [vmem:[%s14784_s1 + $0x84] sm:$0xf] }
  0xef   : > { %v1165_v58 = vpop.f32.mrf.mxu2  ;;  %2152 = vmatpush.bf16.msrb.mxu0 %v7399_v9  ;;  %v7211_v9 = vor.u32 %v9044_v30, %v7208_v0  ;;  %2187 = vmatpush.bf16.msrb.mxu1 %v7455_v52  ;;  %v7440_v52 = vld [vmem:[%s14784_s1 + $0x378] sm:$0xf0]  ;;  %v9171_v30 = vld [vmem:[%s14784_s1 + $0x474] sm:$0xf0] }
  0xf3   : > { %v1196_v19 = vpop.f32.mrf.mxu3  ;;  %v10557_v12 = vpop.f32.mrf.mxu0  ;;  %2153 = vmatpush.bf16.msrb.mxu0 %v7391_v25  ;;  %v1799_v25 = vld [vmem:[#allocation3] sm:$0xee] }
  0xf4   : > { %v10553_v51 = vadd.f32 %v1196_v19, %v1162_v47  ;;  %v10555_v4 = vpop.f32.mrf.mxu1  ;;  %v7216_v47 = vld [vmem:[%s14784_s1 + $0x98] sm:$0xf0]  ;;  %v7382_v19 = vld [vmem:[%s14784_s1 + $0x300] sm:$0xf]  ;;  %v1852_v21 = vunpack.c.l.b16 %v1799_v25 }
  0xf5   : > { %v7219_v59 = vor.u32 %v9046_v50, %v7216_v47  ;;  %v7383_v50 = vor.u32 %v9125_v56, %v7382_v19 }
  0xf6   : > { %1686 = vmatmul.bf16.gmra.mxu0 %v10246_v24  ;;  %v1855_v56 = vpack.c.b16 %v700_v62, %v1852_v21  ;;  %v7568_v62 = vld [vmem:[%s14784_s1 + $0x478] sm:$0xf0] }
  0xf7   : > { %v1167_v49 = vpop.f32.mrf.mxu2  ;;  %1720 = vmatmul.bf16.gmra.mxu1 %v9781_v46  ;;  %1737 = vmatpush.bf16.msrb.mxu2 %v7219_v59 }
  0xf8   : > { %1647 = vmatmul.bf16.gmra.mxu3 %v9812_v10  ;;  %2154 = vmatpush.bf16.msrb.mxu0 %v7383_v50  ;;  %v9154_v50 = vld [vmem:[%s14784_s1 + $0x3f4] sm:$0xf] }
  0xfb   : > { %v1199_v16 = vpop.f32.mrf.mxu3  ;;  %v10585_v13 = vpop.f32.mrf.mxu0  ;;  %1738 = vmatpush.bf16.msrb.mxu2 %v7211_v9 }
  0xfc   : > { %1618 = vmatmul.bf16.gmra.mxu2 %v9781_v46  ;;  %v10581_v61 = vadd.f32 %v1199_v16, %v1165_v58  ;;  %v10583_v15 = vpop.f32.mrf.mxu1  ;;  %v7275_v58 = vor.u32 %v9060_v14, %v7272_v35  ;;  %v1853_v14 = vunpack.c.h.b16 %v1799_v25  ;;  %v7566_v35 = vld [vmem:[%s14784_s1 + $0x470] sm:$0xf] }
  0xfd   : > { %v7567_v0 = vor.u32 %v9171_v30, %v7566_v35 }
  0xfe   : > { %1772 = vmatpush.bf16.msrb.mxu3 %v7275_v58 }
  0xff   : > { %v1213_v5 = vpop.f32.mrf.mxu2  ;;  %2215 = vmatpush.bf16.msra.mxu2 %v7567_v0 }
 0x100   : > { %v10606_v22 = vadd.f32 %v1213_v5, %v10464_v53  ;;  %v9141_v53 = vld [vmem:[%s14784_s1 + $0x384] sm:$0xf0] }
 0x101   : > { %v7447_v44 = vor.u32 %v9141_v53, %v7446_v26  ;;  %v1856_v26 = vpack.c.b16 %v701_v60, %v1853_v14  ;;  %v7504_v53 = vld [vmem:[%s14784_s1 + $0x3f8] sm:$0xf0]  ;;  %v7432_v60 = vld [vmem:[%s14784_s1 + $0x368] sm:$0xf0] }
 0x103   : > { %v1201_v47 = vpop.f32.mrf.mxu3  ;;  %v10624_v8 = vpop.f32.mrf.mxu0  ;;  %2188 = vmatpush.bf16.msrb.mxu1 %v7447_v44  ;;  %v7507_v44 = vor.u32 %v9154_v50, %v7504_v53  ;;  %v1862_v35 = vrot.slane %v1856_v26, 1 }
 0x104   : > { %v10620_v59 = vadd.f32 %v1201_v47, %v1167_v49  ;;  %v10622_v1 = vpop.f32.mrf.mxu1  ;;  %v9138_v49 = vld [vmem:[%s14784_s1 + $0x374] sm:$0xf] }
 0x105   : > { %2283 = vmatpush.bf16.msra.mxu0 %v7507_v44  ;;  %v7496_v44 = vld [vmem:[%s14784_s1 + $0x3e8] sm:$0xf0] }
 0x106   : > { %1691 = vmatmul.bf16.gmra.mxu0 %v10287_v31 }
 0x107   : > { %v1215_v16 = vpop.f32.mrf.mxu2  ;;  %1725 = vmatmul.bf16.gmra.mxu1 %v9906_v23 }
 0x108   : > { %v10628_v45 = vadd.f32 %v1215_v16, %v10488_v38  ;;  %1652 = vmatmul.bf16.gmra.mxu3 %v9844_v34  ;;  %v7443_v38 = vor.u32 %v9138_v49, %v7440_v52  ;;  %v7435_v16 = vor.u32 %v9136_v54, %v7432_v60  ;;  %v1859_v49 = vrot.slane %v1855_v56, 1  ;;  %v9169_v56 = vld [vmem:[%s14784_s1 + $0x464] sm:$0xf0] }
 0x109   : > { %v1860_v52 = vrot.slane %v9926_v41, 1  ;;  %v7558_v41 = vld [vmem:[%s14784_s1 + $0x460] sm:$0xf] }
 0x10a   : > { %2249 = vmatpush.bf16.msra.mxu3 %v7443_v38  ;;  %v1863_v38 = vrot.slane %v9873_v63, 1  ;;  %v7559_v26 = vor.u32 %v9169_v56, %v7558_v41  ;;  %v7488_v41 = vld [vmem:[%s14784_s1 + $0x3d8] sm:$0xf0] }
 0x10b   : > { %v1247_v5 = vpop.f32.mrf.mxu3  ;;  %v10648_v19 = vpop.f32.mrf.mxu0 }
 0x10c   : > { %1623 = vmatmul.bf16.gmra.mxu2 %v9906_v23  ;;  %v1282_v58 = vadd.f32 %v10557_v12, %v1247_v5  ;;  %v10646_v9 = vpop.f32.mrf.mxu1  ;;  %v9170_v12 = vld [vmem:[%s14784_s1 + $0x474] sm:$0xf] }
 0x10d   : > { %v7571_v25 = vor.u32 %v9170_v12, %v7568_v62  ;;  %2216 = vmatpush.bf16.msra.mxu2 %v7559_v26  ;;  %v9152_v12 = vld [vmem:[%s14784_s1 + $0x3e4] sm:$0xf]  ;;  %v7560_v62 = vld [vmem:[%s14784_s1 + $0x468] sm:$0xf0] }
 0x10e   : > { %v10673_v21 = vadd.f32 %v10555_v4, %v1282_v58  ;;  %2250 = vmatpush.bf16.msra.mxu3 %v7435_v16  ;;  %v10689_v58 = vsel %vm14797_vm14, %v1862_v35, %v1863_v38  ;;  %v7424_v35 = vld [vmem:[%s14784_s1 + $0x358] sm:$0xf0] }
 0x10f   : > { %v1218_v47 = vpop.f32.mrf.mxu2  ;;  %2317 = vmatpush.bf16.msra.mxu1 %v7571_v25 }
 0x110   : > { %v10676_v14 = vadd.f32 %v1218_v47, %v10513_v48  ;;  %v10686_v48 = vsel %vm14797_vm14, %v1859_v49, %v1860_v52  ;;  %v9134_v49 = vld [vmem:[%s14784_s1 + $0x354] sm:$0xf] }
 0x113   : > { %v1249_v30 = vpop.f32.mrf.mxu3  ;;  %v10683_v4 = vpop.f32.mrf.mxu0 }
 0x114   : > { %v1284_v0 = vadd.f32 %v10585_v13, %v1249_v30  ;;  %v10681_v5 = vpop.f32.mrf.mxu1  ;;  %v7427_v30 = vor.u32 %v9134_v49, %v7424_v35  ;;  %v1192_v35 = vadd.f32 %v10505_v32, %v10453_v55  ;;  %v7542_v55 = vld [vmem:[%s14784_s1 + $0x440] sm:$0xf]  ;;  %v9165_v32 = vld [vmem:[%s14784_s1 + $0x444] sm:$0xf0] }
 0x116   : > { %v10698_v50 = vadd.f32 %v10583_v15, %v1284_v0  ;;  %2155 = vmatmul.bf16.vlgmr.msrb.gmra.mxu0 %v10686_v48  ;;  %v7499_v15 = vor.u32 %v9152_v12, %v7496_v44  ;;  %v9150_v0 = vld [vmem:[%s14784_s1 + $0x3d4] sm:$0xf]  ;;  %2251 = vmatpush.bf16.msra.mxu3 %v7427_v30 }
 0x117   : > { %v1220_v13 = vpop.f32.mrf.mxu2  ;;  %2189 = vmatmul.bf16.vlgmr.msrb.gmra.mxu1 %v10689_v58 }
 0x118   : > { %v10701_v53 = vadd.f32 %v1220_v13, %v10542_v33  ;;  %1657 = vmatmul.bf16.gmra.mxu3 %v10049_v37  ;;  %v9168_v33 = vld [vmem:[%s14784_s1 + $0x464] sm:$0xf]  ;;  %2284 = vmatpush.bf16.msra.mxu0 %v7499_v15  ;;  %v7491_v13 = vor.u32 %v9150_v0, %v7488_v41  ;;  %v1870_v15 = vrot.slane %v9812_v10, 1 }
 0x119   : > { %v7563_v54 = vor.u32 %v9168_v33, %v7560_v62  ;;  %v1868_v33 = vrot.slane %v9776_v40, 1  ;;  %v9166_v40 = vld [vmem:[%s14784_s1 + $0x454] sm:$0xf] }
 0x11b   : > { %v1252_v60 = vpop.f32.mrf.mxu3  ;;  %v10722_v16 = vpop.f32.mrf.mxu0  ;;  %2318 = vmatpush.bf16.msra.mxu1 %v7563_v54 }
 0x11c   : > { %1739 = vmatmul.bf16.vlgmr.msrb.gmra.mxu2 %v9890_v7  ;;  %v1287_v47 = vadd.f32 %v10624_v8, %v1252_v60  ;;  %v10720_v25 = vpop.f32.mrf.mxu1  ;;  %v7550_v7 = vld [vmem:[%s14784_s1 + $0x450] sm:$0xf]  ;;  %v9167_v8 = vld [vmem:[%s14784_s1 + $0x454] sm:$0xf0]  ;;  %2285 = vmatpush.bf16.msra.mxu0 %v7491_v13 }
 0x11d   : > { %v7551_v26 = vor.u32 %v9167_v8, %v7550_v7 }
 0x11e   : > { %v10743_v12 = vadd.f32 %v10622_v1, %v1287_v47  ;;  %v10756_v1 = vsel %vm14797_vm14, %v1860_v52, %v1868_v33  ;;  %v7552_v47 = vld [vmem:[%s14784_s1 + $0x458] sm:$0xf0] }
 0x11f   : > { %v1223_v56 = vpop.f32.mrf.mxu2  ;;  %2217 = vmatpush.bf16.msra.mxu2 %v7551_v26  ;;  %v7555_v52 = vor.u32 %v9166_v40, %v7552_v47  ;;  %v9130_v40 = vld [vmem:[%s14784_s1 + $0x334] sm:$0xf]  ;;  %v7408_v47 = vld [vmem:[%s14784_s1 + $0x338] sm:$0xf0] }
 0x120   : > { %v10746_v44 = vadd.f32 %v1223_v56, %v10451_v6  ;;  %v10759_v6 = vsel %vm14797_vm14, %v1863_v38, %v1870_v15  ;;  %v7416_v38 = vld [vmem:[%s14784_s1 + $0x348] sm:$0xf0] }
 0x121   : > { %2319 = vmatpush.bf16.msra.mxu1 %v7555_v52  ;;  %v7411_v52 = vor.u32 %v9130_v40, %v7408_v47 }
 0x123   : > { %v1254_v62 = vpop.f32.mrf.mxu3  ;;  %v10753_v49 = vpop.f32.mrf.mxu0 }
 0x124   : > { %v1289_v54 = vadd.f32 %v10648_v19, %v1254_v62  ;;  %v10751_v60 = vpop.f32.mrf.mxu1  ;;  %v9132_v19 = vld [vmem:[%s14784_s1 + $0x344] sm:$0xf]  ;;  %v7480_v62 = vld [vmem:[%s14784_s1 + $0x3c8] sm:$0xf0] }
 0x125   : > { %v7419_v30 = vor.u32 %v9132_v19, %v7416_v38  ;;  %v7534_v38 = vld [vmem:[%s14784_s1 + $0x430] sm:$0xf] }
 0x126   : > { %v10776_v8 = vadd.f32 %v10646_v9, %v1289_v54  ;;  %2160 = vmatmul.bf16.gmra.mxu0 %v10756_v1  ;;  %v7543_v9 = vor.u32 %v9165_v32, %v7542_v55  ;;  %v9164_v54 = vld [vmem:[%s14784_s1 + $0x444] sm:$0xf] }
 0x127   : > { %v1225_v7 = vpop.f32.mrf.mxu2  ;;  %2194 = vmatmul.bf16.gmra.mxu1 %v10759_v6  ;;  %2252 = vmatpush.bf16.msra.mxu3 %v7419_v30 }
 0x128   : > { %v10778_v0 = vadd.f32 %v1225_v7, %v1192_v35  ;;  %1773 = vmatmul.bf16.vlgmr.msrb.gmra.mxu3 %v10156_v39  ;;  %2218 = vmatpush.bf16.msra.mxu2 %v7543_v9  ;;  %v9148_v39 = vld [vmem:[%s14784_s1 + $0x3c4] sm:$0xf]  ;;  %v9163_v7 = vld [vmem:[%s14784_s1 + $0x434] sm:$0xf0]  ;;  %v1874_v9 = vrot.slane %v9781_v46, 1 }
 0x129   : > { %v7535_v32 = vor.u32 %v9163_v7, %v7534_v38  ;;  %v9146_v46 = vld [vmem:[%s14784_s1 + $0x3b4] sm:$0xf] }
 0x12b   : > { %v1257_v41 = vpop.f32.mrf.mxu3  ;;  %v10793_v13 = vpop.f32.mrf.mxu0  ;;  %2253 = vmatpush.bf16.msra.mxu3 %v7411_v52 }
 0x12c   : > { %1744 = vmatmul.bf16.gmra.mxu2 %v9873_v63  ;;  %v1292_v56 = vadd.f32 %v10683_v4, %v1257_v41  ;;  %v10791_v26 = vpop.f32.mrf.mxu1  ;;  %v7483_v63 = vor.u32 %v9148_v39, %v7480_v62  ;;  %v7544_v4 = vld [vmem:[%s14784_s1 + $0x448] sm:$0xf0]  ;;  %v1876_v41 = vrot.slane %v9844_v34, 1 }
 0x12d   : > { %v7547_v35 = vor.u32 %v9164_v54, %v7544_v4  ;;  %2219 = vmatpush.bf16.msra.mxu2 %v7535_v32 }
 0x12e   : > { %v10820_v30 = vadd.f32 %v10681_v5, %v1292_v56  ;;  %2286 = vmatpush.bf16.msra.mxu0 %v7483_v63  ;;  %v10833_v5 = vsel %vm14797_vm14, %v1868_v33, %v1874_v9  ;;  %v7472_v56 = vld [vmem:[%s14784_s1 + $0x3b8] sm:$0xf0]  ;;  %v9162_v33 = vld [vmem:[%s14784_s1 + $0x434] sm:$0xf] }
 0x12f   : > { %v1228_v19 = vpop.f32.mrf.mxu2  ;;  %2320 = vmatpush.bf16.msra.mxu1 %v7547_v35  ;;  %v7475_v63 = vor.u32 %v9146_v46, %v7472_v56  ;;  %v9161_v46 = vld [vmem:[%s14784_s1 + $0x424] sm:$0xf0] }
 0x130   : > { %v10823_v55 = vadd.f32 %v1228_v19, %v10531_v18  ;;  %v10836_v18 = vsel %vm14797_vm14, %v1870_v15, %v1876_v41  ;;  %v7536_v15 = vld [vmem:[%s14784_s1 + $0x438] sm:$0xf0]  ;;  %v7400_v19 = vld [vmem:[%s14784_s1 + $0x328] sm:$0xf0] }
 0x132   : > { %2287 = vmatpush.bf16.msra.mxu0 %v7475_v63 }
 0x133   : > { %v1259_v39 = vpop.f32.mrf.mxu3  ;;  %v10830_v4 = vpop.f32.mrf.mxu0 }
 0x134   : > { %v1294_v62 = vadd.f32 %v10722_v16, %v1259_v39  ;;  %v10828_v54 = vpop.f32.mrf.mxu1 }
 0x136   : > { %v10845_v40 = vadd.f32 %v10720_v25, %v1294_v62  ;;  %2165 = vmatmul.bf16.gmra.mxu0 %v10833_v5  ;;  %v7539_v25 = vor.u32 %v9162_v33, %v7536_v15  ;;  %v7526_v62 = vld [vmem:[%s14784_s1 + $0x420] sm:$0xf]  ;;  %v9160_v33 = vld [vmem:[%s14784_s1 + $0x424] sm:$0xf]  ;;  %v7528_v15 = vld [vmem:[%s14784_s1 + $0x428] sm:$0xf0] }
 0x137   : > { %v1230_v16 = vpop.f32.mrf.mxu2  ;;  %2199 = vmatmul.bf16.gmra.mxu1 %v10836_v18  ;;  %v7527_v63 = vor.u32 %v9161_v46, %v7526_v62 }
 0x138   : > { %v10848_v47 = vadd.f32 %v1230_v16, %v10553_v51  ;;  %1778 = vmatmul.bf16.gmra.mxu3 %v10158_v27  ;;  %v9128_v51 = vld [vmem:[%s14784_s1 + $0x324] sm:$0xf]  ;;  %2321 = vmatpush.bf16.msra.mxu1 %v7539_v25  ;;  %v7464_v16 = vld [vmem:[%s14784_s1 + $0x3a8] sm:$0xf0] }
 0x139   : > { %v7403_v35 = vor.u32 %v9128_v51, %v7400_v19  ;;  %v1880_v51 = vrot.slane %v9906_v23, 1  ;;  %2220 = vmatpush.bf16.msra.mxu2 %v7527_v63  ;;  %v7392_v63 = vld [vmem:[%s14784_s1 + $0x318] sm:$0xf0] }
 0x13a   : > { %v1800_v23 = vld [vmem:[#allocation3 + $0x8] sm:$0xe] }
 0x13b   : > { %v1262_v52 = vpop.f32.mrf.mxu3  ;;  %v10869_v32 = vpop.f32.mrf.mxu0  ;;  %2254 = vmatpush.bf16.msra.mxu3 %v7403_v35 }
 0x13c   : > { %1749 = vmatmul.bf16.gmra.mxu2 %v9812_v10  ;;  %v1297_v38 = vadd.f32 %v10753_v49, %v1262_v52  ;;  %v10867_v7 = vpop.f32.mrf.mxu1  ;;  %v9144_v10 = vld [vmem:[%s14784_s1 + $0x3a4] sm:$0xf] }
 0x13d   : > { %v7467_v25 = vor.u32 %v9144_v10, %v7464_v16 }
 0x13e   : > { %v10881_v49 = vadd.f32 %v10751_v60, %v1297_v38  ;;  %v1882_v60 = vrot.slane %v10049_v37, 1 }
 0x13f   : > { %v1233_v39 = vpop.f32.mrf.mxu2  ;;  %2288 = vmatpush.bf16.msra.mxu0 %v7467_v25 }
 0x140   : > { %v10884_v56 = vadd.f32 %v1233_v39, %v10581_v61  ;;  %v7531_v61 = vor.u32 %v9160_v33, %v7528_v15  ;;  %v10903_v39 = vsel %vm14797_vm14, %v1874_v9, %v1880_v51  ;;  %v10908_v62 = vsel %vm14797_vm14, %v1876_v41, %v1882_v60  ;;  %v7518_v9 = vld [vmem:[%s14784_s1 + $0x410] sm:$0xf]  ;;  %v9159_v33 = vld [vmem:[%s14784_s1 + $0x414] sm:$0xf0] }
 0x141   : > { %v7519_v15 = vor.u32 %v9159_v33, %v7518_v9 }
 0x142   : > { %2322 = vmatpush.bf16.msra.mxu1 %v7531_v61 }
 0x143   : > { %v1264_v19 = vpop.f32.mrf.mxu3  ;;  %v10898_v38 = vpop.f32.mrf.mxu0  ;;  %2221 = vmatpush.bf16.msra.mxu2 %v7519_v15 }
 0x144   : > { %v1299_v35 = vadd.f32 %v10793_v13, %v1264_v19  ;;  %v1706_v52 = vpop.f32.mrf.mxu1  ;;  %v9126_v13 = vld [vmem:[%s14784_s1 + $0x314] sm:$0xf] }
 0x145   : > { %v10911_v46 = vadd.f32 %v1706_v52, %v10673_v21  ;;  %v7395_v21 = vor.u32 %v9126_v13, %v7392_v63  ;;  %v7510_v13 = vld [vmem:[%s14784_s1 + $0x400] sm:$0xf]  ;;  %v9157_v63 = vld [vmem:[%s14784_s1 + $0x404] sm:$0xf0] }
 0x146   : > { %v10923_v16 = vadd.f32 %v10791_v26, %v1299_v35  ;;  %2170 = vmatmul.bf16.gmra.mxu0 %v10903_v39  ;;  %v9142_v26 = vld [vmem:[%s14784_s1 + $0x394] sm:$0xf] }
 0x147   : > { %v1235_v10 = vpop.f32.mrf.mxu2  ;;  %2204 = vmatmul.bf16.gmra.mxu1 %v10908_v62  ;;  %2255 = vmatpush.bf16.msra.mxu3 %v7395_v21  ;;  %v7511_v21 = vor.u32 %v9157_v63, %v7510_v13  ;;  %v9140_v13 = vld [vmem:[%s14784_s1 + $0x384] sm:$0xf] }
 0x148   : > { %v10926_v41 = vadd.f32 %v1235_v10, %v10620_v59  ;;  %1783 = vmatmul.bf16.gmra.mxu3 %v10193_v29  ;;  %v7456_v59 = vld [vmem:[%s14784_s1 + $0x398] sm:$0xf0] }
 0x149   : > { %v7459_v25 = vor.u32 %v9142_v26, %v7456_v59  ;;  %v7384_v59 = vld [vmem:[%s14784_s1 + $0x308] sm:$0xf0]  ;;  %2222 = vmatpush.bf16.msra.mxu2 %v7511_v21 }
 0x14b   : > { %v1267_v61 = vpop.f32.mrf.mxu3  ;;  %2289 = vmatpush.bf16.msra.mxu0 %v7459_v25  ;;  %v1674_v52 = vpop.f32.mrf.mxu0  ;;  %v1886_v25 = vrot.slane %v10075_v28, 1  ;;  %v7512_v28 = vld [vmem:[%s14784_s1 + $0x408] sm:$0xf0] }
 0x14c   : > { %1754 = vmatmul.bf16.gmra.mxu2 %v9844_v34  ;;  %v1302_v19 = vadd.f32 %v10830_v4, %v1267_v61  ;;  %v1708_v35 = vpop.f32.mrf.mxu1  ;;  %v9158_v34 = vld [vmem:[%s14784_s1 + $0x414] sm:$0xf]  ;;  %v7520_v4 = vld [vmem:[%s14784_s1 + $0x418] sm:$0xf0]  ;;  %v1888_v61 = vrot.slane %v10121_v42, 1 }
 0x14d   : > { %v10943_v10 = vadd.f32 %v1708_v35, %v10698_v50  ;;  %v9124_v50 = vld [vmem:[%s14784_s1 + $0x304] sm:$0xf]  ;;  %v7523_v26 = vor.u32 %v9158_v34, %v7520_v4 }
 0x14e   : > { %v10961_v33 = vadd.f32 %v10828_v54, %v1302_v19  ;;  %v7387_v35 = vor.u32 %v9124_v50, %v7384_v59  ;;  %v7448_v54 = vld [vmem:[%s14784_s1 + $0x388] sm:$0xf0]  ;;  %v9156_v19 = vld [vmem:[%s14784_s1 + $0x404] sm:$0xf]  ;;  %v10985_v50 = vsel %vm14797_vm14, %v1880_v51, %v1886_v25  ;;  %v10990_v21 = vsel %vm14797_vm14, %v1882_v60, %v1888_v61 }
 0x14f   : > { %v1604_v9 = vpop.f32.mrf.mxu2  ;;  %2323 = vmatpush.bf16.msra.mxu1 %v7523_v26  ;;  %v7515_v63 = vor.u32 %v9156_v19, %v7512_v28  ;;  %v1854_v51 = vunpack.c.l.b16 %v1800_v23  ;;  %v1866_v28 = vrot.slane %v10158_v27, 1 }
 0x150   : > { %v1605_v15 = vadd.f32 %v1604_v9, %v10606_v22  ;;  %v7451_v22 = vor.u32 %v9140_v13, %v7448_v54  ;;  %2256 = vmatpush.bf16.msra.mxu3 %v7387_v35 }
 0x151   : > { %v1857_v54 = vpack.c.b16 %v702_v2, %v1854_v51 }
 0x152   : > { %2290 = vmatpush.bf16.msra.mxu0 %v7451_v22 }
 0x153   : > { %v1269_v42 = vpop.f32.mrf.mxu3  ;;  %v1677_v4 = vpop.f32.mrf.mxu0  ;;  %2324 = vmatpush.bf16.msra.mxu1 %v7515_v63  ;;  %v1865_v19 = vrot.slane %v1857_v54, 1 }
 0x154   : > { %v1304_v9 = vadd.f32 %v10869_v32, %v1269_v42  ;;  %v1711_v34 = vpop.f32.mrf.mxu1 }
 0x155   : > { %v10993_v26 = vadd.f32 %v1711_v34, %v10743_v12  ;;  %v1867_v34 = vsel %vm14797_vm14, %v1865_v19, %v1866_v28 }
 0x156   : > { %v10996_v35 = vadd.f32 %v10867_v7, %v1304_v9  ;;  %2175 = vmatmul.bf16.gmra.mxu0 %v10985_v50 }
 0x157   : > { %v1606_v59 = vpop.f32.mrf.mxu2  ;;  %2209 = vmatmul.bf16.gmra.mxu1 %v10990_v21 }
 0x158   : > { %v1607_v32 = vadd.f32 %v1606_v59, %v10628_v45  ;;  %1788 = vmatmul.bf16.gmra.mxu3 %v10246_v24 }
 0x15b   : > { %v1638_v60 = vpop.f32.mrf.mxu3  ;;  %v1679_v61 = vpop.f32.mrf.mxu0 }
 0x15c   : > { %1759 = vmatmul.bf16.gmra.mxu2 %v10049_v37  ;;  %v1639_v12 = vadd.f32 %v1638_v60, %v1605_v15  ;;  %v1713_v25 = vpop.f32.mrf.mxu1 }
 0x15d   : > { %v11004_v13 = vadd.f32 %v1713_v25, %v10776_v8 }
 0x15e   : > { %v11007_v7 = vadd.f32 %v10898_v38, %v1639_v12 }
 0x15f   : > { %v1609_v45 = vpop.f32.mrf.mxu2 }
 0x160   : > { %v1610_v22 = vadd.f32 %v1609_v45, %v10676_v14 }
 0x163   : > { %v1640_v42 = vpop.f32.mrf.mxu3  ;;  %v1682_v63 = vpop.f32.mrf.mxu0 }
 0x164   : > { %v1641_v37 = vadd.f32 %v1640_v42, %v1607_v32  ;;  %v1716_v15 = vpop.f32.mrf.mxu1 }
 0x165   : > { %v11014_v9 = vadd.f32 %v1716_v15, %v10820_v30 }
 0x166   : > { %v11016_v8 = vadd.f32 %v1674_v52, %v1641_v37  ;;  %2291 = vmatmul.bf16.vlgmr.msra.gmra.mxu0 %v10689_v58 }
 0x167   : > { %v1611_v38 = vpop.f32.mrf.mxu2  ;;  %2325 = vmatmul.bf16.vlgmr.msra.gmra.mxu1 %v1867_v34 }
 0x168   : > { %v1612_v57 = vadd.f32 %v1611_v38, %v10701_v53  ;;  %1793 = vmatmul.bf16.gmra.mxu3 %v10287_v31  ;;  %v1872_v53 = vrot.slane %v10193_v29, 1 }
 0x16b   : > { %v1643_v2 = vpop.f32.mrf.mxu3  ;;  %v1684_v59 = vpop.f32.mrf.mxu0 }
 0x16c   : > { %2223 = vmatmul.bf16.vlgmr.msra.gmra.mxu2 %v1867_v34  ;;  %v1644_v27 = vadd.f32 %v1643_v2, %v1610_v22  ;;  %v1718_v14 = vpop.f32.mrf.mxu1 }
 0x16d   : > { %v11023_v30 = vadd.f32 %v1718_v14, %v10845_v40  ;;  %v1873_v40 = vsel %vm14797_vm14, %v1866_v28, %v1872_v53  ;;  %v1878_v28 = vrot.slane %v10246_v24, 1 }
 0x16e   : > { %v11025_v52 = vadd.f32 %v1677_v4, %v1644_v27 }
 0x16f   : > { %v1614_v32 = vpop.f32.mrf.mxu2 }
 0x170   : > { %14874 = vst [vmem:[#allocation10_spill] sm:$0xff] %v11025_v52  ;;  %v1615_v23 = vadd.f32 %v1614_v32, %v10746_v44 }
 0x173   : > { %v1645_v51 = vpop.f32.mrf.mxu3  ;;  %v1687_v12 = vpop.f32.mrf.mxu0 }
 0x174   : > { %v1646_v58 = vadd.f32 %v1645_v51, %v1612_v57  ;;  %v1721_v60 = vpop.f32.mrf.mxu1  ;;  %v1879_v57 = vsel %vm14797_vm14, %v1872_v53, %v1878_v28 }
 0x175   : > { %v11030_v25 = vadd.f32 %v1721_v60, %v10881_v49 }
 0x176   : > { %v11032_v45 = vadd.f32 %v1679_v61, %v1646_v58  ;;  %2296 = vmatmul.bf16.gmra.mxu0 %v10759_v6 }
 0x177   : > { %v1616_v54 = vpop.f32.mrf.mxu2  ;;  %2330 = vmatmul.bf16.gmra.mxu1 %v1873_v40 }
 0x178   : > { %14875 = vst [vmem:[#allocation11_spill] sm:$0xff] %v11032_v45  ;;  %v1617_v4 = vadd.f32 %v1616_v54, %v10778_v0  ;;  %2257 = vmatmul.bf16.vlgmr.msra.gmra.mxu3 %v10686_v48 }
 0x17b   : > { %v1648_v29 = vpop.f32.mrf.mxu3  ;;  %v11040_v19 = vpop.f32.mrf.mxu0 }
 0x17c   : > { %2228 = vmatmul.bf16.gmra.mxu2 %v1873_v40  ;;  %v1649_v44 = vadd.f32 %v1648_v29, %v1615_v23  ;;  %v11038_v22 = vpop.f32.mrf.mxu1 }
 0x17e   : > { %v11042_v49 = vadd.f32 %v1682_v63, %v1649_v44 }
 0x17f   : > { %v1619_v61 = vpop.f32.mrf.mxu2 }
 0x180   : > { %14876 = vst [vmem:[#allocation12_spill] sm:$0xff] %v11042_v49  ;;  %v1620_v42 = vadd.f32 %v1619_v61, %v10823_v55 }
 0x183   : > { %v1650_v0 = vpop.f32.mrf.mxu3  ;;  %v1692_v15 = vpop.f32.mrf.mxu0 }
 0x184   : > { %v1651_v37 = vadd.f32 %v1650_v0, %v1617_v4  ;;  %v1726_v6 = vpop.f32.mrf.mxu1  ;;  %v1890_v4 = vrot.slane %v10350_v17, 1 }
 0x185   : > { %v11047_v48 = vadd.f32 %v1726_v6, %v10961_v33 }
 0x186   : > { %v11049_v38 = vadd.f32 %v1684_v59, %v1651_v37  ;;  %2301 = vmatmul.bf16.gmra.mxu0 %v10836_v18  ;;  %v1884_v59 = vrot.slane %v10287_v31, 1 }
 0x187   : > { %v11051_v34 = vpop.f32.mrf.mxu2  ;;  %2335 = vmatmul.bf16.gmra.mxu1 %v1879_v57 }
 0x188   : > { %14877 = vst [vmem:[#allocation13_spill] sm:$0xff] %v11049_v38  ;;  %2262 = vmatmul.bf16.gmra.mxu3 %v10756_v1  ;;  %v1885_v51 = vsel %vm14797_vm14, %v1878_v28, %v1884_v59 }
 0x18b   : > { %v1653_v55 = vpop.f32.mrf.mxu3  ;;  %v11058_v2 = vpop.f32.mrf.mxu0 }
 0x18c   : > { %2233 = vmatmul.bf16.gmra.mxu2 %v1879_v57  ;;  %v1654_v24 = vadd.f32 %v1653_v55, %v1620_v42  ;;  %v11056_v63 = vpop.f32.mrf.mxu1  ;;  %v1891_v42 = vsel %vm14797_vm14, %v1884_v59, %v1890_v4 }
 0x18e   : > { %v11060_v33 = vadd.f32 %v1687_v12, %v1654_v24 }
 0x18f   : > { %v1624_v27 = vpop.f32.mrf.mxu2 }
 0x190   : > { %14878 = vst [vmem:[#allocation14_spill] sm:$0xff] %v11060_v33  ;;  %v1625_v14 = vadd.f32 %v1624_v27, %v10884_v56 }
 0x193   : > { %v11064_v32 = vpop.f32.mrf.mxu3  ;;  %v2156_v18 = vpop.f32.mrf.mxu0 }
 0x194   : > { %v2190_v23 = vpop.f32.mrf.mxu1 }
 0x195   : > { %v11066_v53 = vadd.f32 %v2190_v23, %v2156_v18  ;;  %v2417_v23 = vlaneseq }
 0x196   : > { %2306 = vmatmul.bf16.gmra.mxu0 %v10908_v62 }
 0x197   : > { %v11068_v1 = vpop.f32.mrf.mxu2  ;;  %2340 = vmatmul.bf16.gmra.mxu1 %v1885_v51 }
 0x198   : > { %2267 = vmatmul.bf16.gmra.mxu3 %v10833_v5 }
 0x19b   : > { %v1658_v58 = vpop.f32.mrf.mxu3  ;;  %v11073_v60 = vpop.f32.mrf.mxu0 }
 0x19c   : > { %2238 = vmatmul.bf16.gmra.mxu2 %v1885_v51  ;;  %v1659_v56 = vadd.f32 %v1658_v58, %v1625_v14  ;;  %v11075_v31 = vpop.f32.mrf.mxu1  ;;  %v11113_v58 = vshrl.u32 %v2417_v23, 7 }
 0x19e   : > { %v11077_v12 = vadd.f32 %v1692_v15, %v1659_v56  ;;  %v11160_v45 = vadd.s32 16, %v11113_v58 }
 0x19f   : > { %v1740_v54 = vpop.f32.mrf.mxu2 }
 0x1a0   : > { %14879 = vst [vmem:[#allocation15_spill] sm:$0xff] %v11077_v12  ;;  %v1741_v40 = vadd.f32 %v1740_v54, %v10911_v46  ;;  %v11131_v12 = vadd.s32 8, %v11113_v58 }
 0x1a2   : > { %v2461_v20 = vshrl.u32 %v11131_v12, 16 }
 0x1a3   : > { %v11081_v29 = vpop.f32.mrf.mxu3  ;;  %v2161_v62 = vpop.f32.mrf.mxu0 }
 0x1a4   : > { %v2195_v44 = vpop.f32.mrf.mxu1 }
 0x1a5   : > { %v11083_v61 = vadd.f32 %v2195_v44, %v2161_v62  ;;  %v2432_v62 = vshrl.u32 %v11113_v58, 16 }
 0x1a6   : > { %2311 = vmatmul.bf16.gmra.mxu0 %v10990_v21 }
 0x1a7   : > { %v11085_v5 = vpop.f32.mrf.mxu2  ;;  %2345 = vmatmul.bf16.gmra.mxu1 %v1891_v42 }
 0x1a8   : > { %2272 = vmatmul.bf16.gmra.mxu3 %v10903_v39 }
 0x1ab   : > { %v1774_v28 = vpop.f32.mrf.mxu3  ;;  %v11092_v17 = vpop.f32.mrf.mxu0 }
 0x1ac   : > { %2243 = vmatmul.bf16.gmra.mxu2 %v1891_v42  ;;  %v11090_v46 = vadd.f32 %v1774_v28, %v1741_v40  ;;  %v11094_v0 = vpop.f32.mrf.mxu1  ;;  %v2436_v28 = vmul.u32 52429, %v2432_v62 }
 0x1af   : > { %v1745_v37 = vpop.f32.mrf.mxu2 }
 0x1b0   : > { %v1746_v6 = vadd.f32 %v1745_v37, %v10993_v26 }
 0x1b3   : > { %v11097_v15 = vpop.f32.mrf.mxu3  ;;  %v2166_v57 = vpop.f32.mrf.mxu0 }
 0x1b4   : > { %v2200_v55 = vpop.f32.mrf.mxu1 }
 0x1b5   : > { %v11099_v24 = vadd.f32 %v2200_v55, %v2166_v57  ;;  %v2440_v57 = vshll.u32 %v2436_v28, 16 }
 0x1b7   : > { %14880 = vst [vmem:[#allocation16_spill] sm:$0xff] %v11099_v24  ;;  %v11101_v21 = vpop.f32.mrf.mxu2 }
 0x1b8   : > { %2277 = vmatmul.bf16.gmra.mxu3 %v10985_v50  ;;  %v2431_v50 = vand.u32 65535, %v11113_v58 }
 0x1ba   : > { %v2435_v44 = vmul.u32 52428, %v2431_v50  ;;  %v2434_v42 = vmul.u32 52429, %v2431_v50 }
 0x1bb   : > { %v1779_v39 = vpop.f32.mrf.mxu3  ;;  %v11106_v14 = vpop.f32.mrf.mxu0 }
 0x1bc   : > { %v11104_v27 = vadd.f32 %v1779_v39, %v1746_v6  ;;  %v11108_v59 = vpop.f32.mrf.mxu1  ;;  %v2438_v37 = vshll.u32 %v2435_v44, 16  ;;  %v2437_v6 = vmul.u32 52428, %v2432_v62 }
 0x1be   : > { %14881 = vst [vmem:[#allocation17_spill] sm:$0xff] %v11104_v27  ;;  %vm2442_vm15 = vc.u32 %v2434_v42, %v2438_v37  ;;  %v2444_v55 = vadd.s32 %v2438_v37, %v2434_v42  ;;  %v2460_v42 = vand.u32 65535, %v11131_v12  ;;  %v2439_v37 = vshrl.u32 %v2435_v44, 16  ;;  %v7888_v44 = vld [vmem:[%s14786_s3 + $0x3f0] sm:$0xf] }
 0x1bf   : > { %v1750_v18 = vpop.f32.mrf.mxu2 }
 0x1c0   : > { %v1751_v26 = vadd.f32 %v1750_v18, %v11014_v9  ;;  %vm2446_vm0 = vc.u32 %v2444_v55, %v2440_v57  ;;  %v2464_v33 = vmul.u32 52428, %v2460_v42  ;;  %v2466_v55 = vmul.u32 52428, %v2461_v20 }
 0x1c2   : > { %v2467_v38 = vshll.u32 %v2464_v33, 16 }
 0x1c3   : > { %v11111_v51 = vpop.f32.mrf.mxu3  ;;  %v2171_v56 = vpop.f32.mrf.mxu0 }
 0x1c4   : > { %v2205_v54 = vpop.f32.mrf.mxu1 }
 0x1c5   : > { %v11115_v40 = vadd.f32 %v2205_v54, %v2171_v56  ;;  %v11127_v56 = vld [vmem:[#allocation4 + $0x30] sm:$0xff] }
 0x1c6   : > { %v2443_v54 = vsel %vm2442_vm15, 1, %v11127_v56  ;;  %v2447_v62 = vsel %vm2446_vm0, 1, %v11127_v56  ;;  %vm14798_vm15 = vmor %vm11196_vm8, %vm9652_vm2 }
 0x1c7   : > { %14882 = vst [vmem:[#allocation18_spill] sm:$0xff] %v11115_v40  ;;  %v11118_v4 = vpop.f32.mrf.mxu2  ;;  %v2445_v50 = vadd.s32 %v2443_v54, %v2437_v6  ;;  %v2463_v40 = vmul.u32 52429, %v2460_v42  ;;  %v2441_v6 = vshrl.u32 %v2436_v28, 16 }
 0x1c9   : > { %vm2471_vm1 = vc.u32 %v2463_v40, %v2467_v38  ;;  %v2473_v28 = vadd.s32 %v2467_v38, %v2463_v40  ;;  %v2489_v38 = vand.u32 65535, %v11160_v45 }
 0x1ca   : > { %v2472_v42 = vsel %vm2471_vm1, 1, %v11127_v56 }
 0x1cb   : > { %v1784_v9 = vpop.f32.mrf.mxu3  ;;  %v11123_v18 = vpop.f32.mrf.mxu0  ;;  %v2474_v3 = vadd.s32 %v2472_v42, %v2466_v55  ;;  %v1622_v42 = vadd.f32 %v11051_v34, %v10848_v47  ;;  %v11181_v47 = vadd.f32 %v11038_v22, %v10923_v16 }
 0x1cc   : > { %v11121_v39 = vadd.f32 %v1784_v9, %v1751_v26  ;;  %v11125_v23 = vpop.f32.mrf.mxu1  ;;  %v2449_v9 = vadd.s32 %v2447_v62, %v2445_v50  ;;  %v9323_v62 = vld [vmem:[%s14786_s3 + $0x3f4] sm:$0xf0] }
 0x1ce   : > { %14883 = vst [vmem:[#allocation19_spill] sm:$0xff] %v11121_v39  ;;  %v11137_v39 = vmul.u32 52429, %v2461_v20  ;;  %v2450_v57 = vadd.s32 %v2449_v9, %v2439_v37  ;;  %v7889_v9 = vor.u32 %v9323_v62, %v7888_v44  ;;  %v11168_v62 = vadd.s32 24, %v11113_v58 }
 0x1cf   : > { %v1755_v43 = vpop.f32.mrf.mxu2 }
 0x1d0   : > { %v1756_v26 = vadd.f32 %v1755_v43, %v11030_v25  ;;  %v2469_v54 = vshll.u32 %v11137_v39, 16  ;;  %v7824_v43 = vld [vmem:[%s14786_s3 + $0x370] sm:$0xf]  ;;  %v9307_v25 = vld [vmem:[%s14786_s3 + $0x374] sm:$0xf0]  ;;  %v2451_v27 = vadd.s32 %v2450_v57, %v2441_v6  ;;  %4311 = vmatpush.bf16.msrb.mxu3 %v7889_v9 }
 0x1d1   : > { %v7825_v20 = vor.u32 %v9307_v25, %v7824_v43  ;;  %v2468_v25 = vshrl.u32 %v2464_v33, 16  ;;  %v2470_v33 = vshrl.u32 %v11137_v39, 16 }
 0x1d2   : > { %vm2475_vm3 = vc.u32 %v2473_v28, %v2469_v54  ;;  %v2452_v43 = vshrl.u32 %v2451_v27, 3  ;;  %v2492_v54 = vmul.u32 52429, %v2489_v38  ;;  %v2493_v28 = vmul.u32 52428, %v2489_v38 }
 0x1d3   : > { %v11139_v11 = vpop.f32.mrf.mxu3  ;;  %v2176_v49 = vpop.f32.mrf.mxu0  ;;  %4277 = vmatpush.bf16.msrb.mxu2 %v7825_v20 }
 0x1d4   : > { %v2210_v24 = vpop.f32.mrf.mxu1  ;;  %v2496_v20 = vshll.u32 %v2493_v28, 16  ;;  %v2453_v52 = vmul.u32 10, %v2452_v43 }
 0x1d5   : > { %v11151_v50 = vadd.f32 %v2210_v24, %v2176_v49  ;;  %v2476_v49 = vsel %vm2475_vm3, 1, %v11127_v56  ;;  %v2490_v24 = vshrl.u32 %v11160_v45, 16 }
 0x1d6   : > { %v2478_v44 = vadd.s32 %v2476_v49, %v2474_v3  ;;  %vm2500_vm5 = vc.u32 %v2492_v54, %v2496_v20  ;;  %v2502_v3 = vadd.s32 %v2496_v20, %v2492_v54  ;;  %v1627_v49 = vadd.f32 %v11068_v1, %v10926_v41  ;;  %v2832_v54 = vld [vmem:[#allocation4] sm:$0x33] }
 0x1d7   : > { %14884 = vst [vmem:[#allocation20_spill] sm:$0xff] %v11151_v50  ;;  %v11157_v37 = vpop.f32.mrf.mxu2  ;;  %v2494_v6 = vmul.u32 52429, %v2490_v24  ;;  %v2495_v55 = vmul.u32 52428, %v2490_v24  ;;  %v2501_v38 = vsel %vm2500_vm5, 1, %v11127_v56  ;;  %v2518_v24 = vand.u32 65535, %v11168_v62 }
 0x1d8   : > { %v1661_v39 = vadd.f32 %v11081_v29, %v1627_v49  ;;  %v2497_v41 = vshrl.u32 %v2493_v28, 16  ;;  %v2833_v20 = vsel %vm14798_vm15, 0, %v2832_v54 }
 0x1d9   : > { %v2498_v27 = vshll.u32 %v2494_v6, 16  ;;  %v2503_v34 = vadd.s32 %v2501_v38, %v2495_v55  ;;  %v2522_v28 = vmul.u32 52428, %v2518_v24  ;;  %v11211_v55 = vadd.f32 %v11075_v31, %v11073_v60  ;;  %2834 = vst [vmem:[#allocation4] sm:$0x33] %v2833_v20 }
 0x1db   : > { %v1789_v40 = vpop.f32.mrf.mxu3  ;;  %vm2504_vm6 = vc.u32 %v2502_v3, %v2498_v27  ;;  %v11200_v29 = vpop.f32.mrf.mxu0  ;;  %v11224_v27 = vadd.f32 %v11058_v2, %v1661_v39 }
 0x1dc   : > { %v11165_v50 = vadd.f32 %v1789_v40, %v1756_v26  ;;  %v2479_v26 = vadd.s32 %v2478_v44, %v2468_v25  ;;  %v2519_v40 = vshrl.u32 %v11168_v62, 16  ;;  %v2505_v1 = vsel %vm2504_vm6, 1, %v11127_v56  ;;  %v11228_v49 = vpop.f32.mrf.mxu1 }
 0x1dd   : > { %v11190_v25 = vadd.f32 %v11056_v63, %v10996_v35  ;;  %v11193_v44 = vsub.s32 %v11113_v58, %v2453_v52  ;;  %v2507_v35 = vadd.s32 %v2505_v1, %v2503_v34  ;;  %v2521_v63 = vmul.u32 52429, %v2518_v24 }
 0x1de   : > { %v2480_v22 = vadd.s32 %v2479_v26, %v2470_v33  ;;  %v2523_v52 = vmul.u32 52429, %v2519_v40  ;;  %v2524_v33 = vmul.u32 52428, %v2519_v40  ;;  %v2525_v26 = vshll.u32 %v2522_v28, 16 }
 0x1df   : > { %v1760_v57 = vpop.f32.mrf.mxu2  ;;  %vm2718_vm12 = vcmp.ne.s32.totalorder %v11193_v44, 0  ;;  %vm2728_vm0 = vcmp.lt.s32.totalorder %v11193_v44, 0  ;;  %v2748_v2 = vadd.s32 10, %v11193_v44 }
 0x1e0   : > { %v1761_v9 = vadd.f32 %v1760_v57, %v11047_v48  ;;  %v1656_v48 = vadd.f32 %v11064_v32, %v1622_v42  ;;  %v2499_v32 = vshrl.u32 %v2494_v6, 16  ;;  %v11221_v42 = vadd.s32 32, %v11113_v58  ;;  %vm11247_vm5 = vmand %vm2728_vm0, %vm2718_vm12 }
 0x1e1   : > { %v2481_v60 = vshrl.u32 %v2480_v22, 3  ;;  %v2527_v31 = vshll.u32 %v2523_v52, 16  ;;  %vm2529_vm1 = vc.u32 %v2521_v63, %v2525_v26  ;;  %v2531_v24 = vadd.s32 %v2525_v26, %v2521_v63 }
 0x1e2   : > { %v11207_v57 = vadd.f32 %v11040_v19, %v1656_v48  ;;  %v2508_v19 = vadd.s32 %v2507_v35, %v2497_v41  ;;  %v2547_v3 = vand.u32 65535, %v11221_v42  ;;  %v2530_v48 = vsel %vm2529_vm1, 1, %v11127_v56  ;;  %v2371_v41 = vld [vmem:[%s14785_s2] sm:$0x3] }
 0x1e3   : > { %v11185_v43 = vpop.f32.mrf.mxu3  ;;  %v2548_v40 = vshrl.u32 %v11221_v42, 16  ;;  %v2526_v22 = vshrl.u32 %v2522_v28, 16  ;;  %v2532_v54 = vadd.s32 %v2530_v48, %v2524_v33  ;;  %vm2533_vm3 = vc.u32 %v2531_v24, %v2527_v31  ;;  %v11261_v48 = vpop.f32.mrf.mxu0 }
 0x1e4   : > { %v2509_v38 = vadd.s32 %v2508_v19, %v2499_v32  ;;  %v11234_v34 = vmul.u32 52428, %v2547_v3  ;;  %v1743_v32 = vadd.f32 %v11085_v5, %v10943_v10  ;;  %v2482_v20 = vmul.u32 10, %v2481_v60 }
 0x1e5   : > { %v2534_v19 = vsel %vm2533_vm3, 1, %v11127_v56  ;;  %v2528_v28 = vshrl.u32 %v2523_v52, 16  ;;  %v2550_v31 = vmul.u32 52429, %v2547_v3  ;;  %v11254_v10 = vadd.f32 %v11094_v0, %v11092_v17 }
 0x1e6   : > { %v2510_v1 = vshrl.u32 %v2509_v38, 3  ;;  %v2536_v33 = vadd.s32 %v2534_v19, %v2532_v54  ;;  %v11258_v38 = vmul.u32 52429, %v2548_v40  ;;  %v2554_v24 = vshll.u32 %v11234_v34, 16  ;;  %v11278_v19 = vpop.f32.mrf.mxu1 }
 0x1e7   : > { %v11213_v6 = vpop.f32.mrf.mxu2  ;;  %v2758_v52 = vsel %vm11247_vm5, %v2748_v2, %v11193_v44  ;;  %v11271_v17 = vadd.f32 %v11097_v15, %v1743_v32  ;;  %v1748_v0 = vadd.f32 %v11101_v21, %v11004_v13  ;;  %v2553_v54 = vmul.u32 52428, %v2548_v40  ;;  %v7816_v44 = vld [vmem:[%s14786_s3 + $0x360] sm:$0xf]  ;;  %v9305_v15 = vld [vmem:[%s14786_s3 + $0x364] sm:$0xf0] }
 0x1e8   : > { %v2511_v26 = vmul.u32 10, %v2510_v1  ;;  %v2537_v3 = vadd.s32 %v2536_v33, %v2526_v22  ;;  %v11276_v1 = vsub.s32 %v11131_v12, %v2482_v20  ;;  %v7880_v13 = vld [vmem:[%s14786_s3 + $0x3e0] sm:$0xf]  ;;  %vm11293_vm6 = vc.u32 %v2550_v31, %v2554_v24  ;;  %v9321_v32 = vld [vmem:[%s14786_s3 + $0x3e4] sm:$0xf0] }
 0x1e9   : > { %vm11297_vm7 = vcmp.lt.s32.totalorder %v2758_v52, 8  ;;  %v11301_v40 = vperm.slane %v2371_v41, 1  ;;  %v7817_v22 = vor.u32 %v9305_v15, %v7816_v44  ;;  %v2556_v63 = vshll.u32 %v11258_v38, 16  ;;  %v7952_v2 = vld [vmem:[%s14786_s3 + $0x470] sm:$0xf] }
 0x1ea   : > { %v11291_v12 = vsub.s32 %v11160_v45, %v2511_v26  ;;  %v2538_v21 = vadd.s32 %v2537_v3, %v2528_v28  ;;  %v2560_v45 = vadd.s32 %v2554_v24, %v2550_v31  ;;  %v7881_v28 = vor.u32 %v9321_v32, %v7880_v13  ;;  %v8016_v32 = vld [vmem:[%s14786_s3 + $0x4f0] sm:$0xf] }
 0x1eb   : > { %v1794_v39 = vpop.f32.mrf.mxu3  ;;  %4278 = vmatpush.bf16.msrb.mxu2 %v7817_v22  ;;  %vm2719_vm12 = vcmp.ne.s32.totalorder %v11276_v1, 0  ;;  %vm2729_vm0 = vcmp.lt.s32.totalorder %v11276_v1, 0  ;;  %v2559_v31 = vsel %vm11293_vm6, 1, %v11127_v56  ;;  %v2555_v24 = vshrl.u32 %v11234_v34, 16  ;;  %v9339_v22 = vld [vmem:[%s14786_s3 + $0x474] sm:$0xf0] }
 0x1ec   : > { %v11241_v35 = vadd.f32 %v1794_v39, %v1761_v9  ;;  %v11256_v9 = vperm.slane %v2371_v41, 0  ;;  %v11268_v39 = vadd.s32 40, %v11113_v58  ;;  %v2539_v33 = vshrl.u32 %v2538_v21, 3  ;;  %4312 = vmatpush.bf16.msrb.mxu3 %v7881_v28  ;;  %vm11336_vm5 = vmand %vm2729_vm0, %vm2719_vm12  ;;  %v9355_v28 = vld [vmem:[%s14786_s3 + $0x4f4] sm:$0xf0] }
 0x1ed   : > { %v11316_v41 = vadd.s32 10, %v11276_v1  ;;  %vm2720_vm1 = vcmp.ne.s32.totalorder %v11291_v12, 0  ;;  %v2561_v52 = vadd.s32 %v2559_v31, %v2553_v54  ;;  %vm2562_vm3 = vc.u32 %v2560_v45, %v2556_v63 }
 0x1ee   : > { %v2540_v44 = vmul.u32 10, %v2539_v33  ;;  %v2577_v15 = vshrl.u32 %v11268_v39, 16  ;;  %v11328_v13 = vadd.f32 %v11108_v59, %v11106_v14  ;;  %v1753_v21 = vadd.f32 %v11118_v4, %v11023_v30  ;;  %v9303_v14 = vld [vmem:[%s14786_s3 + $0x354] sm:$0xf0]  ;;  %v7872_v33 = vld [vmem:[%s14786_s3 + $0x3d0] sm:$0xf] }
 0x1ef   : > { %v2224_v5 = vpop.f32.mrf.mxu2  ;;  %v2563_v59 = vsel %vm2562_vm3, 1, %v11127_v56  ;;  %v11350_v30 = vadd.f32 %v11111_v51, %v1748_v0  ;;  %v11354_v4 = vadd.f32 %v11125_v23, %v11123_v18  ;;  %v11370_v18 = vadd.f32 %v11157_v37, %v11181_v47  ;;  %v11372_v23 = vpop.f32.mrf.mxu0 }
 0x1f0   : > { %v2225_v60 = vadd.f32 %v2224_v5, %v11066_v53  ;;  %v2576_v5 = vand.u32 65535, %v11268_v39  ;;  %v2565_v45 = vadd.s32 %v2563_v59, %v2561_v52  ;;  %v11366_v51 = vadd.f32 %v11139_v11, %v1753_v21  ;;  %v9319_v11 = vld [vmem:[%s14786_s3 + $0x3d4] sm:$0xf0]  ;;  %v11388_v52 = vpop.f32.mrf.mxu1 }
 0x1f1   : > { %v7953_v0 = vor.u32 %v9339_v22, %v7952_v2  ;;  %v8017_v31 = vor.u32 %v9355_v28, %v8016_v32  ;;  %vm2730_vm6 = vcmp.lt.s32.totalorder %v11291_v12, 0  ;;  %v7873_v37 = vor.u32 %v9319_v11, %v7872_v33 }
 0x1f2   : > { %v2351_v53 = vadd.f32 %v2225_v60, %v11007_v7  ;;  %v2557_v60 = vshrl.u32 %v11258_v38, 16  ;;  %v7808_v38 = vld [vmem:[%s14786_s3 + $0x350] sm:$0xf]  ;;  %v11347_v54 = vmul.u32 52428, %v2576_v5  ;;  %v11386_v47 = vsub.s32 %v11168_v62, %v2540_v44  ;;  %v9301_v62 = vld [vmem:[%s14786_s3 + $0x344] sm:$0xf0]  ;;  %vm11430_vm15 = vmand %vm2730_vm6, %vm2720_vm1 }
 0x1f3   : > { %v11307_v20 = vpop.f32.mrf.mxu3  ;;  %v7809_v63 = vor.u32 %v9303_v14, %v7808_v38  ;;  %4345 = vmatpush.bf16.msrb.mxu0 %v7953_v0  ;;  %v11395_v21 = vadd.s32 10, %v11291_v12  ;;  %v7800_v38 = vld [vmem:[%s14786_s3 + $0x340] sm:$0xf]  ;;  %v2566_v44 = vadd.s32 %v2565_v45, %v2555_v24  ;;  %v2579_v14 = vmul.u32 52429, %v2576_v5  ;;  %4379 = vmatpush.bf16.msrb.mxu1 %v8017_v31  ;;  %v7856_v31 = vld [vmem:[%s14786_s3 + $0x3b0] sm:$0xf] }
 0x1f4   : > { %v11310_v26 = vadd.f32 %v11256_v9, %v2351_v53  ;;  %4313 = vmatpush.bf16.msrb.mxu3 %v7873_v37  ;;  %v7801_v2 = vor.u32 %v9301_v62, %v7800_v38  ;;  %v11410_v34 = vmul.u32 52429, %v2577_v15  ;;  %v2583_v22 = vshll.u32 %v11347_v54, 16  ;;  %v9315_v37 = vld [vmem:[%s14786_s3 + $0x3b4] sm:$0xf0]  ;;  %v14901_v62 = vld [vmem:[#allocation10_spill] sm:$0xff] }
 0x1f5   : > { %4279 = vmatpush.bf16.msrb.mxu2 %v7809_v63  ;;  %v2567_v32 = vadd.s32 %v2566_v44, %v2557_v60  ;;  %vm2945_vm12 = vcmask 1047557   ;;  %vm2946_vm0 = vsmask.f32 7958  ;;  %vm2731_vm14 = vcmp.lt.s32.totalorder %v11386_v47, 0  ;;  %v7944_v44 = vld [vmem:[%s14786_s3 + $0x460] sm:$0xf] }
 0x1f6   : > { %v2397_v3 = vmax.f32 %v11310_v26, 0.0  ;;  %vm11443_vm11 = vc.u32 %v2579_v14, %v2583_v22 }
 0x1f7   : > { %v2226_v53 = vpop.f32.mrf.mxu2  ;;  %v2568_v60 = vshrl.u32 %v2567_v32, 3 }
 0x1f8   : > { %v2227_v26 = vadd.f32 %v2226_v53, %v11211_v55  ;;  %v2759_v53 = vsel %vm11336_vm5, %v11316_v41, %v11276_v1  ;;  %v7864_v1 = vld [vmem:[%s14786_s3 + $0x3c0] sm:$0xf]  ;;  %v9317_v41 = vld [vmem:[%s14786_s3 + $0x3c4] sm:$0xf0]  ;;  %v11415_v5 = vsel %vm11297_vm7, %v2397_v3, 0.0  ;;  %vm2721_vm5 = vcmp.ne.s32.totalorder %v11386_v47, 0 }
 0x1f9   : > { %v7865_v24 = vor.u32 %v9317_v41, %v7864_v1  ;;  %vm11419_vm3 = vcmp.lt.s32.totalorder %v2759_v53, 8  ;;  %4280 = vmatpush.bf16.msrb.mxu2 %v7801_v2  ;;  %v2582_v3 = vmul.u32 52428, %v2577_v15  ;;  %v2588_v53 = vsel %vm11443_vm11, 1, %v11127_v56  ;;  %v8008_v2 = vld [vmem:[%s14786_s3 + $0x4e0] sm:$0xf] }
 0x1fa   : > { %v7857_v1 = vor.u32 %v9315_v37, %v7856_v31  ;;  %v2589_v41 = vadd.s32 %v2583_v22, %v2579_v14  ;;  %v9335_v14 = vld [vmem:[%s14786_s3 + $0x454] sm:$0xf0]  ;;  %v7784_v15 = vld [vmem:[%s14786_s3 + $0x320] sm:$0xf] }
 0x1fb   : > { %v2258_v55 = vpop.f32.mrf.mxu3  ;;  %4314 = vmatpush.bf16.msrb.mxu3 %v7865_v24  ;;  %v2590_v22 = vadd.s32 %v2588_v53, %v2582_v3  ;;  %v2331_v53 = vpop.f32.mrf.mxu1 }
 0x1fc   : > { %v2293_v59 = vadd.f32 %v11261_v48, %v2258_v55  ;;  %v2353_v48 = vadd.f32 %v2227_v26, %v11016_v8  ;;  %v7792_v26 = vld [vmem:[%s14786_s3 + $0x330] sm:$0xf]  ;;  %v2585_v55 = vshll.u32 %v11410_v34, 16 }
 0x1fe   : > { %v2327_v63 = vadd.f32 %v11278_v19, %v2293_v59  ;;  %v11435_v19 = vadd.s32 10, %v11386_v47  ;;  %v2379_v38 = vadd.f32 %v11256_v9, %v2353_v48  ;;  %v9337_v59 = vld [vmem:[%s14786_s3 + $0x464] sm:$0xf0]  ;;  %v2760_v48 = vsel %vm11430_vm15, %v11395_v21, %v11291_v12  ;;  %vm11498_vm15 = vmand %vm2731_vm14, %vm2721_vm5 }
 0x1ff   : > { %v2229_v0 = vpop.f32.mrf.mxu2  ;;  %v7945_v32 = vor.u32 %v9337_v59, %v7944_v44  ;;  %v2569_v12 = vmul.u32 10, %v2568_v60  ;;  %v2584_v21 = vshrl.u32 %v11347_v54, 16  ;;  %4315 = vmatpush.bf16.msrb.mxu3 %v7857_v1  ;;  %vm2591_vm11 = vc.u32 %v2589_v41, %v2585_v55 }
 0x200   : > { %v2230_v28 = vadd.f32 %v2229_v0, %v11083_v61  ;;  %v9299_v61 = vld [vmem:[%s14786_s3 + $0x334] sm:$0xf0]  ;;  %v2352_v33 = vadd.f32 %v2327_v63, %v11090_v46  ;;  %v9353_v63 = vld [vmem:[%s14786_s3 + $0x4e4] sm:$0xf0]  ;;  %v7936_v0 = vld [vmem:[%s14786_s3 + $0x450] sm:$0xf] }
 0x201   : > { %v7793_v11 = vor.u32 %v9299_v61, %v7792_v26  ;;  %v2297_v26 = vpop.f32.mrf.mxu0  ;;  %v8009_v61 = vor.u32 %v9353_v63, %v8008_v2  ;;  %v7937_v8 = vor.u32 %v9335_v14, %v7936_v0  ;;  %4346 = vmatpush.bf16.msrb.mxu0 %v7945_v32  ;;  %v11508_v44 = vsub.s32 %v11221_v42, %v2569_v12  ;;  %v14908_v14 = vld [vmem:[#allocation11_spill] sm:$0xff] }
 0x202   : > { %v2355_v46 = vadd.f32 %v2230_v28, %v14901_v62  ;;  %v2378_v24 = vadd.f32 %v11301_v40, %v2352_v33  ;;  %v9297_v33 = vld [vmem:[%s14786_s3 + $0x324] sm:$0xf0]  ;;  %v2592_v62 = vsel %vm2591_vm11, 1, %v11127_v56  ;;  %v11512_v2 = vadd.f32 %v11185_v43, %v11370_v18 }
 0x203   : > { %4281 = vmatpush.bf16.msrb.mxu2 %v7793_v11  ;;  %v2260_v28 = vpop.f32.mrf.mxu3  ;;  %v7785_v3 = vor.u32 %v9297_v33, %v7784_v15  ;;  %v2399_v11 = vmax.f32 %v2379_v38, 0.0  ;;  %4380 = vmatpush.bf16.msrb.mxu1 %v8009_v61  ;;  %v2594_v59 = vadd.s32 %v2592_v62, %v2590_v22  ;;  %vm11521_vm14 = vcmp.lt.s32.totalorder %v2760_v48, 8  ;;  %v7848_v61 = vld [vmem:[%s14786_s3 + $0x3a0] sm:$0xf] }
 0x204   : > { %v2398_v31 = vmax.f32 %v2378_v24, 0.0  ;;  %v2295_v37 = vadd.f32 %v11372_v23, %v2260_v28  ;;  %v11492_v60 = vadd.f32 %v11256_v9, %v2355_v46  ;;  %v2586_v23 = vshrl.u32 %v11410_v34, 16  ;;  %v9351_v24 = vld [vmem:[%s14786_s3 + $0x4d4] sm:$0xf0] }
 0x205   : > { %v11516_v34 = vadd.f32 %v11228_v49, %v11200_v29  ;;  %v2761_v43 = vsel %vm11498_vm15, %v11435_v19, %v11386_v47  ;;  %4347 = vmatpush.bf16.msrb.mxu0 %v7937_v8  ;;  %v2595_v42 = vadd.s32 %v2594_v59, %v2584_v21  ;;  %v8000_v19 = vld [vmem:[%s14786_s3 + $0x4d0] sm:$0xf]  ;;  %vm2722_vm1 = vcmp.ne.s32.totalorder %v11508_v44, 0  ;;  %v9313_v8 = vld [vmem:[%s14786_s3 + $0x3a4] sm:$0xf0] }
 0x206   : > { %v2799_v55 = vsel %vm11297_vm7, %v2398_v31, 0.0  ;;  %v2329_v38 = vadd.f32 %v11388_v52, %v2295_v37  ;;  %vm11531_vm7 = vmand %vm2945_vm12, %vm2946_vm0  ;;  %v2401_v47 = vmax.f32 %v11492_v60, 0.0  ;;  %v8001_v28 = vor.u32 %v9351_v24, %v8000_v19  ;;  %v2949_v21 = vld [vmem:[#allocation4] sm:$0xee] }
 0x207   : > { %v2231_v46 = vpop.f32.mrf.mxu2  ;;  %4282 = vmatpush.bf16.msrb.mxu2 %v7785_v3  ;;  %v2818_v1 = vpack.c.bf16 %v2799_v55, %v11415_v5  ;;  %v2596_v48 = vadd.s32 %v2595_v42, %v2586_v23  ;;  %vm2948_vm6 = vmor %vm11531_vm7, %vm9737_vm9  ;;  %vm2732_vm12 = vcmp.lt.s32.totalorder %v11508_v44, 0  ;;  %vm11561_vm0 = vcmp.lt.s32.totalorder %v2761_v43, 8  ;;  %v7992_v42 = vld [vmem:[%s14786_s3 + $0x4c0] sm:$0xf]  ;;  %v14915_v19 = vld [vmem:[#allocation16_spill] sm:$0xff] }
 0x208   : > { %v2232_v7 = vadd.f32 %v2231_v46, %v11254_v10  ;;  %v2354_v52 = vadd.f32 %v2329_v38, %v11271_v17  ;;  %v2800_v10 = vsel %vm11419_vm3, %v2399_v11, 0.0  ;;  %v11538_v17 = vadd.s32 48, %v11113_v58  ;;  %4381 = vmatpush.bf16.msrb.mxu1 %v8001_v28  ;;  %v7928_v38 = vld [vmem:[%s14786_s3 + $0x440] sm:$0xf]  ;;  %v9333_v46 = vld [vmem:[%s14786_s3 + $0x444] sm:$0xf0] }
 0x209   : > { %v2836_v18 = vshrl.u32 %v2818_v1, 16  ;;  %v2839_v29 = vshll.u32 %v2818_v1, 16  ;;  %v2597_v31 = vshrl.u32 %v2596_v48, 3  ;;  %v2299_v3 = vpop.f32.mrf.mxu0  ;;  %v11566_v60 = vadd.s32 10, %v11508_v44  ;;  %v14927_v11 = vld [vmem:[#allocation19_spill] sm:$0xff] }
 0x20a   : > { %v2380_v5 = vadd.f32 %v11301_v40, %v2354_v52  ;;  %v2357_v22 = vadd.f32 %v2232_v7, %v14908_v14  ;;  %v2605_v54 = vand.u32 65535, %v11538_v17  ;;  %v11570_v23 = vadd.s32 56, %v11113_v58  ;;  %v2333_v52 = vpop.f32.mrf.mxu1 }
 0x20b   : > { %v2838_v32 = vrot.slane %v2836_v18, 6  ;;  %v2841_v63 = vrot.slane %v2839_v29, 7  ;;  %v2263_v0 = vpop.f32.mrf.mxu3  ;;  %v2598_v59 = vmul.u32 10, %v2597_v31  ;;  %v7849_v1 = vor.u32 %v9313_v8, %v7848_v61  ;;  %v9349_v18 = vld [vmem:[%s14786_s3 + $0x4c4] sm:$0xf0]  ;;  %v14916_v61 = vld [vmem:[#allocation12_spill] sm:$0xff] }
 0x20c   : > { %v2400_v15 = vmax.f32 %v2380_v5, 0.0  ;;  %v2298_v33 = vadd.f32 %v2297_v26, %v2263_v0  ;;  %v2606_v29 = vshrl.u32 %v11538_v17, 16  ;;  %v7929_v48 = vor.u32 %v9333_v46, %v7928_v38 }
 0x20d   : > { %v2842_v37 = vor.u32 %v2841_v63, %v2838_v32  ;;  %v7993_v32 = vor.u32 %v9349_v18, %v7992_v42  ;;  %v2802_v14 = vsel %vm11521_vm14, %v2401_v47, 0.0  ;;  %4316 = vmatpush.bf16.msrb.mxu3 %v7849_v1  ;;  %v11620_v47 = vmul.u32 52428, %v2605_v54  ;;  %v7810_v42 = vld [vmem:[%s14786_s3 + $0x358] sm:$0xf0] }
 0x20e   : > { %v2801_v26 = vsel %vm11419_vm3, %v2400_v15, 0.0  ;;  %v2332_v62 = vadd.f32 %v2331_v53, %v2298_v33  ;;  %v2383_v53 = vadd.f32 %v11256_v9, %v2357_v22  ;;  %vm11590_vm3 = vmand %vm2732_vm12, %vm2722_vm1  ;;  %v11606_v22 = vsub.s32 %v11268_v39, %v2598_v59  ;;  %4348 = vmatpush.bf16.msrb.mxu0 %v7929_v48  ;;  %v7920_v15 = vld [vmem:[%s14786_s3 + $0x430] sm:$0xf]  ;;  %v9331_v39 = vld [vmem:[%s14786_s3 + $0x434] sm:$0xf0] }
 0x20f   : > { %v2234_v55 = vpop.f32.mrf.mxu2  ;;  %v2950_v7 = vsel %vm2948_vm6, %v2842_v37, %v2949_v21  ;;  %v2819_v45 = vpack.c.bf16 %v2801_v26, %v2800_v10  ;;  %v14914_v10 = vld [vmem:[#allocation17_spill] sm:$0xff]  ;;  %v2762_v21 = vsel %vm11590_vm3, %v11566_v60, %v11508_v44  ;;  %4382 = vmatpush.bf16.msrb.mxu1 %v7993_v32  ;;  %v2843_v38 = vrot.slane %v2842_v37, 4  ;;  %v14928_v48 = vld [vmem:[#allocation18_spill] sm:$0xff] }
 0x210   : > { %2951 = vst [vmem:[#allocation4] sm:$0xee] %v2950_v7  ;;  %v2356_v5 = vadd.f32 %v2332_v62, %v14914_v10  ;;  %v2235_v24 = vadd.f32 %v2234_v55, %v14915_v19  ;;  %v2403_v26 = vmax.f32 %v2383_v53, 0.0  ;;  %v2608_v55 = vmul.u32 52429, %v2605_v54 }
 0x211   : > { %v2845_v63 = vshrl.u32 %v2819_v45, 16  ;;  %v2848_v0 = vshll.u32 %v2819_v45, 16  ;;  %v11622_v60 = vmul.u32 52429, %v2606_v29  ;;  %vm2723_vm5 = vcmp.ne.s32.totalorder %v11606_v22, 0  ;;  %v2302_v10 = vpop.f32.mrf.mxu0 }
 0x212   : > { %v2382_v28 = vadd.f32 %v11301_v40, %v2356_v5  ;;  %v2359_v8 = vadd.f32 %v2235_v24, %v14916_v61  ;;  %vm2733_vm11 = vcmp.lt.s32.totalorder %v11606_v22, 0  ;;  %v7921_v1 = vor.u32 %v9331_v39, %v7920_v15  ;;  %v7984_v15 = vld [vmem:[%s14786_s3 + $0x4b0] sm:$0xf]  ;;  %v9347_v39 = vld [vmem:[%s14786_s3 + $0x4b4] sm:$0xf0] }
 0x213   : > { %v2847_v33 = vrot.slane %v2845_v63, 6  ;;  %v2850_v31 = vrot.slane %v2848_v0, 7  ;;  %v2265_v62 = vpop.f32.mrf.mxu3  ;;  %v2612_v54 = vshll.u32 %v11620_v47, 16  ;;  %v2753_v19 = vadd.s32 10, %v11606_v22  ;;  %v2336_v0 = vpop.f32.mrf.mxu1 }
 0x214   : > { %v2402_v46 = vmax.f32 %v2382_v28, 0.0  ;;  %v2300_v44 = vadd.f32 %v2299_v3, %v2265_v62  ;;  %v2385_v43 = vadd.f32 %v11256_v9, %v2359_v8  ;;  %4349 = vmatpush.bf16.msrb.mxu0 %v7921_v1  ;;  %v2804_v41 = vsel %vm11561_vm0, %v2403_v26, 0.0 }
 0x215   : > { %v2851_v59 = vor.u32 %v2850_v31, %v2847_v33  ;;  %vm11639_vm15 = vcmp.lt.s32.totalorder %v2762_v21, 8  ;;  %v2613_v28 = vshrl.u32 %v11620_v47, 16  ;;  %v11656_v61 = vadd.f32 %v11213_v6, %v11190_v25 }
 0x216   : > { %v2803_v7 = vsel %vm11521_vm14, %v2402_v46, 0.0  ;;  %v2334_v45 = vadd.f32 %v2333_v52, %v2300_v44  ;;  %vm11647_vm14 = vmand %vm2733_vm11, %vm2723_vm5  ;;  %v2614_v21 = vshll.u32 %v11622_v60, 16  ;;  %vm11661_vm1 = vc.u32 %v2608_v55, %v2612_v54 }
 0x217   : > { %v2236_v53 = vpop.f32.mrf.mxu2  ;;  %v2969_v37 = vld [vmem:[#allocation4] sm:$0xff]  ;;  %v11632_v3 = vsel %vm9698_vm4, %v2843_v38, %v2851_v59  ;;  %v2820_v18 = vpack.c.bf16 %v2803_v7, %v2802_v14  ;;  %v14922_v14 = vld [vmem:[#allocation13_spill] sm:$0xff]  ;;  %v2405_v47 = vmax.f32 %v2385_v43, 0.0  ;;  %v2763_v31 = vsel %vm11647_vm14, %v2753_v19, %v11606_v22 }
 0x218   : > { %v2237_v5 = vadd.f32 %v2236_v53, %v11328_v13  ;;  %2980 = vst [vmem:[#allocation5 + $0x18] sm:$0xff] %v2969_v37  ;;  %v2358_v52 = vadd.f32 %v2334_v45, %v11350_v30  ;;  %v2611_v13 = vmul.u32 52428, %v2606_v29  ;;  %v11674_v26 = vld [vmem:[#allocation4] sm:$0xee]  ;;  %v2617_v46 = vsel %vm11661_vm1, 1, %v11127_v56 }
 0x219   : > { %2952 = vst [vmem:[#allocation4 + $0x58] sm:$0xff] %v11632_v3  ;;  %v2855_v32 = vshrl.u32 %v2820_v18, 16  ;;  %v2858_v63 = vshll.u32 %v2820_v18, 16  ;;  %v2618_v44 = vadd.s32 %v2612_v54, %v2608_v55  ;;  %v2853_v1 = vrot.slane %v2851_v59, 4  ;;  %v7776_v29 = vld [vmem:[%s14786_s3 + $0x310] sm:$0xf] }
 0x21a   : > { %v2361_v30 = vadd.f32 %v2237_v5, %v14922_v14  ;;  %2981 = vst [vmem:[#allocation5 + $0x30] sm:$0xff] %v11632_v3  ;;  %v2384_v8 = vadd.f32 %v11301_v40, %v2358_v52  ;;  %v7985_v53 = vor.u32 %v9347_v39, %v7984_v15  ;;  %v3014_v43 = vrot.slane %v11632_v3, 5  ;;  %v14931_v15 = vld [vmem:[#allocation14_spill] sm:$0xff] }
 0x21b   : > { %v2857_v25 = vrot.slane %v2855_v32, 6  ;;  %v2860_v6 = vrot.slane %v2858_v63, 7  ;;  %v2268_v33 = vpop.f32.mrf.mxu3  ;;  %vm11683_vm12 = vc.u32 %v2618_v44, %v2614_v21  ;;  %v2619_v54 = vadd.s32 %v2617_v46, %v2611_v13 }
 0x21c   : > { %v2404_v62 = vmax.f32 %v2384_v8, 0.0  ;;  %v2303_v38 = vadd.f32 %v2302_v10, %v2268_v33  ;;  %v2387_v45 = vadd.f32 %v11256_v9, %v2361_v30  ;;  %4383 = vmatpush.bf16.msrb.mxu1 %v7985_v53  ;;  %v2806_v19 = vsel %vm11639_vm15, %v2405_v47, 0.0  ;;  %v2304_v30 = vpop.f32.mrf.mxu0  ;;  %v2338_v47 = vpop.f32.mrf.mxu1 }
 0x21d   : > { %v2861_v7 = vor.u32 %v2860_v6, %v2857_v25  ;;  %v2634_v63 = vand.u32 65535, %v11570_v23  ;;  %v11703_v13 = vrot.slane %v3014_v43, 4 }
 0x21e   : > { %v2805_v37 = vsel %vm11561_vm0, %v2404_v62, 0.0  ;;  %v2337_v22 = vadd.f32 %v2336_v0, %v2303_v38  ;;  %v2407_v8 = vmax.f32 %v2387_v45, 0.0  ;;  %vm11706_vm0 = vcmp.lt.s32.totalorder %v2763_v31, 8 }
 0x21f   : > { %v2239_v18 = vpop.f32.mrf.mxu2  ;;  %v11690_v55 = vsel %vm9698_vm4, %v2853_v1, %v2861_v7  ;;  %v2821_v59 = vpack.c.bf16 %v2805_v37, %v2804_v41  ;;  %v2621_v41 = vsel %vm11683_vm12, 1, %v11127_v56  ;;  %v2615_v62 = vshrl.u32 %v11622_v60, 16 }
 0x220   : > { %v2360_v52 = vadd.f32 %v2337_v22, %v14927_v11  ;;  %v2240_v32 = vadd.f32 %v2239_v18, %v14928_v48  ;;  %2982 = vst [vmem:[#allocation5 + $0x48] sm:$0xff] %v11690_v55  ;;  %v2623_v38 = vadd.s32 %v2621_v41, %v2619_v54  ;;  %v2635_v1 = vshrl.u32 %v11570_v23, 16 }
 0x221   : > { %v2865_v0 = vshrl.u32 %v2821_v59, 16  ;;  %v2868_v14 = vshll.u32 %v2821_v59, 16  ;;  %v11713_v45 = vmul.u32 52428, %v2634_v63  ;;  %v2863_v53 = vrot.slane %v2861_v7, 4 }
 0x222   : > { %v2386_v21 = vadd.f32 %v11301_v40, %v2360_v52  ;;  %v2363_v39 = vadd.f32 %v2240_v32, %v14931_v15  ;;  %v2808_v37 = vsel %vm11706_vm0, %v2407_v8, 0.0  ;;  %v2624_v22 = vadd.s32 %v2623_v38, %v2613_v28 }
 0x223   : > { %v2867_v25 = vrot.slane %v2865_v0, 6  ;;  %v2870_v6 = vrot.slane %v2868_v14, 7  ;;  %v2270_v33 = vpop.f32.mrf.mxu3  ;;  %v14806_v18 = vrot.slane %v11690_v55, 5  ;;  %v2637_v52 = vmul.u32 52429, %v2634_v63 }
 0x224   : > { %v2406_v46 = vmax.f32 %v2386_v21, 0.0  ;;  %v2305_v44 = vadd.f32 %v2304_v30, %v2270_v33  ;;  %v11721_v60 = vadd.f32 %v11256_v9, %v2363_v39  ;;  %v2625_v7 = vadd.s32 %v2624_v22, %v2615_v62 }
 0x225   : > { %v2871_v31 = vor.u32 %v2870_v6, %v2867_v25  ;;  %v11729_v0 = vmul.u32 52429, %v2635_v1  ;;  %v2641_v24 = vshll.u32 %v11713_v45, 16  ;;  %v2640_v63 = vmul.u32 52428, %v2635_v1  ;;  %v2307_v25 = vpop.f32.mrf.mxu0 }
 0x226   : > { %v2807_v5 = vsel %vm11639_vm15, %v2406_v46, 0.0  ;;  %v2339_v59 = vadd.f32 %v2338_v47, %v2305_v44  ;;  %v2626_v41 = vshrl.u32 %v2625_v7, 3  ;;  %v2642_v44 = vshrl.u32 %v11713_v45, 16 }
 0x227   : > { %v11725_v54 = vsel %vm9698_vm4, %v2863_v53, %v2871_v31  ;;  %v2822_v11 = vpack.c.bf16 %v2807_v5, %v2806_v19  ;;  %v2241_v32 = vpop.f32.mrf.mxu2  ;;  %v2873_v21 = vrot.slane %v2871_v31, 4  ;;  %v2409_v19 = vmax.f32 %v11721_v60, 0.0  ;;  %v2341_v31 = vpop.f32.mrf.mxu1 }
 0x228   : > { %v14805_v48 = vrot.slane %v11725_v54, 5  ;;  %v2362_v28 = vadd.f32 %v2339_v59, %v11366_v51  ;;  %v14801_v14 = vrot.slane %v11725_v54, 6  ;;  %2983 = vst [vmem:[#allocation5 + $0x60] sm:$0xff] %v11725_v54  ;;  %v2627_v6 = vmul.u32 10, %v2626_v41 }
 0x229   : > { %v2875_v30 = vshrl.u32 %v2822_v11, 16  ;;  %v2878_v8 = vshll.u32 %v2822_v11, 16  ;;  %v2242_v33 = vadd.f32 %v2241_v32, %v11354_v4  ;;  %vm11745_vm3 = vc.u32 %v2637_v52, %v2641_v24 }
 0x22a   : > { %v2388_v15 = vadd.f32 %v11301_v40, %v2362_v28  ;;  %v3022_v62 = vrot.slane %v14805_v48, 4  ;;  %v3095_v53 = vrot.slane %v14801_v14, 4  ;;  %v2628_v22 = vsub.s32 %v11538_v17, %v2627_v6 }
 0x22b   : > { %v2877_v39 = vrot.slane %v2875_v30, 6  ;;  %v2880_v51 = vrot.slane %v2878_v8, 7  ;;  %v2273_v47 = vpop.f32.mrf.mxu3  ;;  %v2643_v11 = vshll.u32 %v11729_v0, 16  ;;  %v2647_v7 = vadd.s32 %v2641_v24, %v2637_v52  ;;  %v9295_v30 = vld [vmem:[%s14786_s3 + $0x314] sm:$0xf0] }
 0x22c   : > { %v2408_v38 = vmax.f32 %v2388_v15, 0.0  ;;  %v2308_v46 = vadd.f32 %v2307_v25, %v2273_v47  ;;  %vm2724_vm5 = vcmp.ne.s32.totalorder %v2628_v22, 0  ;;  %v2646_v17 = vsel %vm11745_vm3, 1, %v11127_v56  ;;  %v7912_v52 = vld [vmem:[%s14786_s3 + $0x420] sm:$0xf] }
 0x22d   : > { %v11742_v1 = vor.u32 %v2880_v51, %v2877_v39  ;;  %vm2734_vm11 = vcmp.lt.s32.totalorder %v2628_v22, 0  ;;  %v2754_v8 = vadd.s32 10, %v2628_v22  ;;  %v2365_v39 = vadd.f32 %v2242_v33, %v11207_v57  ;;  %v9329_v51 = vld [vmem:[%s14786_s3 + $0x424] sm:$0xf0]  ;;  %v7840_v25 = vld [vmem:[%s14786_s3 + $0x390] sm:$0xf] }
 0x22e   : > { %v2809_v4 = vsel %vm11706_vm0, %v2408_v38, 0.0  ;;  %v2342_v59 = vadd.f32 %v2341_v31, %v2308_v46  ;;  %vm11772_vm15 = vmand %vm2734_vm11, %vm2724_vm5  ;;  %v2644_v57 = vshrl.u32 %v11729_v0, 16  ;;  %v2648_v33 = vadd.s32 %v2646_v17, %v2640_v63  ;;  %v9311_v46 = vld [vmem:[%s14786_s3 + $0x394] sm:$0xf0]  ;;  %v7976_v31 = vld [vmem:[%s14786_s3 + $0x4a0] sm:$0xf] }
 0x22f   : > { %v11755_v28 = vsel %vm9698_vm4, %v2873_v21, %v11742_v1  ;;  %v2823_v32 = vpack.c.bf16 %v2809_v4, %v2808_v37  ;;  %v9345_v0 = vld [vmem:[%s14786_s3 + $0x4a4] sm:$0xf0]  ;;  %vm2649_vm1 = vc.u32 %v2647_v7, %v2643_v11  ;;  %v14940_v63 = vld [vmem:[#allocation20_spill] sm:$0xff]  ;;  %v9332_v38 = vld [vmem:[%s14786_s3 + $0x444] sm:$0xf] }
 0x230   : > { %v3023_v24 = vrot.slane %v11755_v28, 5  ;;  %v14803_v37 = vrot.slane %v11755_v28, 6  ;;  %2984 = vst [vmem:[#allocation5 + $0x78] sm:$0xff] %v11755_v28  ;;  %v2364_v15 = vadd.f32 %v2342_v59, %v11165_v50 }
 0x231   : > { %v2885_v56 = vshrl.u32 %v2823_v32, 16  ;;  %v2888_v41 = vshll.u32 %v2823_v32, 16  ;;  %v7913_v32 = vor.u32 %v9329_v51, %v7912_v52  ;;  %v7841_v52 = vor.u32 %v9311_v46, %v7840_v25 }
 0x232   : > { %v3024_v47 = vsel %vm9752_vm10, %v3022_v62, %v3023_v24  ;;  %v3097_v50 = vsel %vm10006_vm13, %v3095_v53, %v14803_v37  ;;  %v2764_v62 = vsel %vm11772_vm15, %v2754_v8, %v2628_v22  ;;  %v2390_v59 = vadd.f32 %v11301_v40, %v2364_v15  ;;  %v9293_v22 = vld [vmem:[%s14786_s3 + $0x304] sm:$0xf0]  ;;  %v11815_v8 = vld [vmem:[#allocation4 + $0x58] sm:$0xcc] }
 0x233   : > { %3058 = vst [vmem:[#allocation5 + $0x50] sm:$0xff] %v3024_v47  ;;  %v2887_v5 = vrot.slane %v2885_v56, 6  ;;  %v2890_v4 = vrot.slane %v2888_v41, 7  ;;  %vm11805_vm14 = vcmp.lt.s32.totalorder %v2764_v62, 8  ;;  %v7777_v53 = vor.u32 %v9295_v30, %v7776_v29  ;;  %v2275_v17 = vpop.f32.mrf.mxu3  ;;  %v7768_v56 = vld [vmem:[%s14786_s3 + $0x300] sm:$0xf]  ;;  %v2309_v29 = vpop.f32.mrf.mxu0  ;;  %4350 = vmatpush.bf16.msrb.mxu0 %v7913_v32  ;;  %4317 = vmatpush.bf16.msrb.mxu3 %v7841_v52 }
 0x234   : > { %3133 = vst [vmem:[#allocation5 + $0x40] sm:$0xff] %v3097_v50  ;;  %v2883_v41 = vrot.slane %v11742_v1, 4  ;;  %v2410_v15 = vmax.f32 %v2390_v59, 0.0  ;;  %v11818_v47 = vld [vmem:[#allocation4 + $0x30] sm:$0xff]  ;;  %v2810_v7 = vsel %vm11805_vm14, %v2409_v19, 0.0  ;;  %v7977_v51 = vor.u32 %v9345_v0, %v7976_v31  ;;  %v2343_v62 = vpop.f32.mrf.mxu1 }
 0x235   : > { %v2891_v21 = vor.u32 %v2890_v4, %v2887_v5  ;;  %v2650_v11 = vsel %vm2649_vm1, 1, %v11818_v47  ;;  %4283 = vmatpush.bf16.msrb.mxu2 %v7777_v53  ;;  %v7832_v1 = vld [vmem:[%s14786_s3 + $0x380] sm:$0xf]  ;;  %v9309_v50 = vld [vmem:[%s14786_s3 + $0x384] sm:$0xf0]  ;;  %v2244_v5 = vpop.f32.mrf.mxu2  ;;  %v11838_v25 = vadd.s32 64, %v11113_v58  ;;  %v7769_v53 = vor.u32 %v9293_v22, %v7768_v56 }
 0x236   : > { %v2652_v30 = vadd.s32 %v2650_v11, %v2648_v33  ;;  %v2811_v19 = vsel %vm11805_vm14, %v2410_v15, 0.0  ;;  %v2310_v33 = vadd.f32 %v2309_v29, %v2275_v17  ;;  %v14802_v31 = vrot.slane %v11690_v55, 6  ;;  %4384 = vmatpush.bf16.msrb.mxu1 %v7977_v51  ;;  %v14941_v29 = vld [vmem:[#allocation15_spill] sm:$0xff] }
 0x237   : > { %v11833_v60 = vsel %vm9698_vm4, %v2883_v41, %v2891_v21  ;;  %v2824_v4 = vpack.c.bf16 %v2811_v19, %v2810_v7  ;;  %v7833_v32 = vor.u32 %v9309_v50, %v7832_v1  ;;  %v2245_v41 = vadd.f32 %v2244_v5, %v14940_v63  ;;  %v11857_v50 = vld [vmem:[#allocation5 + $0x18] sm:$0xff] }
 0x238   : > { %v2653_v59 = vadd.s32 %v2652_v30, %v2642_v44  ;;  %v2344_v0 = vadd.f32 %v2343_v62, %v2310_v33  ;;  %2985 = vst [vmem:[#allocation5 + $0x90] sm:$0xff] %v11833_v60  ;;  %v11848_v17 = vrot.slane %v14806_v18, 4  ;;  %v11851_v7 = vadd.f32 %v11256_v9, %v2365_v39 }
 0x239   : > { %v2895_v15 = vshrl.u32 %v2824_v4, 16  ;;  %v2898_v11 = vshll.u32 %v2824_v4, 16  ;;  %4284 = vmatpush.bf16.msrb.mxu2 %v7769_v53  ;;  %v2367_v56 = vadd.f32 %v2245_v41, %v14941_v29  ;;  %v2663_v22 = vand.u32 65535, %v11838_v25  ;;  %4318 = vmatpush.bf16.msrb.mxu3 %v7833_v32  ;;  %14942 = vst [vmem:[#allocation10_spill] sm:$0xff] %v11857_v50  ;;  %v9175_v29 = vld [vmem:[#allocation5 + $0x44] sm:$0xf0] }
 0x23a   : > { %v2654_v45 = vadd.s32 %v2653_v59, %v2644_v57  ;;  %v2366_v44 = vadd.f32 %v2344_v0, %v11512_v2  ;;  %v2893_v30 = vrot.slane %v2891_v21, 4  ;;  %v2664_v1 = vshrl.u32 %v11838_v25, 16 }
 0x23b   : > { %v2897_v52 = vrot.slane %v2895_v15, 6  ;;  %v2900_v51 = vrot.slane %v2898_v11, 7  ;;  %v11861_v57 = vadd.f32 %v11256_v9, %v2367_v56  ;;  %v3401_v2 = vunpack.c.l.b16 %v11818_v47  ;;  %v2312_v14 = vpop.f32.mrf.mxu0 }
 0x23c   : > { %v2655_v5 = vshrl.u32 %v2654_v45, 3  ;;  %v2392_v39 = vadd.f32 %v11301_v40, %v2366_v44  ;;  %v2666_v33 = vmul.u32 52429, %v2663_v22  ;;  %v2667_v4 = vmul.u32 52428, %v2663_v22 }
 0x23d   : > { %v11864_v19 = vor.u32 %v2900_v51, %v2897_v52  ;;  %v11866_v21 = vmul.u32 52429, %v2664_v1  ;;  %v11870_v62 = vrot.slane %v14802_v31, 4  ;;  %v2411_v59 = vmax.f32 %v11851_v7, 0.0  ;;  %v7672_v52 = vld [vmem:[#allocation5 + $0x30] sm:$0xf] }
 0x23e   : > { %v2656_v0 = vmul.u32 10, %v2655_v5  ;;  %v14800_v53 = vunpack.c.l.b16 %v11857_v50  ;;  %v11876_v32 = vrot.slane %v3023_v24, 4  ;;  %v2670_v15 = vshll.u32 %v2667_v4, 16  ;;  %v9172_v31 = vld [vmem:[#allocation5 + $0x34] sm:$0xf] }
 0x23f   : > { %v11882_v41 = vsel %vm9698_vm4, %v2893_v30, %v11864_v19  ;;  %v2412_v45 = vmax.f32 %v2392_v39, 0.0  ;;  %v2669_v44 = vmul.u32 52428, %v2664_v1  ;;  %v2672_v7 = vshll.u32 %v11866_v21, 16 }
 0x240   : > { %v2657_v11 = vsub.s32 %v11570_v23, %v2656_v0  ;;  %2986 = vst [vmem:[#allocation5 + $0xa8] sm:$0xff] %v11882_v41  ;;  %v2413_v24 = vmax.f32 %v11861_v57, 0.0  ;;  %vm2674_vm12 = vc.u32 %v2666_v33, %v2670_v15  ;;  %v2676_v56 = vadd.s32 %v2670_v15, %v2666_v33  ;;  %v7674_v33 = vld [vmem:[#allocation5 + $0x48] sm:$0xf0]  ;;  %v2278_v0 = vpop.f32.mrf.mxu3 }
 0x241   : > { %v11890_v22 = vpack.c.b16 %v14800_v53, %v3401_v2  ;;  %v2671_v30 = vshrl.u32 %v2667_v4, 16  ;;  %v2673_v23 = vshrl.u32 %v11866_v21, 16  ;;  %v2675_v5 = vsel %vm2674_vm12, 1, %v11818_v47 }
 0x242   : > { %vm2725_vm0 = vcmp.ne.s32.totalorder %v2657_v11, 0  ;;  %vm2735_vm3 = vcmp.lt.s32.totalorder %v2657_v11, 0  ;;  %v2755_v1 = vadd.s32 10, %v2657_v11  ;;  %vm2678_vm11 = vc.u32 %v2676_v56, %v2672_v7 }
 0x243   : > { %vm11893_vm5 = vmand %vm2735_vm3, %vm2725_vm0  ;;  %v11898_v39 = vor.u32 %v9175_v29, %v7672_v52  ;;  %v2677_v2 = vadd.s32 %v2675_v5, %v2669_v44  ;;  %v2679_v15 = vsel %vm2678_vm11, 1, %v11818_v47  ;;  %v3504_v4 = vshrl.u32 %v11890_v22, 16  ;;  %v7904_v5 = vld [vmem:[%s14786_s3 + $0x410] sm:$0xf] }
 0x244   : > { %v3506_v21 = vshll.u32 %v11890_v22, 16  ;;  %v2765_v53 = vsel %vm11893_vm5, %v2755_v1, %v2657_v11  ;;  %v3402_v7 = vunpack.c.h.b16 %v11818_v47  ;;  %v14804_v29 = vunpack.c.h.b16 %v11857_v50  ;;  %v9327_v11 = vld [vmem:[%s14786_s3 + $0x414] sm:$0xf0] }
 0x245   : > { %v3511_v46 = vshll.u32 %v11898_v39, 16  ;;  %vm2775_vm15 = vcmp.lt.s32.totalorder %v2765_v53, 8  ;;  %v2681_v56 = vadd.s32 %v2679_v15, %v2677_v2  ;;  %v11908_v52 = vor.u32 %v9172_v31, %v7674_v33  ;;  %v7968_v15 = vld [vmem:[%s14786_s3 + $0x490] sm:$0xf] }
 0x246   : > { %v3508_v44 = vrot.slane %v3506_v21, 1  ;;  %v2812_v51 = vsel %vm2775_vm15, %v2411_v59, 0.0  ;;  %v2813_v1 = vsel %vm2775_vm15, %v2412_v45, 0.0  ;;  %v11920_v37 = vpack.c.b16 %v14804_v29, %v3402_v7  ;;  %v9343_v59 = vld [vmem:[%s14786_s3 + $0x494] sm:$0xf0]  ;;  %v2346_v45 = vpop.f32.mrf.mxu1 }
 0x247   : > { %v11916_v63 = vrot.slane %v3511_v46, 1  ;;  %v2825_v53 = vpack.c.bf16 %v2813_v1, %v2812_v51  ;;  %v2682_v2 = vadd.s32 %v2681_v56, %v2671_v30  ;;  %v3523_v33 = vshll.u32 %v11908_v52, 16  ;;  %v2246_v51 = vpop.f32.mrf.mxu2 }
 0x248   : > { %v3509_v31 = vor.u32 %v3508_v44, %v3504_v4  ;;  %v3516_v46 = vshrl.u32 %v11920_v37, 16  ;;  %v3518_v21 = vshll.u32 %v11920_v37, 16  ;;  %v7905_v7 = vor.u32 %v9327_v11, %v7904_v5 }
 0x249   : > { %v2313_v29 = vadd.f32 %v2312_v14, %v2278_v0  ;;  %v2905_v30 = vshrl.u32 %v2825_v53, 16  ;;  %v2908_v4 = vshll.u32 %v2825_v53, 16  ;;  %v2683_v56 = vadd.s32 %v2682_v2, %v2673_v23  ;;  %v7896_v14 = vld [vmem:[%s14786_s3 + $0x400] sm:$0xf]  ;;  %v9325_v23 = vld [vmem:[%s14786_s3 + $0x404] sm:$0xf0] }
 0x24a   : > { %vm14945_vm14 = vsmask.f32 7424  ;;  %v3520_v1 = vrot.slane %v3518_v21, 1  ;;  %v11936_v48 = vrot.slane %v3523_v33, 1  ;;  %4351 = vmatpush.bf16.msrb.mxu0 %v7905_v7  ;;  %v7969_v10 = vor.u32 %v9343_v59, %v7968_v15  ;;  %v2280_v15 = vpop.f32.mrf.mxu3 }
 0x24b   : > { %v11933_v44 = vsel %vm14945_vm14, %v3509_v31, %v11916_v63  ;;  %v2347_v18 = vadd.f32 %v2346_v45, %v2313_v29  ;;  %v2907_v0 = vrot.slane %v2905_v30, 6  ;;  %v2910_v5 = vrot.slane %v2908_v4, 7  ;;  %vm14946_vm1 = vmmov %vm14945_vm14 }
 0x24c   : > { %4285 = vmatmul.bf16.vlgmr.msrb.gmra.mxu2 %v11933_v44  ;;  %v2684_v11 = vshrl.u32 %v2683_v56, 3  ;;  %v2247_v53 = vadd.f32 %v2246_v51, %v11516_v34  ;;  %v2903_v2 = vrot.slane %v11864_v19, 4  ;;  %v3521_v31 = vor.u32 %v3520_v1, %v3516_v46  ;;  %4385 = vmatpush.bf16.msrb.mxu1 %v7969_v10  ;;  %v2314_v19 = vpop.f32.mrf.mxu0  ;;  %v7960_v56 = vld [vmem:[%s14786_s3 + $0x480] sm:$0xf]  ;;  %v9341_v1 = vld [vmem:[%s14786_s3 + $0x484] sm:$0xf0]  ;;  %vm14951_vm14 = vmmov %vm14946_vm1 }
 0x24d   : > { %v2368_v33 = vadd.f32 %v2347_v18, %v11241_v35  ;;  %v11948_v29 = vadd.s32 72, %v11113_v58  ;;  %v11950_v59 = vor.u32 %v2910_v5, %v2907_v0  ;;  %v7897_v7 = vor.u32 %v9325_v23, %v7896_v14  ;;  %vm14978_vm9 = vmmov %vm14946_vm1 }
 0x24e   : > { %v2685_v45 = vmul.u32 10, %v2684_v11  ;;  %v2369_v21 = vadd.f32 %v2247_v53, %v11224_v27  ;;  %v11955_v30 = vsel %vm14946_vm1, %v3521_v31, %v11936_v48  ;;  %v2315_v46 = vadd.f32 %v2314_v19, %v2280_v15  ;;  %v2348_v23 = vpop.f32.mrf.mxu1  ;;  %vm14979_vm7 = vmmov %vm14946_vm1 }
 0x24f   : > { %v2394_v34 = vadd.f32 %v11301_v40, %v2368_v33  ;;  %v2692_v35 = vand.u32 65535, %v11948_v29  ;;  %v2693_v10 = vshrl.u32 %v11948_v29, 16  ;;  %v11964_v18 = vsel %vm9698_vm4, %v2903_v2, %v11950_v59  ;;  %4319 = vmatmul.bf16.vlgmr.msrb.gmra.mxu3 %v11955_v30  ;;  %4352 = vmatpush.bf16.msrb.mxu0 %v7897_v7  ;;  %v9181_v33 = vld [vmem:[#allocation5 + $0x74] sm:$0xf0] }
 0x250   : > { %v2686_v27 = vsub.s32 %v11838_v25, %v2685_v45  ;;  %v1797_v51 = vadd.f32 %v11307_v20, %v11656_v61  ;;  %2987 = vst [vmem:[#allocation5 + $0xc0] sm:$0xff] %v11964_v18  ;;  %v11979_v20 = vadd.f32 %v11256_v9, %v2369_v21  ;;  %v2349_v2 = vadd.f32 %v2348_v23, %v2315_v46  ;;  %v9178_v46 = vld [vmem:[#allocation5 + $0x64] sm:$0xf] }
 0x251   : > { %v2414_v14 = vmax.f32 %v2394_v34, 0.0  ;;  %v2695_v61 = vmul.u32 52429, %v2692_v35  ;;  %v2696_v0 = vmul.u32 52428, %v2692_v35  ;;  %v2697_v5 = vmul.u32 52429, %v2693_v10  ;;  %v7698_v34 = vld [vmem:[#allocation5 + $0x78] sm:$0xf0] }
 0x252   : > { %vm2726_vm12 = vcmp.ne.s32.totalorder %v2686_v27, 0  ;;  %vm2736_vm0 = vcmp.lt.s32.totalorder %v2686_v27, 0  ;;  %v2756_v25 = vadd.s32 10, %v2686_v27  ;;  %v7961_v31 = vor.u32 %v9341_v1, %v7960_v56  ;;  %v7696_v35 = vld [vmem:[#allocation5 + $0x60] sm:$0xf] }
 0x253   : > { %vm2746_vm3 = vmand %vm2736_vm0, %vm2726_vm12  ;;  %v2698_v15 = vmul.u32 52428, %v2693_v10  ;;  %v2699_v45 = vshll.u32 %v2696_v0, 16  ;;  %v2701_v7 = vshll.u32 %v2697_v5, 16  ;;  %v2700_v9 = vshrl.u32 %v2696_v0, 16 }
 0x254   : > { %v2766_v53 = vsel %vm2746_vm3, %v2756_v25, %v2686_v27  ;;  %v2370_v21 = vadd.f32 %v2349_v2, %v1797_v51  ;;  %4386 = vmatpush.bf16.msrb.mxu1 %v7961_v31  ;;  %v11984_v27 = vor.u32 %v9181_v33, %v7696_v35  ;;  %v2702_v56 = vshrl.u32 %v2697_v5, 16 }
 0x255   : > { %vm2776_vm5 = vcmp.lt.s32.totalorder %v2766_v53, 8  ;;  %vm2703_vm11 = vc.u32 %v2695_v61, %v2699_v45  ;;  %v2705_v11 = vadd.s32 %v2699_v45, %v2695_v61  ;;  %v3575_v1 = vshrl.u32 %v11898_v39, 16 }
 0x256   : > { %v2814_v19 = vsel %vm2776_vm5, %v2413_v24, 0.0  ;;  %v2815_v58 = vsel %vm2776_vm5, %v2414_v14, 0.0  ;;  %v2704_v10 = vsel %vm2703_vm11, 1, %v11818_v47  ;;  %v11988_v25 = vor.u32 %v9178_v46, %v7698_v34  ;;  %vm14964_vm11 = vmmov %vm14946_vm1 }
 0x257   : > { %v2826_v4 = vpack.c.bf16 %v2815_v58, %v2814_v19  ;;  %v2706_v14 = vadd.s32 %v2704_v10, %v2698_v15  ;;  %vm2707_vm15 = vc.u32 %v2705_v11, %v2701_v7  ;;  %v11992_v58 = vadd.f32 %v11301_v40, %v2370_v21 }
 0x258   : > { %v2708_v51 = vsel %vm2707_vm15, 1, %v11818_v47  ;;  %v3577_v23 = vor.u32 %v3575_v1, %v11916_v63  ;;  %v3579_v61 = vshll.u32 %v11984_v27, 16  ;;  %v3583_v2 = vshrl.u32 %v11908_v52, 16  ;;  %vm14965_vm15 = vmmov %vm14946_vm1 }
 0x259   : > { %v2915_v57 = vshrl.u32 %v2826_v4, 16  ;;  %v2918_v24 = vshll.u32 %v2826_v4, 16  ;;  %v2710_v53 = vadd.s32 %v2708_v51, %v2706_v14  ;;  %v3587_v4 = vshll.u32 %v11988_v25, 16 }
 0x25a   : > { %v11997_v31 = vrot.slane %v3579_v61, 1  ;;  %v14947_v47 = vrot.slane %v11674_v26, 9  ;;  %v14948_v63 = vrot.slane %v11690_v55, 5  ;;  %v3585_v45 = vor.u32 %v3583_v2, %v11936_v48 }
 0x25b   : > { %v2917_v0 = vrot.slane %v2915_v57, 6  ;;  %v2920_v5 = vrot.slane %v2918_v24, 7  ;;  %v2711_v15 = vadd.s32 %v2710_v53, %v2700_v9  ;;  %v14950_v7 = vrot.slane %v11725_v54, 5  ;;  %v9176_v53 = vld [vmem:[#allocation5 + $0x4c] sm:$0xf0] }
 0x25c   : > { %v3015_v40 = vsel %vm9752_vm10, %v14947_v47, %v3014_v43  ;;  %v12011_v11 = vsel %vm9752_vm10, %v11703_v13, %v14948_v63  ;;  %v12023_v26 = vsel %vm14951_vm14, %v3577_v23, %v11997_v31  ;;  %v12025_v43 = vrot.slane %v3587_v4, 1  ;;  %v7682_v47 = vld [vmem:[#allocation5 + $0x50] sm:$0xf0]  ;;  %vm14966_vm14 = vmmov %vm14946_vm1 }
 0x25d   : > { %14949 = vst [vmem:[#allocation11_spill] sm:$0xff] %v12011_v11  ;;  %v12013_v33 = vor.u32 %v2920_v5, %v2917_v0  ;;  %v3021_v3 = vsel %vm9752_vm10, %v11848_v17, %v14950_v7  ;;  %v3403_v13 = vunpack.c.l.b16 %v3015_v40  ;;  %v14810_v34 = vunpack.c.l.b16 %v12011_v11  ;;  %4290 = vmatmul.bf16.gmra.mxu2 %v12023_v26 }
 0x25e   : > { %3055 = vst [vmem:[#allocation5 + $0x8] sm:$0xff] %v3015_v40  ;;  %v14952_v19 = vrot.slane %v11755_v28, 6  ;;  %v3099_v48 = vrot.slane %v11833_v60, 6  ;;  %v14953_v21 = vrot.slane %v11950_v59, 4  ;;  %v2712_v35 = vadd.s32 %v2711_v15, %v2702_v56  ;;  %v8080_v15 = vld [vmem:[%s14786_s3 + $0x570] sm:$0xf] }
 0x25f   : > { %3057 = vst [vmem:[#allocation5 + $0x38] sm:$0xff] %v3021_v3  ;;  %v14954_v46 = vrot.slane %v11833_v60, 5  ;;  %v14955_v1 = vrot.slane %v11882_v41, 5  ;;  %v12045_v57 = vsel %vm14946_vm1, %v3585_v45, %v12025_v43  ;;  %v12049_v59 = vpack.c.b16 %v14810_v34, %v3403_v13  ;;  %v8144_v45 = vld [vmem:[%s14786_s3 + $0x5f0] sm:$0xf] }
 0x260   : > { %v3098_v9 = vrot.slane %v14952_v19, 4  ;;  %v12036_v17 = vsel %vm9698_vm4, %v14953_v21, %v12013_v33  ;;  %v2415_v56 = vmax.f32 %v11979_v20, 0.0  ;;  %v2713_v24 = vshrl.u32 %v2712_v35, 3  ;;  %4324 = vmatmul.bf16.gmra.mxu3 %v12045_v57 }
 0x261   : > { %v3028_v10 = vrot.slane %v14954_v46, 4  ;;  %v3031_v28 = vrot.slane %v14955_v1, 4  ;;  %2988 = vst [vmem:[#allocation5 + $0xd8] sm:$0xff] %v12036_v17  ;;  %v3404_v14 = vunpack.c.h.b16 %v3015_v40  ;;  %v14808_v51 = vunpack.c.h.b16 %v12011_v11  ;;  %v9387_v1 = vld [vmem:[%s14786_s3 + $0x5f4] sm:$0xf0] }
 0x262   : > { %v14956_v23 = vrot.slane %v11964_v18, 5  ;;  %v2923_v0 = vrot.slane %v12013_v33, 4  ;;  %v2416_v5 = vmax.f32 %v11992_v58, 0.0  ;;  %v3530_v2 = vshll.u32 %v12049_v59, 16  ;;  %v9371_v58 = vld [vmem:[%s14786_s3 + $0x574] sm:$0xf0] }
 0x263   : > { %v3035_v4 = vrot.slane %v12036_v17, 5  ;;  %v2714_v20 = vmul.u32 10, %v2713_v24  ;;  %v12065_v40 = vpack.c.b16 %v14808_v51, %v3404_v14  ;;  %v3623_v63 = vshrl.u32 %v11984_v27, 16 }
 0x264   : > { %v12057_v61 = vrot.slane %v14956_v23, 4  ;;  %v14957_v7 = vmov %v14954_v46  ;;  %v14958_v13 = vrot.slane %v11690_v55, 6  ;;  %v14959_v19 = vrot.slane %v11815_v8, 10 }
 0x265   : > { %v3027_v3 = vsel %vm9752_vm10, %v11876_v32, %v14957_v7  ;;  %v14960_v35 = vrot.slane %v11725_v54, 6  ;;  %v12101_v32 = vsel %vm10006_vm13, %v3098_v9, %v3099_v48  ;;  %v2715_v55 = vsub.s32 %v11948_v29, %v2714_v20 }
 0x266   : > { %v12088_v21 = vsel %vm10006_vm13, %v14959_v19, %v14958_v13  ;;  %v8081_v8 = vor.u32 %v9371_v58, %v8080_v15  ;;  %v3528_v54 = vshrl.u32 %v12049_v59, 16  ;;  %v3631_v24 = vshrl.u32 %v11988_v25, 16  ;;  %3059 = vst [vmem:[#allocation5 + $0x68] sm:$0xff] %v3027_v3  ;;  %v7680_v14 = vld [vmem:[#allocation5 + $0x38] sm:$0xf] }
 0x267   : > { %v12095_v46 = vsel %vm10006_vm13, %v11870_v62, %v14960_v35  ;;  %v8145_v62 = vor.u32 %v9387_v1, %v8144_v45  ;;  %v3532_v23 = vrot.slane %v3530_v2, 1  ;;  %v3542_v7 = vshll.u32 %v12065_v40, 16  ;;  %3131 = vst [vmem:[#allocation5 + $0x10] sm:$0xff] %v12088_v21  ;;  %v9173_v58 = vld [vmem:[#allocation5 + $0x3c] sm:$0xf] }
 0x268   : > { %14961 = vst [vmem:[#allocation7_spill] sm:$0xff] %v12095_v46  ;;  %v14962_v9 = vrot.slane %v11882_v41, 5  ;;  %vm2727_vm12 = vcmp.ne.s32.totalorder %v2715_v55, 0  ;;  %vm2737_vm0 = vcmp.lt.s32.totalorder %v2715_v55, 0  ;;  %v2757_v20 = vadd.s32 10, %v2715_v55  ;;  %4413 = vmatpush.bf16.msra.mxu2 %v8081_v8 }
 0x269   : > { %v12115_v15 = vor.u32 %v9176_v53, %v7680_v14  ;;  %vm2747_vm3 = vmand %vm2737_vm0, %vm2727_vm12  ;;  %4447 = vmatpush.bf16.msra.mxu3 %v8145_v62  ;;  %v12117_v2 = vor.u32 %v9173_v58, %v7682_v47  ;;  %v3544_v45 = vrot.slane %v3542_v7, 1  ;;  %v8072_v3 = vld [vmem:[%s14786_s3 + $0x560] sm:$0xf]  ;;  %v14963_v13 = vrot.slane %v11964_v18, 5  ;;  %v9306_v1 = vld [vmem:[%s14786_s3 + $0x374] sm:$0xf] }
 0x26a   : > { %v3030_v29 = vsel %vm9752_vm10, %v3028_v10, %v14962_v9  ;;  %v9369_v10 = vld [vmem:[%s14786_s3 + $0x564] sm:$0xf0]  ;;  %v2767_v19 = vsel %vm2747_vm3, %v2757_v20, %v2715_v55  ;;  %v3540_v47 = vshrl.u32 %v12065_v40, 16  ;;  %v7826_v62 = vld [vmem:[%s14786_s3 + $0x378] sm:$0xf0]  ;;  %v3533_v14 = vor.u32 %v3532_v23, %v3528_v54  ;;  %3134 = vst [vmem:[#allocation5 + $0x58] sm:$0xff] %v12101_v32  ;;  %vm14985_vm12 = vmmov %vm14946_vm1 }
 0x26b   : > { %3060 = vst [vmem:[#allocation5 + $0x80] sm:$0xff] %v3030_v29  ;;  %v3033_v53 = vsel %vm9752_vm10, %v3031_v28, %v14963_v13  ;;  %v3535_v35 = vshll.u32 %v12115_v15, 16  ;;  %v8073_v8 = vor.u32 %v9369_v10, %v8072_v3  ;;  %vm2777_vm5 = vcmp.lt.s32.totalorder %v2767_v19, 8  ;;  %v8136_v28 = vld [vmem:[%s14786_s3 + $0x5e0] sm:$0xf]  ;;  %vm14986_vm0 = vmmov %vm14946_vm1 }
 0x26c   : > { %v3547_v7 = vshll.u32 %v12117_v2, 16  ;;  %v7829_v9 = vor.u32 %v9306_v1, %v7826_v62  ;;  %v9385_v55 = vld [vmem:[%s14786_s3 + $0x5e4] sm:$0xf0]  ;;  %v7720_v29 = vld [vmem:[#allocation5 + $0x90] sm:$0xf]  ;;  %v2816_v20 = vsel %vm2777_vm5, %v2415_v56, 0.0  ;;  %v3545_v19 = vor.u32 %v3544_v45, %v3540_v47  ;;  %vm14990_vm3 = vmmov %vm14986_vm0 }
 0x26d   : > { %v2817_v58 = vsel %vm2777_vm5, %v2416_v5, 0.0  ;;  %v12144_v3 = vrot.slane %v3535_v35, 1  ;;  %4414 = vmatpush.bf16.msra.mxu2 %v8073_v8  ;;  %v8137_v10 = vor.u32 %v9385_v55, %v8136_v28  ;;  %v9322_v54 = vld [vmem:[%s14786_s3 + $0x3f4] sm:$0xf]  ;;  %3061 = vst [vmem:[#allocation5 + $0x98] sm:$0xff] %v3033_v53  ;;  %v3036_v35 = vsel %vm9752_vm10, %v12057_v61, %v3035_v4  ;;  %vm14991_vm5 = vmmov %vm14986_vm0 }
 0x26e   : > { %v9184_v23 = vld [vmem:[#allocation5 + $0x94] sm:$0xf]  ;;  %v2827_v13 = vpack.c.bf16 %v2817_v58, %v2816_v20  ;;  %v12149_v1 = vrot.slane %v3547_v7, 1  ;;  %4481 = vmatpush.bf16.msra.mxu0 %v7829_v9  ;;  %v7890_v56 = vld [vmem:[%s14786_s3 + $0x3f8] sm:$0xf0]  ;;  %3062 = vst [vmem:[#allocation5 + $0xb0] sm:$0xff] %v3036_v35  ;;  %v3633_v32 = vor.u32 %v3631_v24, %v12025_v43 }
 0x26f   : > { %v9187_v5 = vld [vmem:[#allocation5 + $0xa4] sm:$0xf0]  ;;  %v12161_v8 = vsel %vm14964_vm11, %v3533_v14, %v12144_v3  ;;  %4448 = vmatpush.bf16.msra.mxu3 %v8137_v10  ;;  %v7893_v45 = vor.u32 %v9322_v54, %v7890_v56  ;;  %v7722_v47 = vld [vmem:[#allocation5 + $0xa8] sm:$0xf0]  ;;  %v8064_v62 = vld [vmem:[%s14786_s3 + $0x550] sm:$0xf] }
 0x270   : > { %v12163_v53 = vor.u32 %v9187_v5, %v7720_v29  ;;  %v9367_v7 = vld [vmem:[%s14786_s3 + $0x554] sm:$0xf0]  ;;  %v2925_v9 = vshrl.u32 %v2827_v13, 16  ;;  %v2928_v28 = vshll.u32 %v2827_v13, 16  ;;  %4353 = vmatmul.bf16.vlgmr.msrb.gmra.mxu0 %v12161_v8  ;;  %v12174_v61 = vsel %vm14965_vm15, %v3545_v19, %v12149_v1  ;;  %v9304_v55 = vld [vmem:[%s14786_s3 + $0x364] sm:$0xf]  ;;  %vm14994_vm11 = vmmov %vm14986_vm0 }
 0x271   : > { %v12176_v14 = vor.u32 %v9184_v23, %v7722_v47  ;;  %v7818_v29 = vld [vmem:[%s14786_s3 + $0x368] sm:$0xf0]  ;;  %4387 = vmatmul.bf16.vlgmr.msrb.gmra.mxu1 %v12174_v61  ;;  %v8065_v58 = vor.u32 %v9367_v7, %v8064_v62  ;;  %v8128_v54 = vld [vmem:[%s14786_s3 + $0x5d0] sm:$0xf]  ;;  %v9383_v23 = vld [vmem:[%s14786_s3 + $0x5d4] sm:$0xf0]  ;;  %v3625_v7 = vor.u32 %v3623_v63, %v11997_v31 }
 0x272   : > { %v3627_v20 = vshll.u32 %v12163_v53, 16  ;;  %v7821_v10 = vor.u32 %v9304_v55, %v7818_v29  ;;  %v2927_v13 = vrot.slane %v2925_v9, 6  ;;  %v2930_v19 = vrot.slane %v2928_v28, 7  ;;  %4515 = vmatpush.bf16.msra.mxu1 %v7893_v45  ;;  %v9320_v47 = vld [vmem:[%s14786_s3 + $0x3e4] sm:$0xf]  ;;  %vm14995_vm15 = vmmov %vm14986_vm0 }
 0x273   : > { %v3635_v56 = vshll.u32 %v12176_v14, 16  ;;  %v8129_v5 = vor.u32 %v9383_v23, %v8128_v54  ;;  %v2961_v62 = vld [vmem:[#allocation4 + $0x60] sm:$0x33]  ;;  %4415 = vmatpush.bf16.msra.mxu2 %v8065_v58  ;;  %v7882_v35 = vld [vmem:[%s14786_s3 + $0x3e8] sm:$0xf0]  ;;  %v3405_v9 = vunpack.c.l.b16 %v12088_v21  ;;  %v14807_v28 = vunpack.c.l.b16 %v12095_v46 }
 0x274   : > { %v12200_v55 = vrot.slane %v3627_v20, 1  ;;  %4482 = vmatpush.bf16.msra.mxu0 %v7821_v10  ;;  %v7704_v45 = vld [vmem:[#allocation5 + $0x68] sm:$0xf]  ;;  %v2931_v29 = vor.u32 %v2930_v19, %v2927_v13  ;;  %v7885_v31 = vor.u32 %v9320_v47, %v7882_v35  ;;  %v9182_v63 = vld [vmem:[#allocation5 + $0x7c] sm:$0xf0]  ;;  %v12249_v33 = vrot.slane %v3099_v48, 4 }
 0x275   : > { %v12210_v54 = vrot.slane %v3635_v56, 1  ;;  %4449 = vmatpush.bf16.msra.mxu3 %v8129_v5  ;;  %v9179_v20 = vld [vmem:[#allocation5 + $0x6c] sm:$0xf]  ;;  %v12216_v10 = vor.u32 %v9182_v63, %v7704_v45  ;;  %v7706_v23 = vld [vmem:[#allocation5 + $0x80] sm:$0xf0]  ;;  %v12226_v24 = vpack.c.b16 %v14807_v28, %v3405_v9  ;;  %v3591_v16 = vshrl.u32 %v12115_v15, 16 }
 0x276   : > { %v12214_v58 = vsel %vm14966_vm14, %v3625_v7, %v12200_v55  ;;  %v8056_v13 = vld [vmem:[%s14786_s3 + $0x540] sm:$0xf]  ;;  %v9365_v43 = vld [vmem:[%s14786_s3 + $0x544] sm:$0xf0]  ;;  %v12232_v19 = vsel %vm9698_vm4, %v2923_v0, %v2931_v29  ;;  %v2933_v56 = vrot.slane %v2931_v29, 4  ;;  %4516 = vmatpush.bf16.msra.mxu1 %v7885_v31  ;;  %v12239_v47 = vor.u32 %v9179_v20, %v7706_v23  ;;  %vm14970_vm4 = vmor %vm11196_vm8, %vm9652_vm2 }
 0x277   : > { %14967 = vst [vmem:[#allocation17_spill] sm:$0xff] %v12216_v10  ;;  %4295 = vmatmul.bf16.gmra.mxu2 %v12214_v58  ;;  %v12237_v5 = vsel %vm14946_vm1, %v3633_v32, %v12210_v54  ;;  %v9302_v7 = vld [vmem:[%s14786_s3 + $0x354] sm:$0xf]  ;;  %v14811_v0 = vrot.slane %v12232_v19, 5  ;;  %v3595_v35 = vshll.u32 %v12216_v10, 16  ;;  %v8057_v45 = vor.u32 %v9365_v43, %v8056_v13  ;;  %vm14973_vm2 = vmmov %vm14946_vm1 }
 0x278   : > { %14968 = vst [vmem:[#allocation16_spill] sm:$0xff] %v12226_v24  ;;  %4329 = vmatmul.bf16.gmra.mxu3 %v12237_v5  ;;  %v8120_v9 = vld [vmem:[%s14786_s3 + $0x5c0] sm:$0xf]  ;;  %v3037_v29 = vrot.slane %v3035_v4, 4  ;;  %v2962_v60 = vsel %vm14970_vm4, %v2933_v56, %v2961_v62  ;;  %v3603_v48 = vshll.u32 %v12239_v47, 16  ;;  %v7813_v32 = vor.u32 %v9302_v7, %v7810_v42  ;;  %vm14975_vm8 = vmmov %vm14946_vm1 }
 0x279   : > { %14969 = vst [vmem:[#allocation12_spill] sm:$0xff] %v12239_v47  ;;  %v9381_v31 = vld [vmem:[%s14786_s3 + $0x5c4] sm:$0xf0]  ;;  %v9318_v63 = vld [vmem:[%s14786_s3 + $0x3d4] sm:$0xf]  ;;  %v3102_v20 = vrot.slane %v11882_v41, 6  ;;  %4416 = vmatpush.bf16.msra.mxu2 %v8057_v45  ;;  %v14809_v7 = vunpack.c.h.b16 %v12095_v46  ;;  %v3593_v42 = vor.u32 %v3591_v16, %v12144_v3  ;;  %vm14997_vm14 = vmmov %vm14986_vm0 }
 0x27a   : > { %2960 = vst [vmem:[#allocation4 + $0x10] sm:$0xff] %v12232_v19  ;;  %v12274_v4 = vrot.slane %v3595_v35, 1  ;;  %v8121_v36 = vor.u32 %v9381_v31, %v8120_v9  ;;  %v3599_v62 = vshrl.u32 %v12117_v2, 16  ;;  %v12277_v23 = vrot.slane %v3603_v48, 1  ;;  %4483 = vmatpush.bf16.msra.mxu0 %v7813_v32  ;;  %v7874_v13 = vld [vmem:[%s14786_s3 + $0x3d8] sm:$0xf0]  ;;  %vm15000_vm4 = vmmov %vm14986_vm0 }
 0x27b   : > { %2963 = vst [vmem:[#allocation4 + $0x60] sm:$0x33] %v2962_v60  ;;  %v7744_v43 = vld [vmem:[#allocation5 + $0xc0] sm:$0xf]  ;;  %v3039_v56 = vsel %vm9752_vm10, %v3037_v29, %v14811_v0  ;;  %v7877_v35 = vor.u32 %v9318_v63, %v7874_v13  ;;  %v9193_v45 = vld [vmem:[#allocation5 + $0xd4] sm:$0xf0]  ;;  %v3406_v48 = vunpack.c.h.b16 %v12088_v21  ;;  %v12350_v49 = vsel %vm10006_vm13, %v12249_v33, %v3102_v20 }
 0x27c   : > { %4450 = vmatpush.bf16.msra.mxu3 %v8121_v36  ;;  %v9190_v9 = vld [vmem:[#allocation5 + $0xc4] sm:$0xf]  ;;  %v7746_v60 = vld [vmem:[#allocation5 + $0xd8] sm:$0xf0]  ;;  %v3601_v32 = vor.u32 %v3599_v62, %v12149_v1  ;;  %v12290_v31 = vor.u32 %v9193_v45, %v7744_v43  ;;  %v3671_v28 = vshrl.u32 %v12163_v53, 16  ;;  %v12297_v29 = vsel %vm14973_vm2, %v3593_v42, %v12274_v4  ;;  %3063 = vst [vmem:[#allocation5 + $0xc8] sm:$0xff] %v3039_v56  ;;  %vm15003_vm2 = vmmov %vm14986_vm0 }
 0x27d   : > { %v12293_v51 = vor.u32 %v9190_v9, %v7746_v60  ;;  %4517 = vmatpush.bf16.msra.mxu1 %v7877_v35  ;;  %v3679_v3 = vshrl.u32 %v12176_v14, 16  ;;  %v7728_v63 = vld [vmem:[#allocation5 + $0x98] sm:$0xf]  ;;  %v9188_v16 = vld [vmem:[#allocation5 + $0xac] sm:$0xf0]  ;;  %v12305_v1 = vpack.c.b16 %v14809_v7, %v3406_v48  ;;  %3135 = vst [vmem:[#allocation5 + $0x70] sm:$0xff] %v12350_v49 }
 0x27e   : > { %14971 = vst [vmem:[#allocation6_spill] sm:$0xff] %v12290_v31  ;;  %v8048_v21 = vld [vmem:[%s14786_s3 + $0x530] sm:$0xf]  ;;  %v12309_v36 = vsel %vm14975_vm8, %v3601_v32, %v12277_v23  ;;  %v3675_v62 = vshll.u32 %v12290_v31, 16  ;;  %v9363_v43 = vld [vmem:[%s14786_s3 + $0x534] sm:$0xf0]  ;;  %v12330_v7 = vor.u32 %v9188_v16, %v7728_v63  ;;  %vm15004_vm8 = vmmov %vm14986_vm0 }
 0x27f   : > { %14972 = vst [vmem:[#allocation13_spill] sm:$0xff] %v12293_v51  ;;  %v3683_v13 = vshll.u32 %v12293_v51, 16  ;;  %v9300_v56 = vld [vmem:[%s14786_s3 + $0x344] sm:$0xf]  ;;  %v7730_v42 = vld [vmem:[#allocation5 + $0xb0] sm:$0xf0]  ;;  %v8049_v35 = vor.u32 %v9363_v43, %v8048_v21  ;;  %v3673_v43 = vor.u32 %v3671_v28, %v12200_v55  ;;  %v3681_v12 = vor.u32 %v3679_v3, %v12210_v54 }
 0x280   : > { %14974 = vst [vmem:[#allocation19_spill] sm:$0xff] %v12305_v1  ;;  %v7802_v45 = vld [vmem:[%s14786_s3 + $0x348] sm:$0xf0]  ;;  %v8112_v9 = vld [vmem:[%s14786_s3 + $0x5b0] sm:$0xf]  ;;  %4358 = vmatmul.bf16.gmra.mxu0 %v12297_v29  ;;  %v12326_v48 = vrot.slane %v3675_v62, 1 }
 0x281   : > { %v12328_v32 = vrot.slane %v3683_v13, 1  ;;  %14976 = vst [vmem:[#allocation18_spill] sm:$0xff] %v12330_v7  ;;  %v9185_v34 = vld [vmem:[#allocation5 + $0x9c] sm:$0xf]  ;;  %v7805_v0 = vor.u32 %v9300_v56, %v7802_v45  ;;  %4392 = vmatmul.bf16.gmra.mxu1 %v12309_v36  ;;  %4417 = vmatpush.bf16.msra.mxu2 %v8049_v35  ;;  %v9379_v62 = vld [vmem:[%s14786_s3 + $0x5b4] sm:$0xf0] }
 0x282   : > { %v2964_v60 = vld [vmem:[#allocation4 + $0x60] sm:$0xee]  ;;  %v9316_v63 = vld [vmem:[%s14786_s3 + $0x3c4] sm:$0xf]  ;;  %v12353_v55 = vor.u32 %v9185_v34, %v7730_v42  ;;  %v8113_v28 = vor.u32 %v9379_v62, %v8112_v9  ;;  %v7866_v16 = vld [vmem:[%s14786_s3 + $0x3c8] sm:$0xf0]  ;;  %v12360_v13 = vsel %vm14978_vm9, %v3673_v43, %v12326_v48 }
 0x283   : > { %v2965_v21 = vsel %vm2948_vm6, 0, %v2964_v60  ;;  %4484 = vmatpush.bf16.msra.mxu0 %v7805_v0  ;;  %v7869_v56 = vor.u32 %v9316_v63, %v7866_v16  ;;  %v8040_v33 = vld [vmem:[%s14786_s3 + $0x520] sm:$0xf]  ;;  %v9361_v34 = vld [vmem:[%s14786_s3 + $0x524] sm:$0xf0]  ;;  %v12373_v0 = vsel %vm14979_vm7, %v3681_v12, %v12328_v32  ;;  %v3643_v3 = vshll.u32 %v12330_v7, 16  ;;  %vm14981_vm6 = vmmov %vm14946_vm1 }
 0x284   : > { %2966 = vst [vmem:[#allocation4 + $0x60] sm:$0xee] %v2965_v21  ;;  %v9298_v54 = vld [vmem:[%s14786_s3 + $0x334] sm:$0xf]  ;;  %4451 = vmatpush.bf16.msra.mxu3 %v8113_v28  ;;  %v8041_v42 = vor.u32 %v9361_v34, %v8040_v33  ;;  %v7794_v35 = vld [vmem:[%s14786_s3 + $0x338] sm:$0xf0]  ;;  %vm15005_vm9 = vmmov %vm14986_vm0 }
 0x285   : > { %14977 = vst [vmem:[#allocation14_spill] sm:$0xff] %v12353_v55  ;;  %v2978_v45 = vld [vmem:[#allocation4 + $0x10] sm:$0x11]  ;;  %4518 = vmatpush.bf16.msra.mxu1 %v7869_v56  ;;  %v7797_v9 = vor.u32 %v9298_v54, %v7794_v35  ;;  %v8104_v60 = vld [vmem:[%s14786_s3 + $0x5a0] sm:$0xf]  ;;  %v3105_v43 = vrot.slane %v11964_v18, 6  ;;  %vm15006_vm7 = vmmov %vm14986_vm0 }
 0x286   : > { %2989 = vst [vmem:[#allocation5 + $0xf0] sm:$0x11] %v2978_v45  ;;  %v9377_v21 = vld [vmem:[%s14786_s3 + $0x5a4] sm:$0xf0]  ;;  %v3651_v62 = vshll.u32 %v12353_v55, 16  ;;  %v3104_v16 = vrot.slane %v3102_v20, 4  ;;  %4418 = vmatpush.bf16.msra.mxu2 %v8041_v42 }
 0x287   : > { %4300 = vmatmul.bf16.gmra.mxu2 %v12360_v13  ;;  %v8105_v63 = vor.u32 %v9377_v21, %v8104_v60  ;;  %v9314_v12 = vld [vmem:[%s14786_s3 + $0x3b4] sm:$0xf]  ;;  %v7858_v28 = vld [vmem:[%s14786_s3 + $0x3b8] sm:$0xf0]  ;;  %v14980_v56 = vrot.slane %v12232_v19, 5  ;;  %v3639_v18 = vshrl.u32 %v12216_v10, 16  ;;  %4485 = vmatpush.bf16.msra.mxu0 %v7797_v9 }
 0x288   : > { %4334 = vmatmul.bf16.gmra.mxu3 %v12373_v0  ;;  %v7861_v34 = vor.u32 %v9314_v12, %v7858_v28  ;;  %v8032_v54 = vld [vmem:[%s14786_s3 + $0x510] sm:$0xf]  ;;  %v9359_v41 = vld [vmem:[%s14786_s3 + $0x514] sm:$0xf0]  ;;  %v9296_v20 = vld [vmem:[%s14786_s3 + $0x324] sm:$0xf] }
 0x289   : > { %v3040_v33 = vrot.slane %v14980_v56, 4  ;;  %4452 = vmatpush.bf16.msra.mxu3 %v8105_v63  ;;  %v7786_v35 = vld [vmem:[%s14786_s3 + $0x328] sm:$0xf0]  ;;  %v12412_v45 = vrot.slane %v3643_v3, 1  ;;  %v3647_v60 = vshrl.u32 %v12239_v47, 16  ;;  %v8033_v9 = vor.u32 %v9359_v41, %v8032_v54 }
 0x28a   : > { %4519 = vmatpush.bf16.msra.mxu1 %v7861_v34  ;;  %v7789_v21 = vor.u32 %v9296_v20, %v7786_v35  ;;  %v8096_v63 = vld [vmem:[%s14786_s3 + $0x590] sm:$0xf]  ;;  %v12418_v28 = vrot.slane %v3651_v62, 1  ;;  %v9375_v56 = vld [vmem:[%s14786_s3 + $0x594] sm:$0xf0]  ;;  %v3106_v34 = vsel %vm10006_vm13, %v3104_v16, %v3105_v43  ;;  %v3641_v54 = vor.u32 %v3639_v18, %v12274_v4 }
 0x28b   : > { %v3000_v42 = vld [vmem:[#allocation4 + $0x60] sm:$0x33]  ;;  %v9312_v3 = vld [vmem:[%s14786_s3 + $0x3a4] sm:$0xf]  ;;  %4419 = vmatpush.bf16.msra.mxu2 %v8033_v9  ;;  %v8097_v41 = vor.u32 %v9375_v56, %v8096_v63  ;;  %v7850_v62 = vld [vmem:[%s14786_s3 + $0x3a8] sm:$0xf0] }
 0x28c   : > { %v3041_v12 = vrot.slane %v3000_v42, 5  ;;  %v8024_v20 = vld [vmem:[%s14786_s3 + $0x500] sm:$0xf]  ;;  %v9357_v35 = vld [vmem:[%s14786_s3 + $0x504] sm:$0xf0]  ;;  %v3649_v42 = vor.u32 %v3647_v60, %v12277_v23  ;;  %4486 = vmatpush.bf16.msra.mxu0 %v7789_v21  ;;  %v7853_v16 = vor.u32 %v9312_v3, %v7850_v62  ;;  %v12449_v56 = vsel %vm14981_vm6, %v3641_v54, %v12412_v45  ;;  %3136 = vst [vmem:[#allocation5 + $0x88] sm:$0xff] %v3106_v34  ;;  %vm15009_vm6 = vmmov %vm14986_vm0 }
 0x28d   : > { %v3268_v46 = vld [vmem:[#allocation5 + $0xf0] sm:$0x11]  ;;  %v8025_v18 = vor.u32 %v9357_v35, %v8024_v20  ;;  %v8088_v9 = vld [vmem:[%s14786_s3 + $0x580] sm:$0xf]  ;;  %v9373_v63 = vld [vmem:[%s14786_s3 + $0x584] sm:$0xf0]  ;;  %4453 = vmatpush.bf16.msra.mxu3 %v8097_v41 }
 0x28e   : > { %v3042_v4 = vsel %vm9752_vm10, %v3040_v33, %v3041_v12  ;;  %v3461_v23 = vunpack.c.l.b16 %v3268_v46  ;;  %v3462_v60 = vunpack.c.h.b16 %v3268_v46  ;;  %v8089_v6 = vor.u32 %v9373_v63, %v8088_v9  ;;  %vm14982_vm10 = vmmov %vm14946_vm1  ;;  %4520 = vmatpush.bf16.msra.mxu1 %v7853_v16  ;;  %v9294_v3 = vld [vmem:[%s14786_s3 + $0x314] sm:$0xf]  ;;  %v7778_v46 = vld [vmem:[%s14786_s3 + $0x318] sm:$0xf0] }
 0x28f   : > { %3064 = vst [vmem:[#allocation5 + $0xe0] sm:$0xff] %v3042_v4  ;;  %v3108_v33 = vrot.slane %v12036_v17, 6  ;;  %v12454_v21 = vsel %vm14982_vm10, %v3649_v42, %v12418_v28  ;;  %4420 = vmatpush.bf16.msra.mxu2 %v8025_v18  ;;  %v9310_v17 = vld [vmem:[%s14786_s3 + $0x394] sm:$0xf]  ;;  %v7842_v41 = vld [vmem:[%s14786_s3 + $0x398] sm:$0xf0]  ;;  %v7781_v42 = vor.u32 %v9294_v3, %v7778_v46  ;;  %vm14998_vm1 = vmmov %vm14986_vm0 }
 0x290   : > { %v12459_v62 = vpack.c.b16 %v3461_v23, %v3461_v23  ;;  %v12461_v54 = vpack.c.b16 %v3462_v60, %v3462_v60  ;;  %v3107_v20 = vrot.slane %v3105_v43, 4  ;;  %4363 = vmatmul.bf16.gmra.mxu0 %v12449_v56  ;;  %v3719_v35 = vshrl.u32 %v12290_v31, 16  ;;  %v9292_v43 = vld [vmem:[%s14786_s3 + $0x304] sm:$0xf]  ;;  %v7752_v3 = vld [vmem:[#allocation5 + $0xc8] sm:$0xf]  ;;  %vm15010_vm10 = vmmov %vm14986_vm0 }
 0x291   : > { %v7845_v4 = vor.u32 %v9310_v17, %v7842_v41  ;;  %4397 = vmatmul.bf16.gmra.mxu1 %v12454_v21  ;;  %v3727_v18 = vshrl.u32 %v12293_v51, 16  ;;  %4454 = vmatpush.bf16.msra.mxu3 %v8089_v6  ;;  %v3043_v63 = vrot.slane %v3041_v12, 4  ;;  %v9191_v49 = vld [vmem:[#allocation5 + $0xcc] sm:$0xf] }
 0x292   : > { %14983 = vst [vmem:[#allocation8_spill] sm:$0xff] %v12459_v62  ;;  %v3723_v16 = vshll.u32 %v12459_v62, 16  ;;  %v3731_v9 = vshll.u32 %v12461_v54, 16  ;;  %v3721_v60 = vor.u32 %v3719_v35, %v12326_v48  ;;  %4487 = vmatpush.bf16.msra.mxu0 %v7781_v42  ;;  %v7770_v46 = vld [vmem:[%s14786_s3 + $0x308] sm:$0xf0]  ;;  %v3109_v12 = vsel %vm10006_vm13, %v3107_v20, %v3108_v33 }
 0x293   : > { %14984 = vst [vmem:[#allocation9_spill] sm:$0xff] %v12461_v54  ;;  %4521 = vmatpush.bf16.msra.mxu1 %v7845_v4  ;;  %v3729_v17 = vor.u32 %v3727_v18, %v12328_v32  ;;  %v7773_v23 = vor.u32 %v9292_v43, %v7770_v46  ;;  %v9338_v48 = vld [vmem:[%s14786_s3 + $0x474] sm:$0xf]  ;;  %v7954_v4 = vld [vmem:[%s14786_s3 + $0x478] sm:$0xf0]  ;;  %v3110_v46 = vrot.slane %v3108_v33, 4 }
 0x294   : > { %v3725_v6 = vrot.slane %v3723_v16, 1  ;;  %v3733_v41 = vrot.slane %v3731_v9, 1  ;;  %3065 = vst [vmem:[#allocation5 + $0xf8] sm:$0x11] %v3043_v63  ;;  %v9308_v18 = vld [vmem:[%s14786_s3 + $0x384] sm:$0xf] }
 0x295   : > { %v7834_v9 = vld [vmem:[%s14786_s3 + $0x388] sm:$0xf0]  ;;  %v9354_v63 = vld [vmem:[%s14786_s3 + $0x4f4] sm:$0xf]  ;;  %v9177_v43 = vld [vmem:[#allocation5 + $0x54] sm:$0xf0] }
 0x296   : > { %v9194_v35 = vld [vmem:[#allocation5 + $0xdc] sm:$0xf0]  ;;  %v7754_v42 = vld [vmem:[#allocation5 + $0xe0] sm:$0xf0]  ;;  %v12497_v34 = vsel %vm14985_vm12, %v3721_v60, %v3725_v6  ;;  %v12500_v20 = vsel %vm14986_vm0, %v3729_v17, %v3733_v41  ;;  %4488 = vmatpush.bf16.msra.mxu0 %v7773_v23  ;;  %v7957_v60 = vor.u32 %v9338_v48, %v7954_v4  ;;  %v7690_v41 = vld [vmem:[#allocation5 + $0x58] sm:$0xf0] }
 0x297   : > { %v12502_v32 = vor.u32 %v9194_v35, %v7752_v3  ;;  %v12504_v16 = vor.u32 %v9191_v49, %v7754_v42  ;;  %4305 = vmatmul.bf16.gmra.mxu2 %v12497_v34  ;;  %v7837_v3 = vor.u32 %v9308_v18, %v7834_v9  ;;  %v8018_v49 = vld [vmem:[%s14786_s3 + $0x4f8] sm:$0xf0]  ;;  %v7688_v35 = vld [vmem:[#allocation5 + $0x40] sm:$0xf]  ;;  %3137 = vst [vmem:[#allocation5 + $0xa0] sm:$0xff] %v3109_v12  ;;  %v3687_v23 = vshrl.u32 %v12330_v7, 16 }
 0x298   : > { %4339 = vmatmul.bf16.gmra.mxu3 %v12500_v20  ;;  %4549 = vmatpush.bf16.msrb.mxu2 %v7957_v60  ;;  %v8021_v42 = vor.u32 %v9354_v63, %v8018_v49  ;;  %v12525_v4 = vor.u32 %v9177_v43, %v7688_v35  ;;  %v9174_v18 = vld [vmem:[#allocation5 + $0x44] sm:$0xf]  ;;  %v14989_v33 = vrot.slane %v12232_v19, 6  ;;  %v3695_v54 = vshrl.u32 %v12353_v55, 16  ;;  %v9183_v55 = vld [vmem:[#allocation5 + $0x84] sm:$0xf0] }
 0x299   : > { %14987 = vst [vmem:[#allocation20_spill] sm:$0xff] %v12502_v32  ;;  %v3691_v6 = vshll.u32 %v12502_v32, 16  ;;  %v3699_v17 = vshll.u32 %v12504_v16, 16  ;;  %4522 = vmatpush.bf16.msra.mxu1 %v7837_v3  ;;  %v12534_v60 = vor.u32 %v9174_v18, %v7690_v41  ;;  %v3689_v12 = vor.u32 %v3687_v23, %v12412_v45  ;;  %v12552_v23 = vld [vmem:[#allocation4 + $0x60] sm:$0xff] }
 0x29a   : > { %14988 = vst [vmem:[#allocation15_spill] sm:$0xff] %v12504_v16  ;;  %v3112_v9 = vsel %vm10006_vm13, %v3110_v46, %v14989_v33  ;;  %4583 = vmatpush.bf16.msrb.mxu3 %v8021_v42  ;;  %v3554_v63 = vshll.u32 %v12226_v24, 16  ;;  %v3697_v43 = vor.u32 %v3695_v54, %v12418_v28  ;;  %v3566_v3 = vshll.u32 %v12305_v1, 16  ;;  %v9336_v33 = vld [vmem:[%s14786_s3 + $0x464] sm:$0xf] }
 0x29b   : > { %v12523_v48 = vrot.slane %v3691_v6, 1  ;;  %v12532_v62 = vrot.slane %v3699_v17, 1  ;;  %3138 = vst [vmem:[#allocation5 + $0xb8] sm:$0xff] %v3112_v9  ;;  %v3269_v49 = vld [vmem:[#allocation5 + $0xf8] sm:$0x11]  ;;  %v3559_v6 = vshll.u32 %v12525_v4, 16 }
 0x29c   : > { %v3571_v41 = vshll.u32 %v12534_v60, 16  ;;  %v3556_v45 = vrot.slane %v3554_v63, 1  ;;  %v3463_v35 = vunpack.c.l.b16 %v3269_v49  ;;  %v3464_v42 = vunpack.c.h.b16 %v3269_v49  ;;  %v7946_v9 = vld [vmem:[%s14786_s3 + $0x468] sm:$0xf0]  ;;  %v8082_v49 = vld [vmem:[%s14786_s3 + $0x578] sm:$0xf0] }
 0x29d   : > { %v12542_v46 = vsel %vm14990_vm3, %v3689_v12, %v12523_v48  ;;  %v12547_v17 = vsel %vm14991_vm5, %v3697_v43, %v12532_v62  ;;  %v3552_v28 = vshrl.u32 %v12226_v24, 16  ;;  %v3568_v54 = vrot.slane %v3566_v3, 1  ;;  %v9370_v3 = vld [vmem:[%s14786_s3 + $0x574] sm:$0xf] }
 0x29e   : > { %v12555_v18 = vrot.slane %v3559_v6, 1  ;;  %v3564_v12 = vshrl.u32 %v12305_v1, 16  ;;  %v12564_v63 = vrot.slane %v3571_v41, 1  ;;  %v7949_v43 = vor.u32 %v9336_v33, %v7946_v9  ;;  %v9352_v41 = vld [vmem:[%s14786_s3 + $0x4e4] sm:$0xf] }
 0x29f   : > { %v3557_v6 = vor.u32 %v3556_v45, %v3552_v28  ;;  %v12572_v11 = vpack.c.b16 %v3463_v35, %v3463_v35  ;;  %v12574_v50 = vpack.c.b16 %v3464_v42, %v3464_v42  ;;  %v8085_v24 = vor.u32 %v9370_v3, %v8082_v49  ;;  %v8010_v33 = vld [vmem:[%s14786_s3 + $0x4e8] sm:$0xf0]  ;;  %v9386_v9 = vld [vmem:[%s14786_s3 + $0x5f4] sm:$0xf]  ;;  %v8146_v35 = vld [vmem:[%s14786_s3 + $0x5f8] sm:$0xf0] }
 0x2a0   : > { %4368 = vmatmul.bf16.gmra.mxu0 %v12542_v46  ;;  %v3569_v1 = vor.u32 %v3568_v54, %v3564_v12  ;;  %4550 = vmatpush.bf16.msrb.mxu2 %v7949_v43  ;;  %v8013_v45 = vor.u32 %v9352_v41, %v8010_v33  ;;  %v3114_v42 = vrot.slane %v12552_v23, 6  ;;  %v7714_v3 = vld [vmem:[#allocation5 + $0x88] sm:$0xf0]  ;;  %v8149_v49 = vor.u32 %v9386_v9, %v8146_v35  ;;  %v7712_v41 = vld [vmem:[#allocation5 + $0x70] sm:$0xf] }
 0x2a1   : > { %4402 = vmatmul.bf16.gmra.mxu1 %v12547_v17  ;;  %14992 = vst [vmem:[#allocation21_spill] sm:$0xff] %v12572_v11  ;;  %v12591_v28 = vsel %vm14994_vm11, %v3557_v6, %v12555_v18  ;;  %4617 = vmatpush.bf16.msrb.mxu0 %v8085_v24  ;;  %v3735_v12 = vshrl.u32 %v12502_v32, 16  ;;  %v3743_v43 = vshrl.u32 %v12504_v16, 16  ;;  %v9180_v33 = vld [vmem:[#allocation5 + $0x74] sm:$0xf]  ;;  %v3739_v23 = vshll.u32 %v12572_v11, 16 }
 0x2a2   : > { %14993 = vst [vmem:[#allocation22_spill] sm:$0xff] %v12574_v50  ;;  %v12596_v54 = vsel %vm14995_vm15, %v3569_v1, %v12564_v63  ;;  %4584 = vmatpush.bf16.msrb.mxu3 %v8013_v45  ;;  %v3747_v24 = vshll.u32 %v12574_v50, 16  ;;  %v12603_v6 = vor.u32 %v9183_v55, %v7712_v41  ;;  %4651 = vmatpush.bf16.msrb.mxu1 %v8149_v49  ;;  %v9334_v1 = vld [vmem:[%s14786_s3 + $0x454] sm:$0xf]  ;;  %v7938_v9 = vld [vmem:[%s14786_s3 + $0x458] sm:$0xf0] }
 0x2a3   : > { %v12611_v35 = vor.u32 %v9180_v33, %v7714_v3  ;;  %v7941_v45 = vor.u32 %v9334_v1, %v7938_v9  ;;  %v9368_v11 = vld [vmem:[%s14786_s3 + $0x564] sm:$0xf]  ;;  %v8074_v55 = vld [vmem:[%s14786_s3 + $0x568] sm:$0xf0]  ;;  %v9350_v49 = vld [vmem:[%s14786_s3 + $0x4d4] sm:$0xf]  ;;  %v3737_v9 = vor.u32 %v3735_v12, %v12523_v48  ;;  %v3745_v16 = vor.u32 %v3743_v43, %v12532_v62 }
 0x2a4   : > { %v8077_v41 = vor.u32 %v9368_v11, %v8074_v55  ;;  %v8002_v50 = vld [vmem:[%s14786_s3 + $0x4d8] sm:$0xf0]  ;;  %v9384_v3 = vld [vmem:[%s14786_s3 + $0x5e4] sm:$0xf]  ;;  %v14996_v33 = vrot.slane %v12232_v19, 6  ;;  %v3741_v7 = vrot.slane %v3739_v23, 1 }
 0x2a5   : > { %4551 = vmatpush.bf16.msrb.mxu2 %v7941_v45  ;;  %v8005_v32 = vor.u32 %v9350_v49, %v8002_v50  ;;  %v8138_v11 = vld [vmem:[%s14786_s3 + $0x5e8] sm:$0xf0]  ;;  %v3076_v55 = vld [vmem:[#allocation4 + $0x40] sm:$0x77]  ;;  %v3611_v51 = vshll.u32 %v12603_v6, 16  ;;  %v3749_v10 = vrot.slane %v3747_v24, 1 }
 0x2a6   : > { %v3113_v1 = vrot.slane %v14996_v33, 4  ;;  %4618 = vmatpush.bf16.msrb.mxu0 %v8077_v41  ;;  %v8141_v31 = vor.u32 %v9384_v3, %v8138_v11  ;;  %v3117_v47 = vrot.slane %v3076_v55, 6  ;;  %v3619_v19 = vshll.u32 %v12611_v35, 16  ;;  %v7994_v45 = vld [vmem:[%s14786_s3 + $0x4c8] sm:$0xf0] }
 0x2a7   : > { %4421 = vmatmul.bf16.vlgmr.msra.gmra.mxu2 %v12591_v28  ;;  %4585 = vmatpush.bf16.msrb.mxu3 %v8005_v32  ;;  %v3116_v48 = vrot.slane %v3114_v42, 4  ;;  %v12642_v43 = vsel %vm14997_vm14, %v3737_v9, %v3741_v7  ;;  %v3607_v23 = vshrl.u32 %v12525_v4, 16  ;;  %v12647_v32 = vsel %vm14998_vm1, %v3745_v16, %v3749_v10  ;;  %v9366_v10 = vld [vmem:[%s14786_s3 + $0x554] sm:$0xf]  ;;  %v9348_v16 = vld [vmem:[%s14786_s3 + $0x4c4] sm:$0xf] }
 0x2a8   : > { %4455 = vmatmul.bf16.vlgmr.msra.gmra.mxu3 %v12596_v54  ;;  %v3115_v62 = vsel %vm10006_vm13, %v3113_v1, %v3114_v42  ;;  %4652 = vmatpush.bf16.msrb.mxu1 %v8141_v31  ;;  %v3119_v50 = vrot.slane %v3117_v47, 4  ;;  %v3613_v24 = vrot.slane %v3611_v51, 1  ;;  %v3615_v42 = vshrl.u32 %v12534_v60, 16  ;;  %v8066_v51 = vld [vmem:[%s14786_s3 + $0x558] sm:$0xf0] }
 0x2a9   : > { %3139 = vst [vmem:[#allocation5 + $0xd0] sm:$0xff] %v3115_v62  ;;  %v3118_v12 = vsel %vm10006_vm13, %v3116_v48, %v3117_v47  ;;  %v3621_v31 = vrot.slane %v3619_v19, 1  ;;  %v7930_v47 = vld [vmem:[%s14786_s3 + $0x448] sm:$0xf0]  ;;  %v3609_v49 = vor.u32 %v3607_v23, %v12555_v18  ;;  %v8069_v41 = vor.u32 %v9366_v10, %v8066_v51  ;;  %v9382_v33 = vld [vmem:[%s14786_s3 + $0x5d4] sm:$0xf]  ;;  %vm14999_vm13 = vmmov %vm14986_vm0 }
 0x2aa   : > { %3140 = vst [vmem:[#allocation5 + $0xe8] sm:$0xff] %v3118_v12  ;;  %v7933_v7 = vor.u32 %v9332_v38, %v7930_v47  ;;  %v7997_v3 = vor.u32 %v9348_v16, %v7994_v45  ;;  %v8130_v1 = vld [vmem:[%s14786_s3 + $0x5d8] sm:$0xf0]  ;;  %v3617_v9 = vor.u32 %v3615_v42, %v12564_v63  ;;  %v9189_v19 = vld [vmem:[#allocation5 + $0xb4] sm:$0xf0]  ;;  %v3655_v45 = vshrl.u32 %v12603_v6, 16 }
 0x2ab   : > { %3141 = vst [vmem:[#allocation5 + $0x100] sm:$0x11] %v3119_v50  ;;  %v8133_v11 = vor.u32 %v9382_v33, %v8130_v1  ;;  %v12678_v55 = vsel %vm14999_vm13, %v3609_v49, %v3613_v24  ;;  %v7738_v62 = vld [vmem:[#allocation5 + $0xb8] sm:$0xf0]  ;;  %4619 = vmatpush.bf16.msrb.mxu0 %v8069_v41  ;;  %v7736_v48 = vld [vmem:[#allocation5 + $0xa0] sm:$0xf] }
 0x2ac   : > { %4552 = vmatpush.bf16.msrb.mxu2 %v7933_v7  ;;  %4586 = vmatpush.bf16.msrb.mxu3 %v7997_v3  ;;  %v12682_v18 = vsel %vm15000_vm4, %v3617_v9, %v3621_v31  ;;  %v9186_v50 = vld [vmem:[#allocation5 + $0xa4] sm:$0xf]  ;;  %v9330_v63 = vld [vmem:[%s14786_s3 + $0x434] sm:$0xf]  ;;  %v7922_v12 = vld [vmem:[%s14786_s3 + $0x438] sm:$0xf0]  ;;  %v12694_v42 = vor.u32 %v9189_v19, %v7736_v48 }
 0x2ad   : > { %4653 = vmatpush.bf16.msrb.mxu1 %v8133_v11  ;;  %v9364_v23 = vld [vmem:[%s14786_s3 + $0x544] sm:$0xf]  ;;  %v12696_v38 = vor.u32 %v9186_v50, %v7738_v62  ;;  %v7925_v47 = vor.u32 %v9330_v63, %v7922_v12  ;;  %v8058_v10 = vld [vmem:[%s14786_s3 + $0x548] sm:$0xf0]  ;;  %v3663_v41 = vshrl.u32 %v12611_v35, 16  ;;  %v3657_v62 = vor.u32 %v3655_v45, %v3613_v24 }
 0x2ae   : > { %15001 = vst [vmem:[#allocation23_spill] sm:$0xff] %v12694_v42  ;;  %v8061_v7 = vor.u32 %v9364_v23, %v8058_v10  ;;  %v3659_v51 = vshll.u32 %v12694_v42, 16  ;;  %v9346_v33 = vld [vmem:[%s14786_s3 + $0x4b4] sm:$0xf]  ;;  %v7986_v1 = vld [vmem:[%s14786_s3 + $0x4b8] sm:$0xf0] }
 0x2af   : > { %15002 = vst [vmem:[#allocation24_spill] sm:$0xff] %v12696_v38  ;;  %v3667_v16 = vshll.u32 %v12696_v38, 16  ;;  %v7989_v9 = vor.u32 %v9346_v33, %v7986_v1  ;;  %v8122_v11 = vld [vmem:[%s14786_s3 + $0x5c8] sm:$0xf0]  ;;  %v9362_v63 = vld [vmem:[%s14786_s3 + $0x534] sm:$0xf]  ;;  %v3665_v23 = vor.u32 %v3663_v41, %v3621_v31 }
 0x2b0   : > { %4373 = vmatmul.bf16.gmra.mxu0 %v12642_v43  ;;  %4553 = vmatpush.bf16.msrb.mxu2 %v7925_v47  ;;  %v3661_v49 = vrot.slane %v3659_v51, 1  ;;  %v7914_v19 = vld [vmem:[%s14786_s3 + $0x428] sm:$0xf0]  ;;  %v8050_v12 = vld [vmem:[%s14786_s3 + $0x538] sm:$0xf0]  ;;  %vm15026_vm12 = vcmask 1046528  }
 0x2b1   : > { %4407 = vmatmul.bf16.gmra.mxu1 %v12647_v32  ;;  %4620 = vmatpush.bf16.msrb.mxu0 %v8061_v7  ;;  %v3669_v3 = vrot.slane %v3667_v16, 1  ;;  %v8053_v47 = vor.u32 %v9362_v63, %v8050_v12  ;;  %v9195_v7 = vld [vmem:[#allocation5 + $0xe4] sm:$0xf0]  ;;  %v7762_v51 = vld [vmem:[#allocation5 + $0xe8] sm:$0xf0]  ;;  %vm15027_vm0 = vmmov %vm15026_vm12 }
 0x2b2   : > { %4587 = vmatpush.bf16.msrb.mxu3 %v7989_v9  ;;  %v12732_v10 = vsel %vm15003_vm2, %v3657_v62, %v3661_v49  ;;  %v7760_v16 = vld [vmem:[#allocation5 + $0xd0] sm:$0xf]  ;;  %v9192_v31 = vld [vmem:[#allocation5 + $0xd4] sm:$0xf]  ;;  %v9344_v9 = vld [vmem:[%s14786_s3 + $0x4a4] sm:$0xf] }
 0x2b3   : > { %v12736_v24 = vsel %vm15004_vm8, %v3665_v23, %v3669_v3  ;;  %v12739_v45 = vor.u32 %v9195_v7, %v7760_v16  ;;  %v12741_v41 = vor.u32 %v9192_v31, %v7762_v51  ;;  %v3270_v7 = vld [vmem:[#allocation5 + $0x100] sm:$0x11]  ;;  %vm15030_vm3 = vmmov %vm15027_vm0 }
 0x2b4   : > { %vm15031_vm5 = vmmov %vm15027_vm0 }
 0x2b5   : > { %4621 = vmatpush.bf16.msrb.mxu0 %v8053_v47  ;;  %v3707_v33 = vshll.u32 %v12739_v45, 16  ;;  %v3715_v1 = vshll.u32 %v12741_v41, 16  ;;  %vm15035_vm11 = vmmov %vm15027_vm0 }
 0x2b6   : > { %vm15036_vm15 = vmmov %vm15027_vm0 }
 0x2b7   : > { %4426 = vmatmul.bf16.gmra.mxu2 %v12678_v55  ;;  %v3709_v62 = vrot.slane %v3707_v33, 1  ;;  %v3717_v63 = vrot.slane %v3715_v1, 1  ;;  %v3465_v33 = vunpack.c.l.b16 %v3270_v7  ;;  %v3466_v1 = vunpack.c.h.b16 %v3270_v7  ;;  %vm15038_vm14 = vmmov %vm15027_vm0 }
 0x2b8   : > { %4460 = vmatmul.bf16.gmra.mxu3 %v12682_v18  ;;  %vm15040_vm1 = vmmov %vm15027_vm0 }
 0x2b9   : > { %v12798_v7 = vpack.c.b16 %v3465_v33, %v3465_v33  ;;  %vm15041_vm13 = vmmov %vm15027_vm0 }
 0x2ba   : > { %vm15042_vm4 = vmmov %vm15027_vm0 }
 0x2bb   : > { %15007 = vst [vmem:[#allocation25_spill] sm:$0xff] %v12798_v7  ;;  %vm15045_vm2 = vmmov %vm15027_vm0 }
 0x2bc   : > { %vm15047_vm8 = vmmov %vm15027_vm0 }
 0x2c0   : > { %4489 = vmatmul.bf16.vlgmr.msra.gmra.mxu0 %v11933_v44  ;;  %v9380_v44 = vld [vmem:[%s14786_s3 + $0x5c4] sm:$0xf] }
 0x2c1   : > { %4523 = vmatmul.bf16.vlgmr.msra.gmra.mxu1 %v11955_v30  ;;  %v9328_v30 = vld [vmem:[%s14786_s3 + $0x424] sm:$0xf]  ;;  %v8125_v48 = vor.u32 %v9380_v44, %v8122_v11  ;;  %v7978_v11 = vld [vmem:[%s14786_s3 + $0x4a8] sm:$0xf0] }
 0x2c2   : > { %v7917_v50 = vor.u32 %v9328_v30, %v7914_v19  ;;  %v9378_v30 = vld [vmem:[%s14786_s3 + $0x5b4] sm:$0xf]  ;;  %v3703_v19 = vshrl.u32 %v12694_v42, 16  ;;  %v3759_v42 = vshrl.u32 %v12741_v41, 16 }
 0x2c3   : > { %4654 = vmatpush.bf16.msrb.mxu1 %v8125_v48  ;;  %v7981_v48 = vor.u32 %v9344_v9, %v7978_v11  ;;  %v9360_v9 = vld [vmem:[%s14786_s3 + $0x524] sm:$0xf] }
 0x2c4   : > { %4554 = vmatpush.bf16.msrb.mxu2 %v7917_v50  ;;  %v3711_v50 = vshrl.u32 %v12696_v38, 16  ;;  %v3705_v23 = vor.u32 %v3703_v19, %v3661_v49  ;;  %v9326_v49 = vld [vmem:[%s14786_s3 + $0x414] sm:$0xf]  ;;  %v7970_v19 = vld [vmem:[%s14786_s3 + $0x498] sm:$0xf0]  ;;  %v3751_v38 = vshrl.u32 %v12739_v45, 16 }
 0x2c5   : > { %4588 = vmatpush.bf16.msrb.mxu3 %v7981_v48 }
 0x2c6   : > { %v3713_v47 = vor.u32 %v3711_v50, %v3669_v3  ;;  %v12762_v51 = vsel %vm15005_vm9, %v3705_v23, %v3709_v62  ;;  %v7906_v3 = vld [vmem:[%s14786_s3 + $0x418] sm:$0xf0]  ;;  %v8106_v23 = vld [vmem:[%s14786_s3 + $0x5a8] sm:$0xf0]  ;;  %vm15048_vm9 = vmmov %vm15027_vm0 }
 0x2c7   : > { %4431 = vmatmul.bf16.gmra.mxu2 %v12732_v10  ;;  %v7909_v11 = vor.u32 %v9326_v49, %v7906_v3  ;;  %v7898_v49 = vld [vmem:[%s14786_s3 + $0x408] sm:$0xf0]  ;;  %v9340_v3 = vld [vmem:[%s14786_s3 + $0x484] sm:$0xf] }
 0x2c8   : > { %4465 = vmatmul.bf16.gmra.mxu3 %v12736_v24  ;;  %v12766_v16 = vsel %vm15006_vm7, %v3713_v47, %v3717_v63  ;;  %v9324_v47 = vld [vmem:[%s14786_s3 + $0x404] sm:$0xf]  ;;  %vm15050_vm7 = vmmov %vm15027_vm0 }
 0x2c9   : > { %4555 = vmatpush.bf16.msrb.mxu2 %v7909_v11  ;;  %v7901_v33 = vor.u32 %v9324_v47, %v7898_v49  ;;  %v3761_v49 = vor.u32 %v3759_v42, %v3717_v63  ;;  %v9356_v42 = vld [vmem:[%s14786_s3 + $0x504] sm:$0xf]  ;;  %v8026_v63 = vld [vmem:[%s14786_s3 + $0x508] sm:$0xf0] }
 0x2cd   : > { %4556 = vmatpush.bf16.msrb.mxu2 %v7901_v33 }
 0x2cf   : > { %v4286_v44 = vpop.f32.mrf.mxu2 }
 0x2d0   : > { %4494 = vmatmul.bf16.gmra.mxu0 %v12023_v26  ;;  %v8114_v26 = vld [vmem:[%s14786_s3 + $0x5b8] sm:$0xf0] }
 0x2d1   : > { %4528 = vmatmul.bf16.gmra.mxu1 %v12045_v57  ;;  %v8117_v12 = vor.u32 %v9378_v30, %v8114_v26  ;;  %v9342_v30 = vld [vmem:[%s14786_s3 + $0x494] sm:$0xf] }
 0x2d2   : > { %v4320_v57 = vpop.f32.mrf.mxu3  ;;  %v7973_v50 = vor.u32 %v9342_v30, %v7970_v19  ;;  %v3755_v19 = vshll.u32 %v12798_v7, 16  ;;  %v9278_v7 = vld [vmem:[%s14786_s3 + $0x294] sm:$0xf] }
 0x2d3   : > { %4655 = vmatpush.bf16.msrb.mxu1 %v8117_v12  ;;  %v12768_v31 = vadd.f32 %v4320_v57, %v4286_v44  ;;  %v8042_v44 = vld [vmem:[%s14786_s3 + $0x528] sm:$0xf0]  ;;  %v9376_v12 = vld [vmem:[%s14786_s3 + $0x5a4] sm:$0xf] }
 0x2d4   : > { %v8045_v26 = vor.u32 %v9360_v9, %v8042_v44  ;;  %v8109_v57 = vor.u32 %v9376_v12, %v8106_v23  ;;  %v7962_v9 = vld [vmem:[%s14786_s3 + $0x488] sm:$0xf0]  ;;  %v12809_v44 = vpack.c.b16 %v3466_v1, %v3466_v1  ;;  %4589 = vmatpush.bf16.msrb.mxu3 %v7973_v50  ;;  %v9358_v1 = vld [vmem:[%s14786_s3 + $0x514] sm:$0xf]  ;;  %v3753_v50 = vor.u32 %v3751_v38, %v3709_v62 }
 0x2d5   : > { %v7965_v30 = vor.u32 %v9340_v3, %v7962_v9  ;;  %v3757_v47 = vrot.slane %v3755_v19, 1  ;;  %v8029_v19 = vor.u32 %v9356_v42, %v8026_v63 }
 0x2d6   : > { %15008 = vst [vmem:[#allocation26_spill] sm:$0xff] %v12809_v44  ;;  %4622 = vmatpush.bf16.msrb.mxu0 %v8045_v26  ;;  %v3763_v23 = vshll.u32 %v12809_v44, 16  ;;  %v8034_v26 = vld [vmem:[%s14786_s3 + $0x518] sm:$0xf0] }
 0x2d7   : > { %4436 = vmatmul.bf16.gmra.mxu2 %v12762_v51  ;;  %v4288_v48 = vpop.f32.mrf.mxu2  ;;  %4656 = vmatpush.bf16.msrb.mxu1 %v8109_v57  ;;  %v8037_v57 = vor.u32 %v9358_v1, %v8034_v26  ;;  %v9372_v1 = vld [vmem:[%s14786_s3 + $0x584] sm:$0xf]  ;;  %v8090_v26 = vld [vmem:[%s14786_s3 + $0x588] sm:$0xf0] }
 0x2d8   : > { %4470 = vmatmul.bf16.gmra.mxu3 %v12766_v16  ;;  %v3765_v3 = vrot.slane %v3763_v23, 1  ;;  %v9211_v23 = vld [vmem:[%s14786_s3 + $0x74] sm:$0xf0] }
 0x2d9   : > { %4590 = vmatpush.bf16.msrb.mxu3 %v7965_v30  ;;  %v12830_v30 = vsel %vm15009_vm6, %v3753_v50, %v3757_v47  ;;  %v8093_v50 = vor.u32 %v9372_v1, %v8090_v26  ;;  %v8272_v47 = vld [vmem:[%s14786_s3 + $0xf0] sm:$0xf]  ;;  %v9243_v1 = vld [vmem:[%s14786_s3 + $0x174] sm:$0xf0]  ;;  %vm15054_vm6 = vmmov %vm15027_vm0 }
 0x2da   : > { %v4322_v11 = vpop.f32.mrf.mxu3  ;;  %4623 = vmatpush.bf16.msrb.mxu0 %v8037_v57  ;;  %v9227_v57 = vld [vmem:[%s14786_s3 + $0xf4] sm:$0xf0] }
 0x2db   : > { %v4323_v12 = vadd.f32 %v4322_v11, %v4288_v48  ;;  %v9374_v48 = vld [vmem:[%s14786_s3 + $0x594] sm:$0xf]  ;;  %v8208_v11 = vld [vmem:[%s14786_s3 + $0x70] sm:$0xf] }
 0x2de   : > { %4624 = vmatpush.bf16.msrb.mxu0 %v8029_v19  ;;  %v9209_v19 = vld [vmem:[%s14786_s3 + $0x64] sm:$0xf0] }
 0x2e0   : > { %4499 = vmatmul.bf16.gmra.mxu0 %v12214_v58  ;;  %v8098_v58 = vld [vmem:[%s14786_s3 + $0x598] sm:$0xf0]  ;;  %v4291_v33 = vpop.f32.mrf.mxu2 }
 0x2e1   : > { %4533 = vmatmul.bf16.gmra.mxu1 %v12237_v5  ;;  %v8101_v9 = vor.u32 %v9374_v48, %v8098_v58  ;;  %v12834_v5 = vsel %vm15010_vm10, %v3761_v49, %v3765_v3  ;;  %v8209_v48 = vor.u32 %v9211_v23, %v8208_v11  ;;  %v8273_v58 = vor.u32 %v9227_v57, %v8272_v47  ;;  %v8200_v11 = vld [vmem:[%s14786_s3 + $0x60] sm:$0xf]  ;;  %v9225_v57 = vld [vmem:[%s14786_s3 + $0xe4] sm:$0xf0]  ;;  %vm15056_vm10 = vmmov %vm15027_vm0 }
 0x2e2   : > { %v8201_v23 = vor.u32 %v9209_v19, %v8200_v11  ;;  %v8264_v47 = vld [vmem:[%s14786_s3 + $0xe0] sm:$0xf]  ;;  %v9241_v19 = vld [vmem:[%s14786_s3 + $0x164] sm:$0xf0] }
 0x2e3   : > { %4657 = vmatpush.bf16.msrb.mxu1 %v8101_v9  ;;  %v4325_v38 = vpop.f32.mrf.mxu3  ;;  %5195 = vmatpush.bf16.msra.mxu2 %v8209_v48  ;;  %v8328_v11 = vld [vmem:[%s14786_s3 + $0x160] sm:$0xf] }
 0x2e4   : > { %v12837_v62 = vadd.f32 %v4325_v38, %v4291_v33  ;;  %5229 = vmatpush.bf16.msra.mxu3 %v8273_v58  ;;  %v8400_v58 = vld [vmem:[%s14786_s3 + $0x1f0] sm:$0xf] }
 0x2e7   : > { %4441 = vmatmul.bf16.gmra.mxu2 %v12830_v30  ;;  %4658 = vmatpush.bf16.msrb.mxu1 %v8093_v50 }
 0x2e8   : > { %4475 = vmatmul.bf16.gmra.mxu3 %v12834_v5  ;;  %v4293_v49 = vpop.f32.mrf.mxu2  ;;  %5196 = vmatpush.bf16.msra.mxu2 %v8201_v23 }
 0x2eb   : > { %v4327_v38 = vpop.f32.mrf.mxu3 }
 0x2ec   : > { %v12864_v42 = vadd.f32 %v4327_v38, %v4293_v49  ;;  %v8265_v49 = vor.u32 %v9225_v57, %v8264_v47 }
 0x2ed   : > { %v4354_v3 = vpop.f32.mrf.mxu0 }
 0x2ee   : > { %v4355_v9 = vadd.f32 %v4354_v3, %v12768_v31  ;;  %v4388_v33 = vpop.f32.mrf.mxu1  ;;  %v8336_v31 = vld [vmem:[%s14786_s3 + $0x170] sm:$0xf]  ;;  %v9207_v3 = vld [vmem:[%s14786_s3 + $0x54] sm:$0xf0]  ;;  %5230 = vmatpush.bf16.msra.mxu3 %v8265_v49 }
 0x2f0   : > { %v12866_v63 = vadd.f32 %v4388_v33, %v4355_v9  ;;  %4504 = vmatmul.bf16.gmra.mxu0 %v12360_v13  ;;  %v8337_v13 = vor.u32 %v9243_v1, %v8336_v31  ;;  %v8256_v31 = vld [vmem:[%s14786_s3 + $0xd0] sm:$0xf]  ;;  %v8329_v1 = vor.u32 %v9241_v19, %v8328_v11 }
 0x2f1   : > { %4538 = vmatmul.bf16.gmra.mxu1 %v12373_v0 }
 0x2f2   : > { %5263 = vmatpush.bf16.msra.mxu0 %v8337_v13  ;;  %v9223_v13 = vld [vmem:[%s14786_s3 + $0xd4] sm:$0xf0] }
 0x2f5   : > { %v4356_v0 = vpop.f32.mrf.mxu0 }
 0x2f6   : > { %v4357_v26 = vadd.f32 %v4356_v0, %v4323_v12  ;;  %v4390_v48 = vpop.f32.mrf.mxu1  ;;  %v8392_v0 = vld [vmem:[%s14786_s3 + $0x1e0] sm:$0xf]  ;;  %5264 = vmatpush.bf16.msra.mxu0 %v8329_v1 }
 0x2f7   : > { %4557 = vmatmul.bf16.vlgmr.msrb.gmra.mxu2 %v12161_v8  ;;  %v9259_v8 = vld [vmem:[%s14786_s3 + $0x1f4] sm:$0xf0] }
 0x2f8   : > { %4591 = vmatmul.bf16.vlgmr.msrb.gmra.mxu3 %v12174_v61  ;;  %v12884_v50 = vadd.f32 %v4390_v48, %v4357_v26  ;;  %v8192_v61 = vld [vmem:[%s14786_s3 + $0x50] sm:$0xf]  ;;  %v8401_v33 = vor.u32 %v9259_v8, %v8400_v58  ;;  %v9257_v26 = vld [vmem:[%s14786_s3 + $0x1e4] sm:$0xf0]  ;;  %v8257_v48 = vor.u32 %v9223_v13, %v8256_v31  ;;  %v8248_v13 = vld [vmem:[%s14786_s3 + $0xc0] sm:$0xf] }
 0x2f9   : > { %v8193_v38 = vor.u32 %v9207_v3, %v8192_v61  ;;  %v8393_v47 = vor.u32 %v9257_v26, %v8392_v0  ;;  %v8184_v61 = vld [vmem:[%s14786_s3 + $0x40] sm:$0xf]  ;;  %v9205_v3 = vld [vmem:[%s14786_s3 + $0x44] sm:$0xf0]  ;;  %v8384_v26 = vld [vmem:[%s14786_s3 + $0x1d0] sm:$0xf] }
 0x2fa   : > { %v4296_v12 = vpop.f32.mrf.mxu2  ;;  %5297 = vmatpush.bf16.msra.mxu1 %v8401_v33  ;;  %5231 = vmatpush.bf16.msra.mxu3 %v8257_v48  ;;  %v8185_v33 = vor.u32 %v9205_v3, %v8184_v61  ;;  %v9221_v0 = vld [vmem:[%s14786_s3 + $0xc4] sm:$0xf0]  ;;  %v8176_v3 = vld [vmem:[%s14786_s3 + $0x30] sm:$0xf] }
 0x2fb   : > { %v4330_v9 = vpop.f32.mrf.mxu3  ;;  %5197 = vmatpush.bf16.msra.mxu2 %v8193_v38  ;;  %v8249_v48 = vor.u32 %v9221_v0, %v8248_v13  ;;  %v9253_v13 = vld [vmem:[%s14786_s3 + $0x1c4] sm:$0xf0] }
 0x2fc   : > { %v4331_v23 = vadd.f32 %v4330_v9, %v4296_v12 }
 0x2fd   : > { %v4359_v57 = vpop.f32.mrf.mxu0 }
 0x2fe   : > { %v4360_v58 = vadd.f32 %v4359_v57, %v12837_v62  ;;  %v4393_v12 = vpop.f32.mrf.mxu1  ;;  %5298 = vmatpush.bf16.msra.mxu1 %v8393_v47  ;;  %v8320_v62 = vld [vmem:[%s14786_s3 + $0x150] sm:$0xf]  ;;  %5232 = vmatpush.bf16.msra.mxu3 %v8249_v48 }
 0x2ff   : > { %5198 = vmatpush.bf16.msra.mxu2 %v8185_v33 }
 0x300   : > { %v12923_v49 = vadd.f32 %v4393_v12, %v4360_v58  ;;  %4509 = vmatmul.bf16.gmra.mxu0 %v12497_v34  ;;  %v9239_v34 = vld [vmem:[%s14786_s3 + $0x154] sm:$0xf0] }
 0x301   : > { %4543 = vmatmul.bf16.gmra.mxu1 %v12500_v20  ;;  %v8321_v38 = vor.u32 %v9239_v34, %v8320_v62  ;;  %v9203_v62 = vld [vmem:[%s14786_s3 + $0x34] sm:$0xf0]  ;;  %v8240_v34 = vld [vmem:[%s14786_s3 + $0xb0] sm:$0xf] }
 0x302   : > { %v4298_v8 = vpop.f32.mrf.mxu2  ;;  %v8177_v33 = vor.u32 %v9203_v62, %v8176_v3  ;;  %v9217_v3 = vld [vmem:[%s14786_s3 + $0xa4] sm:$0xf0] }
 0x303   : > { %v4332_v9 = vpop.f32.mrf.mxu3  ;;  %5265 = vmatpush.bf16.msra.mxu0 %v8321_v38  ;;  %v9219_v38 = vld [vmem:[%s14786_s3 + $0xb4] sm:$0xf0] }
 0x304   : > { %v4333_v20 = vadd.f32 %v4332_v9, %v4298_v8  ;;  %v8312_v9 = vld [vmem:[%s14786_s3 + $0x140] sm:$0xf]  ;;  %5199 = vmatpush.bf16.msra.mxu2 %v8177_v33  ;;  %v8368_v33 = vld [vmem:[%s14786_s3 + $0x1b0] sm:$0xf] }
 0x305   : > { %v4361_v11 = vpop.f32.mrf.mxu0 }
 0x306   : > { %v4362_v19 = vadd.f32 %v4361_v11, %v12864_v42  ;;  %v4395_v31 = vpop.f32.mrf.mxu1 }
 0x307   : > { %4562 = vmatmul.bf16.gmra.mxu2 %v12297_v29  ;;  %v9255_v29 = vld [vmem:[%s14786_s3 + $0x1d4] sm:$0xf0] }
 0x308   : > { %4596 = vmatmul.bf16.gmra.mxu3 %v12309_v36  ;;  %v12942_v1 = vadd.f32 %v4395_v31, %v4362_v19  ;;  %v8385_v47 = vor.u32 %v9255_v29, %v8384_v26  ;;  %v8241_v31 = vor.u32 %v9219_v38, %v8240_v34 }
 0x30a   : > { %v4301_v42 = vpop.f32.mrf.mxu2  ;;  %5299 = vmatpush.bf16.msra.mxu1 %v8385_v47  ;;  %5233 = vmatpush.bf16.msra.mxu3 %v8241_v31  ;;  %v8168_v47 = vld [vmem:[%s14786_s3 + $0x20] sm:$0xf] }
 0x30b   : > { %v4335_v36 = vpop.f32.mrf.mxu3 }
 0x30c   : > { %v4336_v57 = vadd.f32 %v4335_v36, %v4301_v42 }
 0x30d   : > { %v4364_v58 = vpop.f32.mrf.mxu0 }
 0x30e   : > { %v4365_v12 = vadd.f32 %v4364_v58, %v4331_v23  ;;  %v4398_v8 = vpop.f32.mrf.mxu1  ;;  %v9201_v58 = vld [vmem:[%s14786_s3 + $0x24] sm:$0xf0] }
 0x310   : > { %v12956_v61 = vadd.f32 %v4398_v8, %v4365_v12  ;;  %4625 = vmatmul.bf16.vlgmr.msrb.gmra.mxu0 %v12591_v28  ;;  %v9237_v28 = vld [vmem:[%s14786_s3 + $0x144] sm:$0xf0]  ;;  %v8304_v12 = vld [vmem:[%s14786_s3 + $0x130] sm:$0xf]  ;;  %v8169_v8 = vor.u32 %v9201_v58, %v8168_v47  ;;  %v9215_v47 = vld [vmem:[%s14786_s3 + $0x94] sm:$0xf0] }
 0x311   : > { %4659 = vmatmul.bf16.vlgmr.msrb.gmra.mxu1 %v12596_v54  ;;  %v8313_v19 = vor.u32 %v9237_v28, %v8312_v9  ;;  %v8376_v54 = vld [vmem:[%s14786_s3 + $0x1c0] sm:$0xf]  ;;  %v9251_v28 = vld [vmem:[%s14786_s3 + $0x1b4] sm:$0xf0] }
 0x312   : > { %v4303_v23 = vpop.f32.mrf.mxu2  ;;  %v8377_v26 = vor.u32 %v9253_v13, %v8376_v54  ;;  %5200 = vmatpush.bf16.msra.mxu2 %v8169_v8  ;;  %v8369_v38 = vor.u32 %v9251_v28, %v8368_v33  ;;  %v8360_v8 = vld [vmem:[%s14786_s3 + $0x1a0] sm:$0xf]  ;;  %v9197_v33 = vld [vmem:[%s14786_s3 + $0x4] sm:$0xf0] }
 0x313   : > { %v4337_v11 = vpop.f32.mrf.mxu3  ;;  %5266 = vmatpush.bf16.msra.mxu0 %v8313_v19  ;;  %v8216_v28 = vld [vmem:[%s14786_s3 + $0x80] sm:$0xf] }
 0x314   : > { %v4338_v0 = vadd.f32 %v4337_v11, %v4303_v23  ;;  %5300 = vmatpush.bf16.msra.mxu1 %v8377_v26  ;;  %v8160_v26 = vld [vmem:[%s14786_s3 + $0x10] sm:$0xf] }
 0x315   : > { %v4366_v42 = vpop.f32.mrf.mxu0 }
 0x316   : > { %v4367_v48 = vadd.f32 %v4366_v42, %v4333_v20  ;;  %v4400_v29 = vpop.f32.mrf.mxu1  ;;  %v9199_v42 = vld [vmem:[%s14786_s3 + $0x14] sm:$0xf0] }
 0x317   : > { %4567 = vmatmul.bf16.gmra.mxu2 %v12449_v56  ;;  %v9235_v56 = vld [vmem:[%s14786_s3 + $0x134] sm:$0xf0] }
 0x318   : > { %4601 = vmatmul.bf16.gmra.mxu3 %v12454_v21  ;;  %v12986_v36 = vadd.f32 %v4400_v29, %v4367_v48  ;;  %v8232_v21 = vld [vmem:[%s14786_s3 + $0xa0] sm:$0xf]  ;;  %v8305_v9 = vor.u32 %v9235_v56, %v8304_v12  ;;  %5301 = vmatpush.bf16.msra.mxu1 %v8369_v38  ;;  %v8161_v29 = vor.u32 %v9199_v42, %v8160_v26  ;;  %v9249_v56 = vld [vmem:[%s14786_s3 + $0x1a4] sm:$0xf0] }
 0x319   : > { %v8233_v23 = vor.u32 %v9217_v3, %v8232_v21  ;;  %v8361_v21 = vor.u32 %v9249_v56, %v8360_v8 }
 0x31a   : > { %v4306_v20 = vpop.f32.mrf.mxu2  ;;  %5267 = vmatpush.bf16.msra.mxu0 %v8305_v9  ;;  %5201 = vmatpush.bf16.msra.mxu2 %v8161_v29 }
 0x31b   : > { %v4340_v62 = vpop.f32.mrf.mxu3  ;;  %5234 = vmatpush.bf16.msra.mxu3 %v8233_v23  ;;  %v8152_v23 = vld [vmem:[%s14786_s3] sm:$0xf] }
 0x31c   : > { %v4341_v34 = vadd.f32 %v4340_v62, %v4306_v20  ;;  %5302 = vmatpush.bf16.msra.mxu1 %v8361_v21 }
 0x31d   : > { %v4369_v11 = vpop.f32.mrf.mxu0 }
 0x31e   : > { %v4370_v19 = vadd.f32 %v4369_v11, %v4336_v57  ;;  %v4403_v31 = vpop.f32.mrf.mxu1  ;;  %v8296_v57 = vld [vmem:[%s14786_s3 + $0x120] sm:$0xf]  ;;  %v9231_v11 = vld [vmem:[%s14786_s3 + $0x114] sm:$0xf0] }
 0x320   : > { %v13012_v54 = vadd.f32 %v4403_v31, %v4370_v19  ;;  %4630 = vmatmul.bf16.gmra.mxu0 %v12678_v55  ;;  %v9233_v55 = vld [vmem:[%s14786_s3 + $0x124] sm:$0xf0] }
 0x321   : > { %4664 = vmatmul.bf16.gmra.mxu1 %v12682_v18  ;;  %v8224_v18 = vld [vmem:[%s14786_s3 + $0x90] sm:$0xf]  ;;  %v8297_v12 = vor.u32 %v9233_v55, %v8296_v57 }
 0x322   : > { %v4308_v13 = vpop.f32.mrf.mxu2  ;;  %v8225_v20 = vor.u32 %v9215_v47, %v8224_v18  ;;  %v8352_v18 = vld [vmem:[%s14786_s3 + $0x190] sm:$0xf]  ;;  %v9247_v47 = vld [vmem:[%s14786_s3 + $0x194] sm:$0xf0] }
 0x323   : > { %v4342_v48 = vpop.f32.mrf.mxu3  ;;  %5268 = vmatpush.bf16.msra.mxu0 %v8297_v12 }
 0x324   : > { %v4343_v58 = vadd.f32 %v4342_v48, %v4308_v13  ;;  %5235 = vmatpush.bf16.msra.mxu3 %v8225_v20 }
 0x325   : > { %v4371_v3 = vpop.f32.mrf.mxu0 }
 0x326   : > { %v4372_v62 = vadd.f32 %v4371_v3, %v4338_v0  ;;  %v4405_v9 = vpop.f32.mrf.mxu1  ;;  %v8153_v0 = vor.u32 %v9197_v33, %v8152_v23  ;;  %v9245_v23 = vld [vmem:[%s14786_s3 + $0x184] sm:$0xf0] }
 0x327   : > { %4572 = vmatmul.bf16.gmra.mxu2 %v12542_v46  ;;  %v9213_v46 = vld [vmem:[%s14786_s3 + $0x84] sm:$0xf0] }
 0x328   : > { %4606 = vmatmul.bf16.gmra.mxu3 %v12547_v17  ;;  %v13051_v38 = vadd.f32 %v4405_v9, %v4372_v62  ;;  %v8288_v17 = vld [vmem:[%s14786_s3 + $0x110] sm:$0xf]  ;;  %v8217_v31 = vor.u32 %v9213_v46, %v8216_v28  ;;  %5202 = vmatpush.bf16.msra.mxu2 %v8153_v0 }
 0x329   : > { %v8289_v13 = vor.u32 %v9231_v11, %v8288_v17  ;;  %v8528_v46 = vld [vmem:[%s14786_s3 + $0x2f0] sm:$0xf]  ;;  %v9291_v17 = vld [vmem:[%s14786_s3 + $0x2f4] sm:$0xf0] }
 0x32a   : > { %v4422_v19 = vpop.f32.mrf.mxu2  ;;  %5236 = vmatpush.bf16.msra.mxu3 %v8217_v31  ;;  %v8529_v31 = vor.u32 %v9291_v17, %v8528_v46  ;;  %v9287_v46 = vld [vmem:[%s14786_s3 + $0x2d4] sm:$0xf0] }
 0x32b   : > { %v4423_v26 = vadd.f32 %v4422_v19, %v12866_v63  ;;  %v4456_v42 = vpop.f32.mrf.mxu3  ;;  %5269 = vmatpush.bf16.msra.mxu0 %v8289_v13  ;;  %v8353_v63 = vor.u32 %v9247_v47, %v8352_v18  ;;  %v9210_v18 = vld [vmem:[%s14786_s3 + $0x74] sm:$0xf] }
 0x32d   : > { %v13063_v57 = vadd.f32 %v4456_v42, %v4423_v26  ;;  %v4374_v48 = vpop.f32.mrf.mxu0  ;;  %5303 = vmatpush.bf16.msra.mxu1 %v8353_v63 }
 0x32e   : > { %v4375_v29 = vadd.f32 %v4374_v48, %v4341_v34  ;;  %v4408_v55 = vpop.f32.mrf.mxu1  ;;  %5365 = vmatpush.bf16.msrb.mxu3 %v8529_v31  ;;  %v9224_v31 = vld [vmem:[%s14786_s3 + $0xe4] sm:$0xf] }
 0x330   : > { %v13071_v12 = vadd.f32 %v4408_v55, %v4375_v29  ;;  %4635 = vmatmul.bf16.gmra.mxu0 %v12732_v10  ;;  %v8280_v10 = vld [vmem:[%s14786_s3 + $0x100] sm:$0xf]  ;;  %v9273_v55 = vld [vmem:[%s14786_s3 + $0x264] sm:$0xf0] }
 0x331   : > { %4669 = vmatmul.bf16.gmra.mxu1 %v12736_v24  ;;  %v9229_v24 = vld [vmem:[%s14786_s3 + $0x104] sm:$0xf0] }
 0x332   : > { %v4424_v20 = vpop.f32.mrf.mxu2 }
 0x333   : > { %v4425_v8 = vadd.f32 %v4424_v20, %v12884_v50  ;;  %v4458_v34 = vpop.f32.mrf.mxu3  ;;  %v8464_v50 = vld [vmem:[%s14786_s3 + $0x270] sm:$0xf] }
 0x335   : > { %v13076_v56 = vadd.f32 %v4458_v34, %v4425_v8  ;;  %v4376_v21 = vpop.f32.mrf.mxu0  ;;  %v9289_v8 = vld [vmem:[%s14786_s3 + $0x2e4] sm:$0xf0] }
 0x336   : > { %v4377_v3 = vadd.f32 %v4376_v21, %v4343_v58  ;;  %v4410_v62 = vpop.f32.mrf.mxu1  ;;  %v8281_v58 = vor.u32 %v9229_v24, %v8280_v10 }
 0x337   : > { %4577 = vmatmul.bf16.gmra.mxu2 %v12642_v43  ;;  %v9275_v43 = vld [vmem:[%s14786_s3 + $0x274] sm:$0xf0] }
 0x338   : > { %4611 = vmatmul.bf16.gmra.mxu3 %v12647_v32  ;;  %v13089_v9 = vadd.f32 %v4410_v62, %v4377_v3  ;;  %v8344_v32 = vld [vmem:[%s14786_s3 + $0x180] sm:$0xf]  ;;  %v8465_v28 = vor.u32 %v9275_v43, %v8464_v50  ;;  %5270 = vmatpush.bf16.msra.mxu0 %v8281_v58  ;;  %v8274_v3 = vld [vmem:[%s14786_s3 + $0xf8] sm:$0xf0]  ;;  %v8448_v43 = vld [vmem:[%s14786_s3 + $0x250] sm:$0xf] }
 0x339   : > { %v8345_v0 = vor.u32 %v9245_v23, %v8344_v32  ;;  %v9271_v32 = vld [vmem:[%s14786_s3 + $0x254] sm:$0xf0]  ;;  %v9208_v23 = vld [vmem:[%s14786_s3 + $0x64] sm:$0xf] }
 0x33a   : > { %v4427_v33 = vpop.f32.mrf.mxu2  ;;  %5331 = vmatpush.bf16.msrb.mxu2 %v8465_v28  ;;  %v8202_v28 = vld [vmem:[%s14786_s3 + $0x68] sm:$0xf0] }
 0x33b   : > { %v4428_v11 = vadd.f32 %v4427_v33, %v12923_v49  ;;  %v4461_v19 = vpop.f32.mrf.mxu3  ;;  %5304 = vmatpush.bf16.msra.mxu1 %v8345_v0  ;;  %v8456_v49 = vld [vmem:[%s14786_s3 + $0x260] sm:$0xf]  ;;  %v8449_v33 = vor.u32 %v9271_v32, %v8448_v43  ;;  %v8512_v0 = vld [vmem:[%s14786_s3 + $0x2d0] sm:$0xf]  ;;  %v9222_v43 = vld [vmem:[%s14786_s3 + $0xd4] sm:$0xf] }
 0x33c   : > { %v8457_v20 = vor.u32 %v9273_v55, %v8456_v49 }
 0x33d   : > { %v13107_v13 = vadd.f32 %v4461_v19, %v4428_v11  ;;  %v4490_v26 = vpop.f32.mrf.mxu0  ;;  %v8205_v11 = vor.u32 %v9208_v23, %v8202_v28  ;;  %v8513_v19 = vor.u32 %v9287_v46, %v8512_v0  ;;  %v8258_v23 = vld [vmem:[%s14786_s3 + $0xd8] sm:$0xf0] }
 0x33e   : > { %v4524_v42 = vpop.f32.mrf.mxu1  ;;  %5332 = vmatpush.bf16.msrb.mxu2 %v8457_v20  ;;  %v8261_v28 = vor.u32 %v9222_v43, %v8258_v23  ;;  %v9202_v43 = vld [vmem:[%s14786_s3 + $0x34] sm:$0xf]  ;;  %v8178_v23 = vld [vmem:[%s14786_s3 + $0x38] sm:$0xf0] }
 0x33f   : > { %v13109_v48 = vadd.f32 %v4524_v42, %v4490_v26  ;;  %v8266_v26 = vld [vmem:[%s14786_s3 + $0xe8] sm:$0xf0] }
 0x340   : > { %4640 = vmatmul.bf16.gmra.mxu0 %v12762_v51  ;;  %v8210_v51 = vld [vmem:[%s14786_s3 + $0x78] sm:$0xf0]  ;;  %v8269_v49 = vor.u32 %v9224_v31, %v8266_v26  ;;  %v8432_v26 = vld [vmem:[%s14786_s3 + $0x230] sm:$0xf] }
 0x341   : > { %4674 = vmatmul.bf16.gmra.mxu1 %v12766_v16  ;;  %v8520_v16 = vld [vmem:[%s14786_s3 + $0x2e0] sm:$0xf]  ;;  %v8213_v34 = vor.u32 %v9210_v18, %v8210_v51  ;;  %v9269_v51 = vld [vmem:[%s14786_s3 + $0x244] sm:$0xf0] }
 0x342   : > { %v4429_v29 = vpop.f32.mrf.mxu2  ;;  %v8521_v21 = vor.u32 %v9289_v8, %v8520_v16  ;;  %5333 = vmatpush.bf16.msrb.mxu2 %v8449_v33  ;;  %v9206_v16 = vld [vmem:[%s14786_s3 + $0x54] sm:$0xf] }
 0x343   : > { %v4430_v47 = vadd.f32 %v4429_v29, %v12942_v1  ;;  %v4463_v63 = vpop.f32.mrf.mxu3  ;;  %v9226_v1 = vld [vmem:[%s14786_s3 + $0xf4] sm:$0xf]  ;;  %5399 = vmatpush.bf16.msrb.mxu0 %v8213_v34 }
 0x344   : > { %v8277_v10 = vor.u32 %v9226_v1, %v8274_v3  ;;  %5366 = vmatpush.bf16.msrb.mxu3 %v8521_v21 }
 0x345   : > { %v13138_v62 = vadd.f32 %v4463_v63, %v4430_v47  ;;  %v4492_v24 = vpop.f32.mrf.mxu0 }
 0x346   : > { %v4526_v50 = vpop.f32.mrf.mxu1  ;;  %5433 = vmatpush.bf16.msrb.mxu1 %v8277_v10 }
 0x347   : > { %5203 = vmatmul.bf16.vlgmr.msra.gmra.mxu2 %v11890_v22  ;;  %v13141_v58 = vadd.f32 %v4526_v50, %v4492_v24  ;;  %5400 = vmatpush.bf16.msrb.mxu0 %v8205_v11  ;;  %v9285_v50 = vld [vmem:[%s14786_s3 + $0x2c4] sm:$0xf0] }
 0x348   : > { %5237 = vmatmul.bf16.vlgmr.msra.gmra.mxu3 %v11920_v37 }
 0x349   : > { %5367 = vmatpush.bf16.msrb.mxu3 %v8513_v19 }
 0x34a   : > { %v4432_v17 = vpop.f32.mrf.mxu2  ;;  %5434 = vmatpush.bf16.msrb.mxu1 %v8269_v49  ;;  %v8186_v49 = vld [vmem:[%s14786_s3 + $0x48] sm:$0xf0] }
 0x34b   : > { %v4433_v42 = vadd.f32 %v4432_v17, %v12956_v61  ;;  %v4466_v29 = vpop.f32.mrf.mxu3  ;;  %v8440_v61 = vld [vmem:[%s14786_s3 + $0x240] sm:$0xf] }
 0x34c   : > { %v8441_v21 = vor.u32 %v9269_v51, %v8440_v61  ;;  %v9283_v61 = vld [vmem:[%s14786_s3 + $0x2b4] sm:$0xf0]  ;;  %v9220_v51 = vld [vmem:[%s14786_s3 + $0xc4] sm:$0xf] }
 0x34d   : > { %v13169_v55 = vadd.f32 %v4466_v29, %v4433_v42  ;;  %v4495_v18 = vpop.f32.mrf.mxu0  ;;  %v9267_v42 = vld [vmem:[%s14786_s3 + $0x234] sm:$0xf0] }
 0x34e   : > { %v4529_v47 = vpop.f32.mrf.mxu1  ;;  %5334 = vmatpush.bf16.msrb.mxu2 %v8441_v21  ;;  %5435 = vmatpush.bf16.msrb.mxu1 %v8261_v28  ;;  %v8433_v29 = vor.u32 %v9267_v42, %v8432_v26  ;;  %v8250_v21 = vld [vmem:[%s14786_s3 + $0xc8] sm:$0xf0]  ;;  %v9281_v28 = vld [vmem:[%s14786_s3 + $0x2a4] sm:$0xf0]  ;;  %v8242_v26 = vld [vmem:[%s14786_s3 + $0xb8] sm:$0xf0] }
 0x34f   : > { %v13171_v63 = vadd.f32 %v4529_v47, %v4495_v18 }
 0x350   : > { %4645 = vmatmul.bf16.gmra.mxu0 %v12830_v30  ;;  %v8194_v30 = vld [vmem:[%s14786_s3 + $0x58] sm:$0xf0] }
 0x351   : > { %4679 = vmatmul.bf16.gmra.mxu1 %v12834_v5  ;;  %v8197_v5 = vor.u32 %v9206_v16, %v8194_v30  ;;  %v8253_v30 = vor.u32 %v9220_v51, %v8250_v21  ;;  %v9263_v51 = vld [vmem:[%s14786_s3 + $0x214] sm:$0xf0] }
 0x352   : > { %v4434_v20 = vpop.f32.mrf.mxu2  ;;  %5335 = vmatpush.bf16.msrb.mxu2 %v8433_v29 }
 0x353   : > { %v4435_v8 = vadd.f32 %v4434_v20, %v12986_v36  ;;  %v4468_v34 = vpop.f32.mrf.mxu3  ;;  %5401 = vmatpush.bf16.msrb.mxu0 %v8197_v5  ;;  %v8504_v36 = vld [vmem:[%s14786_s3 + $0x2c0] sm:$0xf]  ;;  %v8496_v20 = vld [vmem:[%s14786_s3 + $0x2b0] sm:$0xf]  ;;  %5436 = vmatpush.bf16.msrb.mxu1 %v8253_v30  ;;  %v8170_v30 = vld [vmem:[%s14786_s3 + $0x28] sm:$0xf0] }
 0x354   : > { %v8505_v32 = vor.u32 %v9285_v50, %v8504_v36  ;;  %v9265_v50 = vld [vmem:[%s14786_s3 + $0x224] sm:$0xf0] }
 0x355   : > { %v13188_v1 = vadd.f32 %v4468_v34, %v4435_v8  ;;  %v4497_v3 = vpop.f32.mrf.mxu0  ;;  %v8497_v34 = vor.u32 %v9283_v61, %v8496_v20 }
 0x356   : > { %v4531_v10 = vpop.f32.mrf.mxu1  ;;  %5368 = vmatpush.bf16.msrb.mxu3 %v8505_v32 }
 0x357   : > { %5208 = vmatmul.bf16.gmra.mxu2 %v11898_v39  ;;  %v13191_v24 = vadd.f32 %v4531_v10, %v4497_v3 }
 0x358   : > { %5242 = vmatmul.bf16.gmra.mxu3 %v11908_v52 }
 0x35a   : > { %v4437_v33 = vpop.f32.mrf.mxu2  ;;  %5369 = vmatpush.bf16.msrb.mxu3 %v8497_v34 }
 0x35b   : > { %v4438_v0 = vadd.f32 %v4437_v33, %v13012_v54  ;;  %v4471_v46 = vpop.f32.mrf.mxu3  ;;  %v9204_v54 = vld [vmem:[%s14786_s3 + $0x44] sm:$0xf]  ;;  %v8488_v33 = vld [vmem:[%s14786_s3 + $0x2a0] sm:$0xf] }
 0x35c   : > { %v8189_v47 = vor.u32 %v9204_v54, %v8186_v49 }
 0x35d   : > { %v13207_v17 = vadd.f32 %v4471_v46, %v4438_v0  ;;  %v4500_v11 = vpop.f32.mrf.mxu0  ;;  %v8181_v46 = vor.u32 %v9202_v43, %v8178_v23  ;;  %v8234_v43 = vld [vmem:[%s14786_s3 + $0xa8] sm:$0xf0] }
 0x35e   : > { %v4534_v19 = vpop.f32.mrf.mxu1  ;;  %5402 = vmatpush.bf16.msrb.mxu0 %v8189_v47 }
 0x35f   : > { %v13209_v31 = vadd.f32 %v4534_v19, %v4500_v11  ;;  %v8489_v11 = vor.u32 %v9281_v28, %v8488_v33  ;;  %v9218_v19 = vld [vmem:[%s14786_s3 + $0xb4] sm:$0xf] }
 0x360   : > { %5271 = vmatmul.bf16.vlgmr.msra.gmra.mxu0 %v12049_v59  ;;  %v8245_v29 = vor.u32 %v9218_v19, %v8242_v26  ;;  %v8472_v19 = vld [vmem:[%s14786_s3 + $0x280] sm:$0xf] }
 0x361   : > { %5305 = vmatmul.bf16.vlgmr.msra.gmra.mxu1 %v12065_v40  ;;  %5370 = vmatpush.bf16.msrb.mxu3 %v8489_v11  ;;  %v9261_v11 = vld [vmem:[%s14786_s3 + $0x204] sm:$0xf0] }
 0x362   : > { %v4439_v18 = vpop.f32.mrf.mxu2  ;;  %5403 = vmatpush.bf16.msrb.mxu0 %v8181_v46  ;;  %5437 = vmatpush.bf16.msrb.mxu1 %v8245_v29  ;;  %v8408_v46 = vld [vmem:[%s14786_s3 + $0x200] sm:$0xf]  ;;  %v9198_v29 = vld [vmem:[%s14786_s3 + $0x14] sm:$0xf] }
 0x363   : > { %v4440_v16 = vadd.f32 %v4439_v18, %v13051_v38  ;;  %v4473_v8 = vpop.f32.mrf.mxu3  ;;  %v8424_v38 = vld [vmem:[%s14786_s3 + $0x220] sm:$0xf] }
 0x364   : > { %v8425_v32 = vor.u32 %v9265_v50, %v8424_v38 }
 0x365   : > { %v13238_v5 = vadd.f32 %v4473_v8, %v4440_v16  ;;  %v4502_v3 = vpop.f32.mrf.mxu0  ;;  %v9200_v16 = vld [vmem:[%s14786_s3 + $0x24] sm:$0xf] }
 0x366   : > { %v4536_v10 = vpop.f32.mrf.mxu1  ;;  %5336 = vmatpush.bf16.msrb.mxu2 %v8425_v32  ;;  %v8173_v38 = vor.u32 %v9200_v16, %v8170_v30  ;;  %v15011_v30 = vld [vmem:[#allocation17_spill] sm:$0xff] }
 0x367   : > { %5213 = vmatmul.bf16.gmra.mxu2 %v11984_v27  ;;  %v13241_v36 = vadd.f32 %v4536_v10, %v4502_v3  ;;  %v8480_v3 = vld [vmem:[%s14786_s3 + $0x290] sm:$0xf]  ;;  %v9279_v10 = vld [vmem:[%s14786_s3 + $0x294] sm:$0xf0] }
 0x368   : > { %5247 = vmatmul.bf16.gmra.mxu3 %v11988_v25  ;;  %v8481_v50 = vor.u32 %v9279_v10, %v8480_v3  ;;  %5404 = vmatpush.bf16.msrb.mxu0 %v8173_v38  ;;  %v9214_v3 = vld [vmem:[%s14786_s3 + $0x94] sm:$0xf]  ;;  %v15012_v10 = vld [vmem:[#allocation12_spill] sm:$0xff] }
 0x36a   : > { %v4442_v0 = vpop.f32.mrf.mxu2  ;;  %5371 = vmatpush.bf16.msrb.mxu3 %v8481_v50 }
 0x36b   : > { %v4443_v42 = vadd.f32 %v4442_v0, %v13071_v12  ;;  %v4476_v54 = vpop.f32.mrf.mxu3  ;;  %v8416_v12 = vld [vmem:[%s14786_s3 + $0x210] sm:$0xf] }
 0x36c   : > { %v8417_v21 = vor.u32 %v9263_v51, %v8416_v12 }
 0x36d   : > { %v13269_v49 = vadd.f32 %v4476_v54, %v4443_v42  ;;  %v4505_v18 = vpop.f32.mrf.mxu0  ;;  %v8409_v42 = vor.u32 %v9261_v11, %v8408_v46  ;;  %v9277_v54 = vld [vmem:[%s14786_s3 + $0x284] sm:$0xf0] }
 0x36e   : > { %v4539_v47 = vpop.f32.mrf.mxu1  ;;  %5337 = vmatpush.bf16.msrb.mxu2 %v8417_v21  ;;  %v8473_v12 = vor.u32 %v9277_v54, %v8472_v19  ;;  %v15013_v46 = vld [vmem:[#allocation6_spill] sm:$0xff]  ;;  %v15014_v19 = vld [vmem:[#allocation13_spill] sm:$0xff] }
 0x36f   : > { %v13271_v20 = vadd.f32 %v4539_v47, %v4505_v18  ;;  %v8162_v18 = vld [vmem:[%s14786_s3 + $0x18] sm:$0xf0] }
 0x370   : > { %5276 = vmatmul.bf16.gmra.mxu0 %v12115_v15  ;;  %v8165_v51 = vor.u32 %v9198_v29, %v8162_v18  ;;  %5372 = vmatpush.bf16.msrb.mxu3 %v8473_v12  ;;  %v8338_v18 = vld [vmem:[%s14786_s3 + $0x178] sm:$0xf0] }
 0x371   : > { %5310 = vmatmul.bf16.gmra.mxu1 %v12117_v2 }
 0x372   : > { %v4444_v61 = vpop.f32.mrf.mxu2  ;;  %5338 = vmatpush.bf16.msrb.mxu2 %v8409_v42  ;;  %5405 = vmatpush.bf16.msrb.mxu0 %v8165_v51  ;;  %v8154_v42 = vld [vmem:[%s14786_s3 + $0x8] sm:$0xf0] }
 0x373   : > { %v4445_v8 = vadd.f32 %v4444_v61, %v13089_v9  ;;  %v4478_v34 = vpop.f32.mrf.mxu3  ;;  %v9216_v9 = vld [vmem:[%s14786_s3 + $0xa4] sm:$0xf] }
 0x374   : > { %v8237_v23 = vor.u32 %v9216_v9, %v8234_v43 }
 0x375   : > { %v13300_v32 = vadd.f32 %v4478_v34, %v4445_v8  ;;  %v4507_v33 = vpop.f32.mrf.mxu0 }
 0x376   : > { %v4541_v28 = vpop.f32.mrf.mxu1  ;;  %5438 = vmatpush.bf16.msrb.mxu1 %v8237_v23 }
 0x377   : > { %5218 = vmatmul.bf16.gmra.mxu2 %v12163_v53  ;;  %v13303_v0 = vadd.f32 %v4541_v28, %v4507_v33 }
 0x378   : > { %5252 = vmatmul.bf16.gmra.mxu3 %v12176_v14 }
 0x37a   : > { %v4558_v26 = vpop.f32.mrf.mxu2 }
 0x37b   : > { %v4559_v47 = vadd.f32 %v4558_v26, %v13109_v48  ;;  %v4592_v61 = vpop.f32.mrf.mxu3  ;;  %v8226_v48 = vld [vmem:[%s14786_s3 + $0x98] sm:$0xf0]  ;;  %v9196_v26 = vld [vmem:[%s14786_s3 + $0x4] sm:$0xf] }
 0x37c   : > { %v8229_v50 = vor.u32 %v9214_v3, %v8226_v48  ;;  %v8157_v29 = vor.u32 %v9196_v26, %v8154_v42  ;;  %v9258_v3 = vld [vmem:[%s14786_s3 + $0x1f4] sm:$0xf]  ;;  %v8402_v48 = vld [vmem:[%s14786_s3 + $0x1f8] sm:$0xf0]  ;;  %v15016_v26 = vld [vmem:[#allocation14_spill] sm:$0xff] }
 0x37d   : > { %v4593_v16 = vadd.f32 %v4592_v61, %v4559_v47  ;;  %v4510_v8 = vpop.f32.mrf.mxu0  ;;  %v9212_v47 = vld [vmem:[%s14786_s3 + $0x84] sm:$0xf]  ;;  %v8218_v61 = vld [vmem:[%s14786_s3 + $0x88] sm:$0xf0] }
 0x37e   : > { %v4544_v34 = vpop.f32.mrf.mxu1  ;;  %5439 = vmatpush.bf16.msrb.mxu1 %v8229_v50  ;;  %5406 = vmatpush.bf16.msrb.mxu0 %v8157_v29 }
 0x37f   : > { %v13325_v21 = vadd.f32 %v4544_v34, %v4510_v8  ;;  %v8221_v34 = vor.u32 %v9212_v47, %v8218_v61  ;;  %v8466_v61 = vld [vmem:[%s14786_s3 + $0x278] sm:$0xf0] }
 0x380   : > { %5281 = vmatmul.bf16.gmra.mxu0 %v15011_v30 }
 0x381   : > { %5315 = vmatmul.bf16.gmra.mxu1 %v15012_v10 }
 0x382   : > { %v4560_v38 = vpop.f32.mrf.mxu2  ;;  %5440 = vmatpush.bf16.msrb.mxu1 %v8221_v34 }
 0x383   : > { %v4561_v9 = vadd.f32 %v4560_v38, %v13141_v58  ;;  %v4594_v43 = vpop.f32.mrf.mxu3  ;;  %v9242_v58 = vld [vmem:[%s14786_s3 + $0x174] sm:$0xf]  ;;  %v8405_v38 = vor.u32 %v9258_v3, %v8402_v48  ;;  %v8530_v3 = vld [vmem:[%s14786_s3 + $0x2f8] sm:$0xf0] }
 0x384   : > { %v8341_v8 = vor.u32 %v9242_v58, %v8338_v18  ;;  %v9240_v58 = vld [vmem:[%s14786_s3 + $0x164] sm:$0xf] }
 0x385   : > { %v4595_v23 = vadd.f32 %v4594_v43, %v4561_v9  ;;  %v4512_v33 = vpop.f32.mrf.mxu0  ;;  %5501 = vmatpush.bf16.msra.mxu3 %v8405_v38 }
 0x386   : > { %v4546_v28 = vpop.f32.mrf.mxu1  ;;  %5467 = vmatpush.bf16.msra.mxu2 %v8341_v8 }
 0x387   : > { %5223 = vmatmul.bf16.gmra.mxu2 %v15013_v46  ;;  %v13337_v11 = vadd.f32 %v4546_v28, %v4512_v33  ;;  %v15015_v28 = vld [vmem:[#allocation18_spill] sm:$0xff] }
 0x388   : > { %5257 = vmatmul.bf16.gmra.mxu3 %v15014_v19 }
 0x38a   : > { %v4563_v54 = vpop.f32.mrf.mxu2 }
 0x38b   : > { %v4564_v12 = vadd.f32 %v4563_v54, %v13171_v63  ;;  %v4597_v51 = vpop.f32.mrf.mxu3  ;;  %v8330_v54 = vld [vmem:[%s14786_s3 + $0x168] sm:$0xf0] }
 0x38c   : > { %v8333_v47 = vor.u32 %v9240_v58, %v8330_v54  ;;  %v15018_v58 = vld [vmem:[#allocation19_spill] sm:$0xff] }
 0x38d   : > { %v4598_v50 = vadd.f32 %v4597_v51, %v4564_v12  ;;  %v4626_v9 = vpop.f32.mrf.mxu0  ;;  %v9256_v12 = vld [vmem:[%s14786_s3 + $0x1e4] sm:$0xf]  ;;  %v8394_v51 = vld [vmem:[%s14786_s3 + $0x1e8] sm:$0xf0] }
 0x38e   : > { %v4627_v43 = vadd.f32 %v4626_v9, %v4593_v16  ;;  %v4660_v63 = vpop.f32.mrf.mxu1  ;;  %v9274_v16 = vld [vmem:[%s14786_s3 + $0x274] sm:$0xf]  ;;  %v8397_v34 = vor.u32 %v9256_v12, %v8394_v51  ;;  %5468 = vmatpush.bf16.msra.mxu2 %v8333_v47  ;;  %v8386_v51 = vld [vmem:[%s14786_s3 + $0x1d8] sm:$0xf0] }
 0x38f   : > { %v8469_v8 = vor.u32 %v9274_v16, %v8466_v61  ;;  %v9238_v16 = vld [vmem:[%s14786_s3 + $0x154] sm:$0xf]  ;;  %v8458_v61 = vld [vmem:[%s14786_s3 + $0x268] sm:$0xf0] }
 0x390   : > { %v13365_v33 = vadd.f32 %v4660_v63, %v4627_v43  ;;  %5286 = vmatmul.bf16.gmra.mxu0 %v15015_v28  ;;  %5502 = vmatpush.bf16.msra.mxu3 %v8397_v34  ;;  %v9254_v12 = vld [vmem:[%s14786_s3 + $0x1d4] sm:$0xf] }
 0x391   : > { %5320 = vmatmul.bf16.gmra.mxu1 %v15016_v26  ;;  %5535 = vmatpush.bf16.msra.mxu0 %v8469_v8 }
 0x392   : > { %v4565_v42 = vpop.f32.mrf.mxu2 }
 0x393   : > { %v4566_v29 = vadd.f32 %v4565_v42, %v13191_v24  ;;  %v4599_v18 = vpop.f32.mrf.mxu3  ;;  %v9290_v24 = vld [vmem:[%s14786_s3 + $0x2f4] sm:$0xf]  ;;  %v15017_v42 = vld [vmem:[#allocation16_spill] sm:$0xff] }
 0x394   : > { %v8533_v38 = vor.u32 %v9290_v24, %v8530_v3  ;;  %v8389_v3 = vor.u32 %v9254_v12, %v8386_v51  ;;  %v9236_v51 = vld [vmem:[%s14786_s3 + $0x144] sm:$0xf] }
 0x395   : > { %v4600_v48 = vadd.f32 %v4599_v18, %v4566_v29  ;;  %v4628_v9 = vpop.f32.mrf.mxu0  ;;  %v8322_v29 = vld [vmem:[%s14786_s3 + $0x158] sm:$0xf0] }
 0x396   : > { %v4629_v43 = vadd.f32 %v4628_v9, %v4595_v23  ;;  %v4662_v63 = vpop.f32.mrf.mxu1  ;;  %5569 = vmatpush.bf16.msra.mxu1 %v8533_v38  ;;  %v9272_v23 = vld [vmem:[%s14786_s3 + $0x264] sm:$0xf]  ;;  %v8325_v47 = vor.u32 %v9238_v16, %v8322_v29  ;;  %v8522_v9 = vld [vmem:[%s14786_s3 + $0x2e8] sm:$0xf0]  ;;  %5503 = vmatpush.bf16.msra.mxu3 %v8389_v3  ;;  %v8450_v3 = vld [vmem:[%s14786_s3 + $0x258] sm:$0xf0] }
 0x397   : > { %5339 = vmatmul.bf16.vlgmr.msrb.gmra.mxu2 %v15017_v42  ;;  %v8461_v24 = vor.u32 %v9272_v23, %v8458_v61  ;;  %v9288_v38 = vld [vmem:[%s14786_s3 + $0x2e4] sm:$0xf]  ;;  %v15019_v23 = vld [vmem:[#allocation20_spill] sm:$0xff]  ;;  %v15020_v61 = vld [vmem:[#allocation15_spill] sm:$0xff] }
 0x398   : > { %5373 = vmatmul.bf16.vlgmr.msrb.gmra.mxu3 %v15018_v58  ;;  %v13396_v54 = vadd.f32 %v4662_v63, %v4629_v43  ;;  %5469 = vmatpush.bf16.msra.mxu2 %v8325_v47  ;;  %v8525_v43 = vor.u32 %v9288_v38, %v8522_v9  ;;  %v8314_v47 = vld [vmem:[%s14786_s3 + $0x148] sm:$0xf0] }
 0x399   : > { %5536 = vmatpush.bf16.msra.mxu0 %v8461_v24  ;;  %v8317_v24 = vor.u32 %v9236_v51, %v8314_v47  ;;  %v9286_v51 = vld [vmem:[%s14786_s3 + $0x2d4] sm:$0xf] }
 0x39a   : > { %v4568_v18 = vpop.f32.mrf.mxu2  ;;  %5570 = vmatpush.bf16.msra.mxu1 %v8525_v43 }
 0x39b   : > { %v4569_v8 = vadd.f32 %v4568_v18, %v13209_v31  ;;  %v4602_v34 = vpop.f32.mrf.mxu3 }
 0x39c   : > { %5470 = vmatpush.bf16.msra.mxu2 %v8317_v24 }
 0x39d   : > { %v4603_v63 = vadd.f32 %v4602_v34, %v4569_v8  ;;  %v4631_v16 = vpop.f32.mrf.mxu0 }
 0x39e   : > { %v4632_v29 = vadd.f32 %v4631_v16, %v4598_v50  ;;  %v4665_v31 = vpop.f32.mrf.mxu1  ;;  %v9270_v50 = vld [vmem:[%s14786_s3 + $0x254] sm:$0xf] }
 0x39f   : > { %v8453_v38 = vor.u32 %v9270_v50, %v8450_v3  ;;  %v8514_v50 = vld [vmem:[%s14786_s3 + $0x2d8] sm:$0xf0] }
 0x3a0   : > { %v13423_v18 = vadd.f32 %v4665_v31, %v4632_v29  ;;  %5291 = vmatmul.bf16.gmra.mxu0 %v15019_v23  ;;  %v8517_v24 = vor.u32 %v9286_v51, %v8514_v50 }
 0x3a1   : > { %5325 = vmatmul.bf16.gmra.mxu1 %v15020_v61  ;;  %5537 = vmatpush.bf16.msra.mxu0 %v8453_v38 }
 0x3a2   : > { %v4570_v12 = vpop.f32.mrf.mxu2  ;;  %5571 = vmatpush.bf16.msra.mxu1 %v8517_v24 }
 0x3a3   : > { %v4571_v8 = vadd.f32 %v4570_v12, %v13241_v36  ;;  %v4604_v34 = vpop.f32.mrf.mxu3  ;;  %v9252_v36 = vld [vmem:[%s14786_s3 + $0x1c4] sm:$0xf]  ;;  %v8378_v12 = vld [vmem:[%s14786_s3 + $0x1c8] sm:$0xf0] }
 0x3a4   : > { %v8381_v47 = vor.u32 %v9252_v36, %v8378_v12  ;;  %v9234_v36 = vld [vmem:[%s14786_s3 + $0x134] sm:$0xf]  ;;  %v9268_v12 = vld [vmem:[%s14786_s3 + $0x244] sm:$0xf] }
 0x3a5   : > { %v4605_v9 = vadd.f32 %v4604_v34, %v4571_v8  ;;  %v4633_v43 = vpop.f32.mrf.mxu0 }
 0x3a6   : > { %v4634_v16 = vadd.f32 %v4633_v43, %v4600_v48  ;;  %v4667_v29 = vpop.f32.mrf.mxu1  ;;  %5504 = vmatpush.bf16.msra.mxu3 %v8381_v47  ;;  %v8370_v47 = vld [vmem:[%s14786_s3 + $0x1b8] sm:$0xf0] }
 0x3a7   : > { %5344 = vmatmul.bf16.gmra.mxu2 %v12525_v4 }
 0x3a8   : > { %5378 = vmatmul.bf16.gmra.mxu3 %v12534_v60  ;;  %v13442_v31 = vadd.f32 %v4667_v29, %v4634_v16 }
 0x3aa   : > { %v4573_v48 = vpop.f32.mrf.mxu2 }
 0x3ab   : > { %v4574_v8 = vadd.f32 %v4573_v48, %v13271_v20  ;;  %v4607_v34 = vpop.f32.mrf.mxu3  ;;  %v8306_v20 = vld [vmem:[%s14786_s3 + $0x138] sm:$0xf0]  ;;  %v9250_v48 = vld [vmem:[%s14786_s3 + $0x1b4] sm:$0xf] }
 0x3ac   : > { %v8309_v51 = vor.u32 %v9234_v36, %v8306_v20  ;;  %v8373_v24 = vor.u32 %v9250_v48, %v8370_v47  ;;  %v8434_v47 = vld [vmem:[%s14786_s3 + $0x238] sm:$0xf0] }
 0x3ad   : > { %v4608_v3 = vadd.f32 %v4607_v34, %v4574_v8  ;;  %v4636_v38 = vpop.f32.mrf.mxu0 }
 0x3ae   : > { %v4637_v43 = vadd.f32 %v4636_v38, %v4603_v63  ;;  %v4670_v16 = vpop.f32.mrf.mxu1  ;;  %v8506_v38 = vld [vmem:[%s14786_s3 + $0x2c8] sm:$0xf0]  ;;  %5471 = vmatpush.bf16.msra.mxu2 %v8309_v51  ;;  %5505 = vmatpush.bf16.msra.mxu3 %v8373_v24 }
 0x3af   : > { %v8298_v51 = vld [vmem:[%s14786_s3 + $0x128] sm:$0xf0] }
 0x3b0   : > { %v13457_v29 = vadd.f32 %v4670_v16, %v4637_v43  ;;  %5407 = vmatmul.bf16.vlgmr.msrb.gmra.mxu0 %v11890_v22  ;;  %v8442_v22 = vld [vmem:[%s14786_s3 + $0x248] sm:$0xf0] }
 0x3b1   : > { %5441 = vmatmul.bf16.vlgmr.msrb.gmra.mxu1 %v11920_v37  ;;  %v8445_v34 = vor.u32 %v9268_v12, %v8442_v22  ;;  %v9284_v37 = vld [vmem:[%s14786_s3 + $0x2c4] sm:$0xf]  ;;  %v9266_v22 = vld [vmem:[%s14786_s3 + $0x234] sm:$0xf] }
 0x3b2   : > { %v4575_v63 = vpop.f32.mrf.mxu2  ;;  %v8509_v43 = vor.u32 %v9284_v37, %v8506_v38  ;;  %v8437_v37 = vor.u32 %v9266_v22, %v8434_v47  ;;  %v9230_v47 = vld [vmem:[%s14786_s3 + $0x114] sm:$0xf] }
 0x3b3   : > { %v4576_v50 = vadd.f32 %v4575_v63, %v13303_v0  ;;  %v4609_v8 = vpop.f32.mrf.mxu3  ;;  %5538 = vmatpush.bf16.msra.mxu0 %v8445_v34  ;;  %v9232_v63 = vld [vmem:[%s14786_s3 + $0x124] sm:$0xf] }
 0x3b4   : > { %5572 = vmatpush.bf16.msra.mxu1 %v8509_v43  ;;  %v8301_v48 = vor.u32 %v9232_v63, %v8298_v51  ;;  %v9282_v43 = vld [vmem:[%s14786_s3 + $0x2b4] sm:$0xf] }
 0x3b5   : > { %v4610_v16 = vadd.f32 %v4609_v8, %v4576_v50  ;;  %v4638_v36 = vpop.f32.mrf.mxu0  ;;  %v9248_v50 = vld [vmem:[%s14786_s3 + $0x1a4] sm:$0xf]  ;;  %v8362_v8 = vld [vmem:[%s14786_s3 + $0x1a8] sm:$0xf0] }
 0x3b6   : > { %v4639_v20 = vadd.f32 %v4638_v36, %v4605_v9  ;;  %v4672_v0 = vpop.f32.mrf.mxu1  ;;  %v8365_v38 = vor.u32 %v9248_v50, %v8362_v8  ;;  %v8498_v36 = vld [vmem:[%s14786_s3 + $0x2b8] sm:$0xf0]  ;;  %5472 = vmatpush.bf16.msra.mxu2 %v8301_v48 }
 0x3b7   : > { %5349 = vmatmul.bf16.gmra.mxu2 %v12603_v6  ;;  %5539 = vmatpush.bf16.msra.mxu0 %v8437_v37  ;;  %v8290_v48 = vld [vmem:[%s14786_s3 + $0x118] sm:$0xf0]  ;;  %v9246_v37 = vld [vmem:[%s14786_s3 + $0x194] sm:$0xf] }
 0x3b8   : > { %5383 = vmatmul.bf16.gmra.mxu3 %v12611_v35  ;;  %v13488_v12 = vadd.f32 %v4672_v0, %v4639_v20  ;;  %v8501_v20 = vor.u32 %v9282_v43, %v8498_v36 }
 0x3b9   : > { %5506 = vmatpush.bf16.msra.mxu3 %v8365_v38  ;;  %v8354_v38 = vld [vmem:[%s14786_s3 + $0x198] sm:$0xf0] }
 0x3ba   : > { %v4578_v9 = vpop.f32.mrf.mxu2  ;;  %5573 = vmatpush.bf16.msra.mxu1 %v8501_v20  ;;  %v8357_v36 = vor.u32 %v9246_v37, %v8354_v38  ;;  %v8490_v20 = vld [vmem:[%s14786_s3 + $0x2a8] sm:$0xf0]  ;;  %v9228_v37 = vld [vmem:[%s14786_s3 + $0x104] sm:$0xf] }
 0x3bb   : > { %v4579_v34 = vadd.f32 %v4578_v9, %v13325_v21  ;;  %v4612_v24 = vpop.f32.mrf.mxu3  ;;  %v8346_v38 = vld [vmem:[%s14786_s3 + $0x188] sm:$0xf0] }
 0x3bd   : > { %v4613_v0 = vadd.f32 %v4612_v24, %v4579_v34  ;;  %v4641_v63 = vpop.f32.mrf.mxu0  ;;  %v8293_v34 = vor.u32 %v9230_v47, %v8290_v48  ;;  %v8426_v24 = vld [vmem:[%s14786_s3 + $0x228] sm:$0xf0]  ;;  %5507 = vmatpush.bf16.msra.mxu3 %v8357_v36  ;;  %v15021_v48 = vld [vmem:[#allocation23_spill] sm:$0xff]  ;;  %v8418_v36 = vld [vmem:[%s14786_s3 + $0x218] sm:$0xf0] }
 0x3be   : > { %v4642_v51 = vadd.f32 %v4641_v63, %v4608_v3  ;;  %v4675_v21 = vpop.f32.mrf.mxu1  ;;  %v9264_v3 = vld [vmem:[%s14786_s3 + $0x224] sm:$0xf] }
 0x3bf   : > { %v8429_v43 = vor.u32 %v9264_v3, %v8426_v24  ;;  %5473 = vmatpush.bf16.msra.mxu2 %v8293_v34  ;;  %v15022_v3 = vld [vmem:[#allocation24_spill] sm:$0xff] }
 0x3c0   : > { %v13515_v9 = vadd.f32 %v4675_v21, %v4642_v51  ;;  %5412 = vmatmul.bf16.gmra.mxu0 %v11898_v39 }
 0x3c1   : > { %5446 = vmatmul.bf16.gmra.mxu1 %v11908_v52  ;;  %5540 = vmatpush.bf16.msra.mxu0 %v8429_v43  ;;  %v9262_v43 = vld [vmem:[%s14786_s3 + $0x214] sm:$0xf] }
 0x3c2   : > { %v4580_v22 = vpop.f32.mrf.mxu2 }
 0x3c3   : > { %v4581_v50 = vadd.f32 %v4580_v22, %v13337_v11  ;;  %v4614_v8 = vpop.f32.mrf.mxu3  ;;  %v9280_v11 = vld [vmem:[%s14786_s3 + $0x2a4] sm:$0xf] }
 0x3c4   : > { %v8493_v51 = vor.u32 %v9280_v11, %v8490_v20 }
 0x3c5   : > { %v4615_v63 = vadd.f32 %v4614_v8, %v4581_v50  ;;  %v4643_v21 = vpop.f32.mrf.mxu0  ;;  %v8282_v50 = vld [vmem:[%s14786_s3 + $0x108] sm:$0xf0] }
 0x3c6   : > { %v4644_v22 = vadd.f32 %v4643_v21, %v4610_v16  ;;  %v4677_v47 = vpop.f32.mrf.mxu1  ;;  %5574 = vmatpush.bf16.msra.mxu1 %v8493_v51  ;;  %v9244_v16 = vld [vmem:[%s14786_s3 + $0x184] sm:$0xf]  ;;  %v8285_v34 = vor.u32 %v9228_v37, %v8282_v50  ;;  %v8421_v21 = vor.u32 %v9262_v43, %v8418_v36 }
 0x3c7   : > { %5354 = vmatmul.bf16.gmra.mxu2 %v15021_v48  ;;  %v8349_v51 = vor.u32 %v9244_v16, %v8346_v38 }
 0x3c8   : > { %5388 = vmatmul.bf16.gmra.mxu3 %v15022_v3  ;;  %v13546_v24 = vadd.f32 %v4677_v47, %v4644_v22  ;;  %5474 = vmatpush.bf16.msra.mxu2 %v8285_v34 }
 0x3c9   : > { %5508 = vmatpush.bf16.msra.mxu3 %v8349_v51  ;;  %5541 = vmatpush.bf16.msra.mxu0 %v8421_v21  ;;  %v9260_v51 = vld [vmem:[%s14786_s3 + $0x204] sm:$0xf] }
 0x3ca   : > { %v5204_v8 = vpop.f32.mrf.mxu2 }
 0x3cb   : > { %v5205_v11 = vadd.f32 %v5204_v8, %v13063_v57  ;;  %v5238_v20 = vpop.f32.mrf.mxu3  ;;  %v8482_v57 = vld [vmem:[%s14786_s3 + $0x298] sm:$0xf0] }
 0x3cc   : > { %v8485_v8 = vor.u32 %v9278_v7, %v8482_v57  ;;  %v8410_v7 = vld [vmem:[%s14786_s3 + $0x208] sm:$0xf0] }
 0x3cd   : > { %v5239_v22 = vadd.f32 %v5238_v20, %v5205_v11  ;;  %v4646_v47 = vpop.f32.mrf.mxu0  ;;  %v8413_v21 = vor.u32 %v9260_v51, %v8410_v7 }
 0x3ce   : > { %v4647_v37 = vadd.f32 %v4646_v47, %v4613_v0  ;;  %v4680_v50 = vpop.f32.mrf.mxu1  ;;  %5575 = vmatpush.bf16.msra.mxu1 %v8485_v8  ;;  %v9403_v47 = vld [vmem:[%s14786_s3 + $0x674] sm:$0xf0] }
 0x3cf   : > { %5542 = vmatpush.bf16.msra.mxu0 %v8413_v21  ;;  %v9401_v21 = vld [vmem:[%s14786_s3 + $0x664] sm:$0xf0] }
 0x3d0   : > { %v13567_v44 = vadd.f32 %v4680_v50, %v4647_v37  ;;  %5417 = vmatmul.bf16.gmra.mxu0 %v11984_v27  ;;  %v9276_v37 = vld [vmem:[%s14786_s3 + $0x284] sm:$0xf]  ;;  %v8474_v50 = vld [vmem:[%s14786_s3 + $0x288] sm:$0xf0] }
 0x3d1   : > { %5451 = vmatmul.bf16.gmra.mxu1 %v11988_v25 }
 0x3d2   : > { %v5206_v16 = vpop.f32.mrf.mxu2 }
 0x3d3   : > { %v5207_v34 = vadd.f32 %v5206_v16, %v13076_v56  ;;  %v5240_v0 = vpop.f32.mrf.mxu3  ;;  %v8688_v56 = vld [vmem:[%s14786_s3 + $0x670] sm:$0xf] }
 0x3d4   : > { %v8689_v8 = vor.u32 %v9403_v47, %v8688_v56  ;;  %v8680_v47 = vld [vmem:[%s14786_s3 + $0x660] sm:$0xf] }
 0x3d5   : > { %v5241_v38 = vadd.f32 %v5240_v0, %v5207_v34  ;;  %v4648_v43 = vpop.f32.mrf.mxu0  ;;  %v8477_v34 = vor.u32 %v9276_v37, %v8474_v50  ;;  %v8752_v0 = vld [vmem:[%s14786_s3 + $0x6f0] sm:$0xf] }
 0x3d6   : > { %v4649_v36 = vadd.f32 %v4648_v43, %v4615_v63  ;;  %v4682_v11 = vpop.f32.mrf.mxu1  ;;  %v9419_v43 = vld [vmem:[%s14786_s3 + $0x6f4] sm:$0xf0]  ;;  %6294 = vmatpush.bf16.msrb.mxu2 %v8689_v8  ;;  %v8744_v8 = vld [vmem:[%s14786_s3 + $0x6e0] sm:$0xf] }
 0x3d7   : > { %5359 = vmatmul.bf16.gmra.mxu2 %v12739_v45  ;;  %5576 = vmatpush.bf16.msra.mxu1 %v8477_v34  ;;  %v9417_v34 = vld [vmem:[%s14786_s3 + $0x6e4] sm:$0xf0] }
 0x3d8   : > { %5393 = vmatmul.bf16.gmra.mxu3 %v12741_v41  ;;  %v13580_v20 = vadd.f32 %v4682_v11, %v4649_v36  ;;  %v8753_v36 = vor.u32 %v9419_v43, %v8752_v0  ;;  %v8745_v43 = vor.u32 %v9417_v34, %v8744_v8 }
 0x3da   : > { %v5209_v63 = vpop.f32.mrf.mxu2  ;;  %6328 = vmatpush.bf16.msrb.mxu3 %v8753_v36  ;;  %v9451_v36 = vld [vmem:[%s14786_s3 + $0x7f4] sm:$0xf0] }
 0x3db   : > { %v5210_v57 = vadd.f32 %v5209_v63, %v13107_v13  ;;  %v5243_v16 = vpop.f32.mrf.mxu3 }
 0x3dd   : > { %v5244_v11 = vadd.f32 %v5243_v16, %v5210_v57  ;;  %v5272_v51 = vpop.f32.mrf.mxu0  ;;  %v8681_v57 = vor.u32 %v9401_v21, %v8680_v47  ;;  %v9435_v16 = vld [vmem:[%s14786_s3 + $0x774] sm:$0xf0] }
 0x3de   : > { %v5273_v7 = vadd.f32 %v5272_v51, %v5239_v22  ;;  %v5306_v13 = vpop.f32.mrf.mxu1  ;;  %v8816_v22 = vld [vmem:[%s14786_s3 + $0x770] sm:$0xf]  ;;  %6329 = vmatpush.bf16.msrb.mxu3 %v8745_v43 }
 0x3df   : > { %v8817_v0 = vor.u32 %v9435_v16, %v8816_v22  ;;  %6295 = vmatpush.bf16.msrb.mxu2 %v8681_v57  ;;  %v8672_v22 = vld [vmem:[%s14786_s3 + $0x650] sm:$0xf]  ;;  %v9415_v16 = vld [vmem:[%s14786_s3 + $0x6d4] sm:$0xf0] }
 0x3e0   : > { %v13607_v63 = vadd.f32 %v5306_v13, %v5273_v7  ;;  %5422 = vmatmul.bf16.gmra.mxu0 %v12163_v53 }
 0x3e1   : > { %5456 = vmatmul.bf16.gmra.mxu1 %v12176_v14  ;;  %6362 = vmatpush.bf16.msrb.mxu0 %v8817_v0 }
 0x3e2   : > { %v5211_v56 = vpop.f32.mrf.mxu2 }
 0x3e3   : > { %v5212_v37 = vadd.f32 %v5211_v56, %v13138_v62  ;;  %v5245_v50 = vpop.f32.mrf.mxu3  ;;  %v8880_v62 = vld [vmem:[%s14786_s3 + $0x7f0] sm:$0xf] }
 0x3e4   : > { %v8881_v7 = vor.u32 %v9451_v36, %v8880_v62  ;;  %v8872_v62 = vld [vmem:[%s14786_s3 + $0x7e0] sm:$0xf]  ;;  %v9449_v36 = vld [vmem:[%s14786_s3 + $0x7e4] sm:$0xf0] }
 0x3e5   : > { %v5246_v51 = vadd.f32 %v5245_v50, %v5212_v37  ;;  %v5274_v13 = vpop.f32.mrf.mxu0  ;;  %v9399_v37 = vld [vmem:[%s14786_s3 + $0x654] sm:$0xf0] }
 0x3e6   : > { %v5275_v56 = vadd.f32 %v5274_v13, %v5241_v38  ;;  %v5308_v47 = vpop.f32.mrf.mxu1  ;;  %6396 = vmatpush.bf16.msrb.mxu1 %v8881_v7  ;;  %v8808_v38 = vld [vmem:[%s14786_s3 + $0x760] sm:$0xf]  ;;  %v8673_v57 = vor.u32 %v9399_v37, %v8672_v22  ;;  %v8873_v7 = vor.u32 %v9449_v36, %v8872_v62 }
 0x3e7   : > { %5475 = vmatmul.bf16.vlgmr.msra.gmra.mxu2 %v12049_v59  ;;  %v9433_v59 = vld [vmem:[%s14786_s3 + $0x764] sm:$0xf0] }
 0x3e8   : > { %5509 = vmatmul.bf16.vlgmr.msra.gmra.mxu3 %v12065_v40  ;;  %v13638_v21 = vadd.f32 %v5308_v47, %v5275_v56  ;;  %v8736_v40 = vld [vmem:[%s14786_s3 + $0x6d0] sm:$0xf]  ;;  %v8809_v0 = vor.u32 %v9433_v59, %v8808_v38  ;;  %6296 = vmatpush.bf16.msrb.mxu2 %v8673_v57  ;;  %v8664_v38 = vld [vmem:[%s14786_s3 + $0x640] sm:$0xf] }
 0x3e9   : > { %v8737_v43 = vor.u32 %v9415_v16, %v8736_v40  ;;  %v9431_v16 = vld [vmem:[%s14786_s3 + $0x754] sm:$0xf0] }
 0x3ea   : > { %v5214_v50 = vpop.f32.mrf.mxu2  ;;  %6363 = vmatpush.bf16.msrb.mxu0 %v8809_v0  ;;  %6397 = vmatpush.bf16.msrb.mxu1 %v8873_v7  ;;  %v9413_v7 = vld [vmem:[%s14786_s3 + $0x6c4] sm:$0xf0] }
 0x3eb   : > { %v5215_v8 = vadd.f32 %v5214_v50, %v13169_v55  ;;  %v5248_v34 = vpop.f32.mrf.mxu3  ;;  %6330 = vmatpush.bf16.msrb.mxu3 %v8737_v43  ;;  %v9397_v50 = vld [vmem:[%s14786_s3 + $0x644] sm:$0xf0] }
 0x3ec   : > { %v8665_v40 = vor.u32 %v9397_v50, %v8664_v38 }
 0x3ed   : > { %v5249_v13 = vadd.f32 %v5248_v34, %v5215_v8  ;;  %v5277_v56 = vpop.f32.mrf.mxu0 }
 0x3ee   : > { %v5278_v47 = vadd.f32 %v5277_v56, %v5244_v11  ;;  %v5311_v55 = vpop.f32.mrf.mxu1  ;;  %v8800_v11 = vld [vmem:[%s14786_s3 + $0x750] sm:$0xf]  ;;  %6297 = vmatpush.bf16.msrb.mxu2 %v8665_v40 }
 0x3ef   : > { %v8801_v8 = vor.u32 %v9431_v16, %v8800_v11  ;;  %v8864_v56 = vld [vmem:[%s14786_s3 + $0x7d0] sm:$0xf] }
 0x3f0   : > { %v13665_v22 = vadd.f32 %v5311_v55, %v5278_v47  ;;  %5427 = vmatmul.bf16.gmra.mxu0 %v15013_v46  ;;  %v9447_v55 = vld [vmem:[%s14786_s3 + $0x7d4] sm:$0xf0] }
 0x3f1   : > { %5461 = vmatmul.bf16.gmra.mxu1 %v15014_v19  ;;  %6364 = vmatpush.bf16.msrb.mxu0 %v8801_v8  ;;  %v8865_v50 = vor.u32 %v9447_v55, %v8864_v56  ;;  %v8656_v8 = vld [vmem:[%s14786_s3 + $0x630] sm:$0xf]  ;;  %v9445_v55 = vld [vmem:[%s14786_s3 + $0x7c4] sm:$0xf0] }
 0x3f2   : > { %v5216_v37 = vpop.f32.mrf.mxu2 }
 0x3f3   : > { %v5217_v57 = vadd.f32 %v5216_v37, %v13188_v1  ;;  %v5250_v59 = vpop.f32.mrf.mxu3  ;;  %v8728_v1 = vld [vmem:[%s14786_s3 + $0x6c0] sm:$0xf]  ;;  %6398 = vmatpush.bf16.msrb.mxu1 %v8865_v50 }
 0x3f4   : > { %v8729_v47 = vor.u32 %v9413_v7, %v8728_v1  ;;  %v9411_v1 = vld [vmem:[%s14786_s3 + $0x6b4] sm:$0xf0] }
 0x3f5   : > { %v5251_v34 = vadd.f32 %v5250_v59, %v5217_v57  ;;  %v5279_v0 = vpop.f32.mrf.mxu0 }
 0x3f6   : > { %v5280_v43 = vadd.f32 %v5279_v0, %v5246_v51  ;;  %v5313_v62 = vpop.f32.mrf.mxu1  ;;  %6331 = vmatpush.bf16.msrb.mxu3 %v8729_v47  ;;  %v8792_v0 = vld [vmem:[%s14786_s3 + $0x740] sm:$0xf] }
 0x3f7   : > { %5480 = vmatmul.bf16.gmra.mxu2 %v12115_v15 }
 0x3f8   : > { %5514 = vmatmul.bf16.gmra.mxu3 %v12117_v2  ;;  %v13684_v36 = vadd.f32 %v5313_v62, %v5280_v43  ;;  %v8720_v62 = vld [vmem:[%s14786_s3 + $0x6b0] sm:$0xf] }
 0x3f9   : > { %v8721_v47 = vor.u32 %v9411_v1, %v8720_v62 }
 0x3fa   : > { %v5219_v51 = vpop.f32.mrf.mxu2 }
 0x3fb   : > { %v5220_v37 = vadd.f32 %v5219_v51, %v13207_v17  ;;  %v5253_v38 = vpop.f32.mrf.mxu3  ;;  %v9395_v17 = vld [vmem:[%s14786_s3 + $0x634] sm:$0xf0]  ;;  %6332 = vmatpush.bf16.msrb.mxu3 %v8721_v47 }
 0x3fc   : > { %v8657_v43 = vor.u32 %v9395_v17, %v8656_v8  ;;  %v9393_v8 = vld [vmem:[%s14786_s3 + $0x624] sm:$0xf0]  ;;  %v8784_v17 = vld [vmem:[%s14786_s3 + $0x730] sm:$0xf]  ;;  %v9443_v47 = vld [vmem:[%s14786_s3 + $0x7b4] sm:$0xf0] }
 0x3fd   : > { %v5254_v11 = vadd.f32 %v5253_v38, %v5220_v37  ;;  %v5282_v57 = vpop.f32.mrf.mxu0 }
 0x3fe   : > { %v5283_v59 = vadd.f32 %v5282_v57, %v5249_v13  ;;  %v5316_v40 = vpop.f32.mrf.mxu1  ;;  %6298 = vmatpush.bf16.msrb.mxu2 %v8657_v43  ;;  %v8712_v43 = vld [vmem:[%s14786_s3 + $0x6a0] sm:$0xf] }
 0x400   : > { %v13699_v16 = vadd.f32 %v5316_v40, %v5283_v59  ;;  %5543 = vmatmul.bf16.vlgmr.msra.gmra.mxu0 %v15017_v42  ;;  %v9429_v42 = vld [vmem:[%s14786_s3 + $0x744] sm:$0xf0]  ;;  %v8648_v40 = vld [vmem:[%s14786_s3 + $0x620] sm:$0xf] }
 0x401   : > { %5577 = vmatmul.bf16.vlgmr.msra.gmra.mxu1 %v15018_v58  ;;  %v8793_v51 = vor.u32 %v9429_v42, %v8792_v0  ;;  %v8856_v58 = vld [vmem:[%s14786_s3 + $0x7c0] sm:$0xf]  ;;  %v8649_v0 = vor.u32 %v9393_v8, %v8648_v40  ;;  %v9409_v42 = vld [vmem:[%s14786_s3 + $0x6a4] sm:$0xf0]  ;;  %v8640_v40 = vld [vmem:[%s14786_s3 + $0x610] sm:$0xf] }
 0x402   : > { %v5221_v13 = vpop.f32.mrf.mxu2  ;;  %v8857_v37 = vor.u32 %v9445_v55, %v8856_v58  ;;  %v9391_v8 = vld [vmem:[%s14786_s3 + $0x614] sm:$0xf0] }
 0x403   : > { %v5222_v7 = vadd.f32 %v5221_v13, %v13238_v5  ;;  %v5255_v56 = vpop.f32.mrf.mxu3  ;;  %6365 = vmatpush.bf16.msrb.mxu0 %v8793_v51  ;;  %v9427_v13 = vld [vmem:[%s14786_s3 + $0x734] sm:$0xf0]  ;;  %v8848_v51 = vld [vmem:[%s14786_s3 + $0x7b0] sm:$0xf]  ;;  %6299 = vmatpush.bf16.msrb.mxu2 %v8649_v0  ;;  %v8641_v0 = vor.u32 %v9391_v8, %v8640_v40 }
 0x404   : > { %6399 = vmatpush.bf16.msrb.mxu1 %v8857_v37  ;;  %v8849_v58 = vor.u32 %v9443_v47, %v8848_v51 }
 0x405   : > { %v5256_v38 = vadd.f32 %v5255_v56, %v5222_v7  ;;  %v5284_v50 = vpop.f32.mrf.mxu0  ;;  %v8785_v7 = vor.u32 %v9427_v13, %v8784_v17  ;;  %v8713_v56 = vor.u32 %v9409_v42, %v8712_v43  ;;  %v9425_v13 = vld [vmem:[%s14786_s3 + $0x724] sm:$0xf0]  ;;  %v8704_v43 = vld [vmem:[%s14786_s3 + $0x690] sm:$0xf]  ;;  %v9407_v42 = vld [vmem:[%s14786_s3 + $0x694] sm:$0xf0] }
 0x406   : > { %v5285_v57 = vadd.f32 %v5284_v50, %v5251_v34  ;;  %v5318_v5 = vpop.f32.mrf.mxu1 }
 0x407   : > { %5485 = vmatmul.bf16.gmra.mxu2 %v15011_v30  ;;  %6366 = vmatpush.bf16.msrb.mxu0 %v8785_v7  ;;  %v9441_v7 = vld [vmem:[%s14786_s3 + $0x7a4] sm:$0xf0] }
 0x408   : > { %5519 = vmatmul.bf16.gmra.mxu3 %v15012_v10  ;;  %v13730_v59 = vadd.f32 %v5318_v5, %v5285_v57  ;;  %6400 = vmatpush.bf16.msrb.mxu1 %v8849_v58 }
 0x409   : > { %6333 = vmatpush.bf16.msrb.mxu3 %v8713_v56  ;;  %6300 = vmatpush.bf16.msrb.mxu2 %v8641_v0 }
 0x40a   : > { %v5224_v34 = vpop.f32.mrf.mxu2 }
 0x40b   : > { %v5225_v62 = vadd.f32 %v5224_v34, %v13269_v49  ;;  %v5258_v1 = vpop.f32.mrf.mxu3 }
 0x40d   : > { %v5259_v55 = vadd.f32 %v5258_v1, %v5225_v62  ;;  %v5287_v37 = vpop.f32.mrf.mxu0  ;;  %v8705_v1 = vor.u32 %v9407_v42, %v8704_v43 }
 0x40e   : > { %v5288_v50 = vadd.f32 %v5287_v37, %v5254_v11  ;;  %v5321_v49 = vpop.f32.mrf.mxu1  ;;  %v8776_v11 = vld [vmem:[%s14786_s3 + $0x720] sm:$0xf] }
 0x40f   : > { %v8777_v62 = vor.u32 %v9425_v13, %v8776_v11  ;;  %6334 = vmatpush.bf16.msrb.mxu3 %v8705_v1  ;;  %v9405_v11 = vld [vmem:[%s14786_s3 + $0x684] sm:$0xf0] }
 0x410   : > { %v13757_v57 = vadd.f32 %v5321_v49, %v5288_v50  ;;  %5548 = vmatmul.bf16.gmra.mxu0 %v12525_v4  ;;  %v8632_v49 = vld [vmem:[%s14786_s3 + $0x600] sm:$0xf] }
 0x411   : > { %5582 = vmatmul.bf16.gmra.mxu1 %v12534_v60  ;;  %6367 = vmatpush.bf16.msrb.mxu0 %v8777_v62 }
 0x412   : > { %v5226_v5 = vpop.f32.mrf.mxu2 }
 0x413   : > { %v5227_v17 = vadd.f32 %v5226_v5, %v13300_v32  ;;  %v5260_v34 = vpop.f32.mrf.mxu3  ;;  %v8840_v32 = vld [vmem:[%s14786_s3 + $0x7a0] sm:$0xf]  ;;  %v9389_v5 = vld [vmem:[%s14786_s3 + $0x604] sm:$0xf0] }
 0x414   : > { %v8841_v51 = vor.u32 %v9441_v7, %v8840_v32  ;;  %v8633_v8 = vor.u32 %v9389_v5, %v8632_v49 }
 0x415   : > { %v5261_v56 = vadd.f32 %v5260_v34, %v5227_v17  ;;  %v5289_v47 = vpop.f32.mrf.mxu0  ;;  %v8768_v17 = vld [vmem:[%s14786_s3 + $0x710] sm:$0xf]  ;;  %v9423_v34 = vld [vmem:[%s14786_s3 + $0x714] sm:$0xf0] }
 0x416   : > { %v5290_v58 = vadd.f32 %v5289_v47, %v5256_v38  ;;  %v5323_v37 = vpop.f32.mrf.mxu1  ;;  %6401 = vmatpush.bf16.msrb.mxu1 %v8841_v51  ;;  %v8696_v38 = vld [vmem:[%s14786_s3 + $0x680] sm:$0xf]  ;;  %v8769_v42 = vor.u32 %v9423_v34, %v8768_v17  ;;  %6301 = vmatpush.bf16.msrb.mxu2 %v8633_v8  ;;  %v8832_v47 = vld [vmem:[%s14786_s3 + $0x790] sm:$0xf] }
 0x417   : > { %5490 = vmatmul.bf16.gmra.mxu2 %v15015_v28  ;;  %v8697_v43 = vor.u32 %v9405_v11, %v8696_v38  ;;  %v5603_v11 = vld [vmem:[#allocation5] sm:$0xee] }
 0x418   : > { %5524 = vmatmul.bf16.gmra.mxu3 %v15016_v26  ;;  %v13788_v50 = vadd.f32 %v5323_v37, %v5290_v58  ;;  %6368 = vmatpush.bf16.msrb.mxu0 %v8769_v42  ;;  %v8760_v34 = vld [vmem:[%s14786_s3 + $0x700] sm:$0xf] }
 0x419   : > { %6335 = vmatpush.bf16.msrb.mxu3 %v8697_v43  ;;  %v9467_v43 = vld [vmem:[%s14786_s3 + $0x874] sm:$0xf0]  ;;  %v8824_v42 = vld [vmem:[%s14786_s3 + $0x780] sm:$0xf] }
 0x41a   : > { %v5340_v40 = vpop.f32.mrf.mxu2 }
 0x41b   : > { %v5341_v0 = vadd.f32 %v5340_v40, %v13607_v63  ;;  %v5374_v13 = vpop.f32.mrf.mxu3  ;;  %v9439_v63 = vld [vmem:[%s14786_s3 + $0x794] sm:$0xf0] }
 0x41c   : > { %v8833_v37 = vor.u32 %v9439_v63, %v8832_v47 }
 0x41d   : > { %v13809_v62 = vadd.f32 %v5374_v13, %v5341_v0  ;;  %v5292_v1 = vpop.f32.mrf.mxu0 }
 0x41e   : > { %v5293_v32 = vadd.f32 %v5292_v1, %v5259_v55  ;;  %v5326_v7 = vpop.f32.mrf.mxu1  ;;  %6402 = vmatpush.bf16.msrb.mxu1 %v8833_v37  ;;  %v9437_v1 = vld [vmem:[%s14786_s3 + $0x784] sm:$0xf0]  ;;  %v9483_v37 = vld [vmem:[%s14786_s3 + $0x8f4] sm:$0xf0] }
 0x41f   : > { %v8825_v63 = vor.u32 %v9437_v1, %v8824_v42 }
 0x420   : > { %v13811_v51 = vadd.f32 %v5326_v7, %v5293_v32  ;;  %5553 = vmatmul.bf16.gmra.mxu0 %v12603_v6 }
 0x421   : > { %5587 = vmatmul.bf16.gmra.mxu1 %v12611_v35 }
 0x422   : > { %v5342_v58 = vpop.f32.mrf.mxu2  ;;  %6403 = vmatpush.bf16.msrb.mxu1 %v8825_v63 }
 0x423   : > { %v5343_v49 = vadd.f32 %v5342_v58, %v13638_v21  ;;  %v5376_v55 = vpop.f32.mrf.mxu3  ;;  %v9421_v21 = vld [vmem:[%s14786_s3 + $0x704] sm:$0xf0]  ;;  %v9008_v58 = vld [vmem:[%s14786_s3 + $0x8f0] sm:$0xf] }
 0x424   : > { %v8761_v13 = vor.u32 %v9421_v21, %v8760_v34  ;;  %v15023_v21 = vld [vmem:[#allocation10_spill] sm:$0xff] }
 0x425   : > { %v13822_v5 = vadd.f32 %v5376_v55, %v5343_v49  ;;  %v5294_v38 = vpop.f32.mrf.mxu0  ;;  %v5706_v49 = vunpack.c.l.b16 %v5603_v11  ;;  %v9009_v55 = vor.u32 %v9483_v37, %v9008_v58  ;;  %v15025_v42 = vunpack.c.h.b16 %v15023_v21 }
 0x426   : > { %v5295_v40 = vadd.f32 %v5294_v38, %v5261_v56  ;;  %v5328_v8 = vpop.f32.mrf.mxu1  ;;  %v8944_v56 = vld [vmem:[%s14786_s3 + $0x870] sm:$0xf]  ;;  %6369 = vmatpush.bf16.msrb.mxu0 %v8761_v13  ;;  %v5719_v13 = vrot.slane %v11898_v39, 1 }
 0x427   : > { %5495 = vmatmul.bf16.gmra.mxu2 %v15019_v23  ;;  %v8945_v47 = vor.u32 %v9467_v43, %v8944_v56  ;;  %6464 = vmatpush.bf16.msra.mxu3 %v9009_v55  ;;  %v15024_v56 = vunpack.c.l.b16 %v15023_v21  ;;  %v9000_v55 = vld [vmem:[%s14786_s3 + $0x8e0] sm:$0xf]  ;;  %v8754_v21 = vld [vmem:[%s14786_s3 + $0x6f8] sm:$0xf0] }
 0x428   : > { %5529 = vmatmul.bf16.gmra.mxu3 %v15020_v61  ;;  %v13826_v17 = vadd.f32 %v5328_v8, %v5295_v40  ;;  %v5707_v40 = vunpack.c.h.b16 %v5603_v11  ;;  %v5722_v11 = vrot.slane %v11908_v52, 1  ;;  %v9414_v52 = vld [vmem:[%s14786_s3 + $0x6d4] sm:$0xf] }
 0x429   : > { %6430 = vmatpush.bf16.msra.mxu2 %v8945_v47  ;;  %v9402_v47 = vld [vmem:[%s14786_s3 + $0x674] sm:$0xf] }
 0x42a   : > { %v5345_v0 = vpop.f32.mrf.mxu2  ;;  %v5713_v1 = vpack.c.b16 %v15025_v42, %v5707_v40  ;;  %v9481_v40 = vld [vmem:[%s14786_s3 + $0x8e4] sm:$0xf0] }
 0x42b   : > { %v5346_v32 = vadd.f32 %v5345_v0, %v13665_v22  ;;  %v5379_v7 = vpop.f32.mrf.mxu3  ;;  %v5712_v0 = vpack.c.b16 %v15024_v56, %v5706_v49  ;;  %v8690_v49 = vld [vmem:[%s14786_s3 + $0x678] sm:$0xf0] }
 0x42c   : > { %v5721_v42 = vrot.slane %v5713_v1, 1 }
 0x42d   : > { %v13853_v38 = vadd.f32 %v5379_v7, %v5346_v32  ;;  %v5408_v22 = vpop.f32.mrf.mxu0  ;;  %v9465_v7 = vld [vmem:[%s14786_s3 + $0x864] sm:$0xf0] }
 0x42e   : > { %v5409_v8 = vadd.f32 %v5408_v22, %v13365_v33  ;;  %v5442_v34 = vpop.f32.mrf.mxu1  ;;  %v8936_v33 = vld [vmem:[%s14786_s3 + $0x860] sm:$0xf]  ;;  %v5718_v22 = vrot.slane %v5712_v0, 1 }
 0x42f   : > { %v8937_v37 = vor.u32 %v9465_v7, %v8936_v33 }
 0x430   : > { %v13858_v43 = vadd.f32 %v5442_v34, %v5409_v8  ;;  %5558 = vmatmul.bf16.gmra.mxu0 %v15021_v48  ;;  %v8693_v8 = vor.u32 %v9402_v47, %v8690_v49  ;;  %v9001_v34 = vor.u32 %v9481_v40, %v9000_v55  ;;  %v13896_v0 = vsel %vm15026_vm12, %v5718_v22, %v5719_v13  ;;  %v8682_v40 = vld [vmem:[%s14786_s3 + $0x668] sm:$0xf0]  ;;  %v8992_v22 = vld [vmem:[%s14786_s3 + $0x8d0] sm:$0xf]  ;;  %vm15057_vm12 = vmmov %vm15027_vm0 }
 0x431   : > { %5592 = vmatmul.bf16.gmra.mxu1 %v15022_v3  ;;  %6431 = vmatpush.bf16.msra.mxu2 %v8937_v37  ;;  %v9400_v37 = vld [vmem:[%s14786_s3 + $0x664] sm:$0xf] }
 0x432   : > { %v5347_v32 = vpop.f32.mrf.mxu2  ;;  %6498 = vmatpush.bf16.msra.mxu0 %v8693_v8  ;;  %6465 = vmatpush.bf16.msra.mxu3 %v9001_v34  ;;  %v9479_v8 = vld [vmem:[%s14786_s3 + $0x8d4] sm:$0xf0] }
 0x433   : > { %v5348_v63 = vadd.f32 %v5347_v32, %v13684_v36  ;;  %v5381_v58 = vpop.f32.mrf.mxu3  ;;  %v9418_v36 = vld [vmem:[%s14786_s3 + $0x6f4] sm:$0xf] }
 0x434   : > { %v8757_v32 = vor.u32 %v9418_v36, %v8754_v21  ;;  %v8685_v21 = vor.u32 %v9400_v37, %v8682_v40 }
 0x435   : > { %v13891_v56 = vadd.f32 %v5381_v58, %v5348_v63  ;;  %v5410_v33 = vpop.f32.mrf.mxu0  ;;  %v13903_v63 = vsel %vm15027_vm0, %v5721_v42, %v5722_v11  ;;  %v8928_v58 = vld [vmem:[%s14786_s3 + $0x850] sm:$0xf]  ;;  %v8993_v42 = vor.u32 %v9479_v8, %v8992_v22  ;;  %v9461_v22 = vld [vmem:[%s14786_s3 + $0x844] sm:$0xf0] }
 0x436   : > { %v5411_v7 = vadd.f32 %v5410_v33, %v13396_v54  ;;  %v5444_v47 = vpop.f32.mrf.mxu1  ;;  %6532 = vmatpush.bf16.msra.mxu1 %v8757_v32  ;;  %v9463_v54 = vld [vmem:[%s14786_s3 + $0x854] sm:$0xf0]  ;;  %v9416_v32 = vld [vmem:[%s14786_s3 + $0x6e4] sm:$0xf]  ;;  %v8746_v33 = vld [vmem:[%s14786_s3 + $0x6e8] sm:$0xf0]  ;;  %6499 = vmatpush.bf16.msra.mxu0 %v8685_v21 }
 0x437   : > { %6302 = vmatmul.bf16.vlgmr.msrb.gmra.mxu2 %v13896_v0  ;;  %v8929_v55 = vor.u32 %v9463_v54, %v8928_v58  ;;  %6466 = vmatpush.bf16.msra.mxu3 %v8993_v42  ;;  %v5604_v21 = vld [vmem:[#allocation5 + $0x8] sm:$0xee] }
 0x438   : > { %6336 = vmatmul.bf16.vlgmr.msrb.gmra.mxu3 %v13903_v63  ;;  %v13906_v1 = vadd.f32 %v5444_v47, %v5411_v7  ;;  %v8749_v7 = vor.u32 %v9416_v32, %v8746_v33  ;;  %v8674_v32 = vld [vmem:[%s14786_s3 + $0x658] sm:$0xf0] }
 0x439   : > { %6432 = vmatpush.bf16.msra.mxu2 %v8929_v55  ;;  %v8920_v55 = vld [vmem:[%s14786_s3 + $0x840] sm:$0xf] }
 0x43a   : > { %v5350_v49 = vpop.f32.mrf.mxu2  ;;  %6533 = vmatpush.bf16.msra.mxu1 %v8749_v7  ;;  %v8921_v42 = vor.u32 %v9461_v22, %v8920_v55  ;;  %v5709_v22 = vunpack.c.h.b16 %v5604_v21 }
 0x43b   : > { %v5351_v34 = vadd.f32 %v5350_v49, %v13699_v16  ;;  %v5384_v36 = vpop.f32.mrf.mxu3  ;;  %v14849_v49 = vrot.slane %v11984_v27, 1 }
 0x43d   : > { %v13933_v47 = vadd.f32 %v5384_v36, %v5351_v34  ;;  %v5413_v58 = vpop.f32.mrf.mxu0  ;;  %v14848_v36 = vrot.slane %v11988_v25, 1  ;;  %6433 = vmatpush.bf16.msra.mxu2 %v8921_v42  ;;  %v8738_v42 = vld [vmem:[%s14786_s3 + $0x6d8] sm:$0xf0] }
 0x43e   : > { %v5414_v16 = vadd.f32 %v5413_v58, %v13423_v18  ;;  %v5447_v54 = vpop.f32.mrf.mxu1  ;;  %v9398_v18 = vld [vmem:[%s14786_s3 + $0x654] sm:$0xf] }
 0x43f   : > { %15028 = vst [vmem:[#allocation17_spill] sm:$0xff] %v13933_v47  ;;  %v8677_v33 = vor.u32 %v9398_v18, %v8674_v32  ;;  %v13971_v55 = vsel %vm15031_vm5, %v5722_v11, %v14848_v36  ;;  %v15032_v11 = vld [vmem:[#allocation11_spill] sm:$0xff]  ;;  %v5725_v36 = vrot.slane %v12115_v15, 1  ;;  %vm15064_vm5 = vmmov %vm15027_vm0 }
 0x440   : > { %v13936_v37 = vadd.f32 %v5447_v54, %v5414_v16  ;;  %5563 = vmatmul.bf16.gmra.mxu0 %v12739_v45  ;;  %v5708_v16 = vunpack.c.l.b16 %v5604_v21 }
 0x441   : > { %5597 = vmatmul.bf16.gmra.mxu1 %v12741_v41  ;;  %6500 = vmatpush.bf16.msra.mxu0 %v8677_v33 }
 0x442   : > { %v5352_v40 = vpop.f32.mrf.mxu2 }
 0x443   : > { %v5353_v8 = vadd.f32 %v5352_v40, %v13730_v59  ;;  %v5386_v34 = vpop.f32.mrf.mxu3  ;;  %v13962_v59 = vsel %vm15030_vm3, %v5719_v13, %v14849_v49  ;;  %v8984_v13 = vld [vmem:[%s14786_s3 + $0x8c0] sm:$0xf]  ;;  %vm15062_vm3 = vmmov %vm15027_vm0 }
 0x445   : > { %v13955_v7 = vadd.f32 %v5386_v34, %v5353_v8  ;;  %v5415_v58 = vpop.f32.mrf.mxu0  ;;  %v15033_v8 = vunpack.c.l.b16 %v15032_v11 }
 0x446   : > { %v5416_v54 = vadd.f32 %v5415_v58, %v13442_v31  ;;  %v5449_v40 = vpop.f32.mrf.mxu1  ;;  %v9477_v31 = vld [vmem:[%s14786_s3 + $0x8c4] sm:$0xf0]  ;;  %v15034_v58 = vunpack.c.h.b16 %v15032_v11  ;;  %v9459_v11 = vld [vmem:[%s14786_s3 + $0x834] sm:$0xf0] }
 0x447   : > { %15029 = vst [vmem:[#allocation12_spill] sm:$0xff] %v13955_v7  ;;  %6307 = vmatmul.bf16.gmra.mxu2 %v13962_v59  ;;  %v5714_v34 = vpack.c.b16 %v15033_v8, %v5708_v16  ;;  %v8985_v21 = vor.u32 %v9477_v31, %v8984_v13  ;;  %v5728_v7 = vrot.slane %v12117_v2, 1  ;;  %v9392_v2 = vld [vmem:[%s14786_s3 + $0x624] sm:$0xf] }
 0x448   : > { %6341 = vmatmul.bf16.gmra.mxu3 %v13971_v55  ;;  %v13974_v39 = vadd.f32 %v5449_v40, %v5416_v54  ;;  %v5715_v54 = vpack.c.b16 %v15034_v58, %v5709_v22  ;;  %v8741_v40 = vor.u32 %v9414_v52, %v8738_v42  ;;  %v14851_v22 = vrot.slane %v12163_v53, 1 }
 0x449   : > { %6467 = vmatpush.bf16.msra.mxu3 %v8985_v21  ;;  %v5724_v13 = vrot.slane %v5714_v34, 1  ;;  %v9396_v34 = vld [vmem:[%s14786_s3 + $0x644] sm:$0xf] }
 0x44a   : > { %v5355_v18 = vpop.f32.mrf.mxu2  ;;  %6534 = vmatpush.bf16.msra.mxu1 %v8741_v40  ;;  %v5727_v47 = vrot.slane %v5715_v54, 1  ;;  %v14850_v40 = vrot.slane %v12176_v14, 1 }
 0x44b   : > { %v5356_v32 = vadd.f32 %v5355_v18, %v13757_v57  ;;  %v5389_v33 = vpop.f32.mrf.mxu3  ;;  %v14001_v57 = vsel %vm15035_vm11, %v5724_v13, %v5725_v36  ;;  %vm15069_vm11 = vmmov %vm15027_vm0 }
 0x44c   : > { %v14010_v18 = vsel %vm15036_vm15, %v5727_v47, %v5728_v7  ;;  %v8666_v47 = vld [vmem:[%s14786_s3 + $0x648] sm:$0xf0]  ;;  %vm15071_vm15 = vmmov %vm15027_vm0 }
 0x44d   : > { %v13994_v49 = vadd.f32 %v5389_v33, %v5356_v32  ;;  %v5418_v16 = vpop.f32.mrf.mxu0  ;;  %v8976_v32 = vld [vmem:[%s14786_s3 + $0x8b0] sm:$0xf]  ;;  %v9475_v33 = vld [vmem:[%s14786_s3 + $0x8b4] sm:$0xf0] }
 0x44e   : > { %v5419_v31 = vadd.f32 %v5418_v16, %v13457_v29  ;;  %v5452_v8 = vpop.f32.mrf.mxu1  ;;  %v8912_v29 = vld [vmem:[%s14786_s3 + $0x830] sm:$0xf]  ;;  %v8669_v16 = vor.u32 %v9396_v34, %v8666_v47  ;;  %v8977_v13 = vor.u32 %v9475_v33, %v8976_v32  ;;  %v15037_v34 = vrot.slane %v11984_v27, 1  ;;  %v8904_v27 = vld [vmem:[%s14786_s3 + $0x820] sm:$0xf] }
 0x44f   : > { %v8913_v42 = vor.u32 %v9459_v11, %v8912_v29 }
 0x450   : > { %v14004_v52 = vadd.f32 %v5452_v8, %v5419_v31  ;;  %6370 = vmatmul.bf16.vlgmr.msrb.gmra.mxu0 %v14001_v57  ;;  %v9412_v31 = vld [vmem:[%s14786_s3 + $0x6c4] sm:$0xf]  ;;  %v8730_v8 = vld [vmem:[%s14786_s3 + $0x6c8] sm:$0xf0]  ;;  %6468 = vmatpush.bf16.msra.mxu3 %v8977_v13  ;;  %v8658_v13 = vld [vmem:[%s14786_s3 + $0x638] sm:$0xf0] }
 0x451   : > { %6404 = vmatmul.bf16.vlgmr.msrb.gmra.mxu1 %v14010_v18  ;;  %6434 = vmatpush.bf16.msra.mxu2 %v8913_v42  ;;  %v8733_v29 = vor.u32 %v9412_v31, %v8730_v8  ;;  %v15039_v42 = vrot.slane %v11988_v25, 1  ;;  %v8968_v31 = vld [vmem:[%s14786_s3 + $0x8a0] sm:$0xf]  ;;  %v9473_v8 = vld [vmem:[%s14786_s3 + $0x8a4] sm:$0xf0] }
 0x452   : > { %v5357_v21 = vpop.f32.mrf.mxu2  ;;  %6501 = vmatpush.bf16.msra.mxu0 %v8669_v16 }
 0x453   : > { %v5358_v58 = vadd.f32 %v5357_v21, %v13788_v50  ;;  %v5391_v54 = vpop.f32.mrf.mxu3  ;;  %v14046_v21 = vsel %vm15038_vm14, %v15037_v34, %v14851_v22  ;;  %6535 = vmatpush.bf16.msra.mxu1 %v8733_v29  ;;  %v14055_v33 = vsel %vm15040_vm1, %v15039_v42, %v14850_v40  ;;  %v8722_v42 = vld [vmem:[%s14786_s3 + $0x6b8] sm:$0xf0]  ;;  %v14854_v22 = vrot.slane %v15012_v10, 1  ;;  %vm15073_vm14 = vmmov %vm15027_vm0 }
 0x454   : > { %vm15075_vm1 = vmmov %vm15027_vm0 }
 0x455   : > { %v14039_v11 = vadd.f32 %v5391_v54, %v5358_v58  ;;  %v5420_v50 = vpop.f32.mrf.mxu0  ;;  %v9394_v54 = vld [vmem:[%s14786_s3 + $0x634] sm:$0xf] }
 0x456   : > { %v5421_v47 = vadd.f32 %v5420_v50, %v13488_v12  ;;  %v5454_v32 = vpop.f32.mrf.mxu1  ;;  %v9457_v12 = vld [vmem:[%s14786_s3 + $0x824] sm:$0xf0]  ;;  %v8661_v34 = vor.u32 %v9394_v54, %v8658_v13 }
 0x457   : > { %6312 = vmatmul.bf16.gmra.mxu2 %v14046_v21  ;;  %v8905_v16 = vor.u32 %v9457_v12, %v8904_v27  ;;  %v5740_v27 = vrot.slane %v15011_v30, 1  ;;  %v8706_v30 = vld [vmem:[%s14786_s3 + $0x698] sm:$0xf0] }
 0x458   : > { %6346 = vmatmul.bf16.gmra.mxu3 %v14055_v33  ;;  %v14058_v58 = vadd.f32 %v5454_v32, %v5421_v47  ;;  %v8969_v47 = vor.u32 %v9473_v8, %v8968_v31  ;;  %v9410_v32 = vld [vmem:[%s14786_s3 + $0x6b4] sm:$0xf]  ;;  %6502 = vmatpush.bf16.msra.mxu0 %v8661_v34  ;;  %v14105_v31 = vsel %vm15042_vm4, %v5728_v7, %v14854_v22  ;;  %v14852_v8 = vrot.slane %v15014_v19, 1  ;;  %vm15077_vm4 = vmmov %vm15027_vm0 }
 0x459   : > { %6435 = vmatpush.bf16.msra.mxu2 %v8905_v16  ;;  %v8725_v12 = vor.u32 %v9410_v32, %v8722_v42  ;;  %v14095_v13 = vsel %vm15041_vm13, %v5725_v36, %v5740_v27  ;;  %v8896_v36 = vld [vmem:[%s14786_s3 + $0x810] sm:$0xf]  ;;  %v9471_v42 = vld [vmem:[%s14786_s3 + $0x894] sm:$0xf0]  ;;  %vm15076_vm13 = vmmov %vm15027_vm0 }
 0x45a   : > { %v5360_v25 = vpop.f32.mrf.mxu2  ;;  %6469 = vmatpush.bf16.msra.mxu3 %v8969_v47  ;;  %v8650_v47 = vld [vmem:[%s14786_s3 + $0x628] sm:$0xf0]  ;;  %v8960_v32 = vld [vmem:[%s14786_s3 + $0x890] sm:$0xf] }
 0x45b   : > { %v5361_v29 = vadd.f32 %v5360_v25, %v13811_v51  ;;  %v5394_v50 = vpop.f32.mrf.mxu3  ;;  %6536 = vmatpush.bf16.msra.mxu1 %v8725_v12  ;;  %v8653_v12 = vor.u32 %v9392_v2, %v8650_v47 }
 0x45d   : > { %v14086_v40 = vadd.f32 %v5394_v50, %v5361_v29  ;;  %v5423_v51 = vpop.f32.mrf.mxu0  ;;  %v9455_v29 = vld [vmem:[%s14786_s3 + $0x814] sm:$0xf0]  ;;  %6503 = vmatpush.bf16.msra.mxu0 %v8653_v12 }
 0x45e   : > { %v5424_v54 = vadd.f32 %v5423_v51, %v13515_v9  ;;  %v5457_v25 = vpop.f32.mrf.mxu1  ;;  %v14853_v9 = vrot.slane %v15013_v46, 1  ;;  %v8897_v34 = vor.u32 %v9455_v29, %v8896_v36  ;;  %v8961_v51 = vor.u32 %v9471_v42, %v8960_v32 }
 0x45f   : > { %v15044_v29 = vrot.slane %v12163_v53, 1 }
 0x460   : > { %v14097_v16 = vadd.f32 %v5457_v25, %v5424_v54  ;;  %6375 = vmatmul.bf16.gmra.mxu0 %v14095_v13  ;;  %v8714_v54 = vld [vmem:[%s14786_s3 + $0x6a8] sm:$0xf0]  ;;  %6436 = vmatpush.bf16.msra.mxu2 %v8897_v34  ;;  %v8888_v34 = vld [vmem:[%s14786_s3 + $0x800] sm:$0xf] }
 0x461   : > { %6409 = vmatmul.bf16.gmra.mxu1 %v14105_v31  ;;  %v14142_v2 = vsel %vm15045_vm2, %v15044_v29, %v14853_v9  ;;  %6470 = vmatpush.bf16.msra.mxu3 %v8961_v51  ;;  %v9469_v51 = vld [vmem:[%s14786_s3 + $0x884] sm:$0xf0]  ;;  %vm15078_vm2 = vmmov %vm15027_vm0 }
 0x462   : > { %v5362_v15 = vpop.f32.mrf.mxu2 }
 0x463   : > { %v5363_v7 = vadd.f32 %v5362_v15, %v13826_v17  ;;  %v5396_v50 = vpop.f32.mrf.mxu3  ;;  %v9408_v17 = vld [vmem:[%s14786_s3 + $0x6a4] sm:$0xf] }
 0x464   : > { %v8717_v15 = vor.u32 %v9408_v17, %v8714_v54  ;;  %v9390_v17 = vld [vmem:[%s14786_s3 + $0x614] sm:$0xf]  ;;  %v8642_v54 = vld [vmem:[%s14786_s3 + $0x618] sm:$0xf0] }
 0x465   : > { %v14135_v25 = vadd.f32 %v5396_v50, %v5363_v7  ;;  %v5425_v36 = vpop.f32.mrf.mxu0  ;;  %v15046_v7 = vrot.slane %v12176_v14, 1  ;;  %v8952_v14 = vld [vmem:[%s14786_s3 + $0x880] sm:$0xf] }
 0x466   : > { %v5426_v47 = vadd.f32 %v5425_v36, %v13546_v24  ;;  %v5459_v32 = vpop.f32.mrf.mxu1  ;;  %6537 = vmatpush.bf16.msra.mxu1 %v8717_v15  ;;  %v9453_v24 = vld [vmem:[%s14786_s3 + $0x804] sm:$0xf0]  ;;  %v8953_v29 = vor.u32 %v9469_v51, %v8952_v14  ;;  %v15052_v51 = vld [vmem:[#allocation9_spill] sm:$0xff] }
 0x467   : > { %15043 = vst [vmem:[#allocation6_spill] sm:$0xff] %v14135_v25  ;;  %6317 = vmatmul.bf16.gmra.mxu2 %v14142_v2  ;;  %v14151_v50 = vsel %vm15047_vm8, %v15046_v7, %v14852_v8  ;;  %v8889_v12 = vor.u32 %v9453_v24, %v8888_v34  ;;  %v14855_v34 = vrot.slane %v15016_v26, 1  ;;  %vm15079_vm8 = vmmov %vm15027_vm0 }
 0x468   : > { %6351 = vmatmul.bf16.gmra.mxu3 %v14151_v50  ;;  %v14154_v53 = vadd.f32 %v5459_v32, %v5426_v47  ;;  %v8645_v47 = vor.u32 %v9390_v17, %v8642_v54  ;;  %v5752_v32 = vrot.slane %v15015_v28, 1  ;;  %v15049_v28 = vrot.slane %v15012_v10, 1 }
 0x469   : > { %6437 = vmatpush.bf16.msra.mxu2 %v8889_v12  ;;  %6471 = vmatpush.bf16.msra.mxu3 %v8953_v29  ;;  %v5774_v17 = vrot.slane %v15052_v51, 1 }
 0x46a   : > { %v5476_v42 = vpop.f32.mrf.mxu2  ;;  %6504 = vmatpush.bf16.msra.mxu0 %v8645_v47  ;;  %v14181_v22 = vsel %vm15048_vm9, %v5740_v27, %v5752_v32  ;;  %v14191_v14 = vsel %vm15050_vm7, %v15049_v28, %v14855_v34  ;;  %v15055_v28 = vrot.slane %v15014_v19, 1  ;;  %v9434_v19 = vld [vmem:[%s14786_s3 + $0x774] sm:$0xf]  ;;  %vm15082_vm9 = vmmov %vm15027_vm0 }
 0x46b   : > { %v5477_v15 = vadd.f32 %v5476_v42, %v13858_v43  ;;  %v5510_v36 = vpop.f32.mrf.mxu3  ;;  %vm15083_vm7 = vmmov %vm15027_vm0 }
 0x46d   : > { %v5511_v7 = vadd.f32 %v5510_v36, %v5477_v15  ;;  %v5428_v24 = vpop.f32.mrf.mxu0  ;;  %v15053_v36 = vrot.slane %v15013_v46, 1  ;;  %v9388_v46 = vld [vmem:[%s14786_s3 + $0x604] sm:$0xf] }
 0x46e   : > { %v5429_v8 = vadd.f32 %v5428_v24, %v13567_v44  ;;  %v5462_v9 = vpop.f32.mrf.mxu1  ;;  %v9406_v44 = vld [vmem:[%s14786_s3 + $0x694] sm:$0xf] }
 0x46f   : > { %v8709_v42 = vor.u32 %v9406_v44, %v8706_v30  ;;  %v5605_v44 = vld [vmem:[#allocation5 + $0x10] sm:$0xee] }
 0x470   : > { %v14183_v43 = vadd.f32 %v5462_v9, %v5429_v8  ;;  %6380 = vmatmul.bf16.gmra.mxu0 %v14181_v22  ;;  %v15051_v9 = vld [vmem:[#allocation8_spill] sm:$0xff] }
 0x471   : > { %6414 = vmatmul.bf16.gmra.mxu1 %v14191_v14  ;;  %v5772_v8 = vrot.slane %v15051_v9, 1 }
 0x472   : > { %v5478_v27 = vpop.f32.mrf.mxu2  ;;  %6538 = vmatpush.bf16.msra.mxu1 %v8709_v42  ;;  %v9404_v42 = vld [vmem:[%s14786_s3 + $0x684] sm:$0xf] }
 0x473   : > { %v5479_v12 = vadd.f32 %v5478_v27, %v13906_v1  ;;  %v5512_v10 = vpop.f32.mrf.mxu3  ;;  %v14208_v29 = vsel %vm15054_vm6, %v15053_v36, %v5772_v8  ;;  %v14215_v1 = vsel %vm15056_vm10, %v15055_v28, %v5774_v17  ;;  %v8818_v8 = vld [vmem:[%s14786_s3 + $0x778] sm:$0xf0]  ;;  %v9450_v36 = vld [vmem:[%s14786_s3 + $0x7f4] sm:$0xf]  ;;  %v5710_v28 = vunpack.c.l.b16 %v5605_v44 }
 0x474   : > { %v8821_v17 = vor.u32 %v9434_v19, %v8818_v8 }
 0x475   : > { %v14203_v54 = vadd.f32 %v5512_v10, %v5479_v12  ;;  %v5430_v15 = vpop.f32.mrf.mxu0  ;;  %v8698_v12 = vld [vmem:[%s14786_s3 + $0x688] sm:$0xf0] }
 0x476   : > { %v5431_v47 = vadd.f32 %v5430_v15, %v13580_v20  ;;  %v5464_v24 = vpop.f32.mrf.mxu1  ;;  %v8634_v20 = vld [vmem:[%s14786_s3 + $0x608] sm:$0xf0]  ;;  %v8701_v15 = vor.u32 %v9404_v42, %v8698_v12  ;;  %6566 = vmatpush.bf16.msrb.mxu2 %v8821_v17  ;;  %v15058_v12 = vld [vmem:[#allocation7_spill] sm:$0xff] }
 0x477   : > { %6322 = vmatmul.bf16.gmra.mxu2 %v14208_v29  ;;  %v8637_v9 = vor.u32 %v9388_v46, %v8634_v20  ;;  %v5711_v46 = vunpack.c.h.b16 %v5605_v44  ;;  %v15059_v25 = vunpack.c.l.b16 %v15058_v12 }
 0x478   : > { %6356 = vmatmul.bf16.gmra.mxu3 %v14215_v1  ;;  %v14218_v30 = vadd.f32 %v5464_v24, %v5431_v47  ;;  %v8882_v47 = vld [vmem:[%s14786_s3 + $0x7f8] sm:$0xf0]  ;;  %v14857_v24 = vrot.slane %v15019_v23, 1  ;;  %6539 = vmatpush.bf16.msra.mxu1 %v8701_v15 }
 0x479   : > { %6505 = vmatpush.bf16.msra.mxu0 %v8637_v9  ;;  %v8885_v20 = vor.u32 %v9450_v36, %v8882_v47  ;;  %v5716_v44 = vpack.c.b16 %v15059_v25, %v5710_v28  ;;  %v15060_v9 = vunpack.c.h.b16 %v15058_v12  ;;  %v9432_v36 = vld [vmem:[%s14786_s3 + $0x764] sm:$0xf]  ;;  %v8810_v47 = vld [vmem:[%s14786_s3 + $0x768] sm:$0xf0] }
 0x47a   : > { %v5481_v27 = vpop.f32.mrf.mxu2  ;;  %v14252_v42 = vsel %vm15057_vm12, %v5752_v32, %v14857_v24  ;;  %v14858_v32 = vrot.slane %v12525_v4, 1 }
 0x47b   : > { %v5482_v10 = vadd.f32 %v5481_v27, %v13936_v37  ;;  %v5515_v51 = vpop.f32.mrf.mxu3  ;;  %v14856_v37 = vrot.slane %v15020_v61, 1  ;;  %6600 = vmatpush.bf16.msrb.mxu3 %v8885_v20  ;;  %v8813_v20 = vor.u32 %v9432_v36, %v8810_v47  ;;  %v5730_v12 = vrot.slane %v5716_v44, 1 }
 0x47d   : > { %v14246_v34 = vadd.f32 %v5515_v51, %v5482_v10  ;;  %v5544_v19 = vpop.f32.mrf.mxu0  ;;  %v5717_v10 = vpack.c.b16 %v15060_v9, %v5711_v46  ;;  %6567 = vmatpush.bf16.msrb.mxu2 %v8813_v20  ;;  %v14299_v15 = vsel %vm15062_vm3, %v5730_v12, %v14858_v32  ;;  %v8866_v12 = vld [vmem:[%s14786_s3 + $0x7d8] sm:$0xf0]  ;;  %v15067_v32 = vld [vmem:[#allocation22_spill] sm:$0xff] }
 0x47e   : > { %v5545_v27 = vadd.f32 %v5544_v19, %v5511_v7  ;;  %v5578_v8 = vpop.f32.mrf.mxu1  ;;  %v15061_v7 = vrot.slane %v15016_v26, 1  ;;  %v9466_v26 = vld [vmem:[%s14786_s3 + $0x874] sm:$0xf]  ;;  %v8946_v19 = vld [vmem:[%s14786_s3 + $0x878] sm:$0xf0] }
 0x47f   : > { %v8949_v9 = vor.u32 %v9466_v26, %v8946_v19  ;;  %v5733_v47 = vrot.slane %v5717_v10, 1  ;;  %v15063_v19 = vrot.slane %v12534_v60, 1 }
 0x480   : > { %v14258_v51 = vadd.f32 %v5578_v8, %v5545_v27  ;;  %6385 = vmatmul.bf16.gmra.mxu0 %v14252_v42  ;;  %v14266_v17 = vsel %vm15027_vm0, %v15061_v7, %v14856_v37  ;;  %v9448_v27 = vld [vmem:[%s14786_s3 + $0x7e4] sm:$0xf]  ;;  %v8874_v8 = vld [vmem:[%s14786_s3 + $0x7e8] sm:$0xf0] }
 0x481   : > { %6419 = vmatmul.bf16.gmra.mxu1 %v14266_v17  ;;  %v8877_v7 = vor.u32 %v9448_v27, %v8874_v8  ;;  %6634 = vmatpush.bf16.msrb.mxu0 %v8949_v9  ;;  %v9446_v8 = vld [vmem:[%s14786_s3 + $0x7d4] sm:$0xf] }
 0x482   : > { %v5483_v25 = vpop.f32.mrf.mxu2 }
 0x483   : > { %v5484_v28 = vadd.f32 %v5483_v25, %v13974_v39  ;;  %v5517_v46 = vpop.f32.mrf.mxu3  ;;  %v9482_v39 = vld [vmem:[%s14786_s3 + $0x8f4] sm:$0xf]  ;;  %v9010_v25 = vld [vmem:[%s14786_s3 + $0x8f8] sm:$0xf0]  ;;  %6601 = vmatpush.bf16.msrb.mxu3 %v8877_v7 }
 0x484   : > { %v9013_v37 = vor.u32 %v9482_v39, %v9010_v25  ;;  %v8869_v25 = vor.u32 %v9446_v8, %v8866_v12 }
 0x485   : > { %v5518_v36 = vadd.f32 %v5517_v46, %v5484_v28  ;;  %v5546_v24 = vpop.f32.mrf.mxu0  ;;  %v14306_v28 = vsel %vm15064_vm5, %v5733_v47, %v15063_v19  ;;  %v9430_v46 = vld [vmem:[%s14786_s3 + $0x754] sm:$0xf]  ;;  %v9480_v47 = vld [vmem:[%s14786_s3 + $0x8e4] sm:$0xf] }
 0x486   : > { %v5547_v44 = vadd.f32 %v5546_v24, %v14203_v54  ;;  %v5580_v26 = vpop.f32.mrf.mxu1  ;;  %6668 = vmatpush.bf16.msrb.mxu1 %v9013_v37  ;;  %v8802_v54 = vld [vmem:[%s14786_s3 + $0x758] sm:$0xf0]  ;;  %v9464_v24 = vld [vmem:[%s14786_s3 + $0x864] sm:$0xf]  ;;  %v8938_v37 = vld [vmem:[%s14786_s3 + $0x868] sm:$0xf0] }
 0x487   : > { %6438 = vmatmul.bf16.vlgmr.msra.gmra.mxu2 %v14299_v15  ;;  %v8805_v27 = vor.u32 %v9430_v46, %v8802_v54  ;;  %v8941_v39 = vor.u32 %v9464_v24, %v8938_v37  ;;  %6602 = vmatpush.bf16.msrb.mxu3 %v8869_v25  ;;  %v15068_v37 = vrot.slane %v15019_v23, 1  ;;  %v9428_v23 = vld [vmem:[%s14786_s3 + $0x744] sm:$0xf]  ;;  %v5746_v25 = vrot.slane %v12611_v35, 1 }
 0x488   : > { %6472 = vmatmul.bf16.vlgmr.msra.gmra.mxu3 %v14306_v28  ;;  %v14309_v10 = vadd.f32 %v5580_v26, %v5547_v44  ;;  %v9002_v44 = vld [vmem:[%s14786_s3 + $0x8e8] sm:$0xf0]  ;;  %v15066_v26 = vld [vmem:[#allocation21_spill] sm:$0xff]  ;;  %v15074_v35 = vrot.slane %v12534_v60, 1 }
 0x489   : > { %v5776_v19 = vrot.slane %v15066_v26, 1  ;;  %6568 = vmatpush.bf16.msrb.mxu2 %v8805_v27  ;;  %v9005_v46 = vor.u32 %v9480_v47, %v9002_v44  ;;  %6635 = vmatpush.bf16.msrb.mxu0 %v8941_v39  ;;  %v15070_v27 = vrot.slane %v15020_v61, 1  ;;  %v9462_v61 = vld [vmem:[%s14786_s3 + $0x854] sm:$0xf]  ;;  %v8930_v44 = vld [vmem:[%s14786_s3 + $0x858] sm:$0xf0] }
 0x48a   : > { %15065 = vst [vmem:[#allocation13_spill] sm:$0xff] %v14309_v10  ;;  %v5486_v20 = vpop.f32.mrf.mxu2  ;;  %v5778_v10 = vrot.slane %v15067_v32, 1  ;;  %v8933_v26 = vor.u32 %v9462_v61, %v8930_v44 }
 0x48b   : > { %v5487_v9 = vadd.f32 %v5486_v20, %v14004_v52  ;;  %v5520_v7 = vpop.f32.mrf.mxu3  ;;  %6669 = vmatpush.bf16.msrb.mxu1 %v9005_v46  ;;  %v14342_v8 = vsel %vm15069_vm11, %v15068_v37, %v5776_v19  ;;  %v14379_v37 = vsel %vm15075_vm1, %v15074_v35, %v5746_v25  ;;  %v9460_v35 = vld [vmem:[%s14786_s3 + $0x844] sm:$0xf] }
 0x48c   : > { %v14350_v32 = vsel %vm15071_vm15, %v15070_v27, %v5778_v10 }
 0x48d   : > { %v5521_v54 = vadd.f32 %v5520_v7, %v5487_v9  ;;  %v5549_v52 = vpop.f32.mrf.mxu0  ;;  %v5744_v9 = vrot.slane %v12603_v6, 1  ;;  %v8794_v7 = vld [vmem:[%s14786_s3 + $0x748] sm:$0xf0]  ;;  %6636 = vmatpush.bf16.msrb.mxu0 %v8933_v26  ;;  %v9424_v6 = vld [vmem:[%s14786_s3 + $0x724] sm:$0xf] }
 0x48e   : > { %v5550_v24 = vadd.f32 %v5549_v52, %v14246_v34  ;;  %v5583_v20 = vpop.f32.mrf.mxu1  ;;  %v8797_v47 = vor.u32 %v9428_v23, %v8794_v7  ;;  %v15072_v52 = vrot.slane %v12525_v4, 1  ;;  %v9444_v4 = vld [vmem:[%s14786_s3 + $0x7c4] sm:$0xf]  ;;  %v8994_v7 = vld [vmem:[%s14786_s3 + $0x8d8] sm:$0xf0] }
 0x490   : > { %v14344_v12 = vadd.f32 %v5583_v20, %v5550_v24  ;;  %6390 = vmatmul.bf16.gmra.mxu0 %v14342_v8  ;;  %6569 = vmatpush.bf16.msrb.mxu2 %v8797_v47  ;;  %v14373_v24 = vsel %vm15073_vm14, %v15072_v52, %v5744_v9  ;;  %v5756_v52 = vrot.slane %v15021_v48, 1 }
 0x491   : > { %6424 = vmatmul.bf16.gmra.mxu1 %v14350_v32 }
 0x492   : > { %v5488_v34 = vpop.f32.mrf.mxu2 }
 0x493   : > { %v5489_v10 = vadd.f32 %v5488_v34, %v14058_v58  ;;  %v5522_v39 = vpop.f32.mrf.mxu3  ;;  %v9478_v34 = vld [vmem:[%s14786_s3 + $0x8d4] sm:$0xf] }
 0x495   : > { %v5523_v19 = vadd.f32 %v5522_v39, %v5489_v10  ;;  %v5551_v46 = vpop.f32.mrf.mxu0  ;;  %v8997_v39 = vor.u32 %v9478_v34, %v8994_v7  ;;  %v8850_v34 = vld [vmem:[%s14786_s3 + $0x7b8] sm:$0xf0]  ;;  %v5758_v7 = vrot.slane %v15022_v3, 1  ;;  %v9436_v3 = vld [vmem:[%s14786_s3 + $0x784] sm:$0xf] }
 0x496   : > { %v5552_v58 = vadd.f32 %v5551_v46, %v5518_v36  ;;  %v5585_v20 = vpop.f32.mrf.mxu1  ;;  %v8858_v36 = vld [vmem:[%s14786_s3 + $0x7c8] sm:$0xf0] }
 0x497   : > { %6443 = vmatmul.bf16.gmra.mxu2 %v14373_v24  ;;  %v8861_v23 = vor.u32 %v9444_v4, %v8858_v36  ;;  %6670 = vmatpush.bf16.msrb.mxu1 %v8997_v39  ;;  %v9442_v36 = vld [vmem:[%s14786_s3 + $0x7b4] sm:$0xf]  ;;  %v8986_v39 = vld [vmem:[%s14786_s3 + $0x8c8] sm:$0xf0] }
 0x498   : > { %6477 = vmatmul.bf16.gmra.mxu3 %v14379_v37  ;;  %v14382_v27 = vadd.f32 %v5585_v20, %v5552_v58  ;;  %v9426_v20 = vld [vmem:[%s14786_s3 + $0x734] sm:$0xf] }
 0x499   : > { %6603 = vmatpush.bf16.msrb.mxu3 %v8861_v23 }
 0x49a   : > { %v5491_v60 = vpop.f32.mrf.mxu2 }
 0x49b   : > { %v5492_v61 = vadd.f32 %v5491_v60, %v14097_v16  ;;  %v5525_v10 = vpop.f32.mrf.mxu3  ;;  %v8786_v16 = vld [vmem:[%s14786_s3 + $0x738] sm:$0xf0] }
 0x49c   : > { %v8789_v4 = vor.u32 %v9426_v20, %v8786_v16 }
 0x49d   : > { %v5526_v47 = vadd.f32 %v5525_v10, %v5492_v61  ;;  %v5554_v44 = vpop.f32.mrf.mxu0  ;;  %v8853_v61 = vor.u32 %v9442_v36, %v8850_v34  ;;  %v9476_v10 = vld [vmem:[%s14786_s3 + $0x8c4] sm:$0xf]  ;;  %v8842_v34 = vld [vmem:[%s14786_s3 + $0x7a8] sm:$0xf0] }
 0x49e   : > { %v5555_v26 = vadd.f32 %v5554_v44, %v5521_v54  ;;  %v5588_v46 = vpop.f32.mrf.mxu1  ;;  %6570 = vmatpush.bf16.msrb.mxu2 %v8789_v4  ;;  %v8989_v44 = vor.u32 %v9476_v10, %v8986_v39  ;;  %v9440_v36 = vld [vmem:[%s14786_s3 + $0x7a4] sm:$0xf]  ;;  %v9474_v10 = vld [vmem:[%s14786_s3 + $0x8b4] sm:$0xf]  ;;  %v8978_v39 = vld [vmem:[%s14786_s3 + $0x8b8] sm:$0xf0] }
 0x49f   : > { %6604 = vmatpush.bf16.msrb.mxu3 %v8853_v61  ;;  %v8845_v61 = vor.u32 %v9440_v36, %v8842_v34 }
 0x4a0   : > { %v14398_v58 = vadd.f32 %v5588_v46, %v5555_v26  ;;  %6506 = vmatmul.bf16.vlgmr.msra.gmra.mxu0 %v13896_v0  ;;  %v8922_v0 = vld [vmem:[%s14786_s3 + $0x848] sm:$0xf0]  ;;  %6671 = vmatpush.bf16.msrb.mxu1 %v8989_v44  ;;  %v8981_v44 = vor.u32 %v9474_v10, %v8978_v39 }
 0x4a1   : > { %6540 = vmatmul.bf16.vlgmr.msra.gmra.mxu1 %v13903_v63  ;;  %v8925_v63 = vor.u32 %v9460_v35, %v8922_v0  ;;  %v14439_v35 = vsel %vm15077_vm4, %v5746_v25, %v5758_v7  ;;  %v8914_v25 = vld [vmem:[%s14786_s3 + $0x838] sm:$0xf0]  ;;  %v8970_v10 = vld [vmem:[%s14786_s3 + $0x8a8] sm:$0xf0] }
 0x4a2   : > { %v5493_v54 = vpop.f32.mrf.mxu2 }
 0x4a3   : > { %v5494_v60 = vadd.f32 %v5493_v54, %v14154_v53  ;;  %v5527_v23 = vpop.f32.mrf.mxu3  ;;  %6637 = vmatpush.bf16.msrb.mxu0 %v8925_v63  ;;  %v14433_v53 = vsel %vm15076_vm13, %v5744_v9, %v5756_v52  ;;  %v8778_v9 = vld [vmem:[%s14786_s3 + $0x728] sm:$0xf0]  ;;  %6605 = vmatpush.bf16.msrb.mxu3 %v8845_v61 }
 0x4a4   : > { %v8781_v0 = vor.u32 %v9424_v6, %v8778_v9  ;;  %6672 = vmatpush.bf16.msrb.mxu1 %v8981_v44  ;;  %v5768_v9 = vrot.slane %v12739_v45, 1  ;;  %v9452_v45 = vld [vmem:[%s14786_s3 + $0x804] sm:$0xf] }
 0x4a5   : > { %v5528_v26 = vadd.f32 %v5527_v23, %v5494_v60  ;;  %v5556_v46 = vpop.f32.mrf.mxu0 }
 0x4a6   : > { %v5557_v20 = vadd.f32 %v5556_v46, %v5523_v19  ;;  %v5590_v16 = vpop.f32.mrf.mxu1  ;;  %v9458_v19 = vld [vmem:[%s14786_s3 + $0x834] sm:$0xf]  ;;  %6571 = vmatpush.bf16.msrb.mxu2 %v8781_v0 }
 0x4a7   : > { %6448 = vmatmul.bf16.gmra.mxu2 %v14433_v53  ;;  %v8917_v63 = vor.u32 %v9458_v19, %v8914_v25  ;;  %v5770_v19 = vrot.slane %v12741_v41, 1  ;;  %v9422_v0 = vld [vmem:[%s14786_s3 + $0x714] sm:$0xf]  ;;  %v9456_v25 = vld [vmem:[%s14786_s3 + $0x824] sm:$0xf] }
 0x4a8   : > { %6482 = vmatmul.bf16.gmra.mxu3 %v14439_v35  ;;  %v14442_v54 = vadd.f32 %v5590_v16, %v5557_v20 }
 0x4a9   : > { %6638 = vmatpush.bf16.msrb.mxu0 %v8917_v63 }
 0x4aa   : > { %v5496_v4 = vpop.f32.mrf.mxu2 }
 0x4ab   : > { %v5497_v60 = vadd.f32 %v5496_v4, %v14183_v43  ;;  %v5530_v23 = vpop.f32.mrf.mxu3 }
 0x4ad   : > { %v5531_v46 = vadd.f32 %v5530_v23, %v5497_v60  ;;  %v5559_v20 = vpop.f32.mrf.mxu0  ;;  %v9438_v60 = vld [vmem:[%s14786_s3 + $0x794] sm:$0xf]  ;;  %v8834_v23 = vld [vmem:[%s14786_s3 + $0x798] sm:$0xf0] }
 0x4ae   : > { %v5560_v16 = vadd.f32 %v5559_v20, %v5526_v47  ;;  %v5593_v43 = vpop.f32.mrf.mxu1  ;;  %v8770_v47 = vld [vmem:[%s14786_s3 + $0x718] sm:$0xf0]  ;;  %v8837_v61 = vor.u32 %v9438_v60, %v8834_v23 }
 0x4af   : > { %v8773_v34 = vor.u32 %v9422_v0, %v8770_v47  ;;  %v14513_v0 = vsel %vm15079_vm8, %v5758_v7, %v5770_v19 }
 0x4b0   : > { %v14469_v6 = vadd.f32 %v5593_v43, %v5560_v16  ;;  %6511 = vmatmul.bf16.gmra.mxu0 %v13962_v59  ;;  %v14505_v16 = vsel %vm15078_vm2, %v5756_v52, %v5768_v9  ;;  %6606 = vmatpush.bf16.msrb.mxu3 %v8837_v61  ;;  %v9420_v52 = vld [vmem:[%s14786_s3 + $0x704] sm:$0xf] }
 0x4b1   : > { %6545 = vmatmul.bf16.gmra.mxu1 %v13971_v55  ;;  %v8906_v55 = vld [vmem:[%s14786_s3 + $0x828] sm:$0xf0]  ;;  %6572 = vmatpush.bf16.msrb.mxu2 %v8773_v34 }
 0x4b2   : > { %v5498_v4 = vpop.f32.mrf.mxu2  ;;  %v8909_v63 = vor.u32 %v9456_v25, %v8906_v55  ;;  %v8826_v25 = vld [vmem:[%s14786_s3 + $0x788] sm:$0xf0] }
 0x4b3   : > { %v5499_v59 = vadd.f32 %v5498_v4, %v14218_v30  ;;  %v5532_v36 = vpop.f32.mrf.mxu3  ;;  %v9472_v30 = vld [vmem:[%s14786_s3 + $0x8a4] sm:$0xf]  ;;  %v8829_v55 = vor.u32 %v9436_v3, %v8826_v25  ;;  %v15081_v3 = vld [vmem:[#allocation26_spill] sm:$0xff] }
 0x4b4   : > { %v8973_v44 = vor.u32 %v9472_v30, %v8970_v10  ;;  %6639 = vmatpush.bf16.msrb.mxu0 %v8909_v63 }
 0x4b5   : > { %v5533_v39 = vadd.f32 %v5532_v36, %v5499_v59  ;;  %v5561_v20 = vpop.f32.mrf.mxu0  ;;  %v9454_v59 = vld [vmem:[%s14786_s3 + $0x814] sm:$0xf]  ;;  %v8898_v36 = vld [vmem:[%s14786_s3 + $0x818] sm:$0xf0]  ;;  %6607 = vmatpush.bf16.msrb.mxu3 %v8829_v55 }
 0x4b6   : > { %v5562_v43 = vadd.f32 %v5561_v20, %v5528_v26  ;;  %v5595_v4 = vpop.f32.mrf.mxu1  ;;  %6673 = vmatpush.bf16.msrb.mxu1 %v8973_v44  ;;  %v8762_v26 = vld [vmem:[%s14786_s3 + $0x708] sm:$0xf0]  ;;  %v8901_v60 = vor.u32 %v9454_v59, %v8898_v36  ;;  %v9470_v44 = vld [vmem:[%s14786_s3 + $0x894] sm:$0xf]  ;;  %v8962_v20 = vld [vmem:[%s14786_s3 + $0x898] sm:$0xf0] }
 0x4b7   : > { %6453 = vmatmul.bf16.gmra.mxu2 %v14505_v16  ;;  %v8765_v7 = vor.u32 %v9420_v52, %v8762_v26  ;;  %v8965_v26 = vor.u32 %v9470_v44, %v8962_v20 }
 0x4b8   : > { %6487 = vmatmul.bf16.gmra.mxu3 %v14513_v0  ;;  %v14516_v48 = vadd.f32 %v5595_v4, %v5562_v43  ;;  %6640 = vmatpush.bf16.msrb.mxu0 %v8901_v60  ;;  %v15080_v4 = vld [vmem:[#allocation25_spill] sm:$0xff] }
 0x4b9   : > { %6573 = vmatpush.bf16.msrb.mxu2 %v8765_v7  ;;  %v5780_v52 = vrot.slane %v15080_v4, 1 }
 0x4ba   : > { %v6303_v47 = vpop.f32.mrf.mxu2  ;;  %6674 = vmatpush.bf16.msrb.mxu1 %v8965_v26 }
 0x4bb   : > { %v6337_v34 = vpop.f32.mrf.mxu3  ;;  %v14555_v25 = vsel %vm15082_vm9, %v5768_v9, %v5780_v52  ;;  %v8890_v9 = vld [vmem:[%s14786_s3 + $0x808] sm:$0xf0] }
 0x4bc   : > { %v14536_v23 = vadd.f32 %v6337_v34, %v6303_v47  ;;  %v5782_v47 = vrot.slane %v15081_v3, 1  ;;  %v8893_v55 = vor.u32 %v9452_v45, %v8890_v9 }
 0x4bd   : > { %v5564_v63 = vpop.f32.mrf.mxu0 }
 0x4be   : > { %v5565_v61 = vadd.f32 %v5564_v63, %v5531_v46  ;;  %v5598_v30 = vpop.f32.mrf.mxu1  ;;  %6641 = vmatpush.bf16.msrb.mxu0 %v8893_v55 }
 0x4c0   : > { %v14538_v10 = vadd.f32 %v5598_v30, %v5565_v61  ;;  %6516 = vmatmul.bf16.gmra.mxu0 %v14046_v21 }
 0x4c1   : > { %6550 = vmatmul.bf16.gmra.mxu1 %v14055_v33  ;;  %v14561_v33 = vsel %vm15083_vm7, %v5770_v19, %v5782_v47  ;;  %v8954_v19 = vld [vmem:[%s14786_s3 + $0x888] sm:$0xf0] }
 0x4c2   : > { %v6305_v43 = vpop.f32.mrf.mxu2 }
 0x4c3   : > { %v6339_v46 = vpop.f32.mrf.mxu3 }
 0x4c4   : > { %v14550_v7 = vadd.f32 %v6339_v46, %v6305_v43 }
 0x4c5   : > { %v5566_v21 = vpop.f32.mrf.mxu0 }
 0x4c6   : > { %v5567_v59 = vadd.f32 %v5566_v21, %v5533_v39  ;;  %v5600_v36 = vpop.f32.mrf.mxu1  ;;  %v9468_v39 = vld [vmem:[%s14786_s3 + $0x884] sm:$0xf] }
 0x4c7   : > { %6458 = vmatmul.bf16.gmra.mxu2 %v14555_v25  ;;  %v8957_v63 = vor.u32 %v9468_v39, %v8954_v19 }
 0x4c8   : > { %6492 = vmatmul.bf16.gmra.mxu3 %v14561_v33  ;;  %v14564_v34 = vadd.f32 %v5600_v36, %v5567_v59 }
 0x4c9   : > { %6675 = vmatpush.bf16.msrb.mxu1 %v8957_v63 }
 0x4ca   : > { %v6308_v41 = vpop.f32.mrf.mxu2 }
 0x4cb   : > { %v6342_v60 = vpop.f32.mrf.mxu3 }
 0x4cc   : > { %v14578_v61 = vadd.f32 %v6342_v60, %v6308_v41 }
 0x4cd   : > { %v6371_v30 = vpop.f32.mrf.mxu0 }
 0x4ce   : > { %v6405_v44 = vpop.f32.mrf.mxu1 }
 0x4d0   : > { %6521 = vmatmul.bf16.gmra.mxu0 %v14142_v2 }
 0x4d1   : > { %6555 = vmatmul.bf16.gmra.mxu1 %v14151_v50 }
 0x4d2   : > { %v6310_v20 = vpop.f32.mrf.mxu2 }
 0x4d3   : > { %v6344_v43 = vpop.f32.mrf.mxu3 }
 0x4d4   : > { %v14582_v4 = vadd.f32 %v6344_v43, %v6310_v20 }
 0x4d5   : > { %v6373_v52 = vpop.f32.mrf.mxu0 }
 0x4d6   : > { %v6407_v26 = vpop.f32.mrf.mxu1 }
 0x4d7   : > { %6574 = vmatmul.bf16.vlgmr.msrb.gmra.mxu2 %v14001_v57 }
 0x4d8   : > { %6608 = vmatmul.bf16.vlgmr.msrb.gmra.mxu3 %v14010_v18 }
 0x4da   : > { %v6313_v46 = vpop.f32.mrf.mxu2 }
 0x4db   : > { %v6347_v3 = vpop.f32.mrf.mxu3 }
 0x4dc   : > { %v14586_v47 = vadd.f32 %v6347_v3, %v6313_v46 }
 0x4dd   : > { %v6376_v21 = vpop.f32.mrf.mxu0 }
 0x4de   : > { %v14588_v59 = vpop.f32.mrf.mxu1 }
 0x4e0   : > { %6526 = vmatmul.bf16.gmra.mxu0 %v14208_v29 }
 0x4e1   : > { %6560 = vmatmul.bf16.gmra.mxu1 %v14215_v1 }
 0x4e2   : > { %v6315_v2 = vpop.f32.mrf.mxu2 }
 0x4e3   : > { %v6349_v50 = vpop.f32.mrf.mxu3 }
 0x4e4   : > { %v14592_v36 = vadd.f32 %v6349_v50, %v6315_v2 }
 0x4e5   : > { %v14594_v45 = vpop.f32.mrf.mxu0 }
 0x4e6   : > { %v14596_v57 = vpop.f32.mrf.mxu1 }
 0x4e7   : > { %6579 = vmatmul.bf16.gmra.mxu2 %v14095_v13 }
 0x4e8   : > { %6613 = vmatmul.bf16.gmra.mxu3 %v14105_v31 }
 0x4ea   : > { %v6318_v18 = vpop.f32.mrf.mxu2 }
 0x4eb   : > { %v6352_v9 = vpop.f32.mrf.mxu3 }
 0x4ec   : > { %v14600_v39 = vadd.f32 %v6352_v9, %v6318_v18 }
 0x4ed   : > { %v14602_v41 = vpop.f32.mrf.mxu0 }
 0x4ee   : > { %v14604_v29 = vpop.f32.mrf.mxu1 }
 0x4f0   : > { %6642 = vmatmul.bf16.vlgmr.msrb.gmra.mxu0 %v14299_v15 }
 0x4f1   : > { %6676 = vmatmul.bf16.vlgmr.msrb.gmra.mxu1 %v14306_v28 }
 0x4f2   : > { %v6320_v1 = vpop.f32.mrf.mxu2 }
 0x4f3   : > { %v6354_v55 = vpop.f32.mrf.mxu3 }
 0x4f4   : > { %v14608_v19 = vadd.f32 %v6354_v55, %v6320_v1  ;;  %v6374_v1 = vadd.f32 %v6373_v52, %v14550_v7 }
 0x4f5   : > { %v14610_v60 = vpop.f32.mrf.mxu0 }
 0x4f6   : > { %v14612_v13 = vpop.f32.mrf.mxu1 }
 0x4f7   : > { %6584 = vmatmul.bf16.gmra.mxu2 %v14181_v22  ;;  %v6372_v22 = vadd.f32 %v6371_v30, %v14536_v23 }
 0x4f8   : > { %6618 = vmatmul.bf16.gmra.mxu3 %v14191_v14 }
 0x4f9   : > { %v6406_v50 = vadd.f32 %v6405_v44, %v6372_v22  ;;  %v6408_v44 = vadd.f32 %v6407_v26, %v6374_v1 }
 0x4fa   : > { %v6323_v31 = vpop.f32.mrf.mxu2 }
 0x4fb   : > { %v6357_v63 = vpop.f32.mrf.mxu3 }
 0x4fc   : > { %v14616_v20 = vadd.f32 %v6357_v63, %v6323_v31 }
 0x4fd   : > { %v14618_v43 = vpop.f32.mrf.mxu0 }
 0x4fe   : > { %v14620_v15 = vpop.f32.mrf.mxu1 }
 0x500   : > { %6647 = vmatmul.bf16.gmra.mxu0 %v14373_v24  ;;  %v14636_v24 = vld [vmem:[%s14787_s4] sm:$0x3] }
 0x501   : > { %6681 = vmatmul.bf16.gmra.mxu1 %v14379_v37  ;;  %v14640_v30 = vperm.slane %v14636_v24, 0 }
 0x502   : > { %v6325_v28 = vpop.f32.mrf.mxu2 }
 0x503   : > { %v6359_v46 = vpop.f32.mrf.mxu3 }
 0x504   : > { %v14624_v3 = vadd.f32 %v6359_v46, %v6325_v28 }
 0x505   : > { %v14627_v14 = vpop.f32.mrf.mxu0 }
 0x506   : > { %v14629_v2 = vpop.f32.mrf.mxu1 }
 0x507   : > { %6589 = vmatmul.bf16.gmra.mxu2 %v14252_v42 }
 0x508   : > { %6623 = vmatmul.bf16.gmra.mxu3 %v14266_v17 }
 0x50a   : > { %v6439_v18 = vpop.f32.mrf.mxu2 }
 0x50b   : > { %v6440_v37 = vadd.f32 %v6439_v18, %v6406_v50  ;;  %v6473_v9 = vpop.f32.mrf.mxu3 }
 0x50d   : > { %v6474_v23 = vadd.f32 %v6473_v9, %v6440_v37  ;;  %v14642_v55 = vpop.f32.mrf.mxu0 }
 0x50e   : > { %v14645_v42 = vpop.f32.mrf.mxu1 }
 0x50f   : > { %v6702_v17 = vadd.f32 %v6474_v23, %v13809_v62  ;;  %v6377_v62 = vadd.f32 %v6376_v21, %v14578_v61  ;;  %v6379_v21 = vadd.f32 %v14594_v45, %v14582_v4 }
 0x510   : > { %6652 = vmatmul.bf16.gmra.mxu0 %v14433_v53 }
 0x511   : > { %v6728_v31 = vadd.f32 %v14640_v30, %v6702_v17  ;;  %6686 = vmatmul.bf16.gmra.mxu1 %v14439_v35  ;;  %v6411_v35 = vadd.f32 %v14588_v59, %v6377_v62 }
 0x512   : > { %v6441_v7 = vpop.f32.mrf.mxu2 }
 0x513   : > { %v6748_v52 = vmax.f32 %v6728_v31, 0.0  ;;  %v6442_v63 = vadd.f32 %v6441_v7, %v6408_v44  ;;  %v6475_v28 = vpop.f32.mrf.mxu3  ;;  %v6382_v7 = vadd.f32 %v14602_v41, %v14586_v47 }
 0x515   : > { %6768 = vst [vmem:[%s14653_s10] sm:$0xff] %v6748_v52  ;;  %v6476_v26 = vadd.f32 %v6475_v28, %v6442_v63  ;;  %v14658_v46 = vpop.f32.mrf.mxu0 }
 0x516   : > { %v14660_v53 = vpop.f32.mrf.mxu1 }
 0x517   : > { %v6704_v22 = vadd.f32 %v6476_v26, %v13822_v5  ;;  %6594 = vmatmul.bf16.gmra.mxu2 %v14342_v8 }
 0x518   : > { %6628 = vmatmul.bf16.gmra.mxu3 %v14350_v32  ;;  %v6413_v32 = vadd.f32 %v14596_v57, %v6379_v21 }
 0x519   : > { %v6730_v50 = vadd.f32 %v14640_v30, %v6704_v22 }
 0x51a   : > { %v6444_v18 = vpop.f32.mrf.mxu2 }
 0x51b   : > { %v6750_v37 = vmax.f32 %v6730_v50, 0.0  ;;  %v6445_v9 = vadd.f32 %v6444_v18, %v6411_v35  ;;  %v6478_v61 = vpop.f32.mrf.mxu3  ;;  %v6384_v50 = vadd.f32 %v14610_v60, %v14592_v36  ;;  %v15084_v18 = vld [vmem:[#allocation17_spill] sm:$0xff] }
 0x51d   : > { %6770 = vst [vmem:[%s14653_s10 + $0x10] sm:$0xff] %v6750_v37  ;;  %v6479_v1 = vadd.f32 %v6478_v61, %v6445_v9  ;;  %v6507_v23 = vpop.f32.mrf.mxu0 }
 0x51e   : > { %v6541_v8 = vpop.f32.mrf.mxu1 }
 0x51f   : > { %v6706_v5 = vadd.f32 %v6479_v1, %v13853_v38  ;;  %v14671_v17 = vadd.f32 %v6541_v8, %v6507_v23  ;;  %v6387_v23 = vadd.f32 %v14618_v43, %v14600_v39  ;;  %v6389_v39 = vadd.f32 %v14627_v14, %v14608_v19 }
 0x520   : > { %6657 = vmatmul.bf16.gmra.mxu0 %v14505_v16  ;;  %v6416_v16 = vadd.f32 %v14604_v29, %v6382_v7  ;;  %v6418_v29 = vadd.f32 %v14612_v13, %v6384_v50  ;;  %v6392_v19 = vadd.f32 %v14642_v55, %v14616_v20  ;;  %v6394_v20 = vadd.f32 %v14658_v46, %v14624_v3  ;;  %v15086_v46 = vld [vmem:[#allocation6_spill] sm:$0xff] }
 0x521   : > { %v6732_v59 = vadd.f32 %v14640_v30, %v6706_v5  ;;  %6691 = vmatmul.bf16.gmra.mxu1 %v14513_v0 }
 0x522   : > { %v6446_v44 = vpop.f32.mrf.mxu2 }
 0x523   : > { %v6752_v31 = vmax.f32 %v6732_v59, 0.0  ;;  %v6447_v4 = vadd.f32 %v6446_v44, %v6413_v32  ;;  %v6480_v45 = vpop.f32.mrf.mxu3  ;;  %v15085_v32 = vld [vmem:[#allocation12_spill] sm:$0xff] }
 0x525   : > { %6772 = vst [vmem:[%s14653_s10 + $0x20] sm:$0xff] %v6752_v31  ;;  %v6481_v38 = vadd.f32 %v6480_v45, %v6447_v4  ;;  %v6509_v52 = vpop.f32.mrf.mxu0 }
 0x526   : > { %v6543_v57 = vpop.f32.mrf.mxu1 }
 0x527   : > { %v6708_v63 = vadd.f32 %v6481_v38, %v13891_v56  ;;  %v14681_v28 = vadd.f32 %v6543_v57, %v6509_v52 }
 0x529   : > { %v6734_v0 = vadd.f32 %v14640_v30, %v6708_v63 }
 0x52a   : > { %v6449_v62 = vpop.f32.mrf.mxu2 }
 0x52b   : > { %v6754_v26 = vmax.f32 %v6734_v0, 0.0  ;;  %v6450_v22 = vadd.f32 %v6449_v62, %v6416_v16  ;;  %v6483_v35 = vpop.f32.mrf.mxu3 }
 0x52d   : > { %6774 = vst [vmem:[%s14653_s10 + $0x30] sm:$0xff] %v6754_v26  ;;  %v6484_v47 = vadd.f32 %v6483_v35, %v6450_v22  ;;  %v6512_v41 = vpop.f32.mrf.mxu0 }
 0x52e   : > { %v6546_v37 = vpop.f32.mrf.mxu1 }
 0x52f   : > { %v6710_v56 = vadd.f32 %v6484_v47, %v15084_v18  ;;  %v14689_v9 = vadd.f32 %v6546_v37, %v6512_v41 }
 0x530   : > { %6662 = vmatmul.bf16.gmra.mxu0 %v14555_v25  ;;  %v6421_v25 = vadd.f32 %v14620_v15, %v6387_v23  ;;  %v6423_v15 = vadd.f32 %v14629_v2, %v6389_v39  ;;  %v6426_v2 = vadd.f32 %v14645_v42, %v6392_v19  ;;  %v6428_v42 = vadd.f32 %v14660_v53, %v6394_v20 }
 0x531   : > { %v6736_v61 = vadd.f32 %v14640_v30, %v6710_v56  ;;  %6696 = vmatmul.bf16.gmra.mxu1 %v14561_v33 }
 0x532   : > { %v6451_v21 = vpop.f32.mrf.mxu2 }
 0x533   : > { %v6756_v1 = vmax.f32 %v6736_v61, 0.0  ;;  %v6452_v36 = vadd.f32 %v6451_v21, %v6418_v29  ;;  %v6485_v60 = vpop.f32.mrf.mxu3 }
 0x535   : > { %6776 = vst [vmem:[%s14653_s10 + $0x40] sm:$0xff] %v6756_v1  ;;  %v6486_v5 = vadd.f32 %v6485_v60, %v6452_v36  ;;  %v6514_v8 = vpop.f32.mrf.mxu0 }
 0x536   : > { %v6548_v13 = vpop.f32.mrf.mxu1 }
 0x537   : > { %v6712_v59 = vadd.f32 %v6486_v5, %v15085_v32  ;;  %v14699_v44 = vadd.f32 %v6548_v13, %v6514_v8 }
 0x539   : > { %v6738_v33 = vadd.f32 %v14640_v30, %v6712_v59 }
 0x53a   : > { %v6454_v31 = vpop.f32.mrf.mxu2 }
 0x53b   : > { %v6758_v4 = vmax.f32 %v6738_v33, 0.0  ;;  %v6455_v45 = vadd.f32 %v6454_v31, %v6421_v25  ;;  %v6488_v7 = vpop.f32.mrf.mxu3 }
 0x53d   : > { %6778 = vst [vmem:[%s14653_s10 + $0x50] sm:$0xff] %v6758_v4  ;;  %v6489_v43 = vadd.f32 %v6488_v7, %v6455_v45  ;;  %v6517_v38 = vpop.f32.mrf.mxu0 }
 0x53e   : > { %v6551_v63 = vpop.f32.mrf.mxu1 }
 0x53f   : > { %v6714_v52 = vadd.f32 %v6489_v43, %v13994_v49  ;;  %v14707_v57 = vadd.f32 %v6551_v63, %v6517_v38 }
 0x541   : > { %v6740_v16 = vadd.f32 %v14640_v30, %v6714_v52 }
 0x542   : > { %v6456_v0 = vpop.f32.mrf.mxu2 }
 0x543   : > { %v6760_v62 = vmax.f32 %v6740_v16, 0.0  ;;  %v6457_v26 = vadd.f32 %v6456_v0, %v6423_v15  ;;  %v6490_v22 = vpop.f32.mrf.mxu3 }
 0x545   : > { %6780 = vst [vmem:[%s14653_s10 + $0x60] sm:$0xff] %v6760_v62  ;;  %v6491_v14 = vadd.f32 %v6490_v22, %v6457_v26  ;;  %v6519_v35 = vpop.f32.mrf.mxu0 }
 0x546   : > { %v6553_v50 = vpop.f32.mrf.mxu1 }
 0x547   : > { %v6716_v49 = vadd.f32 %v6491_v14, %v14039_v11  ;;  %v14715_v47 = vadd.f32 %v6553_v50, %v6519_v35  ;;  %v14740_v35 = vperm.slane %v14636_v24, 1 }
 0x549   : > { %v6742_v41 = vadd.f32 %v14640_v30, %v6716_v49 }
 0x54a   : > { %v6459_v18 = vpop.f32.mrf.mxu2 }
 0x54b   : > { %v6762_v56 = vmax.f32 %v6742_v41, 0.0  ;;  %v6460_v37 = vadd.f32 %v6459_v18, %v6426_v2  ;;  %v6493_v29 = vpop.f32.mrf.mxu3 }
 0x54d   : > { %6782 = vst [vmem:[%s14653_s10 + $0x70] sm:$0xff] %v6762_v56  ;;  %v6494_v55 = vadd.f32 %v6493_v29, %v6460_v37  ;;  %v6522_v61 = vpop.f32.mrf.mxu0 }
 0x54e   : > { %v6556_v21 = vpop.f32.mrf.mxu1 }
 0x54f   : > { %v6718_v11 = vadd.f32 %v6494_v55, %v14086_v40  ;;  %v14723_v1 = vadd.f32 %v6556_v21, %v6522_v61  ;;  %v15087_v55 = vld [vmem:[#allocation13_spill] sm:$0xff] }
 0x551   : > { %v6744_v36 = vadd.f32 %v14640_v30, %v6718_v11 }
 0x552   : > { %v6461_v60 = vpop.f32.mrf.mxu2 }
 0x553   : > { %v6764_v23 = vmax.f32 %v6744_v36, 0.0  ;;  %v6462_v5 = vadd.f32 %v6461_v60, %v6428_v42  ;;  %v6495_v8 = vpop.f32.mrf.mxu3 }
 0x555   : > { %6784 = vst [vmem:[%s14653_s10 + $0x80] sm:$0xff] %v6764_v23  ;;  %v6496_v32 = vadd.f32 %v6495_v8, %v6462_v5  ;;  %v6524_v3 = vpop.f32.mrf.mxu0 }
 0x556   : > { %v6558_v13 = vpop.f32.mrf.mxu1 }
 0x557   : > { %v6720_v59 = vadd.f32 %v6496_v32, %v15086_v46  ;;  %v14729_v25 = vadd.f32 %v6558_v13, %v6524_v3 }
 0x559   : > { %v6746_v40 = vadd.f32 %v14640_v30, %v6720_v59 }
 0x55a   : > { %v6575_v33 = vpop.f32.mrf.mxu2 }
 0x55b   : > { %v6766_v31 = vmax.f32 %v6746_v40, 0.0  ;;  %v6609_v53 = vpop.f32.mrf.mxu3  ;;  %v6576_v15 = vadd.f32 %v6575_v33, %v14671_v17 }
 0x55d   : > { %6786 = vst [vmem:[%s14653_s10 + $0x90] sm:$0xff] %v6766_v31  ;;  %v6527_v4 = vpop.f32.mrf.mxu0  ;;  %v6610_v0 = vadd.f32 %v6609_v53, %v6576_v15 }
 0x55e   : > { %v6561_v45 = vpop.f32.mrf.mxu1 }
 0x55f   : > { %v14733_v7 = vadd.f32 %v6561_v45, %v6527_v4 }
 0x562   : > { %v6577_v39 = vpop.f32.mrf.mxu2 }
 0x563   : > { %v6611_v43 = vpop.f32.mrf.mxu3  ;;  %v6578_v19 = vadd.f32 %v6577_v39, %v14681_v28 }
 0x565   : > { %v6529_v38 = vpop.f32.mrf.mxu0  ;;  %v6612_v2 = vadd.f32 %v6611_v43, %v6578_v19 }
 0x566   : > { %v6563_v52 = vpop.f32.mrf.mxu1 }
 0x567   : > { %v14735_v63 = vadd.f32 %v6563_v52, %v6529_v38 }
 0x56a   : > { %v6580_v16 = vpop.f32.mrf.mxu2 }
 0x56b   : > { %v6614_v62 = vpop.f32.mrf.mxu3  ;;  %v6581_v20 = vadd.f32 %v6580_v16, %v14689_v9 }
 0x56d   : > { %v6643_v30 = vpop.f32.mrf.mxu0  ;;  %v6615_v11 = vadd.f32 %v6614_v62, %v6581_v20 }
 0x56e   : > { %v6644_v26 = vadd.f32 %v6643_v30, %v6610_v0  ;;  %v6677_v22 = vpop.f32.mrf.mxu1 }
 0x570   : > { %v6678_v14 = vadd.f32 %v6677_v22, %v6644_v26 }
 0x572   : > { %v6582_v49 = vpop.f32.mrf.mxu2  ;;  %v6703_v50 = vadd.f32 %v6678_v14, %v14258_v51 }
 0x573   : > { %v6616_v29 = vpop.f32.mrf.mxu3  ;;  %v6583_v23 = vadd.f32 %v6582_v49, %v14699_v44 }
 0x574   : > { %v6729_v41 = vadd.f32 %v14740_v35, %v6703_v50 }
 0x575   : > { %v6645_v17 = vpop.f32.mrf.mxu0  ;;  %v6617_v32 = vadd.f32 %v6616_v29, %v6583_v23 }
 0x576   : > { %v6749_v18 = vmax.f32 %v6729_v41, 0.0  ;;  %v6646_v56 = vadd.f32 %v6645_v17, %v6612_v2  ;;  %v6679_v37 = vpop.f32.mrf.mxu1 }
 0x578   : > { %6769 = vst [vmem:[%s14653_s10 + $0x8] sm:$0xff] %v6749_v18  ;;  %v6680_v28 = vadd.f32 %v6679_v37, %v6646_v56 }
 0x57a   : > { %v6705_v61 = vadd.f32 %v6680_v28, %v15087_v55  ;;  %v6585_v24 = vpop.f32.mrf.mxu2 }
 0x57b   : > { %v6619_v8 = vpop.f32.mrf.mxu3  ;;  %v6586_v31 = vadd.f32 %v6585_v24, %v14707_v57 }
 0x57c   : > { %v6731_v21 = vadd.f32 %v14740_v35, %v6705_v61 }
 0x57d   : > { %v6648_v51 = vpop.f32.mrf.mxu0  ;;  %v6620_v45 = vadd.f32 %v6619_v8, %v6586_v31 }
 0x57e   : > { %v6751_v42 = vmax.f32 %v6731_v21, 0.0  ;;  %v6649_v36 = vadd.f32 %v6648_v51, %v6615_v11  ;;  %v6682_v60 = vpop.f32.mrf.mxu1 }
 0x580   : > { %6771 = vst [vmem:[%s14653_s10 + $0x18] sm:$0xff] %v6751_v42  ;;  %v6683_v5 = vadd.f32 %v6682_v60, %v6649_v36 }
 0x582   : > { %v6707_v9 = vadd.f32 %v6683_v5, %v14344_v12  ;;  %v6587_v46 = vpop.f32.mrf.mxu2 }
 0x583   : > { %v6621_v4 = vpop.f32.mrf.mxu3  ;;  %v6588_v16 = vadd.f32 %v6587_v46, %v14715_v47 }
 0x584   : > { %v6733_v3 = vadd.f32 %v14740_v35, %v6707_v9 }
 0x585   : > { %v6650_v59 = vpop.f32.mrf.mxu0  ;;  %v6622_v62 = vadd.f32 %v6621_v4, %v6588_v16 }
 0x586   : > { %v6753_v13 = vmax.f32 %v6733_v3, 0.0  ;;  %v6651_v40 = vadd.f32 %v6650_v59, %v6617_v32  ;;  %v6684_v33 = vpop.f32.mrf.mxu1 }
 0x588   : > { %6773 = vst [vmem:[%s14653_s10 + $0x28] sm:$0xff] %v6753_v13  ;;  %v6685_v53 = vadd.f32 %v6684_v33, %v6651_v40 }
 0x58a   : > { %v6709_v44 = vadd.f32 %v6685_v53, %v14382_v27  ;;  %v6590_v15 = vpop.f32.mrf.mxu2 }
 0x58b   : > { %v6624_v27 = vpop.f32.mrf.mxu3  ;;  %v6591_v49 = vadd.f32 %v6590_v15, %v14723_v1 }
 0x58c   : > { %v6735_v39 = vadd.f32 %v14740_v35, %v6709_v44 }
 0x58d   : > { %v6653_v12 = vpop.f32.mrf.mxu0  ;;  %v6625_v41 = vadd.f32 %v6624_v27, %v6591_v49 }
 0x58e   : > { %v6755_v43 = vmax.f32 %v6735_v39, 0.0  ;;  %v6654_v38 = vadd.f32 %v6653_v12, %v6620_v45  ;;  %v6687_v52 = vpop.f32.mrf.mxu1 }
 0x590   : > { %6775 = vst [vmem:[%s14653_s10 + $0x38] sm:$0xff] %v6755_v43  ;;  %v6688_v0 = vadd.f32 %v6687_v52, %v6654_v38 }
 0x592   : > { %v6711_v57 = vadd.f32 %v6688_v0, %v14398_v58  ;;  %v6592_v2 = vpop.f32.mrf.mxu2 }
 0x593   : > { %v6626_v29 = vpop.f32.mrf.mxu3  ;;  %v6593_v20 = vadd.f32 %v6592_v2, %v14729_v25 }
 0x594   : > { %v6737_v30 = vadd.f32 %v14740_v35, %v6711_v57 }
 0x595   : > { %v6655_v26 = vpop.f32.mrf.mxu0  ;;  %v6627_v61 = vadd.f32 %v6626_v29, %v6593_v20 }
 0x596   : > { %v6757_v22 = vmax.f32 %v6737_v30, 0.0  ;;  %v6656_v19 = vadd.f32 %v6655_v26, %v6622_v62  ;;  %v6689_v14 = vpop.f32.mrf.mxu1 }
 0x598   : > { %6777 = vst [vmem:[%s14653_s10 + $0x48] sm:$0xff] %v6757_v22  ;;  %v6690_v50 = vadd.f32 %v6689_v14, %v6656_v19 }
 0x59a   : > { %v6713_v47 = vadd.f32 %v6690_v50, %v14442_v54  ;;  %v6595_v55 = vpop.f32.mrf.mxu2 }
 0x59b   : > { %v6596_v42 = vadd.f32 %v6595_v55, %v14733_v7  ;;  %v6629_v60 = vpop.f32.mrf.mxu3 }
 0x59c   : > { %v6739_v17 = vadd.f32 %v14740_v35, %v6713_v47 }
 0x59d   : > { %v6658_v58 = vpop.f32.mrf.mxu0  ;;  %v6630_v23 = vadd.f32 %v6629_v60, %v6596_v42 }
 0x59e   : > { %v6759_v18 = vmax.f32 %v6739_v17, 0.0  ;;  %v6659_v56 = vadd.f32 %v6658_v58, %v6625_v41  ;;  %v6692_v37 = vpop.f32.mrf.mxu1 }
 0x5a0   : > { %6779 = vst [vmem:[%s14653_s10 + $0x58] sm:$0xff] %v6759_v18  ;;  %v6693_v28 = vadd.f32 %v6692_v37, %v6659_v56 }
 0x5a2   : > { %v6715_v1 = vadd.f32 %v6693_v28, %v14469_v6  ;;  %v6597_v6 = vpop.f32.mrf.mxu2 }
 0x5a3   : > { %v6598_v46 = vadd.f32 %v6597_v6, %v14735_v63  ;;  %v6631_v13 = vpop.f32.mrf.mxu3 }
 0x5a4   : > { %v6741_v24 = vadd.f32 %v14740_v35, %v6715_v1 }
 0x5a5   : > { %v6660_v54 = vpop.f32.mrf.mxu0  ;;  %v6632_v40 = vadd.f32 %v6631_v13, %v6598_v46 }
 0x5a6   : > { %v6761_v11 = vmax.f32 %v6741_v24, 0.0  ;;  %v6661_v21 = vadd.f32 %v6660_v54, %v6627_v61  ;;  %v6694_v51 = vpop.f32.mrf.mxu1 }
 0x5a8   : > { %6781 = vst [vmem:[%s14653_s10 + $0x68] sm:$0xff] %v6761_v11  ;;  %v6695_v36 = vadd.f32 %v6694_v51, %v6661_v21 }
 0x5aa   : > { %v6717_v25 = vadd.f32 %v6695_v36, %v14516_v48 }
 0x5ac   : > { %v6743_v5 = vadd.f32 %v14740_v35, %v6717_v25 }
 0x5ad   : > { %v6663_v8 = vpop.f32.mrf.mxu0 }
 0x5ae   : > { %v6763_v9 = vmax.f32 %v6743_v5, 0.0  ;;  %v6664_v32 = vadd.f32 %v6663_v8, %v6630_v23  ;;  %v6697_v3 = vpop.f32.mrf.mxu1 }
 0x5b0   : > { %6783 = vst [vmem:[%s14653_s10 + $0x78] sm:$0xff] %v6763_v9  ;;  %v6698_v59 = vadd.f32 %v6697_v3, %v6664_v32 }
 0x5b2   : > { %v6719_v7 = vadd.f32 %v6698_v59, %v14538_v10 }
 0x5b4   : > { %v6745_v48 = vadd.f32 %v14740_v35, %v6719_v7 }
 0x5b5   : > { %v6665_v33 = vpop.f32.mrf.mxu0 }
 0x5b6   : > { %v6765_v31 = vmax.f32 %v6745_v48, 0.0  ;;  %v6666_v53 = vadd.f32 %v6665_v33, %v6632_v40  ;;  %v6699_v44 = vpop.f32.mrf.mxu1 }
 0x5b8   : > { %6785 = vst [vmem:[%s14653_s10 + $0x88] sm:$0xff] %v6765_v31  ;;  %v6700_v4 = vadd.f32 %v6699_v44, %v6666_v53 }
 0x5ba   : > { %v6721_v45 = vadd.f32 %v6700_v4, %v14564_v34 }
 0x5bc   : > { %v6747_v39 = vadd.f32 %v14740_v35, %v6721_v45 }
 0x5be   : > { %v6767_v63 = vmax.f32 %v6747_v39, 0.0 }
 0x5c0   : > { %6787 = vst [vmem:[%s14653_s10 + $0x98] sm:$0xff] %v6767_v63 }
 0x5c1 PF: > { %s15_s18 = sadd.s32 1, %s9519_s18  }
 0x5c2   : > { %p12_p4 = scmp.ge.s32.totalorder %s15_s18, 4  }
 0x5c4   :  { %14 = sbr.rel (!%p12_p4) target bundleno = 1 (0x1), region = 74 }

</bundles_post_ra>
